<compile_context>
chip_gen: v7x
topology: tpu7x:2x2x1
jax: 0.10.0
libtpu: 0.0.40
codegen_flags: <defaults>
</compile_context>

<pallas_src>
import math
from functools import partial

import jax
import jax.numpy as jnp
from jax import lax
from jax.experimental import pallas as pl
from jax.experimental.pallas import tpu as pltpu

HEAD_DIM = 64          # hard-coded in GPT.__init__ (head_dim=64)
ROPE_BASE = 1024.0     # hard-coded in GPT.__init__
RMS_EPS = 1e-6
NEG_BIG = -1e30        # finite mask value (NaN-safe; diagonal always valid)


# --------------------------- small helpers ----------------------------------
def _rmsnorm_feat0(x_f32):
    """RMSNorm over the feature axis (axis 0) of a feature-major (D, T) tile."""
    ms = jnp.mean(x_f32 * x_f32, axis=0, keepdims=True)
    return x_f32 * lax.rsqrt(ms + RMS_EPS)


def _pick_tile(n, candidates):
    for c in candidates:
        if c <= n and n % c == 0:
            return c
    return n


def _decoder_vmem_limit(D, T, mlp_dim):
    """Derive the VMEM ask from actual buffer sizes, clamp to chip capacity."""
    w_layer = (3 * D * D + D * D + 2 * D * mlp_dim) * 2       # bf16 weights/layer
    resident = 2 * (2 * D * T * 2) + 2 * (HEAD_DIM // 2) * T * 4 * 2
    scratch = 5 * D * T * 2                                   # xres + q/k/v + attn
    interm = (3 * D * T + 2 * D * T + 2 * D * T + mlp_dim * T) * 4
    need = int((2 * w_layer + resident + scratch + interm) * 1.5) + (4 << 20)
    try:
        cap = int(getattr(pltpu.get_tpu_info(), "vmem_capacity_bytes", 64 << 20))
    except Exception:
        cap = 64 << 20
    return int(max(32 << 20, min(need, int(cap * 0.9))))


# --------------------------- fused decoder kernel ---------------------------
def decoder_kernel(scales_ref,                       # (depth, 2) f32 in SMEM
                   x0_ref, qkv_ref, ow_ref, w1_ref, w2_ref, cos_ref, sin_ref,
                   out_ref,
                   xres, q_scr, k_scr, v_scr, attn_scr,
                   *, nheads, window_size, bq):
    D, T = x0_ref.shape
    H, d = nheads, HEAD_DIM
    half = d // 2
    nq = T // bq
    kprev = (window_size - 1 + bq - 1) // bq          # kv granules looking back
    R = min(kprev + 1, nq)                            # kv granules per q tile
    layer = pl.program_id(0)

    # residual stream lives in VMEM scratch across the layer grid
    @pl.when(layer == 0)
    def _():
        xres[...] = x0_ref[...]

    o_scale = scales_ref[layer, 0]
    mlp_scale = scales_ref[layer, 1]

    x = xres[...]                                     # (D, T) bf16, feature-major
    xf = x.astype(jnp.float32)

    # ---------------- attention ----------------
    h = _rmsnorm_feat0(xf).astype(jnp.bfloat16)
    # canonical (M,K)x(K,N): (3D, D) @ (D, T) -> (3D, T), f32 accumulate
    qkv_t = lax.dot_general(qkv_ref[...], h, (((1,), (0,)), ((), ())),
                            preferred_element_type=jnp.float32)
    q = qkv_t[0 * D:1 * D].reshape(H, d, T)
    k = qkv_t[1 * D:2 * D].reshape(H, d, T)
    v = qkv_t[2 * D:3 * D].reshape(H, d, T)

    cos = cos_ref[...][None]                          # (1, d//2, T)
    sin = sin_ref[...][None]

    def qknorm_rope(z):                               # (H, d, T) f32
        ms = jnp.mean(z * z, axis=1, keepdims=True)
        z = z * lax.rsqrt(ms + RMS_EPS)
        z1 = z[:, :half, :]                           # sublane-aligned halves
        z2 = z[:, half:, :]
        return jnp.concatenate([z1 * cos + z2 * sin,
                                z2 * cos - z1 * sin], axis=1)

    sm_scale = 1.0 / math.sqrt(d)
    q_rot = (qknorm_rope(q) * sm_scale).astype(jnp.bfloat16)   # fold sm_scale in q
    k_rot = qknorm_rope(k).astype(jnp.bfloat16)
    v_bf = v.astype(jnp.bfloat16)

    # Split T into bq-lane granules on a LEADING scratch axis so the q-tile
    # loop below only uses (well supported) dynamic leading-dim indexing.
    for g in range(nq):                               # static: nq cheap VMEM stores
        sl = slice(g * bq, (g + 1) * bq)
        q_scr[g] = q_rot[:, :, sl]
        k_scr[g] = k_rot[:, :, sl]
        v_scr[g] = v_bf[:, :, sl]

    # TODO(synk): for window_size < bq(=128) up to ~75% of score/PV flops are
    # masked; shrinking the q granule below one 128-lane tile needs sub-tile
    # dynamic lane slicing, avoided here for lowering robustness.
    @pl.loop(0, nq)
    def _(qi):
        q_blk = q_scr[qi]                                       # (H, d, bq)
        gids = [jnp.maximum(qi - r, 0) for r in range(R - 1, -1, -1)]
        k_parts = [k_scr[g] for g in gids]
        v_parts = [v_scr[g] for g in gids]
        k_blk = k_parts[0] if R == 1 else jnp.concatenate(k_parts, axis=-1)
        v_blk = v_parts[0] if R == 1 else jnp.concatenate(v_parts, axis=-1)
        kw = R * bq
        # scores in (kv, q) layout, A^T*B straight from (H, d, T): no per-head
        # transposes; the PV matmul below is then fully canonical.
        s = lax.dot_general(k_blk, q_blk, (((1,), (1,)), ((0,), (0,))),
                            preferred_element_type=jnp.float32)  # (H, kw, bq)
        kpos = lax.broadcasted_iota(jnp.int32, (kw, bq), 0) + (qi - (R - 1)) * bq
        qpos = lax.broadcasted_iota(jnp.int32, (kw, bq), 1) + qi * bq
        mask = (kpos >= 0) & (kpos <= qpos) & (qpos < kpos + window_size)
        s = jnp.where(mask[None], s, NEG_BIG)
        m = jnp.max(s, axis=1, keepdims=True)                    # (H, 1, bq)
        p = jnp.exp(s - m)
        denom = jnp.sum(p, axis=1, keepdims=True)
        p = (p * pl.reciprocal(denom, approx=True)).astype(jnp.bfloat16)
        # (H, d, kw) x (H, kw, bq) -> (H, d, bq): canonical per-head matmul
        o_t = lax.dot_general(v_blk, p, (((2,), (1,)), ((0,), (0,))),
                              preferred_element_type=jnp.float32)
        attn_scr[qi] = o_t.reshape(D, bq).astype(jnp.bfloat16)

    # assemble (D, T) attention output from full-lane-tile granules (cheap copy)
    attn = (attn_scr[0] if nq == 1
            else jnp.concatenate([attn_scr[g] for g in range(nq)], axis=-1))
    # o-projection directly in the feature-major layout: (D, D) @ (D, T)
    o = lax.dot_general(ow_ref[...], attn, (((1,), (0,)), ((), ())),
                        preferred_element_type=jnp.float32)       # (D, T) f32
    xf = xf + o * o_scale                                         # f32 residual add

    # ---------------- MLP: RMSNorm -> Linear -> ReLU^2 -> Linear*scale -------
    h2 = _rmsnorm_feat0(xf).astype(jnp.bfloat16)
    a = lax.dot_general(w1_ref[...], h2, (((1,), (0,)), ((), ())),
                        preferred_element_type=jnp.float32)       # (mlp, T)
    a = jnp.square(jnp.maximum(a, 0.0)).astype(jnp.bfloat16)      # ReLU^2 in f32
    mo = lax.dot_general(w2_ref[...], a, (((1,), (0,)), ((), ())),
                         preferred_element_type=jnp.float32)      # (D, T)
    xf = xf + mo * mlp_scale                                      # f32 residual add
    x_out = xf.astype(jnp.bfloat16)

    xres[...] = x_out

    @pl.when(layer == pl.num_programs(0) - 1)
    def _():
        out_ref[...] = x_out


def run_decoder(x_dt, params, cos_t, sin_t, *, window_size):
    D, T = x_dt.shape
    depth = params["qkv_w"].shape[0]
    mlp_dim = params["mlp_w1"].shape[1]
    assert D % HEAD_DIM == 0 and D % 8 == 0
    nheads = D // HEAD_DIM
    bq = 128 if T % 128 == 0 else T                  # lane-tile aligned q granule
    nq = T // bq

    kern = partial(decoder_kernel, nheads=nheads, window_size=window_size, bq=bq)
    grid_spec = pltpu.PrefetchScalarGridSpec(
        num_scalar_prefetch=0,
        grid=(depth,),
        in_specs=[
            pl.BlockSpec(memory_space=pltpu.MemorySpace.SMEM),          # scales
            pl.BlockSpec((D, T), lambda l: (0, 0)),                     # x0
            pl.BlockSpec((None, 3 * D, D), lambda l: (l, 0, 0)),        # qkv_w
            pl.BlockSpec((None, D, D), lambda l: (l, 0, 0)),            # o_w
            pl.BlockSpec((None, mlp_dim, D), lambda l: (l, 0, 0)),      # mlp_w1
            pl.BlockSpec((None, D, mlp_dim), lambda l: (l, 0, 0)),      # mlp_w2
            pl.BlockSpec((HEAD_DIM // 2, T), lambda l: (0, 0)),         # cos
            pl.BlockSpec((HEAD_DIM // 2, T), lambda l: (0, 0)),         # sin
        ],
        out_specs=pl.BlockSpec((D, T), lambda l: (0, 0)),
        scratch_shapes=[
            pltpu.VMEM((D, T), jnp.bfloat16),                           # residual
            pltpu.VMEM((nq, nheads, HEAD_DIM, bq), jnp.bfloat16),       # q granules
            pltpu.VMEM((nq, nheads, HEAD_DIM, bq), jnp.bfloat16),       # k granules
            pltpu.VMEM((nq, nheads, HEAD_DIM, bq), jnp.bfloat16),       # v granules
            pltpu.VMEM((nq, D, bq), jnp.bfloat16),                      # attn granules
        ],
    )
    return pl.pallas_call(
        kern,
        out_shape=jax.ShapeDtypeStruct((D, T), jnp.bfloat16),
        grid_spec=grid_spec,
        compiler_params=pltpu.CompilerParams(
            dimension_semantics=("arbitrary",),        # layers are sequential
            vmem_limit_bytes=_decoder_vmem_limit(D, T, mlp_dim)),
    )(params["scales"], x_dt, params["qkv_w"], params["o_w"],
      params["mlp_w1"], params["mlp_w2"], cos_t, sin_t)


# --------------------------- lm_head + cross-entropy ------------------------
def lm_loss_kernel(scale_ref, x_ref, w_ref, tgt_ref, out_ref,
                   m_scr, l_scr, t_scr, *, tv):
    j = pl.program_id(1)

    @pl.when(j == 0)
    def _():
        m_scr[...] = jnp.full_like(m_scr, NEG_BIG)
        l_scr[...] = jnp.zeros_like(l_scr)
        t_scr[...] = jnp.zeros_like(t_scr)

    # lane-dense (tv, tq) logits tile, canonical (M,K)x(K,N), f32 end-to-end.
    # NOTE(review): padded vocab rows are *not* masked out of the softmax —
    # the torch reference runs F.cross_entropy over the full padded out_dim
    # logits (the padded rows are real lm_head parameters), so masking them
    # would change the loss vs. the spec.
    logits = lax.dot_general(w_ref[...], x_ref[...], (((1,), (0,)), ((), ())),
                             preferred_element_type=jnp.float32) * scale_ref[0]

    # gather target logit via iota compare (no dense one-hot)
    row = lax.broadcasted_iota(jnp.int32, logits.shape, 0) + j * tv
    t_scr[...] += jnp.sum(jnp.where(row == tgt_ref[...], logits, 0.0),
                          axis=0, keepdims=True)

    # online logsumexp over vocab tiles (per-token accumulators are (1, tq))
    m_prev = m_scr[...]
    m_new = jnp.maximum(m_prev, jnp.max(logits, axis=0, keepdims=True))
    l_scr[...] = (l_scr[...] * jnp.exp(m_prev - m_new)
                  + jnp.sum(jnp.exp(logits - m_new), axis=0, keepdims=True))
    m_scr[...] = m_new

    @pl.when(j == pl.num_programs(1) - 1)
    def _():
        out_ref[...] = m_scr[...] + jnp.log(l_scr[...]) - t_scr[...]


def run_lm_loss(x_dt, lm_w, lm_scale, target_ids):
    D, T = x_dt.shape
    v_pad = lm_w.shape[0]
    tq = _pick_tile(T, (512, 256, 128))        # big q tile: cut lm_w re-streaming
    tv = _pick_tile(v_pad, (512, 256, 128))
    tgt = target_ids.reshape(1, T).astype(jnp.int32)

    grid_spec = pltpu.PrefetchScalarGridSpec(
        num_scalar_prefetch=0,
        grid=(T // tq, v_pad // tv),
        in_specs=[
            pl.BlockSpec(memory_space=pltpu.MemorySpace.SMEM),  # lm_scale
            pl.BlockSpec((D, tq), lambda i, j: (0, i)),         # hidden (feature-major)
            pl.BlockSpec((tv, D), lambda i, j: (j, 0)),         # lm_w tile
            pl.BlockSpec((1, tq), lambda i, j: (0, i)),         # targets
        ],
        out_specs=pl.BlockSpec((1, tq), lambda i, j: (0, i)),   # lane-dense loss
        scratch_shapes=[pltpu.VMEM((1, tq), jnp.float32)] * 3,
    )
    per_tok = pl.pallas_call(
        partial(lm_loss_kernel, tv=tv),
        out_shape=jax.ShapeDtypeStruct((1, T), jnp.float32),
        grid_spec=grid_spec,
        compiler_params=pltpu.CompilerParams(
            dimension_semantics=("parallel", "arbitrary")),
    )(lm_scale, x_dt, lm_w, tgt)
    return jnp.mean(per_tok)


# --------------------------- glue (plain JAX) -------------------------------
def make_rope_tables(seq_len, head_dim, rope_base):
    n = head_dim // 4
    freqs = (1.0 / rope_base) ** jnp.linspace(0.0, 1.0, n, dtype=jnp.float32)
    freqs_d = jnp.concatenate([freqs, jnp.zeros((n,), jnp.float32)])  # (hd//2,)
    theta = jnp.arange(seq_len, dtype=jnp.float32)[:, None] * freqs_d[None, :]
    # transposed (hd//2, T) so they broadcast against the (H, d, T) layout
    return jnp.cos(theta).T, jnp.sin(theta).T


def init_params(key, *, dim, mlp_dim, depth, vocab_size):
    out_dim = (vocab_size + 127) // 128 * 128
    keys = jax.random.split(key, 6)
    bf = jnp.bfloat16

    def rnd(k, shape, scale):
        return (jax.random.normal(k, shape, jnp.float32) * scale).astype(bf)

    # Weights kept in torch's (out_features, in_features) layout: with the
    # feature-major (D, T) activation layout every matmul is already canonical.
    return {
        "embed": jax.random.normal(keys[0], (vocab_size, dim), jnp.float32) * 0.5,
        "lm_w": rnd(keys[1], (out_dim, dim), 1.0 / math.sqrt(dim)),
        "lm_scale": jnp.ones((1,), jnp.float32),   # torch zeroes it; kept at 1
        "qkv_w": rnd(keys[2], (depth, 3 * dim, dim), 0.5 / math.sqrt(dim)),
        "o_w": rnd(keys[3], (depth, dim, dim), 0.02),          # torch zero_init
        "mlp_w1": rnd(keys[4], (depth, mlp_dim, dim), 1.0 / math.sqrt(dim)),
        "mlp_w2": rnd(keys[5], (depth, dim, mlp_dim), 0.02),   # torch zero_init
        "scales": jnp.ones((depth, 2), jnp.float32),  # [:,0]=o_scale [:,1]=mlp
    }


def gpt_forward(params, input_ids, target_ids, *, window_size):
    seq_len = input_ids.shape[0]
    cos_t, sin_t = make_rope_tables(seq_len, HEAD_DIM, ROPE_BASE)
    # data-dependent embedding row gather stays in plain JAX
    x_td = jnp.take(params["embed"], input_ids, axis=0)          # (T, D) f32
    x_dt = x_td.T.astype(jnp.bfloat16)                           # feature-major
    h_dt = run_decoder(x_dt, params, cos_t, sin_t, window_size=window_size)
    return run_lm_loss(h_dt, params["lm_w"], params["lm_scale"], target_ids)


if __name__ == "__main__":
    dim, mlp_dim, depth = 128, 512, 3          # nheads = 128 / 64 = 2
    seq_len, window_size, vocab_size = 256, 64, 1000

    key = jax.random.PRNGKey(0)
    kp, ki, kt = jax.random.split(key, 3)
    params = init_params(kp, dim=dim, mlp_dim=mlp_dim, depth=depth,
                         vocab_size=vocab_size)
    input_ids = jax.random.randint(ki, (seq_len,), 0, vocab_size, dtype=jnp.int32)
    target_ids = jax.random.randint(kt, (seq_len,), 0, vocab_size, dtype=jnp.int32)

    loss = gpt_forward(params, input_ids, target_ids, window_size=window_size)
    jax.block_until_ready(loss)
    assert jnp.isfinite(loss)
    print("KERNEL_OK")
</pallas_src>

<mosaic_0001>
module attributes {stable_mosaic.version = 11 : i64} {
  func.func @decoder_kernel(%arg0: i32, %arg1: memref<3x2xf32, #tpu.memory_space<smem>>, %arg2: memref<128x256xbf16, #tpu.memory_space<vmem>>, %arg3: memref<1x384x128xbf16, #tpu.memory_space<vmem>>, %arg4: memref<1x128x128xbf16, #tpu.memory_space<vmem>>, %arg5: memref<1x512x128xbf16, #tpu.memory_space<vmem>>, %arg6: memref<1x128x512xbf16, #tpu.memory_space<vmem>>, %arg7: memref<32x256xf32, #tpu.memory_space<vmem>>, %arg8: memref<32x256xf32, #tpu.memory_space<vmem>>, %arg9: memref<128x256xbf16, #tpu.memory_space<vmem>>, %arg10: memref<128x256xbf16, #tpu.memory_space<vmem>>, %arg11: memref<2x2x64x128xbf16, #tpu.memory_space<vmem>>, %arg12: memref<2x2x64x128xbf16, #tpu.memory_space<vmem>>, %arg13: memref<2x2x64x128xbf16, #tpu.memory_space<vmem>>, %arg14: memref<2x128x128xbf16, #tpu.memory_space<vmem>>) attributes {dimension_semantics = [#tpu.dimension_semantics<arbitrary>], iteration_bounds = array<i64: 3>, scalar_prefetch = 0 : i64, scratch_operands = 5 : i64, tpu.core_type = #tpu.core_type<tc>, window_params = [{transform_indices = @transform_0, window_bounds = array<i64: 3, 2>}, {pipeline_mode = #tpu.pipeline_mode<synchronous>, transform_indices = @transform_1, window_bounds = array<i64: 128, 256>}, {transform_indices = @transform_2, window_bounds = array<i64: 1, 384, 128>}, {transform_indices = @transform_3, window_bounds = array<i64: 1, 128, 128>}, {transform_indices = @transform_4, window_bounds = array<i64: 1, 512, 128>}, {transform_indices = @transform_5, window_bounds = array<i64: 1, 128, 512>}, {pipeline_mode = #tpu.pipeline_mode<synchronous>, transform_indices = @transform_6, window_bounds = array<i64: 32, 256>}, {pipeline_mode = #tpu.pipeline_mode<synchronous>, transform_indices = @transform_7, window_bounds = array<i64: 32, 256>}, {pipeline_mode = #tpu.pipeline_mode<synchronous>, transform_indices = @transform_8, window_bounds = array<i64: 128, 256>}]} {
    %c0_i32 = arith.constant 0 : i32
    %0 = arith.cmpi eq, %arg0, %c0_i32 : i32
    %1 = arith.extui %0 : i1 to i32
    %c0_i32_0 = arith.constant 0 : i32
    %2 = arith.cmpi ne, %1, %c0_i32_0 : i32
    scf.if %2 {
      %c0_72 = arith.constant 0 : index
      %c0_73 = arith.constant 0 : index
      %149 = vector.load %arg2[%c0_72, %c0_73] : memref<128x256xbf16, #tpu.memory_space<vmem>>, vector<128x256xbf16>
      %c0_74 = arith.constant 0 : index
      %c0_75 = arith.constant 0 : index
      %150 = vector.load %arg10[%c0_74, %c0_75] : memref<128x256xbf16, #tpu.memory_space<vmem>>, vector<128x256xbf16>
      tpu.vector_store %arg10[%c0_74, %c0_75], %149 {strides = array<i32>} : memref<128x256xbf16, #tpu.memory_space<vmem>>, vector<128x256xbf16>,
    } else {
    }
    %3 = arith.index_cast %arg0 : i32 to index
    %c0 = arith.constant 0 : index
    %4 = memref.load %arg1[%3, %c0] : memref<3x2xf32, #tpu.memory_space<smem>>
    %5 = arith.index_cast %arg0 : i32 to index
    %c1 = arith.constant 1 : index
    %6 = memref.load %arg1[%5, %c1] : memref<3x2xf32, #tpu.memory_space<smem>>
    %c0_1 = arith.constant 0 : index
    %c0_2 = arith.constant 0 : index
    %7 = vector.load %arg10[%c0_1, %c0_2] : memref<128x256xbf16, #tpu.memory_space<vmem>>, vector<128x256xbf16>
    %8 = arith.extf %7 : vector<128x256xbf16> to vector<128x256xf32>
    %9 = arith.mulf %8, %8 : vector<128x256xf32>
    %cst = arith.constant dense<0.000000e+00> : vector<256xf32>
    %10 = vector.multi_reduction <add>, %9, %cst [0] : vector<128x256xf32> to vector<256xf32>
    %11 = vector.shape_cast %10 : vector<256xf32> to vector<1x256xf32>
    %cst_3 = arith.constant 1.280000e+02 : f32
    %12 = vector.broadcast %cst_3 : f32 to vector<1x256xf32>
    %13 = arith.divf %11, %12 : vector<1x256xf32>
    %cst_4 = arith.constant 9.99999997E-7 : f32
    %14 = vector.broadcast %cst_4 : f32 to vector<1x256xf32>
    %15 = arith.addf %13, %14 : vector<1x256xf32>
    %16 = math.rsqrt %15 : vector<1x256xf32>
    %17 = vector.broadcast %16 : vector<1x256xf32> to vector<128x256xf32>
    %18 = arith.mulf %8, %17 : vector<128x256xf32>
    %19 = arith.truncf %18 : vector<128x256xf32> to vector<128x256xbf16>
    %c0_5 = arith.constant 0 : index
    %c0_6 = arith.constant 0 : index
    %c0_7 = arith.constant 0 : index
    %20 = vector.load %arg3[%c0_5, %c0_6, %c0_7] : memref<1x384x128xbf16, #tpu.memory_space<vmem>>, vector<1x384x128xbf16>
    %21 = vector.shape_cast %20 : vector<1x384x128xbf16> to vector<384x128xbf16>
    %cst_8 = arith.constant dense<0.000000e+00> : vector<384x256xf32>
    %22 = tpu.matmul %21, %19, %cst_8 {dimension_numbers = #tpu.dot_dimension_numbers<[1], [0], [0], [1], [0, 0, 1, 1], [], []>} : vector<384x128xbf16>, vector<128x256xbf16>, vector<384x256xf32> -> vector<384x256xf32>
    %23 = vector.extract_strided_slice %22 {offsets = [0, 0], sizes = [128, 256], strides = [1, 1]} : vector<384x256xf32> to vector<128x256xf32>
    %24 = vector.shape_cast %23 : vector<128x256xf32> to vector<2x64x256xf32>
    %25 = vector.extract_strided_slice %22 {offsets = [128, 0], sizes = [128, 256], strides = [1, 1]} : vector<384x256xf32> to vector<128x256xf32>
    %26 = vector.shape_cast %25 : vector<128x256xf32> to vector<2x64x256xf32>
    %27 = vector.extract_strided_slice %22 {offsets = [256, 0], sizes = [128, 256], strides = [1, 1]} : vector<384x256xf32> to vector<128x256xf32>
    %28 = vector.shape_cast %27 : vector<128x256xf32> to vector<2x64x256xf32>
    %c0_9 = arith.constant 0 : index
    %c0_10 = arith.constant 0 : index
    %29 = vector.load %arg7[%c0_9, %c0_10] : memref<32x256xf32, #tpu.memory_space<vmem>>, vector<32x256xf32>
    %30 = vector.shape_cast %29 : vector<32x256xf32> to vector<1x32x256xf32>
    %c0_11 = arith.constant 0 : index
    %c0_12 = arith.constant 0 : index
    %31 = vector.load %arg8[%c0_11, %c0_12] : memref<32x256xf32, #tpu.memory_space<vmem>>, vector<32x256xf32>
    %32 = vector.shape_cast %31 : vector<32x256xf32> to vector<1x32x256xf32>
    %33 = arith.mulf %24, %24 : vector<2x64x256xf32>
    %cst_13 = arith.constant dense<0.000000e+00> : vector<2x256xf32>
    %34 = vector.multi_reduction <add>, %33, %cst_13 [1] : vector<2x64x256xf32> to vector<2x256xf32>
    %35 = vector.shape_cast %34 : vector<2x256xf32> to vector<2x1x256xf32>
    %cst_14 = arith.constant 6.400000e+01 : f32
    %36 = vector.broadcast %cst_14 : f32 to vector<2x1x256xf32>
    %37 = arith.divf %35, %36 : vector<2x1x256xf32>
    %cst_15 = arith.constant 9.99999997E-7 : f32
    %38 = vector.broadcast %cst_15 : f32 to vector<2x1x256xf32>
    %39 = arith.addf %37, %38 : vector<2x1x256xf32>
    %40 = math.rsqrt %39 : vector<2x1x256xf32>
    %41 = vector.broadcast %40 : vector<2x1x256xf32> to vector<2x64x256xf32>
    %42 = arith.mulf %24, %41 : vector<2x64x256xf32>
    %43 = vector.extract_strided_slice %42 {offsets = [0, 0, 0], sizes = [2, 32, 256], strides = [1, 1, 1]} : vector<2x64x256xf32> to vector<2x32x256xf32>
    %44 = vector.extract_strided_slice %42 {offsets = [0, 32, 0], sizes = [2, 32, 256], strides = [1, 1, 1]} : vector<2x64x256xf32> to vector<2x32x256xf32>
    %45 = vector.broadcast %30 : vector<1x32x256xf32> to vector<2x32x256xf32>
    %46 = arith.mulf %43, %45 : vector<2x32x256xf32>
    %47 = vector.broadcast %32 : vector<1x32x256xf32> to vector<2x32x256xf32>
    %48 = arith.mulf %44, %47 : vector<2x32x256xf32>
    %49 = arith.addf %46, %48 : vector<2x32x256xf32>
    %50 = vector.broadcast %30 : vector<1x32x256xf32> to vector<2x32x256xf32>
    %51 = arith.mulf %44, %50 : vector<2x32x256xf32>
    %52 = vector.broadcast %32 : vector<1x32x256xf32> to vector<2x32x256xf32>
    %53 = arith.mulf %43, %52 : vector<2x32x256xf32>
    %54 = arith.subf %51, %53 : vector<2x32x256xf32>
    %55 = tpu.concatenate %49, %54 in 1 : vector<2x32x256xf32>, vector<2x32x256xf32> -> vector<2x64x256xf32>
    %cst_16 = arith.constant 1.250000e-01 : f32
    %56 = vector.broadcast %cst_16 : f32 to vector<2x64x256xf32>
    %57 = arith.mulf %55, %56 : vector<2x64x256xf32>
    %58 = arith.truncf %57 : vector<2x64x256xf32> to vector<2x64x256xbf16>
    %59 = arith.mulf %26, %26 : vector<2x64x256xf32>
    %cst_17 = arith.constant dense<0.000000e+00> : vector<2x256xf32>
    %60 = vector.multi_reduction <add>, %59, %cst_17 [1] : vector<2x64x256xf32> to vector<2x256xf32>
    %61 = vector.shape_cast %60 : vector<2x256xf32> to vector<2x1x256xf32>
    %cst_18 = arith.constant 6.400000e+01 : f32
    %62 = vector.broadcast %cst_18 : f32 to vector<2x1x256xf32>
    %63 = arith.divf %61, %62 : vector<2x1x256xf32>
    %cst_19 = arith.constant 9.99999997E-7 : f32
    %64 = vector.broadcast %cst_19 : f32 to vector<2x1x256xf32>
    %65 = arith.addf %63, %64 : vector<2x1x256xf32>
    %66 = math.rsqrt %65 : vector<2x1x256xf32>
    %67 = vector.broadcast %66 : vector<2x1x256xf32> to vector<2x64x256xf32>
    %68 = arith.mulf %26, %67 : vector<2x64x256xf32>
    %69 = vector.extract_strided_slice %68 {offsets = [0, 0, 0], sizes = [2, 32, 256], strides = [1, 1, 1]} : vector<2x64x256xf32> to vector<2x32x256xf32>
    %70 = vector.extract_strided_slice %68 {offsets = [0, 32, 0], sizes = [2, 32, 256], strides = [1, 1, 1]} : vector<2x64x256xf32> to vector<2x32x256xf32>
    %71 = vector.broadcast %30 : vector<1x32x256xf32> to vector<2x32x256xf32>
    %72 = arith.mulf %69, %71 : vector<2x32x256xf32>
    %73 = vector.broadcast %32 : vector<1x32x256xf32> to vector<2x32x256xf32>
    %74 = arith.mulf %70, %73 : vector<2x32x256xf32>
    %75 = arith.addf %72, %74 : vector<2x32x256xf32>
    %76 = vector.broadcast %30 : vector<1x32x256xf32> to vector<2x32x256xf32>
    %77 = arith.mulf %70, %76 : vector<2x32x256xf32>
    %78 = vector.broadcast %32 : vector<1x32x256xf32> to vector<2x32x256xf32>
    %79 = arith.mulf %69, %78 : vector<2x32x256xf32>
    %80 = arith.subf %77, %79 : vector<2x32x256xf32>
    %81 = tpu.concatenate %75, %80 in 1 : vector<2x32x256xf32>, vector<2x32x256xf32> -> vector<2x64x256xf32>
    %82 = arith.truncf %81 : vector<2x64x256xf32> to vector<2x64x256xbf16>
    %83 = arith.truncf %28 : vector<2x64x256xf32> to vector<2x64x256xbf16>
    %84 = vector.extract_strided_slice %58 {offsets = [0, 0, 0], sizes = [2, 64, 128], strides = [1, 1, 1]} : vector<2x64x256xbf16> to vector<2x64x128xbf16>
    %c0_20 = arith.constant 0 : index
    %c0_21 = arith.constant 0 : index
    %c0_22 = arith.constant 0 : index
    %c0_23 = arith.constant 0 : index
    %85 = vector.load %arg11[%c0_20, %c0_21, %c0_22, %c0_23] : memref<2x2x64x128xbf16, #tpu.memory_space<vmem>>, vector<1x2x64x128xbf16>
    %86 = vector.shape_cast %85 : vector<1x2x64x128xbf16> to vector<2x64x128xbf16>
    %87 = vector.shape_cast %84 : vector<2x64x128xbf16> to vector<1x2x64x128xbf16>
    tpu.vector_store %arg11[%c0_20, %c0_21, %c0_22, %c0_23], %87 {strides = array<i32>} : memref<2x2x64x128xbf16, #tpu.memory_space<vmem>>, vector<1x2x64x128xbf16>,
    %88 = vector.extract_strided_slice %82 {offsets = [0, 0, 0], sizes = [2, 64, 128], strides = [1, 1, 1]} : vector<2x64x256xbf16> to vector<2x64x128xbf16>
    %c0_24 = arith.constant 0 : index
    %c0_25 = arith.constant 0 : index
    %c0_26 = arith.constant 0 : index
    %c0_27 = arith.constant 0 : index
    %89 = vector.load %arg12[%c0_24, %c0_25, %c0_26, %c0_27] : memref<2x2x64x128xbf16, #tpu.memory_space<vmem>>, vector<1x2x64x128xbf16>
    %90 = vector.shape_cast %89 : vector<1x2x64x128xbf16> to vector<2x64x128xbf16>
    %91 = vector.shape_cast %88 : vector<2x64x128xbf16> to vector<1x2x64x128xbf16>
    tpu.vector_store %arg12[%c0_24, %c0_25, %c0_26, %c0_27], %91 {strides = array<i32>} : memref<2x2x64x128xbf16, #tpu.memory_space<vmem>>, vector<1x2x64x128xbf16>,
    %92 = vector.extract_strided_slice %83 {offsets = [0, 0, 0], sizes = [2, 64, 128], strides = [1, 1, 1]} : vector<2x64x256xbf16> to vector<2x64x128xbf16>
    %c0_28 = arith.constant 0 : index
    %c0_29 = arith.constant 0 : index
    %c0_30 = arith.constant 0 : index
    %c0_31 = arith.constant 0 : index
    %93 = vector.load %arg13[%c0_28, %c0_29, %c0_30, %c0_31] : memref<2x2x64x128xbf16, #tpu.memory_space<vmem>>, vector<1x2x64x128xbf16>
    %94 = vector.shape_cast %93 : vector<1x2x64x128xbf16> to vector<2x64x128xbf16>
    %95 = vector.shape_cast %92 : vector<2x64x128xbf16> to vector<1x2x64x128xbf16>
    tpu.vector_store %arg13[%c0_28, %c0_29, %c0_30, %c0_31], %95 {strides = array<i32>} : memref<2x2x64x128xbf16, #tpu.memory_space<vmem>>, vector<1x2x64x128xbf16>,
    %96 = vector.extract_strided_slice %58 {offsets = [0, 0, 128], sizes = [2, 64, 128], strides = [1, 1, 1]} : vector<2x64x256xbf16> to vector<2x64x128xbf16>
    %c1_32 = arith.constant 1 : index
    %c0_33 = arith.constant 0 : index
    %c0_34 = arith.constant 0 : index
    %c0_35 = arith.constant 0 : index
    %97 = vector.load %arg11[%c1_32, %c0_33, %c0_34, %c0_35] : memref<2x2x64x128xbf16, #tpu.memory_space<vmem>>, vector<1x2x64x128xbf16>
    %98 = vector.shape_cast %97 : vector<1x2x64x128xbf16> to vector<2x64x128xbf16>
    %99 = vector.shape_cast %96 : vector<2x64x128xbf16> to vector<1x2x64x128xbf16>
    tpu.vector_store %arg11[%c1_32, %c0_33, %c0_34, %c0_35], %99 {strides = array<i32>} : memref<2x2x64x128xbf16, #tpu.memory_space<vmem>>, vector<1x2x64x128xbf16>,
    %100 = vector.extract_strided_slice %82 {offsets = [0, 0, 128], sizes = [2, 64, 128], strides = [1, 1, 1]} : vector<2x64x256xbf16> to vector<2x64x128xbf16>
    %c1_36 = arith.constant 1 : index
    %c0_37 = arith.constant 0 : index
    %c0_38 = arith.constant 0 : index
    %c0_39 = arith.constant 0 : index
    %101 = vector.load %arg12[%c1_36, %c0_37, %c0_38, %c0_39] : memref<2x2x64x128xbf16, #tpu.memory_space<vmem>>, vector<1x2x64x128xbf16>
    %102 = vector.shape_cast %101 : vector<1x2x64x128xbf16> to vector<2x64x128xbf16>
    %103 = vector.shape_cast %100 : vector<2x64x128xbf16> to vector<1x2x64x128xbf16>
    tpu.vector_store %arg12[%c1_36, %c0_37, %c0_38, %c0_39], %103 {strides = array<i32>} : memref<2x2x64x128xbf16, #tpu.memory_space<vmem>>, vector<1x2x64x128xbf16>,
    %104 = vector.extract_strided_slice %83 {offsets = [0, 0, 128], sizes = [2, 64, 128], strides = [1, 1, 1]} : vector<2x64x256xbf16> to vector<2x64x128xbf16>
    %c1_40 = arith.constant 1 : index
    %c0_41 = arith.constant 0 : index
    %c0_42 = arith.constant 0 : index
    %c0_43 = arith.constant 0 : index
    %105 = vector.load %arg13[%c1_40, %c0_41, %c0_42, %c0_43] : memref<2x2x64x128xbf16, #tpu.memory_space<vmem>>, vector<1x2x64x128xbf16>
    %106 = vector.shape_cast %105 : vector<1x2x64x128xbf16> to vector<2x64x128xbf16>
    %107 = vector.shape_cast %104 : vector<2x64x128xbf16> to vector<1x2x64x128xbf16>
    tpu.vector_store %arg13[%c1_40, %c0_41, %c0_42, %c0_43], %107 {strides = array<i32>} : memref<2x2x64x128xbf16, #tpu.memory_space<vmem>>, vector<1x2x64x128xbf16>,
    %c0_i32_44 = arith.constant 0 : i32
    %c2_i32 = arith.constant 2 : i32
    %108 = arith.addi %c0_i32_44, %c2_i32 : i32
    %c1_i32 = arith.constant 1 : i32
    scf.for %arg15 = %c0_i32_44 to %108 step %c1_i32  : i32 {
      %c1_i32_72 = arith.constant 1 : i32
      %149 = arith.muli %arg15, %c1_i32_72 : i32
      %c0_i32_73 = arith.constant 0 : i32
      %150 = arith.addi %c0_i32_73, %149 : i32
      %151 = arith.index_cast %150 : i32 to index
      %c0_74 = arith.constant 0 : index
      %c0_75 = arith.constant 0 : index
      %c0_76 = arith.constant 0 : index
      %152 = vector.load %arg11[%151, %c0_74, %c0_75, %c0_76] : memref<2x2x64x128xbf16, #tpu.memory_space<vmem>>, vector<1x2x64x128xbf16>
      %153 = vector.shape_cast %152 : vector<1x2x64x128xbf16> to vector<2x64x128xbf16>
      %c1_i32_77 = arith.constant 1 : i32
      %154 = arith.subi %150, %c1_i32_77 : i32
      %c0_i32_78 = arith.constant 0 : i32
      %155 = arith.maxsi %154, %c0_i32_78 : i32
      %c0_i32_79 = arith.constant 0 : i32
      %156 = arith.subi %150, %c0_i32_79 : i32
      %c0_i32_80 = arith.constant 0 : i32
      %157 = arith.maxsi %156, %c0_i32_80 : i32
      %158 = arith.index_cast %155 : i32 to index
      %c0_81 = arith.constant 0 : index
      %c0_82 = arith.constant 0 : index
      %c0_83 = arith.constant 0 : index
      %159 = vector.load %arg12[%158, %c0_81, %c0_82, %c0_83] : memref<2x2x64x128xbf16, #tpu.memory_space<vmem>>, vector<1x2x64x128xbf16>
      %160 = vector.shape_cast %159 : vector<1x2x64x128xbf16> to vector<2x64x128xbf16>
      %161 = arith.index_cast %157 : i32 to index
      %c0_84 = arith.constant 0 : index
      %c0_85 = arith.constant 0 : index
      %c0_86 = arith.constant 0 : index
      %162 = vector.load %arg12[%161, %c0_84, %c0_85, %c0_86] : memref<2x2x64x128xbf16, #tpu.memory_space<vmem>>, vector<1x2x64x128xbf16>
      %163 = vector.shape_cast %162 : vector<1x2x64x128xbf16> to vector<2x64x128xbf16>
      %164 = arith.index_cast %155 : i32 to index
      %c0_87 = arith.constant 0 : index
      %c0_88 = arith.constant 0 : index
      %c0_89 = arith.constant 0 : index
      %165 = vector.load %arg13[%164, %c0_87, %c0_88, %c0_89] : memref<2x2x64x128xbf16, #tpu.memory_space<vmem>>, vector<1x2x64x128xbf16>
      %166 = vector.shape_cast %165 : vector<1x2x64x128xbf16> to vector<2x64x128xbf16>
      %167 = arith.index_cast %157 : i32 to index
      %c0_90 = arith.constant 0 : index
      %c0_91 = arith.constant 0 : index
      %c0_92 = arith.constant 0 : index
      %168 = vector.load %arg13[%167, %c0_90, %c0_91, %c0_92] : memref<2x2x64x128xbf16, #tpu.memory_space<vmem>>, vector<1x2x64x128xbf16>
      %169 = vector.shape_cast %168 : vector<1x2x64x128xbf16> to vector<2x64x128xbf16>
      %170 = tpu.concatenate %160, %163 in 2 : vector<2x64x128xbf16>, vector<2x64x128xbf16> -> vector<2x64x256xbf16>
      %171 = tpu.concatenate %166, %169 in 2 : vector<2x64x128xbf16>, vector<2x64x128xbf16> -> vector<2x64x256xbf16>
      %cst_93 = arith.constant dense<0.000000e+00> : vector<2x256x128xf32>
      %172 = tpu.matmul %170, %153, %cst_93 {dimension_numbers = #tpu.dot_dimension_numbers<[1], [1], [2], [2], [0, 0, 0, 2, 1, 2], [0], [0]>} : vector<2x64x256xbf16>, vector<2x64x128xbf16>, vector<2x256x128xf32> -> vector<2x256x128xf32>
      %173 = tpu.iota {dimensions = array<i32: 0>} : vector<256x128xi32>
      %c1_i32_94 = arith.constant 1 : i32
      %174 = arith.subi %150, %c1_i32_94 : i32
      %c128_i32 = arith.constant 128 : i32
      %175 = arith.muli %174, %c128_i32 : i32
      %176 = vector.broadcast %175 : i32 to vector<256x128xi32>
      %177 = arith.addi %173, %176 : vector<256x128xi32>
      %178 = tpu.iota {dimensions = array<i32: 1>} : vector<256x128xi32>
      %c128_i32_95 = arith.constant 128 : i32
      %179 = arith.muli %150, %c128_i32_95 : i32
      %180 = vector.broadcast %179 : i32 to vector<256x128xi32>
      %181 = arith.addi %178, %180 : vector<256x128xi32>
      %c0_i32_96 = arith.constant 0 : i32
      %182 = vector.broadcast %c0_i32_96 : i32 to vector<256x128xi32>
      %183 = arith.cmpi sge, %177, %182 : vector<256x128xi32>
      %184 = arith.cmpi sle, %177, %181 : vector<256x128xi32>
      %185 = arith.andi %183, %184 : vector<256x128xi1>
      %c64_i32 = arith.constant 64 : i32
      %186 = vector.broadcast %c64_i32 : i32 to vector<256x128xi32>
      %187 = arith.addi %177, %186 : vector<256x128xi32>
      %188 = arith.cmpi slt, %181, %187 : vector<256x128xi32>
      %189 = arith.andi %185, %188 : vector<256x128xi1>
      %190 = vector.shape_cast %189 : vector<256x128xi1> to vector<1x256x128xi1>
      %cst_97 = arith.constant -1.000000e+30 : f32
      %191 = vector.shape_cast %190 : vector<1x256x128xi1> to vector<1x256x128xi1>
      %192 = vector.broadcast %191 : vector<1x256x128xi1> to vector<2x256x128xi1>
      %193 = vector.broadcast %cst_97 : f32 to vector<2x256x128xf32>
      %194 = arith.select %192, %172, %193 : vector<2x256x128xi1>, vector<2x256x128xf32>
      %cst_98 = arith.constant dense<0xFF800000> : vector<2x128xf32>
      %195 = vector.multi_reduction <maximumf>, %194, %cst_98 [1] : vector<2x256x128xf32> to vector<2x128xf32>
      %196 = vector.shape_cast %195 : vector<2x128xf32> to vector<2x1x128xf32>
      %197 = vector.broadcast %196 : vector<2x1x128xf32> to vector<2x256x128xf32>
      %198 = arith.subf %194, %197 : vector<2x256x128xf32>
      %199 = math.exp %198 : vector<2x256x128xf32>
      %cst_99 = arith.constant dense<0.000000e+00> : vector<2x128xf32>
      %200 = vector.multi_reduction <add>, %199, %cst_99 [1] : vector<2x256x128xf32> to vector<2x128xf32>
      %201 = vector.shape_cast %200 : vector<2x128xf32> to vector<2x1x128xf32>
      %202 = tpu.reciprocal %201 {approx = true} : vector<2x1x128xf32> -> vector<2x1x128xf32>
      %203 = vector.broadcast %202 : vector<2x1x128xf32> to vector<2x256x128xf32>
      %204 = arith.mulf %199, %203 : vector<2x256x128xf32>
      %205 = arith.truncf %204 : vector<2x256x128xf32> to vector<2x256x128xbf16>
      %cst_100 = arith.constant dense<0.000000e+00> : vector<2x64x128xf32>
      %206 = tpu.matmul %171, %205, %cst_100 {dimension_numbers = #tpu.dot_dimension_numbers<[2], [1], [1], [2], [0, 0, 0, 1, 1, 2], [0], [0]>} : vector<2x64x256xbf16>, vector<2x256x128xbf16>, vector<2x64x128xf32> -> vector<2x64x128xf32>
      %207 = vector.shape_cast %206 : vector<2x64x128xf32> to vector<128x128xf32>
      %208 = arith.truncf %207 : vector<128x128xf32> to vector<128x128xbf16>
      %209 = arith.index_cast %150 : i32 to index
      %c0_101 = arith.constant 0 : index
      %c0_102 = arith.constant 0 : index
      %210 = vector.load %arg14[%209, %c0_101, %c0_102] : memref<2x128x128xbf16, #tpu.memory_space<vmem>>, vector<1x128x128xbf16>
      %211 = vector.shape_cast %210 : vector<1x128x128xbf16> to vector<128x128xbf16>
      %212 = vector.shape_cast %208 : vector<128x128xbf16> to vector<1x128x128xbf16>
      tpu.vector_store %arg14[%209, %c0_101, %c0_102], %212 {strides = array<i32>} : memref<2x128x128xbf16, #tpu.memory_space<vmem>>, vector<1x128x128xbf16>,
    }
    %c2_i32_45 = arith.constant 2 : i32
    %c0_46 = arith.constant 0 : index
    %c0_47 = arith.constant 0 : index
    %c0_48 = arith.constant 0 : index
    %109 = vector.load %arg14[%c0_46, %c0_47, %c0_48] : memref<2x128x128xbf16, #tpu.memory_space<vmem>>, vector<1x128x128xbf16>
    %110 = vector.shape_cast %109 : vector<1x128x128xbf16> to vector<128x128xbf16>
    %c1_49 = arith.constant 1 : index
    %c0_50 = arith.constant 0 : index
    %c0_51 = arith.constant 0 : index
    %111 = vector.load %arg14[%c1_49, %c0_50, %c0_51] : memref<2x128x128xbf16, #tpu.memory_space<vmem>>, vector<1x128x128xbf16>
    %112 = vector.shape_cast %111 : vector<1x128x128xbf16> to vector<128x128xbf16>
    %113 = tpu.concatenate %110, %112 in 1 : vector<128x128xbf16>, vector<128x128xbf16> -> vector<128x256xbf16>
    %c0_52 = arith.constant 0 : index
    %c0_53 = arith.constant 0 : index
    %c0_54 = arith.constant 0 : index
    %114 = vector.load %arg4[%c0_52, %c0_53, %c0_54] : memref<1x128x128xbf16, #tpu.memory_space<vmem>>, vector<1x128x128xbf16>
    %115 = vector.shape_cast %114 : vector<1x128x128xbf16> to vector<128x128xbf16>
    %cst_55 = arith.constant dense<0.000000e+00> : vector<128x256xf32>
    %116 = tpu.matmul %115, %113, %cst_55 {dimension_numbers = #tpu.dot_dimension_numbers<[1], [0], [0], [1], [0, 0, 1, 1], [], []>} : vector<128x128xbf16>, vector<128x256xbf16>, vector<128x256xf32> -> vector<128x256xf32>
    %117 = vector.broadcast %4 : f32 to vector<128x256xf32>
    %118 = arith.mulf %116, %117 : vector<128x256xf32>
    %119 = arith.addf %8, %118 : vector<128x256xf32>
    %120 = arith.mulf %119, %119 : vector<128x256xf32>
    %cst_56 = arith.constant dense<0.000000e+00> : vector<256xf32>
    %121 = vector.multi_reduction <add>, %120, %cst_56 [0] : vector<128x256xf32> to vector<256xf32>
    %122 = vector.shape_cast %121 : vector<256xf32> to vector<1x256xf32>
    %cst_57 = arith.constant 1.280000e+02 : f32
    %123 = vector.broadcast %cst_57 : f32 to vector<1x256xf32>
    %124 = arith.divf %122, %123 : vector<1x256xf32>
    %cst_58 = arith.constant 9.99999997E-7 : f32
    %125 = vector.broadcast %cst_58 : f32 to vector<1x256xf32>
    %126 = arith.addf %124, %125 : vector<1x256xf32>
    %127 = math.rsqrt %126 : vector<1x256xf32>
    %128 = vector.broadcast %127 : vector<1x256xf32> to vector<128x256xf32>
    %129 = arith.mulf %119, %128 : vector<128x256xf32>
    %130 = arith.truncf %129 : vector<128x256xf32> to vector<128x256xbf16>
    %c0_59 = arith.constant 0 : index
    %c0_60 = arith.constant 0 : index
    %c0_61 = arith.constant 0 : index
    %131 = vector.load %arg5[%c0_59, %c0_60, %c0_61] : memref<1x512x128xbf16, #tpu.memory_space<vmem>>, vector<1x512x128xbf16>
    %132 = vector.shape_cast %131 : vector<1x512x128xbf16> to vector<512x128xbf16>
    %cst_62 = arith.constant dense<0.000000e+00> : vector<512x256xf32>
    %133 = tpu.matmul %132, %130, %cst_62 {dimension_numbers = #tpu.dot_dimension_numbers<[1], [0], [0], [1], [0, 0, 1, 1], [], []>} : vector<512x128xbf16>, vector<128x256xbf16>, vector<512x256xf32> -> vector<512x256xf32>
    %cst_63 = arith.constant 0.000000e+00 : f32
    %134 = vector.broadcast %cst_63 : f32 to vector<512x256xf32>
    %135 = arith.maximumf %133, %134 : vector<512x256xf32>
    %136 = arith.mulf %135, %135 : vector<512x256xf32>
    %137 = arith.truncf %136 : vector<512x256xf32> to vector<512x256xbf16>
    %c0_64 = arith.constant 0 : index
    %c0_65 = arith.constant 0 : index
    %c0_66 = arith.constant 0 : index
    %138 = vector.load %arg6[%c0_64, %c0_65, %c0_66] : memref<1x128x512xbf16, #tpu.memory_space<vmem>>, vector<1x128x512xbf16>
    %139 = vector.shape_cast %138 : vector<1x128x512xbf16> to vector<128x512xbf16>
    %cst_67 = arith.constant dense<0.000000e+00> : vector<128x256xf32>
    %140 = tpu.matmul %139, %137, %cst_67 {dimension_numbers = #tpu.dot_dimension_numbers<[1], [0], [0], [1], [0, 0, 1, 1], [], []>} : vector<128x512xbf16>, vector<512x256xbf16>, vector<128x256xf32> -> vector<128x256xf32>
    %141 = vector.broadcast %6 : f32 to vector<128x256xf32>
    %142 = arith.mulf %140, %141 : vector<128x256xf32>
    %143 = arith.addf %119, %142 : vector<128x256xf32>
    %144 = arith.truncf %143 : vector<128x256xf32> to vector<128x256xbf16>
    %c0_68 = arith.constant 0 : index
    %c0_69 = arith.constant 0 : index
    %145 = vector.load %arg10[%c0_68, %c0_69] : memref<128x256xbf16, #tpu.memory_space<vmem>>, vector<128x256xbf16>
    tpu.vector_store %arg10[%c0_68, %c0_69], %144 {strides = array<i32>} : memref<128x256xbf16, #tpu.memory_space<vmem>>, vector<128x256xbf16>,
    %c2_i32_70 = arith.constant 2 : i32
    %146 = arith.cmpi eq, %arg0, %c2_i32_70 : i32
    %147 = arith.extui %146 : i1 to i32
    %c0_i32_71 = arith.constant 0 : i32
    %148 = arith.cmpi ne, %147, %c0_i32_71 : i32
    scf.if %148 {
      %c0_72 = arith.constant 0 : index
      %c0_73 = arith.constant 0 : index
      %149 = vector.load %arg9[%c0_72, %c0_73] : memref<128x256xbf16, #tpu.memory_space<vmem>>, vector<128x256xbf16>
      tpu.vector_store %arg9[%c0_72, %c0_73], %144 {strides = array<i32>} : memref<128x256xbf16, #tpu.memory_space<vmem>>, vector<128x256xbf16>,
    } else {
    }
    return
  }
  func.func @transform_0(%arg0: i32) -> (i32, i32) {
    %c0_i32 = arith.constant 0 : i32
    %c0_i32_0 = arith.constant 0 : i32
    %c0_i32_1 = arith.constant 0 : i32
    return %c0_i32, %c0_i32_0 : i32, i32
  }
  func.func @transform_1(%arg0: i32) -> (i32, i32) {
    %c0_i32 = arith.constant 0 : i32
    %c0_i32_0 = arith.constant 0 : i32
    %c0_i32_1 = arith.constant 0 : i32
    return %c0_i32, %c0_i32_0 : i32, i32
  }
  func.func @transform_2(%arg0: i32) -> (i32, i32, i32) {
    %c0_i32 = arith.constant 0 : i32
    %c0_i32_0 = arith.constant 0 : i32
    %c0_i32_1 = arith.constant 0 : i32
    return %arg0, %c0_i32, %c0_i32_0 : i32, i32, i32
  }
  func.func @transform_3(%arg0: i32) -> (i32, i32, i32) {
    %c0_i32 = arith.constant 0 : i32
    %c0_i32_0 = arith.constant 0 : i32
    %c0_i32_1 = arith.constant 0 : i32
    return %arg0, %c0_i32, %c0_i32_0 : i32, i32, i32
  }
  func.func @transform_4(%arg0: i32) -> (i32, i32, i32) {
    %c0_i32 = arith.constant 0 : i32
    %c0_i32_0 = arith.constant 0 : i32
    %c0_i32_1 = arith.constant 0 : i32
    return %arg0, %c0_i32, %c0_i32_0 : i32, i32, i32
  }
  func.func @transform_5(%arg0: i32) -> (i32, i32, i32) {
    %c0_i32 = arith.constant 0 : i32
    %c0_i32_0 = arith.constant 0 : i32
    %c0_i32_1 = arith.constant 0 : i32
    return %arg0, %c0_i32, %c0_i32_0 : i32, i32, i32
  }
  func.func @transform_6(%arg0: i32) -> (i32, i32) {
    %c0_i32 = arith.constant 0 : i32
    %c0_i32_0 = arith.constant 0 : i32
    %c0_i32_1 = arith.constant 0 : i32
    return %c0_i32, %c0_i32_0 : i32, i32
  }
  func.func @transform_7(%arg0: i32) -> (i32, i32) {
    %c0_i32 = arith.constant 0 : i32
    %c0_i32_0 = arith.constant 0 : i32
    %c0_i32_1 = arith.constant 0 : i32
    return %c0_i32, %c0_i32_0 : i32, i32
  }
  func.func @transform_8(%arg0: i32) -> (i32, i32) {
    %c0_i32 = arith.constant 0 : i32
    %c0_i32_0 = arith.constant 0 : i32
    %c0_i32_1 = arith.constant 0 : i32
    return %c0_i32, %c0_i32_0 : i32, i32
  }
}

</mosaic_0001>

<bundles_post_ra>
// kernel: tpu_custom_call.1
= control target key start
LH: loop header
LB: loop body
LE: loop exit
PB: predicated region body
PF: predicated region fallthrough
CT: control target
= control target key end

     0   :  { %s9705_s0 = inlined_call_operand.vmem [shape: f32[3,2], index: 0, kind: input, shape index: {}]   ;;  %s9706_s1 = inlined_call_operand.hbm [shape: bf16[128,256], index: 1, kind: input, shape index: {}]   ;;  %s9707_s2 = inlined_call_operand.hbm [shape: bf16[3,384,128], index: 2, kind: input, shape index: {}]   ;;  %s9708_s3 = inlined_call_operand.hbm [shape: bf16[3,128,128], index: 3, kind: input, shape index: {}]   ;;  %s9709_s4 = inlined_call_operand.hbm [shape: bf16[3,512,128], index: 4, kind: input, shape index: {}]   ;;  %s9710_s5 = inlined_call_operand.hbm [shape: bf16[3,128,512], index: 5, kind: input, shape index: {}]   ;;  %s9711_s6 = inlined_call_operand.hbm [shape: f32[32,256], index: 6, kind: input, shape index: {}]   ;;  %s9712_s7 = inlined_call_operand.hbm [shape: f32[32,256], index: 7, kind: input, shape index: {}]   ;;  %s9713_s8 = inlined_call_operand.hbm [shape: bf16[128,256], index: 8, kind: output, shape index: {}]  }
   0x1   :  { %9898 = sst [smem:[#allocation130_spill]] %s9705_s0 }
   0x2   :  { %9899 = sst [smem:[#allocation131_spill]] %s9707_s2 }
   0x3   :  { %9900 = sst [smem:[#allocation132_spill]] %s9709_s4 }
   0x4   :  { %9901 = sst [smem:[#allocation133_spill]] %s9711_s6 }
   0x5   :  { %9902 = sst [smem:[#allocation134_spill]] %s9713_s8 }
   0x6   :  { %13 = vsyncpa [#allocation10], 0 }
   0x7   :  { %14 = vsyncpa [#allocation8], 0 }
   0x8   :  { %15 = vsyncpa [#allocation13], 0 }
   0x9   :  { %17 = vsyncpa [#allocation13 + $0x1], 0 }
   0xa   :  { %18 = vsyncpa [#allocation16], 0 }
   0xb   :  { %20 = vsyncpa [#allocation16 + $0x1], 0 }
   0xc   :  { %21 = vsyncpa [#allocation19], 0 }
   0xd   :  { %22 = vsyncpa [#allocation9], 0  ;;  %s6745_s27 = smov 0   ;;  %s6747_s28 = smov 0  }
   0xe   :  { %s6749_s29 = smov 0   ;;  %s6751_s30 = smov 0  }
   0xf LB: > { %9903 = sst [smem:[#allocation28_spill]] %s6668_s28  ;;  %s6764_s9 = sadd.s32 4294967295, %s6676_s30   ;;  %s6676_s30 = sphi %s6751_s30, %s10306_s30   ;;  %s6672_s29 = sphi %s6749_s29, %s10309_s29   ;;  %s6668_s28 = sphi %s6747_s28, %s10308_s28   ;;  %s6664_s27 = sphi %s6745_s27, %s10307_s27  }
  0x10   : > { %9904 = sst [smem:[#allocation29_spill]] %s6672_s29  ;;  %p90_p0 = scmp.ne.s32.totalorder %s6668_s28, %s6664_s27 }
  0x11   : > { %9905 = sst [smem:[#allocation30_spill]] %s6764_s9  ;;  %p9714_p1 = scmp.eq.s32.totalorder %s6764_s9, 0 }
  0x12   : > { %p5482_p2 = scmp.ge.s32.totalorder %s6676_s30, 1  ;;  %p242_p3 = scmp.lt.s32.totalorder %s6676_s30, 4 }
  0x13   : > { %p6773_p5 = por %p9714_p1, %p90_p0  ;;  %s6682_s12 = smov [#allocation18]  }
  0x14   : > { %p6777_p6 = pnand %p5482_p2, %p242_p3  ;;  %s278_s13 = sshll.u32 %s6682_s12, 4  ;;  %s279_s13 = int_to_ptr.vmem [resolvable:$true] %s278_s13 }
  0x15   : > { %s9906_s10 = scalar_select %p6773_p5, 1, 0 }
  0x16   : > { %s9908_s11 = scalar_select %p6777_p6, 1, 0 }
  0x17   : > { %9907 = sst [smem:[#allocation31_spill]] %s9906_s10  ;;  %p5989_p7 = pneg %p6777_p6 }
  0x18   : > { %s6790_s15 = sadd.s32 1, %s6676_s30   ;;  %s77_s16 = sadd.s32 1, %s6672_s29 }
  0x19   : > { %p6785_p8 = pnand %p5989_p7, %p9714_p1  ;;  %9910 = sst [smem:[#allocation32_spill]] %s6790_s15 }
  0x1a   : > { %s74_s17 = ssub.s32 %s6676_s30, %s6790_s15  ;;  %s9911_s6 = sld [smem:[#allocation133_spill]] }
  0x1b   : > { %s9909_s14 = scalar_select %p6785_p8, 1, 0 }
  0x1c   : > { %p6803_p10 = pneg %p6785_p8 }
  0x1e   : > { %s9912_s23 = scalar_select %p6803_p10, 1, 0 }
  0x20   : > { %s6373_s20 = scalar_lea.hbm %s9911_s6, 1024 }
  0x21   : > { %p6374_p9 = scmp.ne.s32.totalorder %s9911_s6, %s6373_s20  ;;  %p6380_p13 = scmp.lt.u32.totalorder %s6373_s20, %s9911_s6 }
  0x23   : > { %p6376_p11 = pnand %p6803_p10, %p6374_p9 }
  0x25   : > { %p6377_p12 = pneg %p6376_p11 }
  0x27   : > { %p6382_p0 = pnand %p6380_p13, %p6377_p12 }
  0x29   : > { %6385 = shalt.err (!%p6382_p0)
}
  0x2a   : > { %s6386_s26 = scalar_lea.vmem %s279_s13, 1024  ;;  %p6394_p4 = scmp.lt.s32.totalorder %s279_s13, %s279_s13 }
  0x2b   : > { %p6387_p2 = scmp.ne.s32.totalorder %s279_s13, %s6386_s26  ;;  %p6395_p1 = scmp.lt.s32.totalorder %s6386_s26, %s6386_s26 }
  0x2d   : > { %p6389_p3 = pnand %p6387_p2, %p6803_p10  ;;  %p6396_p5 = por %p6395_p1, %p6394_p4 }
  0x2f   : > { %p6390_p7 = pneg %p6389_p3 }
  0x31   : > { %p6397_p6 = pnand %p6396_p5, %p6390_p7 }
  0x33   : > { %6400 = shalt.err (!%p6397_p6)
}
  0x34   : > { %s9717_s27 = smov 256   ;;  %s9719_s12 = smov 16  }
  0x35   : > { %5998 = dma.hbm_to_vmem [thread:$0]  (!%p6785_p8), %s9911_s6, 1024, %s279_s13, [#allocation19], %s9717_s27, %s9717_s27, %s9719_s12  }
  0x36   : > { %p75_p1 = scmp.eq.s32.totalorder %s74_s17, 0  ;;  %p84_p4 = scmp.ne.s32.totalorder %s6672_s29, %s6668_s28 }
  0x37   : > { %p85_p5 = scmp.eq.s32.totalorder %s6676_s30, 0  ;;  %p6019_p6 = scmp.lt.s32.totalorder %s6676_s30, 3 }
  0x38   : > { %s6827_s20 = scalar_select %p75_p1, %s6672_s29, %s77_s16  }
  0x39   : > { %p86_p9 = por %p85_p5, %p84_p4  ;;  %s9721_s21 = sand.u32 1, %s6676_s30  }
  0x3a   : > { %9913 = sst [smem:[#allocation33_spill]] %s6827_s20  ;;  %s6831_s22 = sand.u32 1, %s6672_s29  }
  0x3b   : > { %s5958_s24 = smul.u32 192, %s6831_s22  ;;  %p6834_p11 = pnand %p6019_p6, %p86_p9 }
  0x3c   : > { %s5959_s26 = smul.u32 3072, %s6676_s30  ;;  %s9915_s2 = sld [smem:[#allocation131_spill]] }
  0x3d   : > { %s9914_s25 = scalar_select %p6834_p11, 1, 0 }
  0x3e   : > { %s309_s16 = scalar_lea.vmem [#allocation12], %s5958_s24  ;;  %s6848_s27 = scalar_lea.sflag [#allocation13], %s9721_s21 }
  0x3f   : > { %s316_s19 = sshll.u32 %s309_s16, 4  ;;  %p6854_p13 = pneg %p6834_p11  ;;  %s6844_s19 = int_to_ptr.vmem [resolvable:$true] %s316_s19 }
  0x41   : > { %s9916_s6 = scalar_select %p6854_p13, 1, 0 }
  0x42   : > { %s6842_s17 = scalar_lea.hbm %s9915_s2, %s5959_s26  ;;  %s6406_s24 = scalar_lea.hbm %s9915_s2, 9216 }
  0x43   : > { %s6401_s12 = scalar_lea.hbm %s6842_s17, 3072  ;;  %p6407_p3 = scmp.lt.u32.totalorder %s6842_s17, %s9915_s2 }
  0x44   : > { %p6402_p12 = scmp.ne.s32.totalorder %s6842_s17, %s6401_s12  ;;  %p6408_p7 = scmp.lt.u32.totalorder %s6406_s24, %s6401_s12 }
  0x45   : > { %p6410_p4 = scmp.lt.u32.totalorder %s6401_s12, %s6842_s17 }
  0x46   : > { %p6404_p0 = pnand %p6854_p13, %p6402_p12  ;;  %p6409_p1 = por %p6408_p7, %p6407_p3 }
  0x48   : > { %p6405_p2 = pneg %p6404_p0  ;;  %p6411_p5 = por %p6410_p4, %p6409_p1 }
  0x4a   : > { %p6412_p6 = pnand %p6411_p5, %p6405_p2 }
  0x4c   : > { %6415 = shalt.err (!%p6412_p6)
}
  0x4d   : > { %s6416_s21 = scalar_lea.vmem %s6844_s19, 3072  ;;  %s6685_s26 = smov [#allocation12]  }
  0x4e   : > { %p6417_p9 = scmp.ne.s32.totalorder %s6844_s19, %s6416_s21  ;;  %s6421_s13 = sshll.u32 %s6685_s26, 4  ;;  %s6422_s13 = int_to_ptr.vmem [resolvable:$false] %s6421_s13 }
  0x4f   : > { %s6423_s18 = scalar_lea.vmem %s6422_s13, 6144  ;;  %p6424_p8 = scmp.lt.s32.totalorder %s6844_s19, %s6422_s13 }
  0x50   : > { %p6419_p12 = pnand %p6417_p9, %p6854_p13  ;;  %p6425_p10 = scmp.lt.s32.totalorder %s6423_s18, %s6416_s21 }
  0x52   : > { %p6420_p0 = pneg %p6419_p12  ;;  %p6426_p3 = por %p6425_p10, %p6424_p8 }
  0x54   : > { %p6427_p7 = pnand %p6426_p3, %p6420_p0 }
  0x56   : > { %6430 = shalt.err (!%p6427_p7)
}
  0x57   : > { %s9730_s12 = smov 64   ;;  %s9739_s24 = smov 4  }
  0x58   : > { %6005 = dma.hbm_to_vmem [thread:$0]  (!%p6834_p11), %s6842_s17, 3072, %s6844_s19, %s6848_s27, %s9730_s12, %s9730_s12, %s9739_s24  }
  0x59   : > { %s5492_s21 = sshll.u32 %s6831_s22, 8  ;;  %s9729_s16 = sshll.u32 %s6676_s30, 12 }
  0x5a   : > { %s9917_s4 = sld [smem:[#allocation132_spill]]  ;;  %s351_s2 = scalar_lea.vmem [#allocation15], %s5492_s21 }
  0x5b   : > { %s358_s20 = sshll.u32 %s351_s2, 4  ;;  %s9918_s29 = sand.u32 1, %s6676_s30   ;;  %s6892_s20 = int_to_ptr.vmem [resolvable:$true] %s358_s20 }
  0x5c   : > { %s6896_s15 = scalar_lea.sflag [#allocation16], %s9918_s29 }
  0x60   : > { %s6888_s18 = scalar_lea.hbm %s9917_s4, %s9729_s16  ;;  %s6436_s13 = scalar_lea.hbm %s9917_s4, 12288 }
  0x61   : > { %s6431_s17 = scalar_lea.hbm %s6888_s18, 4096  ;;  %p6437_p1 = scmp.lt.u32.totalorder %s6888_s18, %s9917_s4 }
  0x62   : > { %p6432_p8 = scmp.ne.s32.totalorder %s6888_s18, %s6431_s17  ;;  %p6438_p4 = scmp.lt.u32.totalorder %s6436_s13, %s6431_s17 }
  0x63   : > { %p6440_p6 = scmp.lt.u32.totalorder %s6431_s17, %s6888_s18 }
  0x64   : > { %p6434_p10 = pnand %p6432_p8, %p6854_p13  ;;  %p6439_p5 = por %p6438_p4, %p6437_p1 }
  0x66   : > { %p6435_p2 = pneg %p6434_p10  ;;  %p6441_p9 = por %p6440_p6, %p6439_p5 }
  0x68   : > { %p6442_p12 = pnand %p6441_p9, %p6435_p2 }
  0x6a   : > { %6445 = shalt.err (!%p6442_p12)
}
  0x6b   : > { %s6446_s2 = scalar_lea.vmem %s6892_s20, 4096  ;;  %s6688_s29 = smov [#allocation15]  }
  0x6c   : > { %p6447_p0 = scmp.ne.s32.totalorder %s6892_s20, %s6446_s2  ;;  %s6451_s19 = sshll.u32 %s6688_s29, 4  ;;  %s6452_s19 = int_to_ptr.vmem [resolvable:$false] %s6451_s19 }
  0x6d   : > { %s6453_s12 = scalar_lea.vmem %s6452_s19, 8192  ;;  %p6454_p8 = scmp.lt.s32.totalorder %s6892_s20, %s6452_s19 }
  0x6e   : > { %p6449_p3 = pnand %p6447_p0, %p6854_p13  ;;  %p6455_p10 = scmp.lt.s32.totalorder %s6453_s12, %s6446_s2 }
  0x70   : > { %p6450_p7 = pneg %p6449_p3  ;;  %p6456_p1 = por %p6455_p10, %p6454_p8 }
  0x72   : > { %p6457_p4 = pnand %p6456_p1, %p6450_p7 }
  0x74   : > { %6460 = shalt.err (!%p6457_p4)
}
  0x75   : > { %s9919_s16 = smov 64   ;;  %s9920_s17 = sshll.u32 %s6676_s30, 12 }
  0x76   : > { %6011 = dma.hbm_to_vmem [thread:$0]  (!%p6834_p11), %s6888_s18, 4096, %s6892_s20, %s6896_s15, %s9919_s16, %s9919_s16, %s9739_s24  }
  0x77   : > { %s6928_s2 = scalar_lea.hbm %s9710_s5, %s9920_s17  ;;  %s372_s29 = scalar_lea.vmem [#allocation17], %s5492_s21 }
  0x78   : > { %s379_s19 = sshll.u32 %s372_s29, 4  ;;  %s9921_s0 = sld [smem:[#allocation130_spill]]  ;;  %s6932_s19 = int_to_ptr.vmem [resolvable:$true] %s379_s19 }
  0x79   : > { %p9922_p5 = scmp.ne.s32.totalorder %s9912_s23, 0 }
  0x7e   : > { %s255_s8 = sshll.u32 %s9921_s0, 4  ;;  %s256_s8 = int_to_ptr.vmem [resolvable:$true] %s255_s8 }
  0x7f   : > { %s6461_s10 = scalar_lea.vmem %s256_s8, 64  ;;  %p6469_p12 = scmp.lt.s32.totalorder %s256_s8, %s256_s8 }
  0x80   : > { %p6462_p2 = scmp.ne.s32.totalorder %s256_s8, %s6461_s10  ;;  %p6470_p0 = scmp.lt.s32.totalorder %s6461_s10, %s6461_s10 }
  0x82   : > { %p6464_p6 = pnand %p6462_p2, %p9922_p5  ;;  %p6471_p3 = por %p6470_p0, %p6469_p12 }
  0x84   : > { %p6465_p9 = pneg %p6464_p6 }
  0x86   : > { %p6472_p7 = pnand %p6471_p3, %p6465_p9 }
  0x88   : > { %6475 = shalt.err (!%p6472_p7)
}
  0x89   : > { %s6689_s20 = smov [#allocation7]   ;;  %p9923_p8 = scmp.ne.s32.totalorder %s9909_s14, 0 }
  0x8a   : > { %s6690_s21 = smov [#allocation11]   ;;  %s6476_s26 = scalar_lea.hbm %s9706_s1, 2048 }
  0x8b   : > { %5992 = dma.vmem_to_smem (!%p9923_p8), %s256_s8, 64, %s6689_s20, [#allocation10]  }
  0x8c   : > { %s265_s18 = sshll.u32 %s6690_s21, 4  ;;  %p6477_p10 = scmp.ne.s32.totalorder %s9706_s1, %s6476_s26  ;;  %s266_s18 = int_to_ptr.vmem [resolvable:$true] %s265_s18 }
  0x8d   : > { %p6483_p2 = scmp.lt.u32.totalorder %s6476_s26, %s9706_s1 }
  0x8e   : > { %p6479_p1 = pnand %p6477_p10, %p9922_p5 }
  0x90   : > { %p6480_p4 = pneg %p6479_p1 }
  0x92   : > { %p6485_p6 = pnand %p6483_p2, %p6480_p4 }
  0x94   : > { %6488 = shalt.err (!%p6485_p6)
}
  0x95   : > { %s6489_s8 = scalar_lea.vmem %s266_s18, 2048  ;;  %p6497_p3 = scmp.lt.s32.totalorder %s266_s18, %s266_s18 }
  0x96   : > { %p6490_p9 = scmp.ne.s32.totalorder %s266_s18, %s6489_s8  ;;  %p6498_p7 = scmp.lt.s32.totalorder %s6489_s8, %s6489_s8 }
  0x98   : > { %p6492_p12 = pnand %p6490_p9, %p9922_p5  ;;  %p6499_p11 = por %p6498_p7, %p6497_p3 }
  0x9a   : > { %p6493_p0 = pneg %p6492_p12 }
  0x9c   : > { %p6500_p13 = pnand %p6499_p11, %p6493_p0 }
  0x9e   : > { %6503 = shalt.err (!%p6500_p13)
}
  0x9f   : > { %s6691_s20 = smov 128   ;;  %s6692_s21 = smov 8  }
  0xa0   : > { %5995 = dma.hbm_to_vmem [thread:$0]  (!%p9923_p8), %s9706_s1, 2048, %s266_s18, [#allocation8], %s6691_s20, %s6691_s20, %s6692_s21  }
  0xa1   : > { %s6693_s26 = smov [#allocation20]   ;;  %s5489_s29 = sshll.u32 %s6831_s22, 6 }
  0xa2   : > { %s291_s13 = sshll.u32 %s6693_s26, 4  ;;  %s6504_s8 = scalar_lea.hbm %s9712_s7, 1024  ;;  %s292_s13 = int_to_ptr.vmem [resolvable:$true] %s291_s13 }
  0xa3   : > { %p6505_p11 = scmp.ne.s32.totalorder %s9712_s7, %s6504_s8  ;;  %p6511_p1 = scmp.lt.u32.totalorder %s6504_s8, %s9712_s7 }
  0xa5   : > { %p6507_p13 = pnand %p6505_p11, %p9922_p5 }
  0xa7   : > { %p6508_p10 = pneg %p6507_p13 }
  0xa9   : > { %p6513_p4 = pnand %p6511_p1, %p6508_p10 }
  0xab   : > { %6516 = shalt.err (!%p6513_p4)
}
  0xac   : > { %s6517_s18 = scalar_lea.vmem %s292_s13, 1024  ;;  %p6525_p12 = scmp.lt.s32.totalorder %s292_s13, %s292_s13 }
  0xad   : > { %p6518_p2 = scmp.ne.s32.totalorder %s292_s13, %s6517_s18  ;;  %p6526_p0 = scmp.lt.s32.totalorder %s6517_s18, %s6517_s18 }
  0xaf   : > { %p6520_p6 = pnand %p6518_p2, %p9922_p5  ;;  %p6527_p3 = por %p6526_p0, %p6525_p12 }
  0xb1   : > { %p6521_p9 = pneg %p6520_p6 }
  0xb3   : > { %p6528_p7 = pnand %p6527_p3, %p6521_p9 }
  0xb5   : > { %6531 = shalt.err (!%p6528_p7)
}
  0xb6   : > { %s9924_s0 = smov 16   ;;  %s9925_s22 = smov 256  }
  0xb7   : > { %6001 = dma.hbm_to_vmem [thread:$0]  (!%p9923_p8), %s9712_s7, 1024, %s292_s13, [#allocation19], %s9925_s22, %s9925_s22, %s9924_s0  }
  0xb8   : > { %s5685_s24 = sshll.u32 %s6676_s30, 10  ;;  %s330_s23 = scalar_lea.vmem [#allocation14], %s5489_s29 }
  0xb9   : > { %s337_s20 = sshll.u32 %s330_s23, 4  ;;  %s6985_s17 = scalar_lea.hbm %s9708_s3, %s5685_s24  ;;  %s6987_s20 = int_to_ptr.vmem [resolvable:$true] %s337_s20 }
  0xba   : > { %s6532_s14 = scalar_lea.hbm %s6985_s17, 1024  ;;  %p9926_p11 = scmp.ne.s32.totalorder %s9916_s6, 0 }
  0xbb   : > { %p6533_p5 = scmp.ne.s32.totalorder %s6985_s17, %s6532_s14  ;;  %s6537_s13 = scalar_lea.hbm %s9708_s3, 3072 }
  0xbc   : > { %p6538_p8 = scmp.lt.u32.totalorder %s6985_s17, %s9708_s3  ;;  %p6539_p1 = scmp.lt.u32.totalorder %s6537_s13, %s6532_s14 }
  0xbd   : > { %p6535_p13 = pnand %p6533_p5, %p9926_p11  ;;  %p6541_p2 = scmp.lt.u32.totalorder %s6532_s14, %s6985_s17 }
  0xbe   : > { %p6540_p4 = por %p6539_p1, %p6538_p8 }
  0xbf   : > { %p6536_p10 = pneg %p6535_p13 }
  0xc0   : > { %p6542_p6 = por %p6541_p2, %p6540_p4 }
  0xc2   : > { %p6543_p9 = pnand %p6542_p6, %p6536_p10 }
  0xc4   : > { %6546 = shalt.err (!%p6543_p9)
}
  0xc5   : > { %s6547_s12 = scalar_lea.vmem %s6987_s20, 1024  ;;  %s6694_s8 = smov [#allocation14]  }
  0xc6   : > { %p6548_p12 = scmp.ne.s32.totalorder %s6987_s20, %s6547_s12  ;;  %s6552_s18 = sshll.u32 %s6694_s8, 4  ;;  %s6553_s18 = int_to_ptr.vmem [resolvable:$false] %s6552_s18 }
  0xc7   : > { %s6554_s28 = scalar_lea.vmem %s6553_s18, 2048  ;;  %p6555_p7 = scmp.lt.s32.totalorder %s6987_s20, %s6553_s18 }
  0xc8   : > { %p6550_p0 = pnand %p6548_p12, %p9926_p11  ;;  %p6556_p5 = scmp.lt.s32.totalorder %s6554_s28, %s6547_s12 }
  0xca   : > { %p6551_p3 = pneg %p6550_p0  ;;  %p6557_p13 = por %p6556_p5, %p6555_p7 }
  0xcc   : > { %p6558_p8 = pnand %p6557_p13, %p6551_p3 }
  0xce   : > { %6561 = shalt.err (!%p6558_p8)
}
  0xcf   : > { %p9927_p10 = scmp.ne.s32.totalorder %s9914_s25, 0  ;;  %s9928_s9 = smov 4  }
  0xd0   : > { %s6562_s24 = scalar_lea.hbm %s6928_s2, 4096  ;;  %s6567_s4 = scalar_lea.hbm %s9710_s5, 12288 }
  0xd1   : > { %6008 = dma.hbm_to_vmem [thread:$0]  (!%p9927_p10), %s6985_s17, 1024, %s6987_s20, %s6848_s27, %s9919_s16, %s9919_s16, %s9928_s9  }
  0xd2   : > { %p6563_p1 = scmp.ne.s32.totalorder %s6928_s2, %s6562_s24  ;;  %p6568_p6 = scmp.lt.u32.totalorder %s6928_s2, %s9710_s5 }
  0xd3   : > { %p6569_p9 = scmp.lt.u32.totalorder %s6567_s4, %s6562_s24  ;;  %p6571_p0 = scmp.lt.u32.totalorder %s6562_s24, %s6928_s2 }
  0xd4   : > { %p6565_p4 = pnand %p6563_p1, %p9926_p11 }
  0xd5   : > { %p6570_p12 = por %p6569_p9, %p6568_p6 }
  0xd6   : > { %p6566_p2 = pneg %p6565_p4 }
  0xd7   : > { %p6572_p3 = por %p6571_p0, %p6570_p12 }
  0xd9   : > { %p6573_p7 = pnand %p6572_p3, %p6566_p2 }
  0xdb   : > { %6576 = shalt.err (!%p6573_p7)
}
  0xdc   : > { %s6577_s27 = scalar_lea.vmem %s6932_s19, 4096  ;;  %s6695_s16 = smov [#allocation17]  }
  0xdd   : > { %p6578_p5 = scmp.ne.s32.totalorder %s6932_s19, %s6577_s27  ;;  %s6582_s20 = sshll.u32 %s6695_s16, 4  ;;  %s6583_s20 = int_to_ptr.vmem [resolvable:$false] %s6582_s20 }
  0xde   : > { %s6584_s17 = scalar_lea.vmem %s6583_s20, 8192  ;;  %p6585_p1 = scmp.lt.s32.totalorder %s6932_s19, %s6583_s20 }
  0xdf   : > { %p6580_p13 = pnand %p6578_p5, %p9926_p11  ;;  %p6586_p4 = scmp.lt.s32.totalorder %s6584_s17, %s6577_s27 }
  0xe1   : > { %p6581_p8 = pneg %p6580_p13  ;;  %p6587_p6 = por %p6586_p4, %p6585_p1 }
  0xe3   : > { %p6588_p9 = pnand %p6587_p6, %p6581_p8 }
  0xe5   : > { %6591 = shalt.err (!%p6588_p9)
}
  0xe6   : > { %6014 = dma.hbm_to_vmem [thread:$0]  (!%p9927_p10), %s6928_s2, 4096, %s6932_s19, %s6896_s15, %s9925_s22, %s9925_s22, %s9924_s0  }
  0xe7   : > { %p9929_p11 = scmp.ne.s32.totalorder %s9908_s11, 0 }
  0xe9   : > { %391 = sbr.rel (%p9929_p11) target bundleno = 2771 (0xad3), region = 52 }
  0xf0   : > { %s9930_s6 = sld [smem:[#allocation30_spill]] }
  0xf6   : > { %p9931_p2 = scmp.eq.s32.totalorder %s9930_s6, 0 }
  0xf8   : > { %6639 = dma.done.wait (%p9931_p2), [#allocation10], 64   ;;  %p9932_p12 = pmov %p9931_p2 }
  0xf9   : > { %p9933_p0 = pmov %p9931_p2 }
  0xfa   : > { %6641 = vsyncadd (%p9932_p12), [#allocation10], 4294967232 }
  0xfb   : > { %6643 = dma.done.wait (%p9933_p0), [#allocation8], 2048   ;;  %p9934_p3 = pmov %p9933_p0 }
  0xfc   : > { %s9935_s25 = sld [smem:[#allocation28_spill]]  ;;  %s9936_s30 = sld [smem:[#allocation31_spill]] }
  0xfd   : > { %6645 = vsyncadd (%p9934_p3), [#allocation8], 4294965248  ;;  %s401_s13 = sand.u32 1, %s9930_s6  }
  0xfe   : > { %s402_s11 = scalar_lea.sflag [#allocation13], %s401_s13 }
 0x102   : > { %s403_s15 = sand.u32 1, %s9935_s25   ;;  %p9937_p10 = scmp.ne.s32.totalorder %s9936_s30, 0 }
 0x103   : > { %s5960_s2 = smul.u32 192, %s403_s15 }
 0x105   : > { %s7051_s19 = scalar_lea.vmem [#allocation12], %s5960_s2 }
 0x106   : > { %6647 = dma.done.wait (%p9937_p10), %s402_s11, 4096  }
 0x107   : > { %6649 = vsyncadd (%p9937_p10), %s402_s11, 4294963200  ;;  %s5501_s0 = sshll.u32 %s403_s15, 6  ;;  %s5502_s22 = sshll.u32 %s403_s15, 8 }
 0x108   : > { %s7057_s29 = scalar_lea.vmem [#allocation14], %s5501_s0  ;;  %s420_s10 = scalar_lea.sflag [#allocation16], %s401_s13 }
 0x109   : > { %s7059_s12 = scalar_lea.vmem [#allocation15], %s5502_s22 }
 0x10a   : > { %6651 = dma.done.wait (%p9937_p10), %s420_s10, 8192  }
 0x10b   : > { %6653 = vsyncadd (%p9937_p10), %s420_s10, 4294959104  ;;  %s7065_s8 = scalar_lea.vmem [#allocation17], %s5502_s22  ;;  %p9938_p7 = pmov %p9933_p0 }
 0x10c   : > { %p9939_p5 = pmov %p9933_p0 }
 0x10d   : > { %6655 = dma.done.wait (%p9938_p7), [#allocation19], 2048  }
 0x10e   : > { %6657 = vsyncadd (%p9939_p5), [#allocation19], 4294965248 }
 0x10f   : > { %445 = sfence }
 0x110   : > { %p9940_p13 = scmp.ne.s32.totalorder %s9930_s6, 0 }
 0x111   : > { %v6081_v0 = vld [vmem:[#allocation11] ss:$8 sps:$4 sm:$0xff] (!%p9940_p13)   ;;  %v6083_v1 = vld [vmem:[#allocation11 + $0x4] ss:$8 sps:$4 sm:$0xff] (!%p9940_p13)   ;;  %v6084_v2 = vld [vmem:[#allocation11 + $0x10] ss:$8 sps:$4 sm:$0xff] (!%p9940_p13)  }
 0x112   : > { %488 = sbr.rel (%p9940_p13) target bundleno = 282 (0x11a), region = 88  ;;  %585 = vst [vmem:[#allocation2] sm:$0xff] (!%p9940_p13), %v6081_v0  ;;  %v6086_v3 = vld [vmem:[#allocation11 + $0x14] ss:$8 sps:$4 sm:$0xff] (!%p9940_p13)   ;;  %586 = vst [vmem:[#allocation2 + $0x8] sm:$0xff] (!%p9940_p13), %v6083_v1 }
 0x113   : > { %v6087_v4 = vld [vmem:[#allocation11 + $0x20] ss:$8 sps:$4 sm:$0xff] (!%p9940_p13)   ;;  %v6089_v5 = vld [vmem:[#allocation11 + $0x24] ss:$8 sps:$4 sm:$0xff] (!%p9940_p13)   ;;  %587 = vst [vmem:[#allocation2 + $0x10] sm:$0xff] (!%p9940_p13), %v6084_v2  ;;  %588 = vst [vmem:[#allocation2 + $0x18] sm:$0xff] (!%p9940_p13), %v6086_v3 }
 0x114   : > { %v6090_v6 = vld [vmem:[#allocation11 + $0x30] ss:$8 sps:$4 sm:$0xff] (!%p9940_p13)   ;;  %589 = vst [vmem:[#allocation2 + $0x20] sm:$0xff] (!%p9940_p13), %v6087_v4  ;;  %590 = vst [vmem:[#allocation2 + $0x28] sm:$0xff] (!%p9940_p13), %v6089_v5  ;;  %v6092_v7 = vld [vmem:[#allocation11 + $0x34] ss:$8 sps:$4 sm:$0xff] (!%p9940_p13)  }
 0x115   : > { %591 = vst [vmem:[#allocation2 + $0x30] sm:$0xff] (!%p9940_p13), %v6090_v6  ;;  %v6093_v8 = vld [vmem:[#allocation11 + $0x40] ss:$8 sps:$4 sm:$0xff] (!%p9940_p13)   ;;  %v6095_v9 = vld [vmem:[#allocation11 + $0x44] ss:$8 sps:$4 sm:$0xff] (!%p9940_p13)   ;;  %592 = vst [vmem:[#allocation2 + $0x38] sm:$0xff] (!%p9940_p13), %v6092_v7 }
 0x116   : > { %v6096_v10 = vld [vmem:[#allocation11 + $0x50] ss:$8 sps:$4 sm:$0xff] (!%p9940_p13)   ;;  %v6098_v11 = vld [vmem:[#allocation11 + $0x54] ss:$8 sps:$4 sm:$0xff] (!%p9940_p13)   ;;  %593 = vst [vmem:[#allocation2 + $0x40] sm:$0xff] (!%p9940_p13), %v6093_v8  ;;  %594 = vst [vmem:[#allocation2 + $0x48] sm:$0xff] (!%p9940_p13), %v6095_v9 }
 0x117   : > { %v6099_v12 = vld [vmem:[#allocation11 + $0x60] ss:$8 sps:$4 sm:$0xff] (!%p9940_p13)   ;;  %595 = vst [vmem:[#allocation2 + $0x50] sm:$0xff] (!%p9940_p13), %v6096_v10  ;;  %596 = vst [vmem:[#allocation2 + $0x58] sm:$0xff] (!%p9940_p13), %v6098_v11  ;;  %v6101_v13 = vld [vmem:[#allocation11 + $0x64] ss:$8 sps:$4 sm:$0xff] (!%p9940_p13)  }
 0x118   : > { %597 = vst [vmem:[#allocation2 + $0x60] sm:$0xff] (!%p9940_p13), %v6099_v12  ;;  %v6102_v14 = vld [vmem:[#allocation11 + $0x70] ss:$8 sps:$4 sm:$0xff] (!%p9940_p13)   ;;  %v6104_v15 = vld [vmem:[#allocation11 + $0x74] ss:$8 sps:$4 sm:$0xff] (!%p9940_p13)   ;;  %598 = vst [vmem:[#allocation2 + $0x68] sm:$0xff] (!%p9940_p13), %v6101_v13 }
 0x119   : > { %599 = vst [vmem:[#allocation2 + $0x70] sm:$0xff] %v6102_v14  ;;  %600 = vst [vmem:[#allocation2 + $0x78] sm:$0xff] %v6104_v15 }
 0x11a PF: > { %s9941_s18 = sld [smem:[#allocation30_spill]]  ;;  %v606_v16 = vld [vmem:[#allocation2 + $0x8] sm:$0xff]  ;;  %v9744_v20 = vmov 0   ;;  %v605_v28 = vld [vmem:[#allocation2] sm:$0xff]  ;;  %s7861_s21 = smov 0  }
 0x11b   : > { %v608_v17 = vld [vmem:[#allocation2 + $0x18] sm:$0xff]  ;;  %v7076_v18 = vunpack.c.l.bf16 %v606_v16  ;;  %v7078_v19 = vunpack.c.h.bf16 %v606_v16  ;;  %1006 = vmatprep.mubr.bf16.mxu0 %v9744_v20  ;;  %1126 = vmatprep.mubr.bf16.mxu1 %v9744_v20  ;;  %v607_v33 = vld [vmem:[#allocation2 + $0x10] sm:$0xff]  ;;  %v7100_v34 = vunpack.c.l.bf16 %v605_v28  ;;  %v7102_v35 = vunpack.c.h.bf16 %v605_v28 }
 0x11c   : > { %v7084_v21 = vunpack.c.l.bf16 %v608_v17  ;;  %v610_v22 = vld [vmem:[#allocation2 + $0x28] sm:$0xff]  ;;  %v7086_v23 = vunpack.c.h.bf16 %v608_v17  ;;  %v7108_v40 = vunpack.c.l.bf16 %v607_v33  ;;  %v609_v44 = vld [vmem:[#allocation2 + $0x20] sm:$0xff]  ;;  %v7114_v46 = vunpack.c.h.bf16 %v607_v33 }
 0x11d   : > { %9942 = vst [vmem:[#allocation34_spill] sm:$0xff] %v7076_v18  ;;  %9943 = vst [vmem:[#allocation35_spill] sm:$0xff] %v7078_v19  ;;  %v654_v24 = vmul.f32 %v7076_v18, %v7076_v18  ;;  %v656_v25 = vmul.f32 %v7078_v19, %v7078_v19  ;;  %v7092_v26 = vunpack.c.l.bf16 %v610_v22  ;;  %v612_v29 = vld [vmem:[#allocation2 + $0x38] sm:$0xff]  ;;  %v7096_v30 = vunpack.c.h.bf16 %v610_v22  ;;  %v611_v52 = vld [vmem:[#allocation2 + $0x30] sm:$0xff] }
 0x11e   : > { %9944 = vst [vmem:[#allocation36_spill] sm:$0xff] %v7084_v21  ;;  %9945 = vst [vmem:[#allocation37_spill] sm:$0xff] %v7086_v23  ;;  %v658_v27 = vmul.f32 %v7084_v21, %v7084_v21  ;;  %v660_v31 = vmul.f32 %v7086_v23, %v7086_v23  ;;  %v7104_v36 = vunpack.c.l.bf16 %v612_v29  ;;  %v614_v39 = vld [vmem:[#allocation2 + $0x48] sm:$0xff]  ;;  %v7110_v41 = vunpack.c.h.bf16 %v612_v29  ;;  %v613_v1 = vld [vmem:[#allocation2 + $0x40] sm:$0xff] }
 0x11f   : > { %9946 = vst [vmem:[#allocation38_spill] sm:$0xff] %v7092_v26  ;;  %9947 = vst [vmem:[#allocation39_spill] sm:$0xff] %v7096_v30  ;;  %v706_v32 = vadd.f32 %v656_v25, %v654_v24  ;;  %v662_v37 = vmul.f32 %v7092_v26, %v7092_v26  ;;  %v664_v42 = vmul.f32 %v7096_v30, %v7096_v30  ;;  %v616_v45 = vld [vmem:[#allocation2 + $0x58] sm:$0xff]  ;;  %v7120_v49 = vunpack.c.l.bf16 %v614_v39 }
 0x120   : > { %s5523_s28 = sshll.u32 %s9941_s18, 7  ;;  %9948 = vst [vmem:[#allocation40_spill] sm:$0xff] %v7100_v34  ;;  %9949 = vst [vmem:[#allocation41_spill] sm:$0xff] %v7102_v35  ;;  %v653_v47 = vmul.f32 %v7100_v34, %v7100_v34  ;;  %v655_v48 = vmul.f32 %v7102_v35, %v7102_v35  ;;  %v666_v50 = vmul.f32 %v7104_v36, %v7104_v36  ;;  %v7124_v53 = vunpack.c.l.bf16 %v609_v44  ;;  %v618_v58 = vld [vmem:[#allocation2 + $0x68] sm:$0xff]  ;;  %v620_v11 = vld [vmem:[#allocation2 + $0x78] sm:$0xff] }
 0x121   : > { %s7074_s9 = sld [smem:[#allocation7 + %s5523_s28]]  ;;  %s603_s24 = sadd.s32 1, %s5523_s28  ;;  %9950 = vst [vmem:[#allocation42_spill] sm:$0xff] %v7104_v36  ;;  %v707_v38 = vadd.f32 %v706_v32, %v658_v27  ;;  %9951 = vst [vmem:[#allocation43_spill] sm:$0xff] %v7108_v40  ;;  %v657_v54 = vmul.f32 %v7108_v40, %v7108_v40  ;;  %v7128_v55 = vunpack.c.h.bf16 %v614_v39  ;;  %v668_v56 = vmul.f32 %v7110_v41, %v7110_v41  ;;  %v615_v27 = vld [vmem:[#allocation2 + $0x50] sm:$0xff] }
 0x122   : > { %s7082_s23 = sld [smem:[#allocation7 + %s603_s24]]  ;;  %9952 = vst [vmem:[#allocation44_spill] sm:$0xff] %v7110_v41  ;;  %9953 = vst [vmem:[#allocation45_spill] sm:$0xff] %v7114_v46  ;;  %v7132_v59 = vunpack.c.h.bf16 %v609_v44  ;;  %v659_v60 = vmul.f32 %v7114_v46, %v7114_v46  ;;  %v685_v61 = vadd.f32 %v655_v48, %v653_v47  ;;  %v7136_v62 = vunpack.c.l.bf16 %v616_v45  ;;  %v617_v47 = vld [vmem:[#allocation2 + $0x60] sm:$0xff] }
 0x123   : > { %v708_v43 = vadd.f32 %v707_v38, %v660_v31  ;;  %9954 = vst [vmem:[#allocation46_spill] sm:$0xff] %v7120_v49  ;;  %9955 = vst [vmem:[#allocation47_spill] sm:$0xff] %v7124_v53  ;;  %v670_v63 = vmul.f32 %v7120_v49, %v7120_v49  ;;  %v7140_v2 = vunpack.c.l.bf16 %v611_v52  ;;  %v661_v3 = vmul.f32 %v7124_v53, %v7124_v53 }
 0x124   : > { %9956 = vst [vmem:[#allocation48_spill] sm:$0xff] %v7128_v55  ;;  %9957 = vst [vmem:[#allocation49_spill] sm:$0xff] %v7132_v59  ;;  %v686_v4 = vadd.f32 %v685_v61, %v657_v54  ;;  %v7144_v5 = vunpack.c.h.bf16 %v616_v45  ;;  %v672_v6 = vmul.f32 %v7128_v55, %v7128_v55  ;;  %v7148_v8 = vunpack.c.h.bf16 %v611_v52 }
 0x125   : > { %v709_v51 = vadd.f32 %v708_v43, %v662_v37  ;;  %9958 = vst [vmem:[#allocation50_spill] sm:$0xff] %v7136_v62  ;;  %9959 = vst [vmem:[#allocation51_spill] sm:$0xff] %v7140_v2  ;;  %v663_v9 = vmul.f32 %v7132_v59, %v7132_v59  ;;  %v7152_v12 = vunpack.c.l.bf16 %v618_v58  ;;  %v674_v13 = vmul.f32 %v7136_v62, %v7136_v62 }
 0x126   : > { %9960 = vst [vmem:[#allocation52_spill] sm:$0xff] %v7144_v5  ;;  %9961 = vst [vmem:[#allocation53_spill] sm:$0xff] %v7148_v8  ;;  %v687_v10 = vadd.f32 %v686_v4, %v659_v60  ;;  %v7156_v15 = vunpack.c.l.bf16 %v613_v1  ;;  %v665_v16 = vmul.f32 %v7140_v2, %v7140_v2  ;;  %v7160_v22 = vunpack.c.h.bf16 %v618_v58 }
 0x127   : > { %v710_v57 = vadd.f32 %v709_v51, %v664_v42  ;;  %9962 = vst [vmem:[#allocation54_spill] sm:$0xff] %v7152_v12  ;;  %v676_v24 = vmul.f32 %v7144_v5, %v7144_v5  ;;  %v7164_v28 = vunpack.c.h.bf16 %v613_v1  ;;  %v667_v29 = vmul.f32 %v7148_v8, %v7148_v8 }
 0x128   : > { %9963 = vst [vmem:[#allocation55_spill] sm:$0xff] %v7156_v15  ;;  %v688_v17 = vadd.f32 %v687_v10, %v661_v3  ;;  %9964 = vst [vmem:[#allocation56_spill] sm:$0xff] %v7160_v22  ;;  %v7168_v32 = vunpack.c.l.bf16 %v620_v11  ;;  %v678_v33 = vmul.f32 %v7152_v12, %v7152_v12  ;;  %v7172_v38 = vunpack.c.l.bf16 %v615_v27 }
 0x129   : > { %v711_v0 = vadd.f32 %v710_v57, %v666_v50  ;;  %9965 = vst [vmem:[#allocation57_spill] sm:$0xff] %v7164_v28  ;;  %v669_v39 = vmul.f32 %v7156_v15, %v7156_v15  ;;  %v7176_v43 = vunpack.c.h.bf16 %v620_v11  ;;  %v680_v44 = vmul.f32 %v7160_v22, %v7160_v22 }
 0x12a   : > { %v689_v31 = vadd.f32 %v688_v17, %v663_v9  ;;  %9966 = vst [vmem:[#allocation58_spill] sm:$0xff] %v7168_v32  ;;  %9967 = vst [vmem:[#allocation59_spill] sm:$0xff] %v7172_v38  ;;  %v7180_v48 = vunpack.c.h.bf16 %v615_v27  ;;  %v671_v50 = vmul.f32 %v7164_v28, %v7164_v28  ;;  %v682_v52 = vmul.f32 %v7168_v32, %v7168_v32 }
 0x12b   : > { %v712_v7 = vadd.f32 %v711_v0, %v668_v56  ;;  %9968 = vst [vmem:[#allocation60_spill] sm:$0xff] %v7176_v43  ;;  %v7186_v56 = vunpack.c.l.bf16 %v617_v47  ;;  %v673_v57 = vmul.f32 %v7172_v38, %v7172_v38  ;;  %v684_v60 = vmul.f32 %v7176_v43, %v7176_v43 }
 0x12c   : > { %v690_v42 = vadd.f32 %v689_v31, %v665_v16  ;;  %9969 = vst [vmem:[#allocation61_spill] sm:$0xff] %v7180_v48  ;;  %v7192_v0 = vunpack.c.h.bf16 %v617_v47  ;;  %v675_v1 = vmul.f32 %v7180_v48, %v7180_v48 }
 0x12d   : > { %v713_v14 = vadd.f32 %v712_v7, %v670_v63  ;;  %9970 = vst [vmem:[#allocation62_spill] sm:$0xff] %v7186_v56  ;;  %v619_v63 = vld [vmem:[#allocation2 + $0x70] sm:$0xff]  ;;  %v677_v7 = vmul.f32 %v7186_v56, %v7186_v56 }
 0x12e   : > { %v691_v51 = vadd.f32 %v690_v42, %v667_v29  ;;  %9971 = vst [vmem:[#allocation63_spill] sm:$0xff] %v7192_v0  ;;  %v7200_v11 = vunpack.c.h.bf16 %v619_v63 }
 0x12f   : > { %v714_v25 = vadd.f32 %v713_v14, %v672_v6  ;;  %v7196_v6 = vunpack.c.l.bf16 %v619_v63 }
 0x130   : > { %v692_v58 = vadd.f32 %v691_v51, %v669_v39  ;;  %9973 = vst [vmem:[#allocation65_spill] sm:$0xff] %v7200_v11  ;;  %v683_v27 = vmul.f32 %v7200_v11, %v7200_v11 }
 0x131   : > { %v715_v37 = vadd.f32 %v714_v25, %v674_v13  ;;  %9972 = vst [vmem:[#allocation64_spill] sm:$0xff] %v7196_v6  ;;  %v679_v13 = vmul.f32 %v7192_v0, %v7192_v0  ;;  %v681_v17 = vmul.f32 %v7196_v6, %v7196_v6 }
 0x132   : > { %v693_v3 = vadd.f32 %v692_v58, %v671_v50 }
 0x133   : > { %v716_v45 = vadd.f32 %v715_v37, %v676_v24 }
 0x134   : > { %v694_v9 = vadd.f32 %v693_v3, %v673_v57 }
 0x135   : > { %v717_v54 = vadd.f32 %v716_v45, %v678_v33 }
 0x136   : > { %v695_v14 = vadd.f32 %v694_v9, %v675_v1 }
 0x137   : > { %v718_v61 = vadd.f32 %v717_v54, %v680_v44 }
 0x138   : > { %v696_v24 = vadd.f32 %v695_v14, %v677_v7 }
 0x139   : > { %v719_v4 = vadd.f32 %v718_v61, %v682_v52 }
 0x13a   : > { %v697_v29 = vadd.f32 %v696_v24, %v679_v13 }
 0x13b   : > { %v720_v10 = vadd.f32 %v719_v4, %v684_v60 }
 0x13c   : > { %v698_v33 = vadd.f32 %v697_v29, %v681_v17 }
 0x13d   : > { %v721_v16 = vrot.slane %v720_v10, 4 }
 0x13e   : > { %v699_v39 = vadd.f32 %v698_v33, %v683_v27 }
 0x13f   : > { %v722_v25 = vadd.f32 %v721_v16, %v720_v10 }
 0x140   : > { %v700_v44 = vrot.slane %v699_v39, 4 }
 0x141   : > { %v723_v31 = vrot.slane %v722_v25, 2 }
 0x142   : > { %v701_v47 = vadd.f32 %v700_v44, %v699_v39 }
 0x143   : > { %v724_v37 = vadd.f32 %v723_v31, %v722_v25 }
 0x144   : > { %v702_v51 = vrot.slane %v701_v47, 2 }
 0x145   : > { %v725_v42 = vrot.slane %v724_v37, 1 }
 0x146   : > { %v703_v54 = vadd.f32 %v702_v51, %v701_v47 }
 0x147   : > { %v726_v45 = vadd.f32 %v725_v42, %v724_v37 }
 0x148   : > { %v704_v57 = vrot.slane %v703_v54, 1 }
 0x149   : > { %v729_v50 = vmul.f32 0.0078125, %v726_v45 }
 0x14a   : > { %v705_v58 = vadd.f32 %v704_v57, %v703_v54 }
 0x14b   : > { %v731_v52 = vadd.f32 1e-06, %v729_v50 }
 0x14c   : > { %v728_v60 = vmul.f32 0.0078125, %v705_v58 }
 0x14d   : > { %6129 = vrsqrt.f32 %v731_v52 }
 0x14e   : > { %v730_v61 = vadd.f32 1e-06, %v728_v60 }
 0x150   : > { %6131 = vrsqrt.f32 %v730_v61 }
 0x157   : > { %v6130_v63 = vpop.eup %6129 }
 0x158   : > { %v735_v1 = vmul.f32 %v6130_v63, %v7076_v18  ;;  %v737_v3 = vmul.f32 %v6130_v63, %v7078_v19  ;;  %v739_v4 = vmul.f32 %v6130_v63, %v7084_v21  ;;  %v741_v7 = vmul.f32 %v6130_v63, %v7086_v23 }
 0x159   : > { %v743_v9 = vmul.f32 %v6130_v63, %v7092_v26  ;;  %v745_v10 = vmul.f32 %v6130_v63, %v7096_v30  ;;  %v747_v13 = vmul.f32 %v6130_v63, %v7104_v36  ;;  %v749_v14 = vmul.f32 %v6130_v63, %v7110_v41 }
 0x15a   : > { %v767_v16 = vpack.c.bf16 %v737_v3, %v735_v1  ;;  %v769_v17 = vpack.c.bf16 %v741_v7, %v739_v4  ;;  %v751_v24 = vmul.f32 %v6130_v63, %v7120_v49  ;;  %v753_v25 = vmul.f32 %v6130_v63, %v7128_v55  ;;  %v6132_v52 = vpop.eup %6131 }
 0x15b   : > { %v771_v27 = vpack.c.bf16 %v745_v10, %v743_v9  ;;  %v773_v29 = vpack.c.bf16 %v749_v14, %v747_v13  ;;  %v755_v31 = vmul.f32 %v6130_v63, %v7136_v62  ;;  %v757_v33 = vmul.f32 %v6130_v63, %v7144_v5 }
 0x15c   : > { %974 = vmatprep.subr.bf16.mxu0 %v767_v16  ;;  %5910 = vmatprep.subr.bf16.mxu1 %v767_v16  ;;  %v775_v37 = vpack.c.bf16 %v753_v25, %v751_v24  ;;  %v759_v39 = vmul.f32 %v6130_v63, %v7152_v12  ;;  %v761_v42 = vmul.f32 %v6130_v63, %v7160_v22 }
 0x15d   : > { %v777_v44 = vpack.c.bf16 %v757_v33, %v755_v31  ;;  %v763_v45 = vmul.f32 %v6130_v63, %v7168_v32  ;;  %v765_v47 = vmul.f32 %v6130_v63, %v7176_v43  ;;  %v734_v54 = vmul.f32 %v6132_v52, %v7100_v34 }
 0x15e   : > { %v779_v50 = vpack.c.bf16 %v761_v42, %v759_v39  ;;  %v736_v57 = vmul.f32 %v6132_v52, %v7102_v35  ;;  %v738_v58 = vmul.f32 %v6132_v52, %v7108_v40  ;;  %v740_v60 = vmul.f32 %v6132_v52, %v7114_v46  ;;  %v6105_v42 = vld [vmem:[%s7051_s19] sm:$0xff]  }
 0x15f   : > { %v781_v51 = vpack.c.bf16 %v765_v47, %v763_v45  ;;  %v742_v3 = vmul.f32 %v6132_v52, %v7124_v53  ;;  %v744_v4 = vmul.f32 %v6132_v52, %v7132_v59  ;;  %v746_v7 = vmul.f32 %v6132_v52, %v7140_v2  ;;  %v6107_v45 = vld [vmem:[%s7051_s19 + $0x8] sm:$0xff]  }
 0x160   : > { %v766_v61 = vpack.c.bf16 %v736_v57, %v734_v54  ;;  %v768_v1 = vpack.c.bf16 %v740_v60, %v738_v58  ;;  %v748_v9 = vmul.f32 %v6132_v52, %v7148_v8  ;;  %v750_v13 = vmul.f32 %v6132_v52, %v7156_v15  ;;  %v6108_v47 = vld [vmem:[%s7051_s19 + $0x68] sm:$0xff]   ;;  %v6112_v54 = vld [vmem:[%s7051_s19 + $0x78] sm:$0xff]   ;;  %v6113_v57 = vld [vmem:[%s7051_s19 + $0x20] sm:$0xff]  }
 0x161   : > { %v770_v63 = vpack.c.bf16 %v744_v4, %v742_v3  ;;  %v752_v14 = vmul.f32 %v6132_v52, %v7164_v28  ;;  %v756_v24 = vmul.f32 %v6132_v52, %v7180_v48  ;;  %v760_v31 = vmul.f32 %v6132_v52, %v7192_v0  ;;  %v6118_v58 = vld [vmem:[%s7051_s19 + $0x80] sm:$0xff]   ;;  %v6114_v60 = vld [vmem:[%s7051_s19 + $0x28] sm:$0xff]   ;;  %v6122_v3 = vld [vmem:[%s7051_s19 + $0x90] sm:$0xff]  }
 0x162   : > { %975 = vmatpush1.bf16.msra.mxu0 %v766_v61  ;;  %5918 = vmatpush1.bf16.msra.mxu1 %v766_v61  ;;  %v772_v10 = vpack.c.bf16 %v748_v9, %v746_v7  ;;  %v762_v33 = vmul.f32 %v6132_v52, %v7196_v6  ;;  %v764_v39 = vmul.f32 %v6132_v52, %v7200_v11  ;;  %v6120_v61 = vld [vmem:[%s7051_s19 + $0x88] sm:$0xff]   ;;  %v6116_v4 = vld [vmem:[%s7051_s19 + $0x38] sm:$0xff]   ;;  %v6117_v7 = vld [vmem:[%s7051_s19 + $0x40] sm:$0xff]  }
 0x163   : > { %976 = vmatprep.subr.bf16.mxu0 %v769_v17  ;;  %5911 = vmatprep.subr.bf16.mxu1 %v769_v17  ;;  %v774_v16 = vpack.c.bf16 %v752_v14, %v750_v13  ;;  %v754_v17 = vmul.f32 %v6132_v52, %v7172_v38  ;;  %v6125_v9 = vld [vmem:[%s7051_s19 + $0xa0] sm:$0xff]   ;;  %v6126_v13 = vld [vmem:[%s7051_s19 + $0xa8] sm:$0xff]   ;;  %v6121_v14 = vld [vmem:[%s7051_s19 + $0x50] sm:$0xff]  }
 0x165   : > { %v776_v25 = vpack.c.bf16 %v756_v24, %v754_v17  ;;  %v6123_v17 = vld [vmem:[%s7051_s19 + $0x58] sm:$0xff]  }
 0x166   : > { %977 = vmatpush1.bf16.msra.mxu0 %v768_v1  ;;  %5919 = vmatpush1.bf16.msra.mxu1 %v768_v1  ;;  %v6115_v1 = vld [vmem:[%s7051_s19 + $0x30] sm:$0xff]   ;;  %v6128_v24 = vld [vmem:[%s7051_s19 + $0xb8] sm:$0xff]  }
 0x167   : > { %978 = vmatprep.subr.bf16.mxu0 %v771_v27  ;;  %5912 = vmatprep.subr.bf16.mxu1 %v771_v27  ;;  %v758_v27 = vmul.f32 %v6132_v52, %v7186_v56  ;;  %v6111_v52 = vld [vmem:[%s7051_s19 + $0x18] sm:$0xff]  }
 0x16a   : > { %979 = vmatpush1.bf16.msra.mxu0 %v770_v63  ;;  %5920 = vmatpush1.bf16.msra.mxu1 %v770_v63  ;;  %v6124_v63 = vld [vmem:[%s7051_s19 + $0x98] sm:$0xff]  }
 0x16b   : > { %980 = vmatprep.subr.bf16.mxu0 %v773_v29  ;;  %5913 = vmatprep.subr.bf16.mxu1 %v773_v29  ;;  %v778_v29 = vpack.c.bf16 %v760_v31, %v758_v27 }
 0x16e   : > { %981 = vmatpush1.bf16.msra.mxu0 %v772_v10  ;;  %5921 = vmatpush1.bf16.msra.mxu1 %v772_v10  ;;  %v6119_v10 = vld [vmem:[%s7051_s19 + $0x48] sm:$0xff]  }
 0x16f   : > { %982 = vmatprep.subr.bf16.mxu0 %v775_v37  ;;  %5914 = vmatprep.subr.bf16.mxu1 %v775_v37  ;;  %v780_v37 = vpack.c.bf16 %v764_v39, %v762_v33 }
 0x172   : > { %983 = vmatpush1.bf16.msra.mxu0 %v774_v16  ;;  %5922 = vmatpush1.bf16.msra.mxu1 %v774_v16  ;;  %v6127_v16 = vld [vmem:[%s7051_s19 + $0xb0] sm:$0xff]  }
 0x173   : > { %984 = vmatprep.subr.bf16.mxu0 %v777_v44  ;;  %5915 = vmatprep.subr.bf16.mxu1 %v777_v44  ;;  %v6106_v44 = vld [vmem:[%s7051_s19 + $0x60] sm:$0xff]  }
 0x176   : > { %985 = vmatpush1.bf16.msra.mxu0 %v776_v25  ;;  %5923 = vmatpush1.bf16.msra.mxu1 %v776_v25 }
 0x177   : > { %986 = vmatprep.subr.bf16.mxu0 %v779_v50  ;;  %5916 = vmatprep.subr.bf16.mxu1 %v779_v50  ;;  %v6109_v50 = vld [vmem:[%s7051_s19 + $0x10] sm:$0xff]  }
 0x17a   : > { %987 = vmatpush1.bf16.msra.mxu0 %v778_v29  ;;  %5924 = vmatpush1.bf16.msra.mxu1 %v778_v29 }
 0x17b   : > { %988 = vmatprep.subr.bf16.mxu0 %v781_v51  ;;  %5917 = vmatprep.subr.bf16.mxu1 %v781_v51  ;;  %v6110_v51 = vld [vmem:[%s7051_s19 + $0x70] sm:$0xff]  }
 0x17e   : > { %989 = vmatpush1.bf16.msra.mxu0 %v780_v37  ;;  %5925 = vmatpush1.bf16.msra.mxu1 %v780_v37 }
 0x181   : > { %1007 = vmatmul.mubr.bf16.vlgmr.msra.gmra.mrb[0].mxu0 %v6105_v42  ;;  %1127 = vmatmul.mubr.bf16.vlgmr.msra.gmra.mrb[0].mxu1 %v6106_v44 }
 0x182   : > { %1016 = vmatprep.mubr.bf16.mxu0 %v9744_v20  ;;  %1136 = vmatprep.mubr.bf16.mxu1 %v9744_v20 }
 0x189   : > { %1017 = vmatmul.mubr.bf16.gmra.mrb[4].mxu0 %v6107_v45  ;;  %1137 = vmatmul.mubr.bf16.gmra.mrb[4].mxu1 %v6108_v47 }
 0x18a   : > { %1026 = vmatprep.mubr.bf16.mxu0 %v9744_v20  ;;  %1146 = vmatprep.mubr.bf16.mxu1 %v9744_v20 }
 0x191   : > { %1027 = vmatmul.mubr.bf16.gmra.mrb[8].mxu0 %v6109_v50  ;;  %1147 = vmatmul.mubr.bf16.gmra.mrb[8].mxu1 %v6110_v51 }
 0x192   : > { %1036 = vmatprep.mubr.bf16.mxu0 %v9744_v20  ;;  %1156 = vmatprep.mubr.bf16.mxu1 %v9744_v20 }
 0x199   : > { %1037 = vmatmul.mubr.bf16.gmra.mrb[12].mxu0 %v6111_v52  ;;  %1157 = vmatmul.mubr.bf16.gmra.mrb[12].mxu1 %v6112_v54 }
 0x19a   : > { %1046 = vmatprep.mubr.bf16.mxu0 %v9744_v20  ;;  %1166 = vmatprep.mubr.bf16.mxu1 %v9744_v20 }
 0x1a1   : > { %1047 = vmatmul.mubr.bf16.gmra.mrb[16].mxu0 %v6113_v57  ;;  %1167 = vmatmul.mubr.bf16.gmra.mrb[16].mxu1 %v6118_v58 }
 0x1a2   : > { %1056 = vmatprep.mubr.bf16.mxu0 %v9744_v20  ;;  %1176 = vmatprep.mubr.bf16.mxu1 %v9744_v20 }
 0x1a9   : > { %1057 = vmatmul.mubr.bf16.gmra.mrb[20].mxu0 %v6114_v60  ;;  %1177 = vmatmul.mubr.bf16.gmra.mrb[20].mxu1 %v6120_v61 }
 0x1aa   : > { %1066 = vmatprep.mubr.bf16.mxu0 %v9744_v20  ;;  %1186 = vmatprep.mubr.bf16.mxu1 %v9744_v20 }
 0x1b1   : > { %1067 = vmatmul.mubr.bf16.gmra.mrb[24].mxu0 %v6115_v1  ;;  %1187 = vmatmul.mubr.bf16.gmra.mrb[24].mxu1 %v6122_v3 }
 0x1b2   : > { %1076 = vmatprep.mubr.bf16.mxu0 %v9744_v20  ;;  %1196 = vmatprep.mubr.bf16.mxu1 %v9744_v20 }
 0x1b9   : > { %1077 = vmatmul.mubr.bf16.gmra.mrb[28].mxu0 %v6116_v4  ;;  %1197 = vmatmul.mubr.bf16.gmra.mrb[28].mxu1 %v6124_v63 }
 0x1ba   : > { %1086 = vmatprep.mubr.bf16.mxu0 %v9744_v20  ;;  %1206 = vmatprep.mubr.bf16.mxu1 %v9744_v20 }
 0x1c1   : > { %1087 = vmatmul.mubr.bf16.gmra.mrb[32].mxu0 %v6117_v7  ;;  %1207 = vmatmul.mubr.bf16.gmra.mrb[32].mxu1 %v6125_v9 }
 0x1c2   : > { %1096 = vmatprep.mubr.bf16.mxu0 %v9744_v20  ;;  %1216 = vmatprep.mubr.bf16.mxu1 %v9744_v20 }
 0x1c9   : > { %1097 = vmatmul.mubr.bf16.gmra.mrb[36].mxu0 %v6119_v10  ;;  %1217 = vmatmul.mubr.bf16.gmra.mrb[36].mxu1 %v6126_v13 }
 0x1ca   : > { %1106 = vmatprep.mubr.bf16.mxu0 %v9744_v20  ;;  %1226 = vmatprep.mubr.bf16.mxu1 %v9744_v20 }
 0x1d1   : > { %1107 = vmatmul.mubr.bf16.gmra.mrb[40].mxu0 %v6121_v14  ;;  %1227 = vmatmul.mubr.bf16.gmra.mrb[40].mxu1 %v6127_v16 }
 0x1d2   : > { %1116 = vmatprep.mubr.bf16.mxu0 %v9744_v20  ;;  %1236 = vmatprep.mubr.bf16.mxu1 %v9744_v20 }
 0x1d9   : > { %1117 = vmatmul.mubr.bf16.gmra.mrb[44].mxu0 %v6123_v17  ;;  %1237 = vmatmul.mubr.bf16.gmra.mrb[44].mxu1 %v6128_v24 }
 0x254   : > { %v7286_v25 = vpop.f32.mrb[0].mxu0  ;;  %v7288_v27 = vpop.f32.mrb[0].mxu1 }
 0x255   : > { %v7290_v31 = vpop.f32.mrb[1].mxu0  ;;  %v1552_v29 = vmul.f32 %v7288_v27, %v7288_v27  ;;  %v7294_v33 = vpop.f32.mrb[1].mxu1  ;;  %v1263_v44 = vmul.f32 %v7286_v25, %v7286_v25 }
 0x256   : > { %v7296_v39 = vpop.f32.mrb[2].mxu0  ;;  %v1553_v37 = vmul.f32 %v7294_v33, %v7294_v33  ;;  %v7300_v42 = vpop.f32.mrb[2].mxu1  ;;  %v1264_v52 = vmul.f32 %v7290_v31, %v7290_v31 }
 0x257   : > { %v1265_v45 = vmul.f32 %v7296_v39, %v7296_v39  ;;  %v7306_v47 = vpop.f32.mrb[3].mxu0  ;;  %v1554_v50 = vmul.f32 %v7300_v42, %v7300_v42  ;;  %v7310_v51 = vpop.f32.mrb[3].mxu1 }
 0x258   : > { %v1266_v54 = vmul.f32 %v7306_v47, %v7306_v47  ;;  %v1555_v57 = vmul.f32 %v7310_v51, %v7310_v51 }
 0x259   : > { %v1295_v58 = vadd.f32 %v1265_v45, %v1263_v44  ;;  %v1594_v60 = vadd.f32 %v1554_v50, %v1552_v29 }
 0x25a   : > { %v1308_v61 = vadd.f32 %v1266_v54, %v1264_v52  ;;  %v1607_v1 = vadd.f32 %v1555_v57, %v1553_v37 }
 0x25c   : > { %v7318_v3 = vpop.f32.mrb[4].mxu0  ;;  %v7320_v4 = vpop.f32.mrb[4].mxu1 }
 0x25d   : > { %v1267_v63 = vmul.f32 %v7318_v3, %v7318_v3  ;;  %v7324_v7 = vpop.f32.mrb[5].mxu0  ;;  %v1556_v9 = vmul.f32 %v7320_v4, %v7320_v4  ;;  %v7328_v10 = vpop.f32.mrb[5].mxu1 }
 0x25e   : > { %v1268_v13 = vmul.f32 %v7324_v7, %v7324_v7  ;;  %v7332_v14 = vpop.f32.mrb[6].mxu0  ;;  %v1557_v16 = vmul.f32 %v7328_v10, %v7328_v10  ;;  %v7336_v17 = vpop.f32.mrb[6].mxu1 }
 0x25f   : > { %v1296_v24 = vadd.f32 %v1295_v58, %v1267_v63  ;;  %v1269_v29 = vmul.f32 %v7332_v14, %v7332_v14  ;;  %v7340_v37 = vpop.f32.mrb[7].mxu0  ;;  %v1595_v44 = vadd.f32 %v1594_v60, %v1556_v9  ;;  %v1558_v45 = vmul.f32 %v7336_v17, %v7336_v17  ;;  %v7344_v50 = vpop.f32.mrb[7].mxu1 }
 0x260   : > { %v1309_v52 = vadd.f32 %v1308_v61, %v1268_v13  ;;  %v1270_v54 = vmul.f32 %v7340_v37, %v7340_v37  ;;  %v1608_v57 = vadd.f32 %v1607_v1, %v1557_v16  ;;  %v1559_v20 = vmul.f32 %v7344_v50, %v7344_v50 }
 0x261   : > { %v1297_v58 = vadd.f32 %v1296_v24, %v1269_v29  ;;  %v1596_v63 = vadd.f32 %v1595_v44, %v1558_v45 }
 0x262   : > { %v1310_v43 = vadd.f32 %v1309_v52, %v1270_v54  ;;  %v1609_v11 = vadd.f32 %v1608_v57, %v1559_v20 }
 0x264   : > { %v7350_v32 = vpop.f32.mrb[8].mxu0  ;;  %v7352_v60 = vpop.f32.mrb[8].mxu1 }
 0x265   : > { %v1271_v9 = vmul.f32 %v7350_v32, %v7350_v32  ;;  %v7356_v6 = vpop.f32.mrb[9].mxu0  ;;  %v1560_v61 = vmul.f32 %v7352_v60, %v7352_v60  ;;  %v7360_v1 = vpop.f32.mrb[9].mxu1 }
 0x266   : > { %v1272_v13 = vmul.f32 %v7356_v6, %v7356_v6  ;;  %v7364_v16 = vpop.f32.mrb[10].mxu0  ;;  %v1561_v20 = vmul.f32 %v7360_v1, %v7360_v1  ;;  %v7368_v24 = vpop.f32.mrb[10].mxu1 }
 0x267   : > { %v1298_v29 = vadd.f32 %v1297_v58, %v1271_v9  ;;  %v1273_v44 = vmul.f32 %v7364_v16, %v7364_v16  ;;  %v7372_v45 = vpop.f32.mrb[11].mxu0  ;;  %v1597_v52 = vadd.f32 %v1596_v63, %v1560_v61  ;;  %v1562_v54 = vmul.f32 %v7368_v24, %v7368_v24  ;;  %v7376_v57 = vpop.f32.mrb[11].mxu1 }
 0x268   : > { %v1311_v22 = vadd.f32 %v1310_v43, %v1272_v13  ;;  %v1274_v0 = vmul.f32 %v7372_v45, %v7372_v45  ;;  %v1610_v12 = vadd.f32 %v1609_v11, %v1561_v20  ;;  %v1563_v56 = vmul.f32 %v7376_v57, %v7376_v57 }
 0x269   : > { %v1299_v58 = vadd.f32 %v1298_v29, %v1273_v44  ;;  %v1598_v9 = vadd.f32 %v1597_v52, %v1562_v54 }
 0x26a   : > { %v1312_v5 = vadd.f32 %v1311_v22, %v1274_v0  ;;  %v1611_v48 = vadd.f32 %v1610_v12, %v1563_v56 }
 0x26c   : > { %v7382_v62 = vpop.f32.mrb[12].mxu0  ;;  %v7384_v63 = vpop.f32.mrb[12].mxu1 }
 0x26d   : > { %v1275_v61 = vmul.f32 %v7382_v62, %v7382_v62  ;;  %v1564_v43 = vmul.f32 %v7384_v63, %v7384_v63  ;;  %v7390_v13 = vpop.f32.mrb[13].mxu0  ;;  %v7392_v11 = vpop.f32.mrb[13].mxu1 }
 0x26e   : > { %v1276_v20 = vmul.f32 %v7390_v13, %v7390_v13  ;;  %v1565_v12 = vmul.f32 %v7392_v11, %v7392_v11  ;;  %v7398_v22 = vpop.f32.mrb[14].mxu0  ;;  %v7400_v56 = vpop.f32.mrb[14].mxu1 }
 0x26f   : > { %v1300_v0 = vadd.f32 %v1299_v58, %v1275_v61  ;;  %v1599_v29 = vadd.f32 %v1598_v9, %v1564_v43  ;;  %v1277_v44 = vmul.f32 %v7398_v22, %v7398_v22  ;;  %v1566_v52 = vmul.f32 %v7400_v56, %v7400_v56  ;;  %v7406_v54 = vpop.f32.mrb[15].mxu0  ;;  %v7408_v38 = vpop.f32.mrb[15].mxu1 }
 0x270   : > { %v1313_v55 = vadd.f32 %v1312_v5, %v1276_v20  ;;  %v1612_v28 = vadd.f32 %v1611_v48, %v1565_v12  ;;  %v1278_v49 = vmul.f32 %v7406_v54, %v7406_v54  ;;  %v1567_v15 = vmul.f32 %v7408_v38, %v7408_v38 }
 0x271   : > { %v1301_v58 = vadd.f32 %v1300_v0, %v1277_v44  ;;  %v1600_v9 = vadd.f32 %v1599_v29, %v1566_v52 }
 0x272   : > { %v1314_v61 = vadd.f32 %v1313_v55, %v1278_v49  ;;  %v1613_v43 = vadd.f32 %v1612_v28, %v1567_v15 }
 0x273   : > { %v1302_v41 = vrot.slane %v1301_v58, 4  ;;  %v1601_v8 = vrot.slane %v1600_v9, 4 }
 0x274   : > { %v1315_v36 = vrot.slane %v1314_v61, 4  ;;  %v1614_v2 = vrot.slane %v1613_v43, 4  ;;  %v7414_v30 = vpop.f32.mrb[16].mxu0  ;;  %v1168_v59 = vpop.f32.mrb[16].mxu1 }
 0x275   : > { %9974 = vst [vmem:[#allocation66_spill] sm:$0xff] %v7414_v30  ;;  %v1303_v26 = vadd.f32 %v1302_v41, %v1301_v58  ;;  %v1602_v5 = vadd.f32 %v1601_v8, %v1600_v9  ;;  %v7416_v48 = vpop.f32.mrb[17].mxu0  ;;  %v1170_v20 = vpop.f32.mrb[17].mxu1  ;;  %v1279_v0 = vmul.f32 %v7414_v30, %v7414_v30 }
 0x276   : > { %9975 = vst [vmem:[#allocation67_spill] sm:$0xff] %v7416_v48  ;;  %v1316_v12 = vadd.f32 %v1315_v36, %v1314_v61  ;;  %v1615_v53 = vadd.f32 %v1614_v2, %v1613_v43  ;;  %v1280_v49 = vmul.f32 %v7416_v48, %v7416_v48  ;;  %v7422_v55 = vpop.f32.mrb[18].mxu0  ;;  %v1172_v15 = vpop.f32.mrb[18].mxu1 }
 0x277   : > { %9976 = vst [vmem:[#allocation68_spill] sm:$0xff] %v7422_v55  ;;  %v1304_v28 = vrot.slane %v1303_v26, 2  ;;  %v1603_v29 = vrot.slane %v1602_v5, 2  ;;  %v1281_v41 = vmul.f32 %v7422_v55, %v7422_v55  ;;  %v7426_v8 = vpop.f32.mrb[19].mxu0  ;;  %v1776_v44 = vpack.c.bf16 %v1172_v15, %v1168_v59  ;;  %v1174_v52 = vpop.f32.mrb[19].mxu1 }
 0x278   : > { %9977 = vst [vmem:[#allocation69_spill] sm:$0xff] %v7426_v8  ;;  %v1317_v36 = vrot.slane %v1316_v12, 2  ;;  %v1616_v2 = vrot.slane %v1615_v53, 2  ;;  %v1282_v58 = vmul.f32 %v7426_v8, %v7426_v8  ;;  %v1777_v9 = vpack.c.bf16 %v1174_v52, %v1170_v20 }
 0x279   : > { %v1305_v61 = vadd.f32 %v1304_v28, %v1303_v26  ;;  %v1604_v43 = vadd.f32 %v1603_v29, %v1602_v5  ;;  %v1321_v23 = vadd.f32 %v1281_v41, %v1279_v0  ;;  %1808 = vst [vmem:[#allocation5] sm:$0xff] %v1776_v44 }
 0x27a   : > { %v1318_v46 = vadd.f32 %v1317_v36, %v1316_v12  ;;  %v1617_v21 = vadd.f32 %v1616_v2, %v1615_v53  ;;  %v1334_v18 = vadd.f32 %v1282_v58, %v1280_v49  ;;  %1835 = vst [vmem:[#allocation5 + $0x40] sm:$0xff] %v1777_v9 }
 0x27b   : > { %v1306_v40 = vrot.slane %v1305_v61, 1  ;;  %v1605_v34 = vrot.slane %v1604_v43, 1 }
 0x27c   : > { %v1319_v19 = vrot.slane %v1318_v46, 1  ;;  %v7430_v35 = vpop.f32.mrb[20].mxu0  ;;  %v1178_v59 = vpop.f32.mrb[20].mxu1  ;;  %v1618_v48 = vrot.slane %v1617_v21, 1 }
 0x27d   : > { %9978 = vst [vmem:[#allocation70_spill] sm:$0xff] %v7430_v35  ;;  %v1307_v15 = vadd.f32 %v1306_v40, %v1305_v61  ;;  %v1283_v8 = vmul.f32 %v7430_v35, %v7430_v35  ;;  %v7434_v20 = vpop.f32.mrb[21].mxu0  ;;  %v1180_v26 = vpop.f32.mrb[21].mxu1  ;;  %v1606_v5 = vadd.f32 %v1605_v34, %v1604_v43 }
 0x27e   : > { %9979 = vst [vmem:[#allocation71_spill] sm:$0xff] %v7434_v20  ;;  %v1284_v53 = vmul.f32 %v7434_v20, %v7434_v20  ;;  %v7438_v12 = vpop.f32.mrb[22].mxu0  ;;  %v1182_v0 = vpop.f32.mrb[22].mxu1  ;;  %v1320_v44 = vadd.f32 %v1319_v19, %v1318_v46  ;;  %v1619_v2 = vadd.f32 %v1618_v48, %v1617_v21 }
 0x27f   : > { %9980 = vst [vmem:[#allocation72_spill] sm:$0xff] %v7438_v12  ;;  %v1348_v49 = vmul.f32 0.015625, %v1307_v15  ;;  %v1322_v28 = vadd.f32 %v1321_v23, %v1283_v8  ;;  %v1285_v29 = vmul.f32 %v7438_v12, %v7438_v12  ;;  %v7442_v40 = vpop.f32.mrb[23].mxu0  ;;  %v1184_v41 = vpop.f32.mrb[23].mxu1  ;;  %v1778_v9 = vpack.c.bf16 %v1182_v0, %v1178_v59 }
 0x280   : > { %9981 = vst [vmem:[#allocation73_spill] sm:$0xff] %v7442_v40  ;;  %v1335_v52 = vadd.f32 %v1334_v18, %v1284_v53  ;;  %v1286_v36 = vmul.f32 %v7442_v40, %v7442_v40  ;;  %v1622_v61 = vmul.f32 0.015625, %v1606_v5  ;;  %v1779_v20 = vpack.c.bf16 %v1184_v41, %v1180_v26 }
 0x281   : > { %v1352_v34 = vadd.f32 1e-06, %v1348_v49  ;;  %v1323_v58 = vadd.f32 %v1322_v28, %v1285_v29  ;;  %1809 = vst [vmem:[#allocation5 + $0x8] sm:$0xff] %v1778_v9  ;;  %v1349_v23 = vmul.f32 0.015625, %v1320_v44  ;;  %v1623_v12 = vmul.f32 0.015625, %v1619_v2  ;;  %v7466_v2 = vld [vmem:[#allocation18] sm:$0xff] }
 0x282   : > { %v1336_v43 = vadd.f32 %v1335_v52, %v1286_v36  ;;  %1836 = vst [vmem:[#allocation5 + $0x48] sm:$0xff] %v1779_v20  ;;  %v1626_v21 = vadd.f32 1e-06, %v1622_v61  ;;  %9987 = vst [vmem:[#allocation79_spill] sm:$0xff] %v7466_v2 }
 0x283   : > { %6133 = vrsqrt.f32 %v1352_v34  ;;  %v1353_v28 = vadd.f32 1e-06, %v1349_v23  ;;  %v1627_v52 = vadd.f32 1e-06, %v1623_v12  ;;  %v7474_v23 = vld [vmem:[#allocation18 + $0x20] sm:$0xff]  ;;  %v7476_v12 = vld [vmem:[#allocation18 + $0x30] sm:$0xff] }
 0x284   : > { %v7446_v8 = vpop.f32.mrb[24].mxu0  ;;  %v1188_v15 = vpop.f32.mrb[24].mxu1  ;;  %6135 = vrsqrt.f32 %v1626_v21  ;;  %9991 = vst [vmem:[#allocation83_spill] sm:$0xff] %v7474_v23  ;;  %9992 = vst [vmem:[#allocation84_spill] sm:$0xff] %v7476_v12 }
 0x285   : > { %9982 = vst [vmem:[#allocation74_spill] sm:$0xff] %v7446_v8  ;;  %v1287_v18 = vmul.f32 %v7446_v8, %v7446_v8  ;;  %v7450_v19 = vpop.f32.mrb[25].mxu0  ;;  %v1190_v46 = vpop.f32.mrb[25].mxu1  ;;  %6137 = vrsqrt.f32 %v1353_v28 }
 0x286   : > { %9983 = vst [vmem:[#allocation75_spill] sm:$0xff] %v7450_v19  ;;  %v1288_v48 = vmul.f32 %v7450_v19, %v7450_v19  ;;  %v7454_v59 = vpop.f32.mrb[26].mxu0  ;;  %v1192_v26 = vpop.f32.mrb[26].mxu1  ;;  %6139 = vrsqrt.f32 %v1627_v52 }
 0x287   : > { %9984 = vst [vmem:[#allocation76_spill] sm:$0xff] %v7454_v59  ;;  %v1324_v5 = vadd.f32 %v1323_v58, %v1287_v18  ;;  %v1289_v53 = vmul.f32 %v7454_v59, %v7454_v59  ;;  %v7458_v20 = vpop.f32.mrb[27].mxu0  ;;  %v1780_v0 = vpack.c.bf16 %v1192_v26, %v1188_v15  ;;  %v1194_v49 = vpop.f32.mrb[27].mxu1  ;;  %v7468_v58 = vld [vmem:[#allocation18 + $0x10] sm:$0xff]  ;;  %v7478_v15 = vld [vmem:[#allocation20] sm:$0xff] }
 0x288   : > { %9985 = vst [vmem:[#allocation77_spill] sm:$0xff] %v7458_v20  ;;  %v1337_v29 = vadd.f32 %v1336_v43, %v1288_v48  ;;  %v1290_v41 = vmul.f32 %v7458_v20, %v7458_v20  ;;  %v1781_v44 = vpack.c.bf16 %v1194_v49, %v1190_v46  ;;  %9988 = vst [vmem:[#allocation80_spill] sm:$0xff] %v7468_v58  ;;  %v7488_v48 = vld [vmem:[#allocation20 + $0x10] sm:$0xff]  ;;  %v7490_v26 = vld [vmem:[#allocation20 + $0x20] sm:$0xff] }
 0x289   : > { %v7462_v36 = vadd.f32 %v1324_v5, %v1289_v53  ;;  %1810 = vst [vmem:[#allocation5 + $0x10] sm:$0xff] %v1780_v0  ;;  %9993 = vst [vmem:[#allocation85_spill] sm:$0xff] %v7478_v15  ;;  %v7492_v5 = vld [vmem:[#allocation20 + $0x30] sm:$0xff] }
 0x28a   : > { %v7464_v34 = vadd.f32 %v1337_v29, %v1290_v41  ;;  %1837 = vst [vmem:[#allocation5 + $0x50] sm:$0xff] %v1781_v44  ;;  %9996 = vst [vmem:[#allocation88_spill] sm:$0xff] %v7488_v48 }
 0x28b   : > { %9997 = vst [vmem:[#allocation89_spill] sm:$0xff] %v7490_v26  ;;  %9998 = vst [vmem:[#allocation90_spill] sm:$0xff] %v7492_v5 }
 0x28c   : > { %9986 = vst [vmem:[#allocation78_spill] sm:$0xff] %v7464_v34  ;;  %v7470_v9 = vpop.f32.mrb[28].mxu0  ;;  %v7472_v61 = vpop.f32.mrb[28].mxu1 }
 0x28d   : > { %9989 = vst [vmem:[#allocation81_spill] sm:$0xff] %v7470_v9  ;;  %9990 = vst [vmem:[#allocation82_spill] sm:$0xff] %v7472_v61  ;;  %v6134_v43 = vpop.eup %6133  ;;  %v7482_v18 = vmul.f32 %v7470_v9, %v7470_v9  ;;  %v7484_v46 = vpop.f32.mrb[29].mxu0 }
 0x28e   : > { %9994 = vst [vmem:[#allocation86_spill] sm:$0xff] %v7484_v46  ;;  %v7486_v21 = vpop.f32.mrb[29].mxu1  ;;  %v1360_v53 = vmul.f32 %v6134_v43, %v7286_v25  ;;  %v1362_v0 = vmul.f32 %v6134_v43, %v7296_v39  ;;  %v1364_v49 = vmul.f32 %v6134_v43, %v7318_v3  ;;  %v1366_v28 = vmul.f32 %v6134_v43, %v7332_v14  ;;  %v7498_v29 = vpop.f32.mrb[30].mxu0 }
 0x28f   : > { %9995 = vst [vmem:[#allocation87_spill] sm:$0xff] %v7486_v21  ;;  %9999 = vst [vmem:[#allocation91_spill] sm:$0xff] %v7498_v29  ;;  %v7500_v41 = vpop.f32.mrb[30].mxu1  ;;  %v1368_v44 = vmul.f32 %v6134_v43, %v7350_v32  ;;  %v1370_v52 = vmul.f32 %v6134_v43, %v7364_v16  ;;  %v1372_v20 = vmul.f32 %v6134_v43, %v7382_v62  ;;  %v7506_v40 = vpop.f32.mrb[31].mxu0 }
 0x290   : > { %10000 = vst [vmem:[#allocation92_spill] sm:$0xff] %v7500_v41  ;;  %v1374_v19 = vmul.f32 %v6134_v43, %v7398_v22  ;;  %10001 = vst [vmem:[#allocation93_spill] sm:$0xff] %v7506_v40  ;;  %v7508_v25 = vpop.f32.mrb[31].mxu1  ;;  %v1392_v39 = vmul.f32 %v1360_v53, %v7466_v2  ;;  %v1394_v3 = vmul.f32 %v1362_v0, %v7468_v58  ;;  %v6136_v41 = vpop.eup %6135 }
 0x291   : > { %10002 = vst [vmem:[#allocation94_spill] sm:$0xff] %v7508_v25  ;;  %v1396_v14 = vmul.f32 %v1364_v49, %v7474_v23  ;;  %v1398_v9 = vmul.f32 %v1366_v28, %v7476_v12  ;;  %v1408_v32 = vmul.f32 %v1368_v44, %v7478_v15  ;;  %v1410_v16 = vmul.f32 %v1370_v52, %v7488_v48 }
 0x292   : > { %v1412_v62 = vmul.f32 %v1372_v20, %v7490_v26  ;;  %v1414_v22 = vmul.f32 %v1374_v19, %v7492_v5  ;;  %v1440_v43 = vmul.f32 %v1368_v44, %v7466_v2  ;;  %v1442_v59 = vmul.f32 %v1370_v52, %v7468_v58 }
 0x293   : > { %v1444_v8 = vmul.f32 %v1372_v20, %v7474_v23  ;;  %v1446_v35 = vmul.f32 %v1374_v19, %v7476_v12  ;;  %v1424_v55 = vadd.f32 %v1408_v32, %v1392_v39  ;;  %v1426_v30 = vadd.f32 %v1410_v16, %v1394_v3 }
 0x294   : > { %v1428_v25 = vadd.f32 %v1412_v62, %v1396_v14  ;;  %v1430_v21 = vadd.f32 %v1414_v22, %v1398_v9  ;;  %v1456_v61 = vmul.f32 %v1360_v53, %v7478_v15  ;;  %v1458_v40 = vmul.f32 %v1362_v0, %v7488_v48  ;;  %v7526_v44 = vpop.f32.mrb[32].mxu0  ;;  %v7528_v52 = vpop.f32.mrb[32].mxu1 }
 0x295   : > { %v1460_v29 = vmul.f32 %v1364_v49, %v7490_v26  ;;  %v1462_v34 = vmul.f32 %v1366_v28, %v7492_v5  ;;  %v1488_v20 = vmul.f32 0.125, %v1424_v55  ;;  %v1490_v46 = vmul.f32 0.125, %v1426_v30  ;;  %v7530_v3 = vpop.f32.mrb[33].mxu0  ;;  %v7532_v9 = vpop.f32.mrb[33].mxu1 }
 0x296   : > { %v1492_v19 = vmul.f32 0.125, %v1428_v25  ;;  %v1494_v39 = vmul.f32 0.125, %v1430_v21  ;;  %10003 = vst [vmem:[#allocation95_spill] sm:$0xff] %v7532_v9  ;;  %v7534_v14 = vpop.eup %6137  ;;  %v1472_v53 = vsub.f32 %v1440_v43, %v1456_v61  ;;  %v1474_v0 = vsub.f32 %v1442_v59, %v1458_v40  ;;  %v7536_v16 = vpop.f32.mrb[34].mxu0 }
 0x297   : > { %v1476_v32 = vsub.f32 %v1444_v8, %v1460_v29  ;;  %v1478_v49 = vsub.f32 %v1446_v35, %v1462_v34  ;;  %v7538_v28 = vpop.f32.mrb[34].mxu1  ;;  %v7540_v62 = vpop.eup %6139  ;;  %v1520_v55 = vpack.c.bf16 %v1490_v46, %v1488_v20  ;;  %v1648_v21 = vmul.f32 %v6136_v41, %v7288_v27 }
 0x298   : > { %v1522_v30 = vpack.c.bf16 %v1494_v39, %v1492_v19  ;;  %v1650_v25 = vmul.f32 %v6136_v41, %v7300_v42  ;;  %v7544_v22 = vpop.f32.mrb[35].mxu0  ;;  %v7546_v9 = vpop.f32.mrb[35].mxu1  ;;  %v1496_v61 = vmul.f32 0.125, %v1472_v53  ;;  %v1498_v40 = vmul.f32 0.125, %v1474_v0 }
 0x299   : > { %10004 = vst [vmem:[#allocation96_spill] sm:$0xff] %v7546_v9  ;;  %v1500_v8 = vmul.f32 0.125, %v1476_v32  ;;  %v1502_v35 = vmul.f32 0.125, %v1478_v49  ;;  %1792 = vst [vmem:[#allocation3] sm:$0xff] %v1520_v55  ;;  %v1652_v59 = vmul.f32 %v6136_v41, %v7320_v4  ;;  %v1654_v34 = vmul.f32 %v6136_v41, %v7336_v17 }
 0x29a   : > { %1793 = vst [vmem:[#allocation3 + $0x8] sm:$0xff] %v1522_v30  ;;  %v1656_v46 = vmul.f32 %v6136_v41, %v7352_v60  ;;  %v1658_v27 = vmul.f32 %v6136_v41, %v7368_v24  ;;  %v1524_v29 = vpack.c.bf16 %v1498_v40, %v1496_v61  ;;  %v1660_v43 = vmul.f32 %v6136_v41, %v7384_v63 }
 0x29b   : > { %v1526_v42 = vpack.c.bf16 %v1502_v35, %v1500_v8  ;;  %v1662_v20 = vmul.f32 %v6136_v41, %v7400_v56  ;;  %v1672_v19 = vmul.f32 %v1648_v21, %v7466_v2  ;;  %v1674_v39 = vmul.f32 %v1650_v25, %v7468_v58 }
 0x29c   : > { %v1676_v53 = vmul.f32 %v1652_v59, %v7474_v23  ;;  %v1678_v4 = vmul.f32 %v1654_v34, %v7476_v12  ;;  %1794 = vst [vmem:[#allocation3 + $0x10] sm:$0xff] %v1524_v29  ;;  %v1688_v17 = vmul.f32 %v1656_v46, %v7478_v15  ;;  %v1690_v60 = vmul.f32 %v1658_v27, %v7488_v48  ;;  %v7562_v0 = vpop.f32.mrb[36].mxu0  ;;  %v7564_v56 = vpop.f32.mrb[36].mxu1 }
 0x29d   : > { %1795 = vst [vmem:[#allocation3 + $0x18] sm:$0xff] %v1526_v42  ;;  %v1692_v24 = vmul.f32 %v1660_v43, %v7490_v26  ;;  %v1694_v63 = vmul.f32 %v1662_v20, %v7492_v5  ;;  %v1720_v41 = vmul.f32 %v1656_v46, %v7466_v2  ;;  %v1722_v32 = vmul.f32 %v1658_v27, %v7468_v58  ;;  %v7570_v30 = vpop.f32.mrb[37].mxu0  ;;  %v7572_v61 = vpop.f32.mrb[37].mxu1 }
 0x29e   : > { %v1724_v49 = vmul.f32 %v1660_v43, %v7474_v23  ;;  %v1726_v55 = vmul.f32 %v1662_v20, %v7476_v12  ;;  %10005 = vst [vmem:[#allocation97_spill] sm:$0xff] %v7572_v61  ;;  %v1704_v40 = vadd.f32 %v1688_v17, %v1672_v19  ;;  %v1706_v8 = vadd.f32 %v1690_v60, %v1674_v39  ;;  %v7574_v42 = vpop.f32.mrb[38].mxu0  ;;  %v7576_v9 = vpop.f32.mrb[38].mxu1 }
 0x29f   : > { %v1708_v35 = vadd.f32 %v1692_v24, %v1676_v53  ;;  %v1710_v29 = vadd.f32 %v1694_v63, %v1678_v4  ;;  %v1736_v46 = vmul.f32 %v1648_v21, %v7478_v15  ;;  %v1738_v27 = vmul.f32 %v1650_v25, %v7488_v48  ;;  %v7582_v12 = vpop.f32.mrb[39].mxu0  ;;  %v7584_v23 = vpop.f32.mrb[39].mxu1  ;;  %v7586_v53 = vld [vmem:[#allocation18 + $0x8] sm:$0xff]  ;;  %v7588_v4 = vld [vmem:[#allocation18 + $0x18] sm:$0xff] }
 0x2a0   : > { %v1740_v43 = vmul.f32 %v1652_v59, %v7490_v26  ;;  %v1742_v20 = vmul.f32 %v1654_v34, %v7492_v5  ;;  %10006 = vst [vmem:[#allocation98_spill] sm:$0xff] %v7584_v23  ;;  %v1768_v19 = vpack.c.bf16 %v1706_v8, %v1704_v40  ;;  %v1361_v17 = vmul.f32 %v7534_v14, %v7290_v31  ;;  %v7594_v24 = vld [vmem:[#allocation18 + $0x28] sm:$0xff]  ;;  %v7596_v63 = vld [vmem:[#allocation18 + $0x38] sm:$0xff] }
 0x2a1   : > { %v1770_v39 = vpack.c.bf16 %v1710_v29, %v1708_v35  ;;  %v1363_v21 = vmul.f32 %v7534_v14, %v7306_v47  ;;  %v1752_v25 = vsub.f32 %v1720_v41, %v1736_v46  ;;  %v1754_v59 = vsub.f32 %v1722_v32, %v1738_v27  ;;  %v7598_v40 = vld [vmem:[#allocation20 + $0x8] sm:$0xff]  ;;  %v7600_v8 = vld [vmem:[#allocation20 + $0x18] sm:$0xff] }
 0x2a2   : > { %v1756_v60 = vsub.f32 %v1724_v49, %v1740_v43  ;;  %v1758_v34 = vsub.f32 %v1726_v55, %v1742_v20  ;;  %1804 = vst [vmem:[#allocation4 + $0x20] sm:$0xff] %v1768_v19  ;;  %v7602_v35 = vld [vmem:[#allocation20 + $0x28] sm:$0xff]  ;;  %v7604_v31 = vld [vmem:[#allocation20 + $0x38] sm:$0xff]  ;;  %v1365_v47 = vmul.f32 %v7534_v14, %v7324_v7  ;;  %v1367_v41 = vmul.f32 %v7534_v14, %v7340_v37 }
 0x2a3   : > { %1805 = vst [vmem:[#allocation4 + $0x28] sm:$0xff] %v1770_v39  ;;  %v1369_v32 = vmul.f32 %v7534_v14, %v7356_v6  ;;  %v1371_v49 = vmul.f32 %v7534_v14, %v7372_v45  ;;  %v1772_v55 = vpack.c.bf16 %v1754_v59, %v1752_v25  ;;  %v1373_v46 = vmul.f32 %v7534_v14, %v7390_v13 }
 0x2a4   : > { %v1774_v29 = vpack.c.bf16 %v1758_v34, %v1756_v60  ;;  %v1375_v27 = vmul.f32 %v7534_v14, %v7406_v54  ;;  %v1393_v43 = vmul.f32 %v1361_v17, %v7586_v53  ;;  %v1395_v7 = vmul.f32 %v1363_v21, %v7588_v4  ;;  %v7622_v6 = vpop.f32.mrb[40].mxu0  ;;  %v7624_v19 = vpop.f32.mrb[40].mxu1 }
 0x2a5   : > { %v1397_v37 = vmul.f32 %v1365_v47, %v7594_v24  ;;  %v1399_v20 = vmul.f32 %v1367_v41, %v7596_v63  ;;  %10007 = vst [vmem:[#allocation99_spill] sm:$0xff] %v7624_v19  ;;  %1806 = vst [vmem:[#allocation4 + $0x30] sm:$0xff] %v1772_v55  ;;  %v1409_v45 = vmul.f32 %v1369_v32, %v7598_v40  ;;  %v7630_v39 = vpop.f32.mrb[41].mxu0  ;;  %v7632_v25 = vpop.f32.mrb[41].mxu1 }
 0x2a6   : > { %1807 = vst [vmem:[#allocation4 + $0x38] sm:$0xff] %v1774_v29  ;;  %v1411_v13 = vmul.f32 %v1371_v49, %v7600_v8  ;;  %v1413_v54 = vmul.f32 %v1373_v46, %v7602_v35  ;;  %v1415_v14 = vmul.f32 %v1375_v27, %v7604_v31  ;;  %10008 = vst [vmem:[#allocation100_spill] sm:$0xff] %v7630_v39  ;;  %v7638_v29 = vpop.f32.mrb[42].mxu0  ;;  %v7640_v5 = vpop.f32.mrb[42].mxu1 }
 0x2a7   : > { %10009 = vst [vmem:[#allocation101_spill] sm:$0xff] %v7632_v25  ;;  %v1441_v59 = vmul.f32 %v1369_v32, %v7586_v53  ;;  %v1443_v60 = vmul.f32 %v1371_v49, %v7588_v4  ;;  %v1445_v34 = vmul.f32 %v1373_v46, %v7594_v24  ;;  %v1447_v55 = vmul.f32 %v1375_v27, %v7596_v63  ;;  %v7642_v2 = vpop.f32.mrb[43].mxu0  ;;  %v7644_v19 = vpop.f32.mrb[43].mxu1 }
 0x2a8   : > { %10010 = vst [vmem:[#allocation102_spill] sm:$0xff] %v7640_v5  ;;  %v1425_v26 = vadd.f32 %v1409_v45, %v1393_v43  ;;  %v1427_v48 = vadd.f32 %v1411_v13, %v1395_v7  ;;  %v1429_v15 = vadd.f32 %v1413_v54, %v1397_v37  ;;  %v1431_v58 = vadd.f32 %v1415_v14, %v1399_v20 }
 0x2a9   : > { %10011 = vst [vmem:[#allocation103_spill] sm:$0xff] %v7642_v2  ;;  %v1457_v32 = vmul.f32 %v1361_v17, %v7598_v40  ;;  %v1459_v49 = vmul.f32 %v1363_v21, %v7600_v8  ;;  %v1461_v46 = vmul.f32 %v1365_v47, %v7602_v35  ;;  %v1463_v27 = vmul.f32 %v1367_v41, %v7604_v31 }
 0x2aa   : > { %v1489_v25 = vmul.f32 0.125, %v1425_v26  ;;  %v1491_v23 = vmul.f32 0.125, %v1427_v48  ;;  %v1493_v61 = vmul.f32 0.125, %v1429_v15  ;;  %v1495_v5 = vmul.f32 0.125, %v1431_v58 }
 0x2ab   : > { %v1473_v43 = vsub.f32 %v1441_v59, %v1457_v32  ;;  %v1475_v7 = vsub.f32 %v1443_v60, %v1459_v49  ;;  %v1477_v37 = vsub.f32 %v1445_v34, %v1461_v46  ;;  %v1479_v20 = vsub.f32 %v1447_v55, %v1463_v27 }
 0x2ac   : > { %v1521_v45 = vpack.c.bf16 %v1491_v23, %v1489_v25  ;;  %v1523_v13 = vpack.c.bf16 %v1495_v5, %v1493_v61  ;;  %v1649_v54 = vmul.f32 %v7540_v62, %v7294_v33  ;;  %v1651_v17 = vmul.f32 %v7540_v62, %v7310_v51  ;;  %v7654_v26 = vpop.f32.mrb[44].mxu0  ;;  %v7656_v15 = vpop.f32.mrb[44].mxu1 }
 0x2ad   : > { %v1497_v21 = vmul.f32 0.125, %v1473_v43  ;;  %v1499_v47 = vmul.f32 0.125, %v1475_v7  ;;  %v1501_v14 = vmul.f32 0.125, %v1477_v37  ;;  %v1503_v41 = vmul.f32 0.125, %v1479_v20  ;;  %v7666_v48 = vpop.f32.mrb[45].mxu0  ;;  %v7668_v5 = vpop.f32.mrb[45].mxu1 }
 0x2ae   : > { %1817 = vst [vmem:[#allocation3 + $0x40] sm:$0xff] %v1521_v45  ;;  %1818 = vst [vmem:[#allocation3 + $0x48] sm:$0xff] %v1523_v13  ;;  %v1653_v58 = vmul.f32 %v7540_v62, %v7328_v10  ;;  %v1655_v23 = vmul.f32 %v7540_v62, %v7344_v50  ;;  %v1657_v33 = vmul.f32 %v7540_v62, %v7360_v1  ;;  %v7674_v60 = vpop.f32.mrb[46].mxu0  ;;  %v7676_v50 = vpop.f32.mrb[46].mxu1 }
 0x2af   : > { %v1659_v51 = vmul.f32 %v7540_v62, %v7376_v57  ;;  %10012 = vst [vmem:[#allocation104_spill] sm:$0xff] %v7666_v48  ;;  %v1525_v61 = vpack.c.bf16 %v1499_v47, %v1497_v21  ;;  %v1527_v25 = vpack.c.bf16 %v1503_v41, %v1501_v14  ;;  %v1661_v59 = vmul.f32 %v7540_v62, %v7392_v11  ;;  %v7682_v32 = vpop.f32.mrb[47].mxu0  ;;  %v7684_v49 = vpop.f32.mrb[47].mxu1 }
 0x2b0   : > { %v1663_v10 = vmul.f32 %v7540_v62, %v7408_v38  ;;  %v1673_v1 = vmul.f32 %v1649_v54, %v7586_v53  ;;  %v1675_v57 = vmul.f32 %v1651_v17, %v7588_v4  ;;  %v1677_v34 = vmul.f32 %v1653_v58, %v7594_v24  ;;  %10013 = vst [vmem:[#allocation105_spill] sm:$0xff] %v7682_v32 }
 0x2b1   : > { %v1679_v55 = vmul.f32 %v1655_v23, %v7596_v63  ;;  %1819 = vst [vmem:[#allocation3 + $0x50] sm:$0xff] %v1525_v61  ;;  %1820 = vst [vmem:[#allocation3 + $0x58] sm:$0xff] %v1527_v25  ;;  %v1689_v38 = vmul.f32 %v1657_v33, %v7598_v40  ;;  %v1691_v11 = vmul.f32 %v1659_v51, %v7600_v8 }
 0x2b2   : > { %v1693_v62 = vmul.f32 %v1661_v59, %v7602_v35  ;;  %v1695_v46 = vmul.f32 %v1663_v10, %v7604_v31  ;;  %v1721_v27 = vmul.f32 %v1657_v33, %v7586_v53  ;;  %v1723_v43 = vmul.f32 %v1659_v51, %v7588_v4 }
 0x2b3   : > { %v1725_v7 = vmul.f32 %v1661_v59, %v7594_v24  ;;  %v1727_v37 = vmul.f32 %v1663_v10, %v7596_v63  ;;  %v1705_v20 = vadd.f32 %v1689_v38, %v1673_v1  ;;  %v1707_v45 = vadd.f32 %v1691_v11, %v1675_v57  ;;  %v10014_v59 = vld [vmem:[#allocation86_spill] sm:$0xff]  ;;  %v10016_v38 = vld [vmem:[#allocation91_spill] sm:$0xff] }
 0x2b4   : > { %v1709_v13 = vadd.f32 %v1693_v62, %v1677_v34  ;;  %v1711_v21 = vadd.f32 %v1695_v46, %v1679_v55  ;;  %v1737_v47 = vmul.f32 %v1649_v54, %v7598_v40  ;;  %v1739_v14 = vmul.f32 %v1651_v17, %v7600_v8  ;;  %v10015_v54 = vld [vmem:[#allocation78_spill] sm:$0xff] }
 0x2b5   : > { %v1741_v41 = vmul.f32 %v1653_v58, %v7602_v35  ;;  %v1743_v61 = vmul.f32 %v1655_v23, %v7604_v31  ;;  %v1769_v25 = vpack.c.bf16 %v1707_v45, %v1705_v20  ;;  %v1326_v51 = vadd.f32 %v7462_v36, %v7482_v18  ;;  %v10017_v23 = vld [vmem:[#allocation93_spill] sm:$0xff] }
 0x2b6   : > { %v1771_v33 = vpack.c.bf16 %v1711_v21, %v1709_v13  ;;  %v1292_v10 = vmul.f32 %v10014_v59, %v10014_v59  ;;  %v1753_v1 = vsub.f32 %v1721_v27, %v1737_v47  ;;  %v1755_v57 = vsub.f32 %v1723_v43, %v1739_v14 }
 0x2b7   : > { %v1757_v34 = vsub.f32 %v1725_v7, %v1741_v41  ;;  %v1759_v55 = vsub.f32 %v1727_v37, %v1743_v61  ;;  %1830 = vst [vmem:[#allocation4 + $0x60] sm:$0xff] %v1769_v25  ;;  %v1293_v58 = vmul.f32 %v10016_v38, %v10016_v38  ;;  %v1294_v11 = vmul.f32 %v10017_v23, %v10017_v23 }
 0x2b8   : > { %1831 = vst [vmem:[#allocation4 + $0x68] sm:$0xff] %v1771_v33  ;;  %v1339_v17 = vadd.f32 %v10015_v54, %v1292_v10  ;;  %v1536_v36 = vmul.f32 %v7526_v44, %v7526_v44  ;;  %v1773_v18 = vpack.c.bf16 %v1755_v57, %v1753_v1  ;;  %v1537_v46 = vmul.f32 %v7530_v3, %v7530_v3 }
 0x2b9   : > { %v1775_v62 = vpack.c.bf16 %v1759_v55, %v1757_v34  ;;  %v1538_v27 = vmul.f32 %v7536_v16, %v7536_v16  ;;  %v1327_v43 = vadd.f32 %v1326_v51, %v1293_v58  ;;  %v1539_v37 = vmul.f32 %v7544_v22, %v7544_v22 }
 0x2ba   : > { %v1340_v7 = vadd.f32 %v1339_v17, %v1294_v11  ;;  %v1540_v20 = vmul.f32 %v7562_v0, %v7562_v0  ;;  %1832 = vst [vmem:[#allocation4 + $0x70] sm:$0xff] %v1773_v18  ;;  %v1541_v13 = vmul.f32 %v7570_v30, %v7570_v30  ;;  %v1542_v21 = vmul.f32 %v7574_v42, %v7574_v42 }
 0x2bb   : > { %1833 = vst [vmem:[#allocation4 + $0x78] sm:$0xff] %v1775_v62  ;;  %v1568_v45 = vadd.f32 %v1538_v27, %v1536_v36  ;;  %v1543_v47 = vmul.f32 %v7582_v12, %v7582_v12  ;;  %v1328_v14 = vrot.slane %v1327_v43, 4  ;;  %v1581_v61 = vadd.f32 %v1539_v37, %v1537_v46  ;;  %v10018_v27 = vld [vmem:[#allocation82_spill] sm:$0xff] }
 0x2bc   : > { %v1341_v41 = vrot.slane %v1340_v7, 4  ;;  %v1544_v25 = vmul.f32 %v7622_v6, %v7622_v6  ;;  %v1545_v51 = vmul.f32 %v7630_v39, %v7630_v39  ;;  %v1546_v10 = vmul.f32 %v7638_v29, %v7638_v29 }
 0x2bd   : > { %v1569_v33 = vadd.f32 %v1568_v45, %v1540_v20  ;;  %v1547_v1 = vmul.f32 %v7642_v2, %v7642_v2  ;;  %v1329_v57 = vadd.f32 %v1328_v14, %v1327_v43  ;;  %v1582_v55 = vadd.f32 %v1581_v61, %v1541_v13  ;;  %v10019_v43 = vld [vmem:[#allocation92_spill] sm:$0xff]  ;;  %v10020_v20 = vld [vmem:[#allocation87_spill] sm:$0xff]  ;;  %v10021_v45 = vld [vmem:[#allocation94_spill] sm:$0xff] }
 0x2be   : > { %v1342_v34 = vadd.f32 %v1341_v41, %v1340_v7  ;;  %v1548_v54 = vmul.f32 %v7654_v26, %v7654_v26  ;;  %v1549_v58 = vmul.f32 %v7666_v48, %v7666_v48  ;;  %v1550_v11 = vmul.f32 %v7674_v60, %v7674_v60  ;;  %v10022_v14 = vld [vmem:[#allocation95_spill] sm:$0xff]  ;;  %v10023_v41 = vld [vmem:[#allocation96_spill] sm:$0xff] }
 0x2bf   : > { %v1570_v17 = vadd.f32 %v1569_v33, %v1542_v21  ;;  %v1551_v36 = vmul.f32 %v7682_v32, %v7682_v32  ;;  %v1330_v18 = vrot.slane %v1329_v57, 2  ;;  %v1583_v46 = vadd.f32 %v1582_v55, %v1543_v47 }
 0x2c0   : > { %v1343_v62 = vrot.slane %v1342_v34, 2  ;;  %v1782_v7 = vpack.c.bf16 %v10019_v43, %v10018_v27  ;;  %v1783_v13 = vpack.c.bf16 %v10021_v45, %v10020_v20  ;;  %v1784_v21 = vpack.c.bf16 %v7538_v28, %v7528_v52  ;;  %v10026_v43 = vld [vmem:[#allocation99_spill] sm:$0xff]  ;;  %v10027_v20 = vld [vmem:[#allocation102_spill] sm:$0xff]  ;;  %v10028_v28 = vld [vmem:[#allocation101_spill] sm:$0xff] }
 0x2c1   : > { %v1571_v37 = vadd.f32 %v1570_v17, %v1544_v25  ;;  %v1785_v61 = vpack.c.bf16 %v10023_v41, %v10022_v14  ;;  %v1331_v33 = vadd.f32 %v1330_v18, %v1329_v57  ;;  %v1584_v2 = vadd.f32 %v1583_v46, %v1545_v51  ;;  %v10024_v25 = vld [vmem:[#allocation97_spill] sm:$0xff]  ;;  %v10025_v17 = vld [vmem:[#allocation98_spill] sm:$0xff] }
 0x2c2   : > { %v1344_v48 = vadd.f32 %v1343_v62, %v1342_v34  ;;  %1811 = vst [vmem:[#allocation5 + $0x18] sm:$0xff] %v1782_v7  ;;  %v1786_v47 = vpack.c.bf16 %v7576_v9, %v7564_v56  ;;  %1838 = vst [vmem:[#allocation5 + $0x58] sm:$0xff] %v1783_v13  ;;  %v1787_v27 = vpack.c.bf16 %v10025_v17, %v10024_v25  ;;  %v10030_v17 = vld [vmem:[#allocation68_spill] sm:$0xff] }
 0x2c3   : > { %v1572_v55 = vadd.f32 %v1571_v37, %v1546_v10  ;;  %1812 = vst [vmem:[#allocation5 + $0x20] sm:$0xff] %v1784_v21  ;;  %1839 = vst [vmem:[#allocation5 + $0x60] sm:$0xff] %v1785_v61  ;;  %v1788_v52 = vpack.c.bf16 %v10027_v20, %v10026_v43  ;;  %v1789_v45 = vpack.c.bf16 %v7644_v19, %v10028_v28  ;;  %v1332_v57 = vrot.slane %v1331_v33, 1  ;;  %v10031_v43 = vld [vmem:[#allocation70_spill] sm:$0xff] }
 0x2c4   : > { %v1345_v34 = vrot.slane %v1344_v48, 1  ;;  %v1585_v51 = vadd.f32 %v1584_v2, %v1547_v1  ;;  %1813 = vst [vmem:[#allocation5 + $0x28] sm:$0xff] %v1786_v47  ;;  %v1790_v9 = vpack.c.bf16 %v7676_v50, %v7656_v15  ;;  %1840 = vst [vmem:[#allocation5 + $0x68] sm:$0xff] %v1787_v27  ;;  %v1791_v10 = vpack.c.bf16 %v7684_v49, %v7668_v5 }
 0x2c5   : > { %v1573_v56 = vadd.f32 %v1572_v55, %v1548_v54  ;;  %1814 = vst [vmem:[#allocation5 + $0x30] sm:$0xff] %v1788_v52  ;;  %1841 = vst [vmem:[#allocation5 + $0x70] sm:$0xff] %v1789_v45  ;;  %v1333_v18 = vadd.f32 %v1332_v57, %v1331_v33  ;;  %v10029_v55 = vld [vmem:[#allocation66_spill] sm:$0xff]  ;;  %v10032_v52 = vld [vmem:[#allocation72_spill] sm:$0xff] }
 0x2c6   : > { %v1586_v62 = vadd.f32 %v1585_v51, %v1549_v58  ;;  %1815 = vst [vmem:[#allocation5 + $0x38] sm:$0xff] %v1790_v9  ;;  %v1346_v46 = vadd.f32 %v1345_v34, %v1344_v48  ;;  %1842 = vst [vmem:[#allocation5 + $0x78] sm:$0xff] %v1791_v10  ;;  %v10033_v45 = vld [vmem:[#allocation74_spill] sm:$0xff]  ;;  %v10034_v34 = vld [vmem:[#allocation76_spill] sm:$0xff] }
 0x2c7   : > { %v1574_v7 = vadd.f32 %v1573_v56, %v1550_v11  ;;  %v1350_v19 = vmul.f32 0.015625, %v1333_v18  ;;  %v10035_v9 = vld [vmem:[#allocation81_spill] sm:$0xff]  ;;  %v10036_v18 = vld [vmem:[#allocation79_spill] sm:$0xff] }
 0x2c8   : > { %v1587_v37 = vadd.f32 %v1586_v62, %v1551_v36  ;;  %v1351_v21 = vmul.f32 0.015625, %v1346_v46  ;;  %v10037_v46 = vld [vmem:[#allocation80_spill] sm:$0xff] }
 0x2c9   : > { %v1575_v2 = vrot.slane %v1574_v7, 4  ;;  %v1354_v1 = vadd.f32 1e-06, %v1350_v19  ;;  %v10038_v19 = vld [vmem:[#allocation83_spill] sm:$0xff] }
 0x2ca   : > { %v1588_v13 = vrot.slane %v1587_v37, 4  ;;  %v1355_v41 = vadd.f32 1e-06, %v1351_v21 }
 0x2cb   : > { %v1576_v15 = vadd.f32 %v1575_v2, %v1574_v7  ;;  %6141 = vrsqrt.f32 %v1354_v1  ;;  %v10039_v2 = vld [vmem:[#allocation84_spill] sm:$0xff] }
 0x2cc   : > { %v1589_v50 = vadd.f32 %v1588_v13, %v1587_v37  ;;  %6143 = vrsqrt.f32 %v1355_v41  ;;  %v10040_v13 = vld [vmem:[#allocation85_spill] sm:$0xff]  ;;  %v10043_v41 = vld [vmem:[#allocation90_spill] sm:$0xff] }
 0x2cd   : > { %v1577_v54 = vrot.slane %v1576_v15, 2 }
 0x2ce   : > { %v1590_v14 = vrot.slane %v1589_v50, 2 }
 0x2cf   : > { %v1578_v61 = vadd.f32 %v1577_v54, %v1576_v15  ;;  %v10041_v15 = vld [vmem:[#allocation88_spill] sm:$0xff]  ;;  %v10042_v54 = vld [vmem:[#allocation89_spill] sm:$0xff] }
 0x2d0   : > { %v1591_v5 = vadd.f32 %v1590_v14, %v1589_v50 }
 0x2d1   : > { %v1579_v49 = vrot.slane %v1578_v61, 1 }
 0x2d2   : > { %v1592_v58 = vrot.slane %v1591_v5, 1 }
 0x2d3   : > { %v1580_v48 = vadd.f32 %v1579_v49, %v1578_v61 }
 0x2d4   : > { %v1593_v11 = vadd.f32 %v1592_v58, %v1591_v5 }
 0x2d5   : > { %v6142_v33 = vpop.eup %6141  ;;  %v7759_v47 = vmul.f32 0.015625, %v1580_v48 }
 0x2d6   : > { %v7761_v36 = vmul.f32 0.015625, %v1593_v11  ;;  %v1376_v25 = vmul.f32 %v6142_v33, %v10029_v55  ;;  %v1378_v27 = vmul.f32 %v6142_v33, %v10030_v17  ;;  %v1380_v20 = vmul.f32 %v6142_v33, %v10031_v43  ;;  %v6144_v17 = vpop.eup %6143 }
 0x2d7   : > { %v1382_v28 = vmul.f32 %v6142_v33, %v10032_v52  ;;  %v1384_v57 = vmul.f32 %v6142_v33, %v10033_v45  ;;  %v1386_v51 = vmul.f32 %v6142_v33, %v10034_v34  ;;  %v1388_v56 = vmul.f32 %v6142_v33, %v10035_v9 }
 0x2d8   : > { %v1390_v10 = vmul.f32 %v6142_v33, %v10016_v38  ;;  %v1400_v62 = vmul.f32 %v1376_v25, %v10036_v18  ;;  %v1402_v7 = vmul.f32 %v1378_v27, %v10037_v46  ;;  %v1404_v37 = vmul.f32 %v1380_v20, %v10038_v19 }
 0x2d9   : > { %v1406_v1 = vmul.f32 %v1382_v28, %v10039_v2  ;;  %v1416_v21 = vmul.f32 %v1384_v57, %v10040_v13  ;;  %v1418_v50 = vmul.f32 %v1386_v51, %v10041_v15  ;;  %v1420_v14 = vmul.f32 %v1388_v56, %v10042_v54 }
 0x2da   : > { %v1422_v61 = vmul.f32 %v1390_v10, %v10043_v41  ;;  %v1448_v5 = vmul.f32 %v1384_v57, %v10036_v18  ;;  %v1450_v38 = vmul.f32 %v1386_v51, %v10037_v46  ;;  %v1452_v49 = vmul.f32 %v1388_v56, %v10038_v19 }
 0x2db   : > { %v1454_v58 = vmul.f32 %v1390_v10, %v10039_v2  ;;  %v1432_v48 = vadd.f32 %v1416_v21, %v1400_v62  ;;  %v1434_v11 = vadd.f32 %v1418_v50, %v1402_v7  ;;  %v1436_v33 = vadd.f32 %v1420_v14, %v1404_v37  ;;  %v10045_v50 = vld [vmem:[#allocation69_spill] sm:$0xff] }
 0x2dc   : > { %v1438_v55 = vadd.f32 %v1422_v61, %v1406_v1  ;;  %v1464_v43 = vmul.f32 %v1376_v25, %v10040_v13  ;;  %v1466_v52 = vmul.f32 %v1378_v27, %v10041_v15  ;;  %v1468_v45 = vmul.f32 %v1380_v20, %v10042_v54  ;;  %v10044_v1 = vld [vmem:[#allocation67_spill] sm:$0xff] }
 0x2dd   : > { %v1470_v34 = vmul.f32 %v1382_v28, %v10043_v41  ;;  %v1504_v57 = vmul.f32 0.125, %v1432_v48  ;;  %v1506_v9 = vmul.f32 0.125, %v1434_v11  ;;  %v1508_v51 = vmul.f32 0.125, %v1436_v33  ;;  %v10046_v28 = vld [vmem:[#allocation71_spill] sm:$0xff]  ;;  %v10047_v11 = vld [vmem:[#allocation73_spill] sm:$0xff] }
 0x2de   : > { %v1510_v32 = vmul.f32 0.125, %v1438_v55  ;;  %v1480_v56 = vsub.f32 %v1448_v5, %v1464_v43  ;;  %v1482_v39 = vsub.f32 %v1450_v38, %v1466_v52  ;;  %v1484_v10 = vsub.f32 %v1452_v49, %v1468_v45  ;;  %v10048_v5 = vld [vmem:[#allocation75_spill] sm:$0xff]  ;;  %v10049_v49 = vld [vmem:[#allocation77_spill] sm:$0xff] }
 0x2df   : > { %v1486_v62 = vsub.f32 %v1454_v58, %v1470_v34  ;;  %v1528_v7 = vpack.c.bf16 %v1506_v9, %v1504_v57  ;;  %v1377_v21 = vmul.f32 %v6144_v17, %v10044_v1  ;;  %v1379_v25 = vmul.f32 %v6144_v17, %v10045_v50 }
 0x2e0   : > { %v1530_v37 = vpack.c.bf16 %v1510_v32, %v1508_v51  ;;  %v1512_v14 = vmul.f32 0.125, %v1480_v56  ;;  %v1514_v27 = vmul.f32 0.125, %v1482_v39  ;;  %v1516_v61 = vmul.f32 0.125, %v1484_v10 }
 0x2e1   : > { %v1518_v20 = vmul.f32 0.125, %v1486_v62  ;;  %1796 = vst [vmem:[#allocation3 + $0x20] sm:$0xff] %v1528_v7  ;;  %v1381_v48 = vmul.f32 %v6144_v17, %v10046_v28  ;;  %v1383_v33 = vmul.f32 %v6144_v17, %v10047_v11  ;;  %v1385_v38 = vmul.f32 %v6144_v17, %v10048_v5 }
 0x2e2   : > { %1797 = vst [vmem:[#allocation3 + $0x28] sm:$0xff] %v1530_v37  ;;  %v1387_v58 = vmul.f32 %v6144_v17, %v10049_v49  ;;  %v1532_v55 = vpack.c.bf16 %v1514_v27, %v1512_v14  ;;  %v1389_v43 = vmul.f32 %v6144_v17, %v10014_v59  ;;  %v1391_v52 = vmul.f32 %v6144_v17, %v10017_v23 }
 0x2e3   : > { %v1534_v32 = vpack.c.bf16 %v1518_v20, %v1516_v61  ;;  %v1401_v39 = vmul.f32 %v1377_v21, %v7586_v53  ;;  %v1403_v45 = vmul.f32 %v1379_v25, %v7588_v4  ;;  %v1405_v34 = vmul.f32 %v1381_v48, %v7594_v24 }
 0x2e4   : > { %v1407_v57 = vmul.f32 %v1383_v33, %v7596_v63  ;;  %1798 = vst [vmem:[#allocation3 + $0x30] sm:$0xff] %v1532_v55  ;;  %v1417_v9 = vmul.f32 %v1385_v38, %v7598_v40  ;;  %v1419_v51 = vmul.f32 %v1387_v58, %v7600_v8  ;;  %v1421_v56 = vmul.f32 %v1389_v43, %v7602_v35 }
 0x2e5   : > { %1799 = vst [vmem:[#allocation3 + $0x38] sm:$0xff] %v1534_v32  ;;  %v1423_v59 = vmul.f32 %v1391_v52, %v7604_v31  ;;  %v1449_v23 = vmul.f32 %v1385_v38, %v7586_v53  ;;  %v1451_v17 = vmul.f32 %v1387_v58, %v7588_v4  ;;  %v1453_v10 = vmul.f32 %v1389_v43, %v7594_v24 }
 0x2e6   : > { %v1455_v62 = vmul.f32 %v1391_v52, %v7596_v63  ;;  %v1433_v7 = vadd.f32 %v1417_v9, %v1401_v39  ;;  %v1435_v37 = vadd.f32 %v1419_v51, %v1403_v45  ;;  %v1437_v1 = vadd.f32 %v1421_v56, %v1405_v34 }
 0x2e7   : > { %v1439_v50 = vadd.f32 %v1423_v59, %v1407_v57  ;;  %v1465_v14 = vmul.f32 %v1377_v21, %v7598_v40  ;;  %v1467_v27 = vmul.f32 %v1379_v25, %v7600_v8  ;;  %v1469_v61 = vmul.f32 %v1381_v48, %v7602_v35 }
 0x2e8   : > { %v1471_v20 = vmul.f32 %v1383_v33, %v7604_v31  ;;  %v1505_v28 = vmul.f32 0.125, %v1433_v7  ;;  %v1507_v11 = vmul.f32 0.125, %v1435_v37  ;;  %v1509_v5 = vmul.f32 0.125, %v1437_v1 }
 0x2e9   : > { %v1511_v38 = vmul.f32 0.125, %v1439_v50  ;;  %v1481_v49 = vsub.f32 %v1449_v23, %v1465_v14  ;;  %v1483_v58 = vsub.f32 %v1451_v17, %v1467_v27  ;;  %v1485_v55 = vsub.f32 %v1453_v10, %v1469_v61 }
 0x2ea   : > { %v1487_v32 = vsub.f32 %v1455_v62, %v1471_v20  ;;  %v1529_v43 = vpack.c.bf16 %v1507_v11, %v1505_v28  ;;  %v1624_v39 = vadd.f32 1e-06, %v7759_v47  ;;  %v1625_v57 = vadd.f32 1e-06, %v7761_v36 }
 0x2eb   : > { %v1531_v52 = vpack.c.bf16 %v1511_v38, %v1509_v5  ;;  %v1513_v45 = vmul.f32 0.125, %v1481_v49  ;;  %v1515_v21 = vmul.f32 0.125, %v1483_v58  ;;  %v1517_v34 = vmul.f32 0.125, %v1485_v55 }
 0x2ec   : > { %v1519_v25 = vmul.f32 0.125, %v1487_v32  ;;  %1821 = vst [vmem:[#allocation3 + $0x60] sm:$0xff] %v1529_v43  ;;  %6145 = vrsqrt.f32 %v1624_v39  ;;  %v10050_v43 = vld [vmem:[#allocation100_spill] sm:$0xff] }
 0x2ed   : > { %1822 = vst [vmem:[#allocation3 + $0x68] sm:$0xff] %v1531_v52  ;;  %v1533_v48 = vpack.c.bf16 %v1515_v21, %v1513_v45  ;;  %6147 = vrsqrt.f32 %v1625_v57  ;;  %v10051_v52 = vld [vmem:[#allocation103_spill] sm:$0xff]  ;;  %v10052_v21 = vld [vmem:[#allocation104_spill] sm:$0xff] }
 0x2ee   : > { %v1535_v33 = vpack.c.bf16 %v1519_v25, %v1517_v34  ;;  %v10053_v34 = vld [vmem:[#allocation105_spill] sm:$0xff] }
 0x2ef   : > { %1823 = vst [vmem:[#allocation3 + $0x70] sm:$0xff] %v1533_v48 }
 0x2f0   : > { %1824 = vst [vmem:[#allocation3 + $0x78] sm:$0xff] %v1535_v33 }
 0x2f6   : > { %v6146_v9 = vpop.eup %6145 }
 0x2f7   : > { %v1632_v51 = vmul.f32 %v6146_v9, %v7526_v44  ;;  %v1634_v56 = vmul.f32 %v6146_v9, %v7536_v16  ;;  %v1636_v47 = vmul.f32 %v6146_v9, %v7562_v0  ;;  %v1638_v59 = vmul.f32 %v6146_v9, %v7574_v42  ;;  %v6148_v37 = vpop.eup %6147 }
 0x2f8   : > { %v1640_v23 = vmul.f32 %v6146_v9, %v7622_v6  ;;  %v1642_v17 = vmul.f32 %v6146_v9, %v7638_v29  ;;  %v1644_v10 = vmul.f32 %v6146_v9, %v7654_v26  ;;  %v1646_v36 = vmul.f32 %v6146_v9, %v7674_v60 }
 0x2f9   : > { %v1664_v62 = vmul.f32 %v1632_v51, %v10036_v18  ;;  %v1666_v7 = vmul.f32 %v1634_v56, %v10037_v46  ;;  %v1668_v44 = vmul.f32 %v1636_v47, %v10038_v19  ;;  %v1670_v16 = vmul.f32 %v1638_v59, %v10039_v2 }
 0x2fa   : > { %v1680_v0 = vmul.f32 %v1640_v23, %v10040_v13  ;;  %v1682_v42 = vmul.f32 %v1642_v17, %v10041_v15  ;;  %v1684_v6 = vmul.f32 %v1644_v10, %v10042_v54  ;;  %v1686_v29 = vmul.f32 %v1646_v36, %v10043_v41 }
 0x2fb   : > { %v1712_v26 = vmul.f32 %v1640_v23, %v10036_v18  ;;  %v1714_v60 = vmul.f32 %v1642_v17, %v10037_v46  ;;  %v1716_v1 = vmul.f32 %v1644_v10, %v10038_v19  ;;  %v1718_v50 = vmul.f32 %v1646_v36, %v10039_v2 }
 0x2fc   : > { %v1696_v14 = vadd.f32 %v1680_v0, %v1664_v62  ;;  %v1698_v27 = vadd.f32 %v1682_v42, %v1666_v7  ;;  %v1700_v61 = vadd.f32 %v1684_v6, %v1668_v44  ;;  %v1702_v20 = vadd.f32 %v1686_v29, %v1670_v16 }
 0x2fd   : > { %v1728_v28 = vmul.f32 %v1632_v51, %v10040_v13  ;;  %v1730_v11 = vmul.f32 %v1634_v56, %v10041_v15  ;;  %v1732_v5 = vmul.f32 %v1636_v47, %v10042_v54  ;;  %v1734_v38 = vmul.f32 %v1638_v59, %v10043_v41 }
 0x2fe   : > { %v1760_v49 = vpack.c.bf16 %v1698_v27, %v1696_v14  ;;  %v1762_v18 = vpack.c.bf16 %v1702_v20, %v1700_v61  ;;  %v1633_v46 = vmul.f32 %v6148_v37, %v7530_v3  ;;  %v1635_v19 = vmul.f32 %v6148_v37, %v7544_v22 }
 0x2ff   : > { %v1744_v58 = vsub.f32 %v1712_v26, %v1728_v28  ;;  %v1746_v2 = vsub.f32 %v1714_v60, %v1730_v11  ;;  %v1748_v55 = vsub.f32 %v1716_v1, %v1732_v5  ;;  %v1750_v32 = vsub.f32 %v1718_v50, %v1734_v38 }
 0x300   : > { %1800 = vst [vmem:[#allocation4] sm:$0xff] %v1760_v49  ;;  %1801 = vst [vmem:[#allocation4 + $0x8] sm:$0xff] %v1762_v18  ;;  %v1637_v13 = vmul.f32 %v6148_v37, %v7570_v30  ;;  %v1639_v15 = vmul.f32 %v6148_v37, %v7582_v12  ;;  %v1641_v54 = vmul.f32 %v6148_v37, %v10050_v43 }
 0x301   : > { %v1643_v41 = vmul.f32 %v6148_v37, %v10051_v52  ;;  %v1764_v39 = vpack.c.bf16 %v1746_v2, %v1744_v58  ;;  %v1766_v45 = vpack.c.bf16 %v1750_v32, %v1748_v55  ;;  %v1645_v3 = vmul.f32 %v6148_v37, %v10052_v21 }
 0x302   : > { %v1647_v22 = vmul.f32 %v6148_v37, %v10053_v34  ;;  %v1665_v25 = vmul.f32 %v1633_v46, %v7586_v53  ;;  %v1667_v48 = vmul.f32 %v1635_v19, %v7588_v4  ;;  %v1669_v33 = vmul.f32 %v1637_v13, %v7594_v24 }
 0x303   : > { %v1671_v30 = vmul.f32 %v1639_v15, %v7596_v63  ;;  %1802 = vst [vmem:[#allocation4 + $0x10] sm:$0xff] %v1764_v39  ;;  %1803 = vst [vmem:[#allocation4 + $0x18] sm:$0xff] %v1766_v45  ;;  %v1681_v12 = vmul.f32 %v1641_v54, %v7598_v40  ;;  %v1683_v57 = vmul.f32 %v1643_v41, %v7600_v8 }
 0x304   : > { %v1685_v9 = vmul.f32 %v1645_v3, %v7602_v35  ;;  %v1687_v51 = vmul.f32 %v1647_v22, %v7604_v31  ;;  %v1713_v56 = vmul.f32 %v1641_v54, %v7586_v53  ;;  %v1715_v47 = vmul.f32 %v1643_v41, %v7588_v4 }
 0x305   : > { %v1717_v59 = vmul.f32 %v1645_v3, %v7594_v24  ;;  %v1719_v23 = vmul.f32 %v1647_v22, %v7596_v63  ;;  %v1697_v17 = vadd.f32 %v1681_v12, %v1665_v25  ;;  %v1699_v10 = vadd.f32 %v1683_v57, %v1667_v48 }
 0x306   : > { %v1701_v36 = vadd.f32 %v1685_v9, %v1669_v33  ;;  %v1703_v62 = vadd.f32 %v1687_v51, %v1671_v30  ;;  %v1729_v7 = vmul.f32 %v1633_v46, %v7598_v40  ;;  %v1731_v44 = vmul.f32 %v1635_v19, %v7600_v8 }
 0x307   : > { %v1733_v16 = vmul.f32 %v1637_v13, %v7602_v35  ;;  %v1735_v0 = vmul.f32 %v1639_v15, %v7604_v31  ;;  %v1761_v42 = vpack.c.bf16 %v1699_v10, %v1697_v17 }
 0x308   : > { %v1763_v53 = vpack.c.bf16 %v1703_v62, %v1701_v36  ;;  %v1745_v6 = vsub.f32 %v1713_v56, %v1729_v7  ;;  %v1747_v4 = vsub.f32 %v1715_v47, %v1731_v44 }
 0x309   : > { %v1749_v29 = vsub.f32 %v1717_v59, %v1733_v16  ;;  %v1751_v24 = vsub.f32 %v1719_v23, %v1735_v0  ;;  %1826 = vst [vmem:[#allocation4 + $0x40] sm:$0xff] %v1761_v42 }
 0x30a   : > { %1827 = vst [vmem:[#allocation4 + $0x48] sm:$0xff] %v1763_v53  ;;  %v1765_v63 = vpack.c.bf16 %v1747_v4, %v1745_v6 }
 0x30b   : > { %v1767_v37 = vpack.c.bf16 %v1751_v24, %v1749_v29 }
 0x30c   : > { %1828 = vst [vmem:[#allocation4 + $0x50] sm:$0xff] %v1765_v63 }
 0x30d   : > { %1829 = vst [vmem:[#allocation4 + $0x58] sm:$0xff] %v1767_v37 }
 0x30e LB: >> { %s7867_s4 = sadd.s32 4294967295, %s6680_s21  ;;  %s5688_s14 = sshll.u32 %s6680_s21, 6  ;;  %vm1939_vm0 = vcmask 523264   ;;  %v2390_v42 = vlaneseq  ;;  %s6680_s21 = sphi %s7861_s21, %s1848_s21  }
 0x30f   : >> { %p1861_p8 = scmp.gt.s32.totalorder %s7867_s4, 0  ;;  %s7877_s16 = scalar_lea.vmem [#allocation3], %s5688_s14 }
 0x310   : >> { %v1852_v40 = vld [vmem:[%s7877_s16] sm:$0xff]  ;;  %v1853_v26 = vld [vmem:[%s7877_s16 + $0x8] sm:$0xff]  ;;  %v1854_v14 = vld [vmem:[%s7877_s16 + $0x10] sm:$0xff]  ;;  %p1863_p1 = scmp.gt.s32.totalorder %s6680_s21, 0  ;;  %s5590_s30 = sshll.u32 %s6680_s21, 7  ;;  %v2458_v53 = vand.u32 127, %v2390_v42 }
 0x311   : >> { %s7872_s26 = scalar_select %p1861_p8, %s7867_s4, 0  ;;  %v1856_v8 = vld [vmem:[%s7877_s16 + $0x20] sm:$0xff]  ;;  %5830 = vmatprep.subr.bf16.mxu0 %v1852_v40  ;;  %v1857_v50 = vld [vmem:[%s7877_s16 + $0x28] sm:$0xff]  ;;  %v1858_v20 = vld [vmem:[%s7877_s16 + $0x30] sm:$0xff]  ;;  %v2460_v6 = vstv %s5590_s30  ;;  %v7930_v4 = vshrl.u32 %v2390_v42, 7  ;;  %v10078_v42 = vmov 0 }
 0x312   : >> { %5870 = vmatprep.subr.bf16.mxu1 %v1856_v8  ;;  %5831 = vmatpush3.bf16.msra.mxu0 %v1852_v40  ;;  %v1855_v28 = vld [vmem:[%s7877_s16 + $0x18] sm:$0xff]  ;;  %s7891_s17 = scalar_select %p1863_p1, %s6680_s21, 0  ;;  %v7935_v63 = vadd.s32 %v2460_v6, %v2458_v53 }
 0x313   : >> { %s5689_s27 = sshll.u32 %s7872_s26, 6  ;;  %5871 = vmatpush3.bf16.msra.mxu1 %v1856_v8  ;;  %5832 = vmatprep.subr.bf16.mxu0 %v1853_v26  ;;  %v1859_v11 = vld [vmem:[%s7877_s16 + $0x38] sm:$0xff]  ;;  %s5589_s13 = sshll.u32 %s7867_s4, 7  ;;  %v2393_v24 = vadd.s32 16, %v7930_v4  ;;  %v2394_v40 = vadd.s32 24, %v7930_v4  ;;  %v2409_v6 = vadd.s32 144, %v7930_v4 }
 0x314   : >> { %s1867_s20 = scalar_lea.vmem [#allocation4], %s5689_s27  ;;  %5872 = vmatprep.subr.bf16.mxu1 %v1857_v50  ;;  %s5690_s6 = sshll.u32 %s7891_s17, 6  ;;  %v7932_v29 = vstv %s5589_s13 }
 0x315   : >> { %v1872_v35 = vld [vmem:[%s1867_s20 + $0x20] sm:$0xff]  ;;  %v1873_v60 = vld [vmem:[%s1867_s20 + $0x28] sm:$0xff]  ;;  %v1874_v27 = vld [vmem:[%s1867_s20 + $0x30] sm:$0xff]  ;;  %s1878_s25 = scalar_lea.vmem [#allocation4], %s5690_s6  ;;  %v2427_v37 = vadd.s32 %v7932_v29, %v2393_v24  ;;  %v2425_v8 = vadd.s32 %v7932_v29, %v7930_v4  ;;  %v10080_v24 = vmov 0  ;;  %s8732_s15 = scalar_lea.vmem [#allocation5], %s5690_s6 }
 0x316   : >> { %v1868_v31 = vld [vmem:[%s1867_s20] sm:$0xff]  ;;  %2149 = vxpose.xlu1.c.b16.start [1/4] (short) %v1872_v35, 128  ;;  %v1869_v1 = vld [vmem:[%s1867_s20 + $0x8] sm:$0xff]  ;;  %v1870_v61 = vld [vmem:[%s1867_s20 + $0x10] sm:$0xff]  ;;  %5833 = vmatpush3.bf16.msra.mxu0 %v1853_v26  ;;  %v2392_v35 = vadd.s32 8, %v7930_v4  ;;  %v2428_v26 = vadd.s32 %v7932_v29, %v2394_v40  ;;  %v2443_v40 = vadd.s32 %v7932_v29, %v2409_v6  ;;  %v2421_v6 = vadd.s32 240, %v7930_v4  ;;  %s9095_s2 = scalar_lea.vmem [#allocation5], %s5689_s27 }
 0x317   : >> { %1907 = vxpose.xlu0.c.b16.start [1/4] (short) %v1868_v31, 128  ;;  %5873 = vmatpush3.bf16.msra.mxu1 %v1857_v50  ;;  %v1875_v5 = vld [vmem:[%s1867_s20 + $0x38] sm:$0xff]  ;;  %v1883_v49 = vld [vmem:[%s1878_s25 + $0x20] sm:$0xff]  ;;  %v1884_v46 = vld [vmem:[%s1878_s25 + $0x28] sm:$0xff]  ;;  %v2560_v31 = vadd.s32 64, %v2427_v37  ;;  %vm2464_vm1 = vcmp.ge.s32.totalorder %v2427_v37, 0  ;;  %vm2496_vm2 = vcmp.le.s32.totalorder %v2427_v37, %v7935_v63  ;;  %vm2462_vm5 = vcmp.ge.s32.totalorder %v2425_v8, 0 }
 0x318   : >> { %5834 = vmatprep.subr.bf16.mxu0 %v1854_v14  ;;  %5874 = vmatprep.subr.bf16.mxu1 %v1858_v20  ;;  %v1871_v38 = vld [vmem:[%s1867_s20 + $0x18] sm:$0xff]  ;;  %v1879_v18 = vld [vmem:[%s1878_s25] sm:$0xff]  ;;  %v1880_v19 = vld [vmem:[%s1878_s25 + $0x8] sm:$0xff]  ;;  %vm2494_vm6 = vcmp.le.s32.totalorder %v2425_v8, %v7935_v63  ;;  %v2561_v50 = vadd.s32 64, %v2428_v26  ;;  %vm2465_vm9 = vcmp.ge.s32.totalorder %v2428_v26, 0  ;;  %vm2497_vm10 = vcmp.le.s32.totalorder %v2428_v26, %v7935_v63  ;;  %s9153_s11 = scalar_lea.vmem [#allocation6], %s5688_s14 }
 0x319   : >> { %v1885_v58 = vld [vmem:[%s1878_s25 + $0x30] sm:$0xff]  ;;  %v1886_v55 = vld [vmem:[%s1878_s25 + $0x38] sm:$0xff]  ;;  %vm2528_vm3 = vmand %vm2464_vm1, %vm2496_vm2  ;;  %vm2592_vm4 = vcmp.lt.s32.totalorder %v7935_v63, %v2560_v31  ;;  %v2407_v37 = vadd.s32 128, %v7930_v4  ;;  %v2408_v26 = vadd.s32 136, %v7930_v4  ;;  %s1848_s21 = sadd.s32 1, %s6680_s21  }
 0x31a   : >> { %2150 = vxpose.xlu1.c.b16.cont [2/4] (short) %v1873_v60, 128  ;;  %5835 = vmatpush3.bf16.msra.mxu0 %v1854_v14  ;;  %v1881_v2 = vld [vmem:[%s1878_s25 + $0x10] sm:$0xff]  ;;  %v1882_v32 = vld [vmem:[%s1878_s25 + $0x18] sm:$0xff]  ;;  %v2558_v60 = vadd.s32 64, %v2425_v8  ;;  %vm7947_vm7 = vmand %vm2528_vm3, %vm2592_vm4  ;;  %vm2593_vm12 = vcmp.lt.s32.totalorder %v7935_v63, %v2561_v50  ;;  %v2410_v8 = vadd.s32 152, %v7930_v4  ;;  %v10084_v50 = vmov 0  ;;  %p1845_p4 = scmp.ge.s32.totalorder %s1848_s21, 2  }
 0x31b   : >> { %1908 = vxpose.xlu0.c.b16.cont [2/4] (short) %v1869_v1, 128  ;;  %5875 = vmatpush3.bf16.msra.mxu1 %v1858_v20  ;;  %v2426_v1 = vadd.s32 %v7932_v29, %v2392_v35  ;;  %vm2526_vm11 = vmand %vm2462_vm5, %vm2494_vm6  ;;  %v10056_v20 = vmov 0  ;;  %v10082_v35 = vmov 0  ;;  %v2441_v31 = vadd.s32 %v7932_v29, %v2407_v37  ;;  %s10303_s19 = sld [smem:[#allocation30_spill]] (%p1845_p4) }
 0x31c   : >> { %5836 = vmatprep.subr.bf16.mxu0 %v1855_v28  ;;  %5876 = vmatprep.subr.bf16.mxu1 %v1859_v11  ;;  %vm2590_vm8 = vcmp.lt.s32.totalorder %v7935_v63, %v2558_v60  ;;  %vm2529_vm1 = vmand %vm2465_vm9, %vm2497_vm10  ;;  %v2576_v60 = vadd.s32 64, %v2443_v40  ;;  %v10104_v37 = vmov 0 }
 0x31d   : >> { %vm2495_vm13 = vcmp.le.s32.totalorder %v2426_v1, %v7935_v63  ;;  %vm7956_vm14 = vmand %vm2526_vm11, %vm2590_vm8  ;;  %vm2463_vm15 = vcmp.ge.s32.totalorder %v2426_v1, 0 }
 0x31e   : >> { %2151 = vxpose.xlu1.c.b16.cont [3/4] (short) %v1874_v27, 128  ;;  %5837 = vmatpush3.bf16.msra.mxu0 %v1855_v28  ;;  %v2559_v27 = vadd.s32 64, %v2426_v1  ;;  %v10057_v20 = vsel %vm7956_vm14, 4294967295, %v10056_v20  ;;  %v2395_v28 = vadd.s32 32, %v7930_v4  ;;  %vm7964_vm2 = vmand %vm2529_vm1, %vm2593_vm12  ;;  %v2444_v1 = vadd.s32 %v7932_v29, %v2410_v8 }
 0x31f   : >> { %1909 = vxpose.xlu0.c.b16.cont [3/4] (short) %v1870_v61, 128  ;;  %5877 = vmatpush3.bf16.msra.mxu1 %v1859_v11  ;;  %v2397_v61 = vadd.s32 48, %v7930_v4  ;;  %vm2527_vm3 = vmand %vm2463_vm15, %vm2495_vm13  ;;  %v2455_v8 = vadd.s32 %v7932_v29, %v2421_v6 }
 0x321   : >> { %v2431_v11 = vadd.s32 %v7932_v29, %v2397_v61  ;;  %v2442_v61 = vadd.s32 %v7932_v29, %v2408_v26  ;;  %v10106_v26 = vmov 0  ;;  %p5664_p6 = scmp.ne.s32.totalorder (%p1845_p4), %s10303_s19, 2 }
 0x322   : >> { %2152 = vxpose.xlu1.c.b16.end [4/4] (short) %v1875_v5, 128  ;;  %v2398_v5 = vadd.s32 56, %v7930_v4 }
 0x323   : >> { %1910 = vxpose.xlu0.c.b16.end [4/4] (short) %v1871_v38, 128  ;;  %v10058_v38 = vmov 0  ;;  %vm2468_vm5 = vcmp.ge.s32.totalorder %v2431_v11, 0  ;;  %vm2500_vm6 = vcmp.le.s32.totalorder %v2431_v11, %v7935_v63 }
 0x324   : >> { %v10059_v38 = vsel %vm7964_vm2, 4294967295, %v10058_v38  ;;  %vm2532_vm8 = vmand %vm2468_vm5, %vm2500_vm6 }
 0x333   : >> { %2165 = vxpose.xlu1.c.b16.start [1/4] (short) %v1883_v49, 128  ;;  %v2429_v49 = vadd.s32 %v7932_v29, %v2395_v28  ;;  %v2577_v28 = vadd.s32 64, %v2444_v1 }
 0x334   : >> { %1923 = vxpose.xlu0.c.b16.start [1/4] (short) %v1879_v18, 128  ;;  %v2396_v18 = vadd.s32 40, %v7930_v4 }
 0x335   : >> { %vm2466_vm10 = vcmp.ge.s32.totalorder %v2429_v49, 0  ;;  %vm2498_vm11 = vcmp.le.s32.totalorder %v2429_v49, %v7935_v63 }
 0x336   : >> { %vm2530_vm1 = vmand %vm2466_vm10, %vm2498_vm11 }
 0x337   : >> { %2166 = vxpose.xlu1.c.b16.cont [2/4] (short) %v1884_v46, 128  ;;  %v2564_v46 = vadd.s32 64, %v2431_v11  ;;  %v10086_v11 = vmov 0 }
 0x338   : >> { %1924 = vxpose.xlu0.c.b16.cont [2/4] (short) %v1880_v19, 128  ;;  %v2432_v19 = vadd.s32 %v7932_v29, %v2398_v5  ;;  %v2575_v5 = vadd.s32 64, %v2442_v61 }
 0x339   : >> { %vm2596_vm9 = vcmp.lt.s32.totalorder %v7935_v63, %v2564_v46  ;;  %v2411_v46 = vadd.s32 160, %v7930_v4 }
 0x33a   : >> { %vm7979_vm12 = vmand %vm2532_vm8, %vm2596_vm9  ;;  %vm2469_vm15 = vcmp.ge.s32.totalorder %v2432_v19, 0 }
 0x33b   : >> { %2167 = vxpose.xlu1.c.b16.cont [3/4] (short) %v1885_v58, 128  ;;  %v10060_v58 = vmov 0 }
 0x33c   : >> { %1925 = vxpose.xlu0.c.b16.cont [3/4] (short) %v1881_v2, 128  ;;  %v2562_v2 = vadd.s32 64, %v2429_v49  ;;  %v2413_v49 = vadd.s32 176, %v7930_v4 }
 0x33e   : >> { %vm2594_vm13 = vcmp.lt.s32.totalorder %v7935_v63, %v2562_v2  ;;  %v2414_v2 = vadd.s32 184, %v7930_v4 }
 0x33f   : >> { %2168 = vxpose.xlu1.c.b16.end [4/4] (short) %v1886_v55, 128  ;;  %v2430_v55 = vadd.s32 %v7932_v29, %v2396_v18  ;;  %vm7988_vm6 = vmand %vm2530_vm1, %vm2594_vm13  ;;  %v10088_v18 = vmov 0 }
 0x340   : >> { %1926 = vxpose.xlu0.c.b16.end [4/4] (short) %v1882_v32, 128  ;;  %v2565_v32 = vadd.s32 64, %v2432_v19 }
 0x341   : >> { %vm2499_vm5 = vcmp.le.s32.totalorder %v2430_v55, %v7935_v63  ;;  %vm2467_vm8 = vcmp.ge.s32.totalorder %v2430_v55, 0 }
 0x342   : >> { %vm2531_vm11 = vmand %vm2467_vm8, %vm2499_vm5 }
 0x37c   : >> { %v2157_v13 = vpop.trf.xlu1 }
 0x37d   : >> { %v1915_v15 = vpop.trf.xlu0  ;;  %5878 = vmatprep.mubr.msk.bf16.mxu1 %vm1939_vm0, %v2157_v13  ;;  %v10062_v13 = vmov 0 }
 0x37e   : >> { %5838 = vmatprep.mubr.msk.bf16.mxu0 %vm1939_vm0, %v1915_v15  ;;  %v10063_v13 = vsel %vm7979_vm12, 4294967295, %v10062_v13  ;;  %v2563_v15 = vadd.s32 64, %v2430_v55  ;;  %v10090_v55 = vmov 0 }
 0x380   : >> { %v2158_v43 = vpop.trf.xlu1  ;;  %vm2595_vm9 = vcmp.lt.s32.totalorder %v7935_v63, %v2563_v15  ;;  %v2412_v15 = vadd.s32 168, %v7930_v4 }
 0x381   : >> { %v1916_v54 = vpop.trf.xlu0  ;;  %5879 = vmatmul.mubr.msk.bf16.vlgmr.msra.gmra.mrb[0].mxu1 %vm1939_vm0, %v2158_v43  ;;  %v2401_v43 = vadd.s32 80, %v7930_v4  ;;  %vm8003_vm13 = vmand %vm2531_vm11, %vm2595_vm9 }
 0x382   : >> { %5839 = vmatmul.mubr.msk.bf16.vlgmr.msra.gmra.mrb[0].mxu0 %vm1939_vm0, %v1916_v54  ;;  %v10064_v54 = vmov 0 }
 0x383   : >> { %v10065_v54 = vsel %vm7988_vm6, 4294967295, %v10064_v54 }
 0x384   : >> { %v2159_v52 = vpop.trf.xlu1 }
 0x385   : >> { %v1917_v41 = vpop.trf.xlu0  ;;  %5882 = vmatprep.mubr.msk.bf16.mxu1 %vm1939_vm0, %v2159_v52  ;;  %v2399_v52 = vadd.s32 64, %v7930_v4 }
 0x386   : >> { %5842 = vmatprep.mubr.msk.bf16.mxu0 %vm1939_vm0, %v1917_v41  ;;  %v2435_v41 = vadd.s32 %v7932_v29, %v2401_v43 }
 0x388   : >> { %v2160_v39 = vpop.trf.xlu1 }
 0x389   : >> { %v1918_v45 = vpop.trf.xlu0  ;;  %5883 = vmatmul.mubr.msk.bf16.gmra.mrb[4].mxu1 %vm1939_vm0, %v2160_v39  ;;  %v2402_v39 = vadd.s32 88, %v7930_v4 }
 0x38a   : >> { %5843 = vmatmul.mubr.msk.bf16.gmra.mrb[4].mxu0 %vm1939_vm0, %v1918_v45  ;;  %v10066_v45 = vmov 0 }
 0x38c   : >> { %v2161_v21 = vpop.trf.xlu1 }
 0x38d   : >> { %v1919_v3 = vpop.trf.xlu0  ;;  %5886 = vmatprep.mubr.msk.bf16.mxu1 %vm1939_vm0, %v2161_v21  ;;  %v2433_v21 = vadd.s32 %v7932_v29, %v2399_v52  ;;  %v2448_v52 = vadd.s32 %v7932_v29, %v2414_v2 }
 0x38e   : >> { %5846 = vmatprep.mubr.msk.bf16.mxu0 %vm1939_vm0, %v1919_v3  ;;  %v2400_v3 = vadd.s32 72, %v7930_v4 }
 0x390   : >> { %v2162_v34 = vpop.trf.xlu1 }
 0x391   : >> { %v1920_v22 = vpop.trf.xlu0  ;;  %5887 = vmatmul.mubr.msk.bf16.gmra.mrb[8].mxu1 %vm1939_vm0, %v2162_v34  ;;  %v2568_v34 = vadd.s32 64, %v2435_v41 }
 0x392   : >> { %5847 = vmatmul.mubr.msk.bf16.gmra.mrb[8].mxu0 %vm1939_vm0, %v1920_v22  ;;  %v2436_v22 = vadd.s32 %v7932_v29, %v2402_v39 }
 0x393   : >> { %vm2600_vm1 = vcmp.lt.s32.totalorder %v7935_v63, %v2568_v34  ;;  %v10094_v34 = vmov 0 }
 0x394   : >> { %v2163_v25 = vpop.trf.xlu1  ;;  %vm2473_vm9 = vcmp.ge.s32.totalorder %v2436_v22, 0  ;;  %vm2505_vm11 = vcmp.le.s32.totalorder %v2436_v22, %v7935_v63 }
 0x395   : >> { %v1921_v48 = vpop.trf.xlu0  ;;  %5890 = vmatprep.mubr.msk.bf16.mxu1 %vm1939_vm0, %v2163_v25  ;;  %v10068_v25 = vmov 0 }
 0x396   : >> { %5850 = vmatprep.mubr.msk.bf16.mxu0 %vm1939_vm0, %v1921_v48  ;;  %v10069_v25 = vsel %vm8003_vm13, 4294967295, %v10068_v25  ;;  %v2566_v48 = vadd.s32 64, %v2433_v21 }
 0x398   : >> { %v2164_v33 = vpop.trf.xlu1  ;;  %vm2598_vm8 = vcmp.lt.s32.totalorder %v7935_v63, %v2566_v48  ;;  %v2417_v48 = vadd.s32 208, %v7930_v4 }
 0x399   : >> { %v1922_v30 = vpop.trf.xlu0  ;;  %5891 = vmatmul.mubr.msk.bf16.gmra.mrb[12].mxu1 %vm1939_vm0, %v2164_v33  ;;  %v2434_v33 = vadd.s32 %v7932_v29, %v2400_v3  ;;  %v2581_v3 = vadd.s32 64, %v2448_v52 }
 0x39a   : >> { %5851 = vmatmul.mubr.msk.bf16.gmra.mrb[12].mxu0 %vm1939_vm0, %v1922_v30  ;;  %v2569_v30 = vadd.s32 64, %v2436_v22 }
 0x39c   : >> { %v2173_v12 = vpop.trf.xlu1  ;;  %vm2601_vm6 = vcmp.lt.s32.totalorder %v7935_v63, %v2569_v30  ;;  %v2415_v30 = vadd.s32 192, %v7930_v4 }
 0x39d   : >> { %v1931_v57 = vpop.trf.xlu0  ;;  %5894 = vmatprep.mubr.msk.bf16.mxu1 %vm1939_vm0, %v2173_v12  ;;  %v10070_v12 = vmov 0 }
 0x39e   : >> { %5854 = vmatprep.mubr.msk.bf16.mxu0 %vm1939_vm0, %v1931_v57  ;;  %v2567_v57 = vadd.s32 64, %v2434_v33 }
 0x3a0   : >> { %v2174_v9 = vpop.trf.xlu1 }
 0x3a1   : >> { %v1932_v51 = vpop.trf.xlu0  ;;  %5895 = vmatmul.mubr.msk.bf16.gmra.mrb[16].mxu1 %vm1939_vm0, %v2174_v9  ;;  %v2405_v9 = vadd.s32 112, %v7930_v4 }
 0x3a2   : >> { %5855 = vmatmul.mubr.msk.bf16.gmra.mrb[16].mxu0 %vm1939_vm0, %v1932_v51  ;;  %v10072_v51 = vmov 0 }
 0x3a4   : >> { %v2175_v56 = vpop.trf.xlu1 }
 0x3a5   : >> { %v1933_v47 = vpop.trf.xlu0  ;;  %5898 = vmatprep.mubr.msk.bf16.mxu1 %vm1939_vm0, %v2175_v56  ;;  %v2403_v56 = vadd.s32 96, %v7930_v4 }
 0x3a6   : >> { %5858 = vmatprep.mubr.msk.bf16.mxu0 %vm1939_vm0, %v1933_v47  ;;  %v2439_v47 = vadd.s32 %v7932_v29, %v2405_v9  ;;  %v2418_v9 = vadd.s32 216, %v7930_v4 }
 0x3a8   : >> { %v2176_v59 = vpop.trf.xlu1 }
 0x3a9   : >> { %v1934_v23 = vpop.trf.xlu0  ;;  %5899 = vmatmul.mubr.msk.bf16.gmra.mrb[20].mxu1 %vm1939_vm0, %v2176_v59  ;;  %v2406_v59 = vadd.s32 120, %v7930_v4 }
 0x3aa   : >> { %5859 = vmatmul.mubr.msk.bf16.gmra.mrb[20].mxu0 %vm1939_vm0, %v1934_v23  ;;  %v10074_v23 = vmov 0 }
 0x3ac   : >> { %v2177_v17 = vpop.trf.xlu1 }
 0x3ad   : >> { %v1935_v10 = vpop.trf.xlu0  ;;  %5902 = vmatprep.mubr.msk.bf16.mxu1 %vm1939_vm0, %v2177_v17  ;;  %v2437_v17 = vadd.s32 %v7932_v29, %v2403_v56  ;;  %v10098_v56 = vmov 0 }
 0x3ae   : >> { %5862 = vmatprep.mubr.msk.bf16.mxu0 %vm1939_vm0, %v1935_v10  ;;  %v2404_v10 = vadd.s32 104, %v7930_v4 }
 0x3b0   : >> { %v2178_v36 = vpop.trf.xlu1 }
 0x3b1   : >> { %v1936_v62 = vpop.trf.xlu0  ;;  %5903 = vmatmul.mubr.msk.bf16.gmra.mrb[24].mxu1 %vm1939_vm0, %v2178_v36  ;;  %v2572_v36 = vadd.s32 64, %v2439_v47 }
 0x3b2   : >> { %5863 = vmatmul.mubr.msk.bf16.gmra.mrb[24].mxu0 %vm1939_vm0, %v1936_v62  ;;  %v2440_v62 = vadd.s32 %v7932_v29, %v2406_v59  ;;  %v2416_v59 = vadd.s32 200, %v7930_v4 }
 0x3b4   : >> { %v2179_v7 = vpop.trf.xlu1 }
 0x3b5   : >> { %v1937_v44 = vpop.trf.xlu0  ;;  %5906 = vmatprep.mubr.msk.bf16.mxu1 %vm1939_vm0, %v2179_v7  ;;  %v10076_v7 = vmov 0 }
 0x3b6   : >> { %5866 = vmatprep.mubr.msk.bf16.mxu0 %vm1939_vm0, %v1937_v44  ;;  %v2570_v44 = vadd.s32 64, %v2437_v17 }
 0x3b8   : >> { %v2180_v16 = vpop.trf.xlu1 }
 0x3b9   : >> { %v1938_v0 = vpop.trf.xlu0  ;;  %5907 = vmatmul.mubr.msk.bf16.gmra.mrb[28].mxu1 %vm1939_vm0, %v2180_v16  ;;  %v2438_v16 = vadd.s32 %v7932_v29, %v2404_v10  ;;  %v2452_v10 = vadd.s32 %v7932_v29, %v2418_v9 }
 0x3ba   : >> { %5867 = vmatmul.mubr.msk.bf16.gmra.mrb[28].mxu0 %vm1939_vm0, %v1938_v0  ;;  %vm2591_vm0 = vcmp.lt.s32.totalorder %v7935_v63, %v2559_v27  ;;  %v2573_v0 = vadd.s32 64, %v2440_v62  ;;  %v2574_v27 = vadd.s32 64, %v2441_v31 }
 0x3bb   : >> { %vm7971_vm4 = vmand %vm2527_vm3, %vm2591_vm0  ;;  %vm2501_vm0 = vcmp.le.s32.totalorder %v2432_v19, %v7935_v63  ;;  %vm2597_vm3 = vcmp.lt.s32.totalorder %v7935_v63, %v2565_v32  ;;  %v2571_v53 = vadd.s32 64, %v2438_v16  ;;  %v2447_v19 = vadd.s32 %v7932_v29, %v2413_v49 }
 0x3bc   : >> { %v10061_v58 = vsel %vm7971_vm4, 4294967295, %v10060_v58  ;;  %vm2533_vm12 = vmand %vm2469_vm15, %vm2501_vm0  ;;  %vm2472_vm15 = vcmp.ge.s32.totalorder %v2435_v41, 0  ;;  %vm2504_vm0 = vcmp.le.s32.totalorder %v2435_v41, %v7935_v63  ;;  %v2445_v32 = vadd.s32 %v7932_v29, %v2411_v46 }
 0x3bd   : >> { %vm7996_vm10 = vmand %vm2533_vm12, %vm2597_vm3  ;;  %vm2470_vm3 = vcmp.ge.s32.totalorder %v2433_v21, 0  ;;  %v2580_v43 = vadd.s32 64, %v2447_v19  ;;  %v10092_v41 = vmov 0  ;;  %v10110_v46 = vmov 0 }
 0x3be   : >> { %v10067_v45 = vsel %vm7996_vm10, 4294967295, %v10066_v45  ;;  %vm2536_vm12 = vmand %vm2472_vm15, %vm2504_vm0  ;;  %vm2502_vm10 = vcmp.le.s32.totalorder %v2433_v21, %v7935_v63  ;;  %vm2503_vm15 = vcmp.le.s32.totalorder %v2434_v33, %v7935_v63  ;;  %v2578_v39 = vadd.s32 64, %v2445_v32 }
 0x3bf   : >> { %vm8011_vm5 = vmand %vm2536_vm12, %vm2600_vm1  ;;  %vm2471_vm12 = vcmp.ge.s32.totalorder %v2434_v33, 0  ;;  %vm2599_vm1 = vcmp.lt.s32.totalorder %v7935_v63, %v2567_v57  ;;  %v2446_v21 = vadd.s32 %v7932_v29, %v2412_v15  ;;  %v10096_v33 = vmov 0 }
 0x3c0   : >> { %v10071_v12 = vsel %vm8011_vm5, 4294967295, %v10070_v12  ;;  %vm2534_vm13 = vmand %vm2470_vm3, %vm2502_vm10  ;;  %v2451_v57 = vadd.s32 %v7932_v29, %v2417_v48 }
 0x3c1   : >> { %vm8020_vm0 = vmand %vm2534_vm13, %vm2598_vm8  ;;  %vm2476_vm8 = vcmp.ge.s32.totalorder %v2439_v47, 0  ;;  %v2579_v22 = vadd.s32 64, %v2446_v21 }
 0x3c2   : >> { %v10073_v51 = vsel %vm8020_vm0, 4294967295, %v10072_v51  ;;  %vm2537_vm5 = vmand %vm2473_vm9, %vm2505_vm11  ;;  %vm2508_vm9 = vcmp.le.s32.totalorder %v2439_v47, %v7935_v63  ;;  %vm2474_vm11 = vcmp.ge.s32.totalorder %v2437_v17, 0  ;;  %vm2605_vm0 = vcmp.lt.s32.totalorder %v7935_v63, %v2573_v0 }
 0x3c3   : >> { %vm8028_vm10 = vmand %vm2537_vm5, %vm2601_vm6  ;;  %vm2604_vm5 = vcmp.lt.s32.totalorder %v7935_v63, %v2572_v36  ;;  %v2449_v47 = vadd.s32 %v7932_v29, %v2415_v30  ;;  %v10100_v36 = vmov 0  ;;  %v10102_v0 = vmov 0 }
 0x3c4   : >> { %v10075_v23 = vsel %vm8028_vm10, 4294967295, %v10074_v23  ;;  %vm2535_vm13 = vmand %vm2471_vm12, %vm2503_vm15  ;;  %vm2506_vm10 = vcmp.le.s32.totalorder %v2437_v17, %v7935_v63  ;;  %vm2602_vm12 = vcmp.lt.s32.totalorder %v7935_v63, %v2570_v44  ;;  %v2584_v17 = vadd.s32 64, %v2451_v57 }
 0x3c5   : >> { %vm8035_vm3 = vmand %vm2535_vm13, %vm2599_vm1  ;;  %vm2477_vm1 = vcmp.ge.s32.totalorder %v2440_v62, 0  ;;  %vm2509_vm13 = vcmp.le.s32.totalorder %v2440_v62, %v7935_v63  ;;  %v2582_v62 = vadd.s32 64, %v2449_v47  ;;  %v2450_v44 = vadd.s32 %v7932_v29, %v2416_v59 }
 0x3c6   : >> { %v10077_v7 = vsel %vm8035_vm3, 4294967295, %v10076_v7  ;;  %vm2540_vm6 = vmand %vm2476_vm8, %vm2508_vm9  ;;  %vm2507_vm8 = vcmp.le.s32.totalorder %v2438_v16, %v7935_v63 }
 0x3c7   : >> { %vm8043_vm15 = vmand %vm2540_vm6, %vm2604_vm5  ;;  %vm2475_vm6 = vcmp.ge.s32.totalorder %v2438_v16, 0  ;;  %vm2603_vm5 = vcmp.lt.s32.totalorder %v7935_v63, %v2571_v53  ;;  %v2585_v16 = vadd.s32 64, %v2452_v10  ;;  %v2583_v53 = vadd.s32 64, %v2450_v44 }
 0x3c8   : >> { %v10079_v42 = vsel %vm8043_vm15, 4294967295, %v10078_v42  ;;  %vm2538_vm3 = vmand %vm2474_vm11, %vm2506_vm10 }
 0x3c9   : >> { %vm8052_vm9 = vmand %vm2538_vm3, %vm2602_vm12  ;;  %vm2480_vm12 = vcmp.ge.s32.totalorder %v2443_v40, 0 }
 0x3ca   : >> { %v10081_v24 = vsel %vm8052_vm9, 4294967295, %v10080_v24  ;;  %vm2541_vm15 = vmand %vm2477_vm1, %vm2509_vm13  ;;  %vm2512_vm1 = vcmp.le.s32.totalorder %v2443_v40, %v7935_v63  ;;  %vm2478_vm13 = vcmp.ge.s32.totalorder %v2441_v31, 0  ;;  %vm2609_vm9 = vcmp.lt.s32.totalorder %v7935_v63, %v2577_v28 }
 0x3cb   : >> { %vm8060_vm10 = vmand %vm2541_vm15, %vm2605_vm0  ;;  %vm2608_vm15 = vcmp.lt.s32.totalorder %v7935_v63, %v2576_v60  ;;  %v2419_v40 = vadd.s32 224, %v7930_v4  ;;  %v10108_v28 = vmov 0 }
 0x3cc   : >> { %v10083_v35 = vsel %vm8060_vm10, 4294967295, %v10082_v35  ;;  %vm2539_vm3 = vmand %vm2475_vm6, %vm2507_vm8  ;;  %vm2510_vm10 = vcmp.le.s32.totalorder %v2441_v31, %v7935_v63  ;;  %vm2606_vm6 = vcmp.lt.s32.totalorder %v7935_v63, %v2574_v27  ;;  %v2422_v31 = vadd.s32 248, %v7930_v4 }
 0x3cd   : >> { %vm8067_vm11 = vmand %vm2539_vm3, %vm2603_vm5  ;;  %vm2481_vm5 = vcmp.ge.s32.totalorder %v2444_v1, 0  ;;  %vm2513_vm3 = vcmp.le.s32.totalorder %v2444_v1, %v7935_v63  ;;  %v2453_v60 = vadd.s32 %v7932_v29, %v2419_v40  ;;  %v2420_v1 = vadd.s32 232, %v7930_v4 }
 0x3ce   : >> { %v10085_v50 = vsel %vm8067_vm11, 4294967295, %v10084_v50  ;;  %vm2544_vm0 = vmand %vm2480_vm12, %vm2512_vm1  ;;  %vm2511_vm12 = vcmp.le.s32.totalorder %v2442_v61, %v7935_v63  ;;  %v2588_v27 = vadd.s32 64, %v2455_v8 }
 0x3cf   : >> { %vm8075_vm8 = vmand %vm2544_vm0, %vm2608_vm15  ;;  %vm2479_vm0 = vcmp.ge.s32.totalorder %v2442_v61, 0  ;;  %vm2607_vm15 = vcmp.lt.s32.totalorder %v7935_v63, %v2575_v5  ;;  %v2456_v61 = vadd.s32 %v7932_v29, %v2422_v31  ;;  %v2586_v5 = vadd.s32 64, %v2453_v60 }
 0x3d0   : >> { %v10087_v11 = vsel %vm8075_vm8, 4294967295, %v10086_v11  ;;  %vm2542_vm11 = vmand %vm2478_vm13, %vm2510_vm10  ;;  %v2454_v49 = vadd.s32 %v7932_v29, %v2420_v1 }
 0x3d1   : >> { %vm8084_vm1 = vmand %vm2542_vm11, %vm2606_vm6  ;;  %vm2484_vm6 = vcmp.ge.s32.totalorder %v2447_v19, 0  ;;  %v2589_v4 = vadd.s32 64, %v2456_v61 }
 0x3d2   : >> { %v10089_v18 = vsel %vm8084_vm1, 4294967295, %v10088_v18  ;;  %vm2545_vm8 = vmand %vm2481_vm5, %vm2513_vm3  ;;  %vm2516_vm5 = vcmp.le.s32.totalorder %v2447_v19, %v7935_v63  ;;  %vm2482_vm3 = vcmp.ge.s32.totalorder %v2445_v32, 0  ;;  %vm2613_vm1 = vcmp.lt.s32.totalorder %v7935_v63, %v2581_v3 }
 0x3d3   : >> { %vm8092_vm10 = vmand %vm2545_vm8, %vm2609_vm9  ;;  %vm2612_vm8 = vcmp.lt.s32.totalorder %v7935_v63, %v2580_v43  ;;  %v2587_v19 = vadd.s32 64, %v2454_v49  ;;  %vm2491_vm4 = vcmp.ge.s32.totalorder %v2454_v49, 0 }
 0x3d4   : >> { %v10091_v55 = vsel %vm8092_vm10, 4294967295, %v10090_v55  ;;  %vm2543_vm11 = vmand %vm2479_vm0, %vm2511_vm12  ;;  %vm2514_vm10 = vcmp.le.s32.totalorder %v2445_v32, %v7935_v63  ;;  %vm2610_vm0 = vcmp.lt.s32.totalorder %v7935_v63, %v2578_v39 }
 0x3d5   : >> { %vm8099_vm13 = vmand %vm2543_vm11, %vm2607_vm15  ;;  %vm2485_vm15 = vcmp.ge.s32.totalorder %v2448_v52, 0  ;;  %vm2517_vm11 = vcmp.le.s32.totalorder %v2448_v52, %v7935_v63 }
 0x3d6   : >> { %v10093_v41 = vsel %vm8099_vm13, 4294967295, %v10092_v41  ;;  %vm2548_vm9 = vmand %vm2484_vm6, %vm2516_vm5  ;;  %vm2515_vm6 = vcmp.le.s32.totalorder %v2446_v21, %v7935_v63 }
 0x3d7   : >> { %vm8107_vm12 = vmand %vm2548_vm9, %vm2612_vm8  ;;  %vm2483_vm9 = vcmp.ge.s32.totalorder %v2446_v21, 0  ;;  %vm2611_vm8 = vcmp.lt.s32.totalorder %v7935_v63, %v2579_v22 }
 0x3d8   : >> { %v10095_v34 = vsel %vm8107_vm12, 4294967295, %v10094_v34  ;;  %vm2546_vm13 = vmand %vm2482_vm3, %vm2514_vm10 }
 0x3d9   : >> { %vm8116_vm5 = vmand %vm2546_vm13, %vm2610_vm0  ;;  %vm2488_vm0 = vcmp.ge.s32.totalorder %v2451_v57, 0 }
 0x3da   : >> { %v10097_v33 = vsel %vm8116_vm5, 4294967295, %v10096_v33  ;;  %vm2549_vm12 = vmand %vm2485_vm15, %vm2517_vm11  ;;  %vm2520_vm15 = vcmp.le.s32.totalorder %v2451_v57, %v7935_v63  ;;  %vm2486_vm11 = vcmp.ge.s32.totalorder %v2449_v47, 0  ;;  %vm2617_vm5 = vcmp.lt.s32.totalorder %v7935_v63, %v2585_v16 }
 0x3db   : >> { %vm8124_vm10 = vmand %vm2549_vm12, %vm2613_vm1  ;;  %vm2616_vm12 = vcmp.lt.s32.totalorder %v7935_v63, %v2584_v17 }
 0x3dc   : >> { %v10099_v56 = vsel %vm8124_vm10, 4294967295, %v10098_v56  ;;  %vm2547_vm13 = vmand %vm2483_vm9, %vm2515_vm6  ;;  %vm2518_vm10 = vcmp.le.s32.totalorder %v2449_v47, %v7935_v63  ;;  %vm2614_vm9 = vcmp.lt.s32.totalorder %v7935_v63, %v2582_v62 }
 0x3dd   : >> { %vm8131_vm3 = vmand %vm2547_vm13, %vm2611_vm8  ;;  %vm2489_vm8 = vcmp.ge.s32.totalorder %v2452_v10, 0  ;;  %vm2521_vm13 = vcmp.le.s32.totalorder %v2452_v10, %v7935_v63 }
 0x3de   : >> { %v10101_v36 = vsel %vm8131_vm3, 4294967295, %v10100_v36  ;;  %vm2552_vm1 = vmand %vm2488_vm0, %vm2520_vm15  ;;  %vm2519_vm0 = vcmp.le.s32.totalorder %v2450_v44, %v7935_v63 }
 0x3df   : >> { %vm8139_vm6 = vmand %vm2552_vm1, %vm2616_vm12  ;;  %vm2487_vm1 = vcmp.ge.s32.totalorder %v2450_v44, 0  ;;  %vm2615_vm12 = vcmp.lt.s32.totalorder %v7935_v63, %v2583_v53 }
 0x3e0   : >> { %v10103_v0 = vsel %vm8139_vm6, 4294967295, %v10102_v0  ;;  %vm2550_vm3 = vmand %vm2486_vm11, %vm2518_vm10 }
 0x3e1   : >> { %vm8148_vm15 = vmand %vm2550_vm3, %vm2614_vm9  ;;  %vm2492_vm9 = vcmp.ge.s32.totalorder %v2455_v8, 0 }
 0x3e2   : >> { %v10105_v37 = vsel %vm8148_vm15, 4294967295, %v10104_v37  ;;  %vm2553_vm6 = vmand %vm2489_vm8, %vm2521_vm13  ;;  %vm2524_vm8 = vcmp.le.s32.totalorder %v2455_v8, %v7935_v63  ;;  %vm2490_vm13 = vcmp.ge.s32.totalorder %v2453_v60, 0  ;;  %vm2621_vm15 = vcmp.lt.s32.totalorder %v7935_v63, %v2589_v4 }
 0x3e3   : >> { %vm8156_vm10 = vmand %vm2553_vm6, %vm2617_vm5  ;;  %vm2620_vm6 = vcmp.lt.s32.totalorder %v7935_v63, %v2588_v27 }
 0x3e4   : >> { %v10107_v26 = vsel %vm8156_vm10, 4294967295, %v10106_v26  ;;  %vm2551_vm3 = vmand %vm2487_vm1, %vm2519_vm0  ;;  %vm2522_vm10 = vcmp.le.s32.totalorder %v2453_v60, %v7935_v63  ;;  %vm2618_vm1 = vcmp.lt.s32.totalorder %v7935_v63, %v2586_v5 }
 0x3e5   : >> { %vm8163_vm11 = vmand %vm2551_vm3, %vm2615_vm12  ;;  %vm2493_vm12 = vcmp.ge.s32.totalorder %v2456_v61, 0  ;;  %vm2525_vm3 = vcmp.le.s32.totalorder %v2456_v61, %v7935_v63 }
 0x3e6   : >> { %v10109_v28 = vsel %vm8163_vm11, 4294967295, %v10108_v28  ;;  %vm2556_vm5 = vmand %vm2492_vm9, %vm2524_vm8  ;;  %vm2523_vm9 = vcmp.le.s32.totalorder %v2454_v49, %v7935_v63 }
 0x3e7   : >> { %vm8171_vm0 = vmand %vm2556_vm5, %vm2620_vm6  ;;  %vm2619_vm5 = vcmp.lt.s32.totalorder %v7935_v63, %v2587_v19 }
 0x3e8   : >> { %v10111_v46 = vsel %vm8171_vm0, 4294967295, %v10110_v46  ;;  %vm2554_vm11 = vmand %vm2490_vm13, %vm2522_vm10  ;;  %vm10122_vm10 = vnez %v10065_v54  ;;  %vm10124_vm13 = vnez %v10069_v25 }
 0x3e9   : >> { %vm8179_vm8 = vmand %vm2554_vm11, %vm2618_vm1  ;;  %vm10123_vm11 = vnez %v10067_v45  ;;  %vm10125_vm1 = vnez %v10071_v12 }
 0x3ea   : >> { %vm2557_vm6 = vmand %vm2493_vm12, %vm2525_vm3  ;;  %vm10127_vm12 = vnez %v10073_v51  ;;  %vm10128_vm3 = vnez %v10075_v23 }
 0x3eb   : >> { %vm8184_vm0 = vmand %vm2557_vm6, %vm2621_vm15  ;;  %vm10118_vm15 = vnez %v10057_v20  ;;  %vm10134_vm6 = vnez %v10081_v24 }
 0x3ec   : >> { %vm2555_vm2 = vmand %vm2491_vm4, %vm2523_vm9  ;;  %vm10121_vm4 = vnez %v10063_v13  ;;  %vm10130_vm9 = vnez %v10077_v7 }
 0x3ed   : >> { %vm8188_vm14 = vmand %vm2555_vm2, %vm2619_vm5  ;;  %vm10120_vm2 = vnez %v10061_v58  ;;  %vm10132_vm5 = vnez %v10079_v42 }
 0x454   : >> { %v5880_v43 = vpop.f32.mrb[0].mxu1 }
 0x455   : >> { %v5840_v15 = vpop.f32.mrb[0].mxu0  ;;  %v8198_v39 = vsel %vm7947_vm7, %v5880_v43, -1e+30  ;;  %v2263_v21 = vpop.f32.mrb[1].mxu1 }
 0x456   : >> { %v8194_v52 = vsel %vm7947_vm7, %v5840_v15, -1e+30  ;;  %v2022_v63 = vpop.f32.mrb[1].mxu0  ;;  %v8206_v22 = vsel %vm10118_vm15, %v2263_v21, -1e+30  ;;  %v5881_v30 = vpop.f32.mrb[2].mxu1  ;;  %vm10119_vm7 = vnez %v10059_v38 }
 0x457   : >> { %v8202_v3 = vsel %vm10118_vm15, %v2022_v63, -1e+30  ;;  %v5841_v48 = vpop.f32.mrb[2].mxu0  ;;  %v2819_v14 = vmax.f32 %v8206_v22, %v8198_v39  ;;  %v8218_v47 = vsel %vm10119_vm7, %v5881_v30, -1e+30  ;;  %v2266_v20 = vpop.f32.mrb[3].mxu1  ;;  %vm10136_vm15 = vnez %v10083_v35 }
 0x458   : >> { %v2782_v57 = vmax.f32 %v8202_v3, %v8194_v52  ;;  %v8214_v9 = vsel %vm10119_vm7, %v5841_v48, -1e+30  ;;  %v2025_v59 = vpop.f32.mrb[3].mxu0  ;;  %v8226_v10 = vsel %vm10120_vm2, %v2266_v20, -1e+30  ;;  %vm10138_vm7 = vnez %v10085_v50 }
 0x459   : >> { %v8222_v17 = vsel %vm10120_vm2, %v2025_v59, -1e+30  ;;  %v2820_v44 = vmax.f32 %v8226_v10, %v8218_v47  ;;  %vm10140_vm2 = vnez %v10087_v11 }
 0x45a   : >> { %v2783_v62 = vmax.f32 %v8222_v17, %v8214_v9 }
 0x45c   : >> { %v5884_v38 = vpop.f32.mrb[4].mxu1 }
 0x45d   : >> { %v5844_v16 = vpop.f32.mrb[4].mxu0  ;;  %v8238_v6 = vsel %vm10121_vm4, %v5884_v38, -1e+30  ;;  %v2279_v58 = vpop.f32.mrb[5].mxu1 }
 0x45e   : >> { %v8234_v53 = vsel %vm10121_vm4, %v5844_v16, -1e+30  ;;  %v2038_v40 = vpop.f32.mrb[5].mxu0  ;;  %v8246_v31 = vsel %vm10122_vm10, %v2279_v58, -1e+30  ;;  %v5885_v1 = vpop.f32.mrb[6].mxu1  ;;  %vm10142_vm4 = vnez %v10089_v18 }
 0x45f   : >> { %v8242_v8 = vsel %vm10122_vm10, %v2038_v40, -1e+30  ;;  %v5845_v60 = vpop.f32.mrb[6].mxu0  ;;  %v2821_v61 = vmax.f32 %v2819_v14, %v8246_v31  ;;  %v8256_v5 = vsel %vm10123_vm11, %v5885_v1, -1e+30  ;;  %v2282_v4 = vpop.f32.mrb[7].mxu1  ;;  %vm10144_vm10 = vnez %v10091_v55 }
 0x460   : >> { %v2784_v27 = vmax.f32 %v2782_v57, %v8242_v8  ;;  %v8252_v13 = vsel %vm10123_vm11, %v5845_v60, -1e+30  ;;  %v2041_v49 = vpop.f32.mrb[7].mxu0  ;;  %v8264_v19 = vsel %vm10124_vm13, %v2282_v4, -1e+30  ;;  %vm10146_vm11 = vnez %v10093_v41 }
 0x461   : >> { %v8260_v54 = vsel %vm10124_vm13, %v2041_v49, -1e+30  ;;  %v2822_v43 = vmax.f32 %v2820_v44, %v8264_v19  ;;  %v2823_v45 = vmax.f32 %v2821_v61, %v8238_v6  ;;  %vm10148_vm13 = vnez %v10095_v34 }
 0x462   : >> { %v2785_v15 = vmax.f32 %v2783_v62, %v8260_v54  ;;  %v2786_v63 = vmax.f32 %v2784_v27, %v8234_v53 }
 0x463   : >> { %v2824_v48 = vmax.f32 %v2822_v43, %v8256_v5 }
 0x464   : >> { %v2787_v21 = vmax.f32 %v2785_v15, %v8252_v13  ;;  %v5888_v57 = vpop.f32.mrb[8].mxu1 }
 0x465   : >> { %v5848_v30 = vpop.f32.mrb[8].mxu0  ;;  %v8278_v25 = vsel %vm10125_vm1, %v5888_v57, -1e+30  ;;  %v2295_v20 = vpop.f32.mrb[9].mxu1 }
 0x466   : >> { %v8274_v14 = vsel %vm10125_vm1, %v5848_v30, -1e+30  ;;  %10126 = vst [vmem:[#allocation106_spill] sm:$0xff] %v8278_v25  ;;  %v2054_v59 = vpop.f32.mrb[9].mxu0  ;;  %v8286_v44 = vsel %vm10127_vm12, %v2295_v20, -1e+30  ;;  %vm10150_vm1 = vnez %v10097_v33 }
 0x467   : >> { %v8282_v62 = vsel %vm10127_vm12, %v2054_v59, -1e+30  ;;  %v5849_v16 = vpop.f32.mrb[10].mxu0  ;;  %v5889_v38 = vpop.f32.mrb[10].mxu1  ;;  %v2825_v58 = vmax.f32 %v2823_v45, %v8286_v44  ;;  %vm10152_vm12 = vnez %v10099_v56 }
 0x468   : >> { %v2788_v40 = vmax.f32 %v2786_v63, %v8282_v62  ;;  %v8292_v12 = vsel %vm10128_vm3, %v5849_v16, -1e+30  ;;  %v8296_v60 = vsel %vm10128_vm3, %v5889_v38, -1e+30  ;;  %v2057_v1 = vpop.f32.mrb[11].mxu0  ;;  %v2298_v27 = vpop.f32.mrb[11].mxu1  ;;  %vm10154_vm3 = vnez %v10101_v36 }
 0x469   : >> { %10129 = vst [vmem:[#allocation107_spill] sm:$0xff] %v8296_v60  ;;  %v8300_v51 = vsel %vm10130_vm9, %v2057_v1, -1e+30  ;;  %v8304_v61 = vsel %vm10130_vm9, %v2298_v27, -1e+30  ;;  %v2827_v23 = vmax.f32 %v2825_v58, %v8278_v25  ;;  %vm10156_vm9 = vnez %v10103_v0 }
 0x46a   : >> { %10131 = vst [vmem:[#allocation108_spill] sm:$0xff] %v8304_v61  ;;  %v2789_v49 = vmax.f32 %v2787_v21, %v8300_v51  ;;  %v2826_v4 = vmax.f32 %v2824_v48, %v8304_v61  ;;  %v2790_v15 = vmax.f32 %v2788_v40, %v8274_v14 }
 0x46c   : >> { %v2791_v43 = vmax.f32 %v2789_v49, %v8292_v12  ;;  %v2828_v63 = vmax.f32 %v2826_v4, %v8296_v60  ;;  %v5892_v30 = vpop.f32.mrb[12].mxu1 }
 0x46d   : >> { %v5852_v45 = vpop.f32.mrb[12].mxu0  ;;  %v8318_v7 = vsel %vm10132_vm5, %v5892_v30, -1e+30  ;;  %v2311_v48 = vpop.f32.mrb[13].mxu1 }
 0x46e   : >> { %v8314_v57 = vsel %vm10132_vm5, %v5852_v45, -1e+30  ;;  %10133 = vst [vmem:[#allocation109_spill] sm:$0xff] %v8318_v7  ;;  %v2070_v21 = vpop.f32.mrb[13].mxu0  ;;  %v8326_v20 = vsel %vm10134_vm6, %v2311_v48, -1e+30  ;;  %vm10158_vm5 = vnez %v10105_v37 }
 0x46f   : >> { %v8322_v59 = vsel %vm10134_vm6, %v2070_v21, -1e+30  ;;  %10135 = vst [vmem:[#allocation110_spill] sm:$0xff] %v8326_v20  ;;  %v5853_v16 = vpop.f32.mrb[14].mxu0  ;;  %v5893_v38 = vpop.f32.mrb[14].mxu1  ;;  %v2829_v58 = vmax.f32 %v2827_v23, %v8326_v20  ;;  %vm10160_vm6 = vnez %v10107_v26 }
 0x470   : >> { %v2792_v40 = vmax.f32 %v2790_v15, %v8322_v59  ;;  %v8332_v42 = vsel %vm10136_vm15, %v5853_v16, -1e+30  ;;  %v8336_v1 = vsel %vm10136_vm15, %v5893_v38, -1e+30  ;;  %v2073_v27 = vpop.f32.mrb[15].mxu0  ;;  %v2314_v49 = vpop.f32.mrb[15].mxu1  ;;  %vm10162_vm15 = vnez %v10109_v28 }
 0x471   : >> { %10137 = vst [vmem:[#allocation111_spill] sm:$0xff] %v8336_v1  ;;  %v8340_v24 = vsel %vm10138_vm7, %v2073_v27, -1e+30  ;;  %v8344_v4 = vsel %vm10138_vm7, %v2314_v49, -1e+30  ;;  %v2831_v35 = vmax.f32 %v2829_v58, %v8318_v7  ;;  %vm10164_vm7 = vnez %v10111_v46 }
 0x472   : >> { %10139 = vst [vmem:[#allocation112_spill] sm:$0xff] %v8344_v4  ;;  %v2793_v15 = vmax.f32 %v2791_v43, %v8340_v24  ;;  %v2830_v23 = vmax.f32 %v2828_v63, %v8344_v4  ;;  %v2794_v45 = vmax.f32 %v2792_v40, %v8314_v57 }
 0x474   : >> { %v2795_v30 = vmax.f32 %v2793_v15, %v8332_v42  ;;  %v2832_v21 = vmax.f32 %v2830_v23, %v8336_v1  ;;  %v5896_v16 = vpop.f32.mrb[16].mxu1 }
 0x475   : >> { %v5856_v48 = vpop.f32.mrb[16].mxu0  ;;  %v8358_v50 = vsel %vm10140_vm2, %v5896_v16, -1e+30  ;;  %v2327_v63 = vpop.f32.mrb[17].mxu1 }
 0x476   : >> { %v8354_v38 = vsel %vm10140_vm2, %v5856_v48, -1e+30  ;;  %10141 = vst [vmem:[#allocation113_spill] sm:$0xff] %v8358_v50  ;;  %v2086_v43 = vpop.f32.mrb[17].mxu0  ;;  %v8366_v58 = vsel %vm10142_vm4, %v2327_v63, -1e+30 }
 0x477   : >> { %v8362_v40 = vsel %vm10142_vm4, %v2086_v43, -1e+30  ;;  %10143 = vst [vmem:[#allocation114_spill] sm:$0xff] %v8366_v58  ;;  %v5857_v27 = vpop.f32.mrb[18].mxu0  ;;  %v5897_v49 = vpop.f32.mrb[18].mxu1  ;;  %v2833_v23 = vmax.f32 %v2831_v35, %v8366_v58 }
 0x478   : >> { %v2796_v15 = vmax.f32 %v2794_v45, %v8362_v40  ;;  %v8372_v11 = vsel %vm10144_vm10, %v5857_v27, -1e+30  ;;  %v8376_v48 = vsel %vm10144_vm10, %v5897_v49, -1e+30  ;;  %v2089_v16 = vpop.f32.mrb[19].mxu0  ;;  %v2330_v43 = vpop.f32.mrb[19].mxu1 }
 0x479   : >> { %10145 = vst [vmem:[#allocation115_spill] sm:$0xff] %v8376_v48  ;;  %v8380_v18 = vsel %vm10146_vm11, %v2089_v16, -1e+30  ;;  %v8384_v63 = vsel %vm10146_vm11, %v2330_v43, -1e+30  ;;  %v2835_v55 = vmax.f32 %v2833_v23, %v8358_v50 }
 0x47a   : >> { %10147 = vst [vmem:[#allocation116_spill] sm:$0xff] %v8384_v63  ;;  %v2797_v45 = vmax.f32 %v2795_v30, %v8380_v18  ;;  %v2834_v35 = vmax.f32 %v2832_v21, %v8384_v63  ;;  %v2798_v27 = vmax.f32 %v2796_v15, %v8354_v38 }
 0x47c   : >> { %v2799_v49 = vmax.f32 %v2797_v45, %v8372_v11  ;;  %v2836_v58 = vmax.f32 %v2834_v35, %v8376_v48  ;;  %v5900_v7 = vpop.f32.mrb[20].mxu1 }
 0x47d   : >> { %v5860_v1 = vpop.f32.mrb[20].mxu0  ;;  %v8398_v41 = vsel %vm10148_vm13, %v5900_v7, -1e+30  ;;  %v2343_v21 = vpop.f32.mrb[21].mxu1 }
 0x47e   : >> { %v8394_v16 = vsel %vm10148_vm13, %v5860_v1, -1e+30  ;;  %10149 = vst [vmem:[#allocation117_spill] sm:$0xff] %v8398_v41  ;;  %v2102_v30 = vpop.f32.mrb[21].mxu0  ;;  %v8406_v23 = vsel %vm10150_vm1, %v2343_v21, -1e+30 }
 0x47f   : >> { %v8402_v15 = vsel %vm10150_vm1, %v2102_v30, -1e+30  ;;  %10151 = vst [vmem:[#allocation118_spill] sm:$0xff] %v8406_v23  ;;  %v5861_v43 = vpop.f32.mrb[22].mxu0  ;;  %v5901_v45 = vpop.f32.mrb[22].mxu1  ;;  %v2837_v1 = vmax.f32 %v2835_v55, %v8406_v23 }
 0x480   : >> { %v2800_v35 = vmax.f32 %v2798_v27, %v8402_v15  ;;  %v8412_v34 = vsel %vm10152_vm12, %v5861_v43, -1e+30  ;;  %v8416_v7 = vsel %vm10152_vm12, %v5901_v45, -1e+30  ;;  %v2105_v30 = vpop.f32.mrb[23].mxu0  ;;  %v2346_v48 = vpop.f32.mrb[23].mxu1 }
 0x481   : >> { %10153 = vst [vmem:[#allocation119_spill] sm:$0xff] %v8416_v7  ;;  %v8420_v33 = vsel %vm10154_vm3, %v2105_v30, -1e+30  ;;  %v8424_v21 = vsel %vm10154_vm3, %v2346_v48, -1e+30  ;;  %v2839_v56 = vmax.f32 %v2837_v1, %v8398_v41 }
 0x482   : >> { %10155 = vst [vmem:[#allocation120_spill] sm:$0xff] %v8424_v21  ;;  %v2801_v27 = vmax.f32 %v2799_v49, %v8420_v33  ;;  %v2838_v55 = vmax.f32 %v2836_v58, %v8424_v21  ;;  %v2802_v43 = vmax.f32 %v2800_v35, %v8394_v16 }
 0x484   : >> { %v2803_v45 = vmax.f32 %v2801_v27, %v8412_v34  ;;  %v2840_v23 = vmax.f32 %v2838_v55, %v8416_v7  ;;  %v5904_v63 = vpop.f32.mrb[24].mxu1 }
 0x485   : >> { %v5864_v50 = vpop.f32.mrb[24].mxu0  ;;  %v8438_v36 = vsel %vm10156_vm9, %v5904_v63, -1e+30  ;;  %v2359_v58 = vpop.f32.mrb[25].mxu1 }
 0x486   : >> { %v8434_v30 = vsel %vm10156_vm9, %v5864_v50, -1e+30  ;;  %10157 = vst [vmem:[#allocation121_spill] sm:$0xff] %v8438_v36  ;;  %v2118_v48 = vpop.f32.mrb[25].mxu0  ;;  %v8446_v35 = vsel %vm10158_vm5, %v2359_v58, -1e+30 }
 0x487   : >> { %v8442_v49 = vsel %vm10158_vm5, %v2118_v48, -1e+30  ;;  %10159 = vst [vmem:[#allocation122_spill] sm:$0xff] %v8446_v35  ;;  %v5865_v1 = vpop.f32.mrb[26].mxu0  ;;  %v5905_v27 = vpop.f32.mrb[26].mxu1  ;;  %v2841_v50 = vmax.f32 %v2839_v56, %v8446_v35 }
 0x488   : >> { %v2804_v55 = vmax.f32 %v2802_v43, %v8442_v49  ;;  %v8452_v0 = vsel %vm10160_vm6, %v5865_v1, -1e+30  ;;  %v8456_v63 = vsel %vm10160_vm6, %v5905_v27, -1e+30  ;;  %v2121_v48 = vpop.f32.mrb[27].mxu0  ;;  %v2362_v7 = vpop.f32.mrb[27].mxu1 }
 0x489   : >> { %10161 = vst [vmem:[#allocation123_spill] sm:$0xff] %v8456_v63  ;;  %v8460_v37 = vsel %vm10162_vm15, %v2121_v48, -1e+30  ;;  %v8464_v58 = vsel %vm10162_vm15, %v2362_v7, -1e+30  ;;  %v2843_v26 = vmax.f32 %v2841_v50, %v8438_v36 }
 0x48a   : >> { %10163 = vst [vmem:[#allocation124_spill] sm:$0xff] %v8464_v58  ;;  %v2805_v43 = vmax.f32 %v2803_v45, %v8460_v37  ;;  %v2842_v56 = vmax.f32 %v2840_v23, %v8464_v58  ;;  %v2806_v1 = vmax.f32 %v2804_v55, %v8434_v30 }
 0x48c   : >> { %v2807_v27 = vmax.f32 %v2805_v43, %v8452_v0  ;;  %v2844_v35 = vmax.f32 %v2842_v56, %v8456_v63  ;;  %v5908_v21 = vpop.f32.mrb[28].mxu1 }
 0x48d   : >> { %v5868_v41 = vpop.f32.mrb[28].mxu0  ;;  %v8478_v28 = vsel %vm10164_vm7, %v5908_v21, -1e+30  ;;  %v2375_v23 = vpop.f32.mrb[29].mxu1 }
 0x48e   : >> { %v8474_v48 = vsel %vm10164_vm7, %v5868_v41, -1e+30  ;;  %10165 = vst [vmem:[#allocation125_spill] sm:$0xff] %v8478_v28  ;;  %v2134_v7 = vpop.f32.mrb[29].mxu0  ;;  %v8486_v55 = vsel %vm8179_vm8, %v2375_v23, -1e+30 }
 0x48f   : >> { %v8482_v45 = vsel %vm8179_vm8, %v2134_v7, -1e+30  ;;  %10166 = vst [vmem:[#allocation126_spill] sm:$0xff] %v8486_v55  ;;  %v5869_v50 = vpop.f32.mrb[30].mxu0  ;;  %v5909_v43 = vpop.f32.mrb[30].mxu1  ;;  %v2845_v41 = vmax.f32 %v2843_v26, %v8486_v55 }
 0x490   : >> { %v2808_v56 = vmax.f32 %v2806_v1, %v8482_v45  ;;  %v8492_v46 = vsel %vm8184_vm0, %v5869_v50, -1e+30  ;;  %v8496_v21 = vsel %vm8184_vm0, %v5909_v43, -1e+30  ;;  %v2137_v7 = vpop.f32.mrb[31].mxu0  ;;  %v2378_v63 = vpop.f32.mrb[31].mxu1 }
 0x491   : >> { %10167 = vst [vmem:[#allocation127_spill] sm:$0xff] %v8496_v21  ;;  %v8500_v29 = vsel %vm8188_vm14, %v2137_v7, -1e+30  ;;  %v8504_v23 = vsel %vm8188_vm14, %v2378_v63, -1e+30  ;;  %v2847_v26 = vmax.f32 %v2845_v41, %v8478_v28 }
 0x492   : >> { %v2810_v1 = vmax.f32 %v2808_v56, %v8474_v48  ;;  %v2809_v50 = vmax.f32 %v2807_v27, %v8500_v29  ;;  %v2846_v2 = vmax.f32 %v2844_v35, %v8504_v23 }
 0x494   : >> { %v2811_v43 = vmax.f32 %v2809_v50, %v8492_v46  ;;  %v2848_v55 = vmax.f32 %v2846_v2, %v8496_v21 }
 0x496   : >> { %v2812_v36 = vmax.f32 %v2810_v1, %v2811_v43  ;;  %v2849_v58 = vmax.f32 %v2847_v26, %v2848_v55  ;;  %v10184_v43 = vld [vmem:[#allocation120_spill] sm:$0xff] }
 0x498   : >> { %v2813_v7 = vrot.slane %v2812_v36, 4  ;;  %v2850_v4 = vrot.slane %v2849_v58, 4 }
 0x49a   : >> { %v2814_v20 = vmax.f32 %v2812_v36, %v2813_v7  ;;  %v2851_v32 = vmax.f32 %v2849_v58, %v2850_v4 }
 0x49c   : >> { %v2815_v63 = vrot.slane %v2814_v20, 2  ;;  %v2852_v60 = vrot.slane %v2851_v32, 2 }
 0x49e   : >> { %v2816_v25 = vmax.f32 %v2814_v20, %v2815_v63  ;;  %v2853_v56 = vmax.f32 %v2851_v32, %v2852_v60  ;;  %v10183_v20 = vld [vmem:[#allocation118_spill] sm:$0xff] }
 0x4a0   : >> { %v2817_v61 = vrot.slane %v2816_v25, 1  ;;  %v2854_v41 = vrot.slane %v2853_v56, 1 }
 0x4a2   : >> { %v8512_v28 = vmax.f32 %v2816_v25, %v2817_v61  ;;  %v8514_v27 = vmax.f32 %v2853_v56, %v2854_v41 }
 0x4a4   : >> { %v2856_v35 = vsub.f32 %v8202_v3, %v8512_v28  ;;  %v2857_v55 = vsub.f32 %v8222_v17, %v8512_v28  ;;  %v2858_v36 = vsub.f32 %v8194_v52, %v8512_v28  ;;  %v2859_v4 = vsub.f32 %v8214_v9, %v8512_v28 }
 0x4a5   : >> { %v2860_v60 = vsub.f32 %v8242_v8, %v8512_v28  ;;  %v2861_v25 = vsub.f32 %v8260_v54, %v8512_v28  ;;  %v2862_v61 = vsub.f32 %v8234_v53, %v8512_v28  ;;  %v2863_v3 = vsub.f32 %v8252_v13, %v8512_v28  ;;  %v10188_v13 = vld [vmem:[#allocation122_spill] sm:$0xff]  ;;  %v10192_v54 = vld [vmem:[#allocation123_spill] sm:$0xff] }
 0x4a6   : >> { %v2864_v17 = vsub.f32 %v8282_v62, %v8512_v28  ;;  %v2865_v52 = vsub.f32 %v8300_v51, %v8512_v28  ;;  %v2866_v9 = vsub.f32 %v8274_v14, %v8512_v28  ;;  %v2867_v8 = vsub.f32 %v8292_v12, %v8512_v28  ;;  %v10190_v12 = vld [vmem:[#allocation121_spill] sm:$0xff] }
 0x4a7   : >> { %v2920_v50 = vmul.f32 1.442695, %v2856_v35  ;;  %v2922_v7 = vmul.f32 1.442695, %v2857_v55  ;;  %v2924_v26 = vmul.f32 1.442695, %v2858_v36  ;;  %v10196_v35 = vsub.f32 %v8314_v57, %v8512_v28 }
 0x4a8   : >> { %v2926_v56 = vmul.f32 1.442695, %v2859_v4  ;;  %v2928_v41 = vmul.f32 1.442695, %v2860_v60  ;;  %v2930_v1 = vmul.f32 1.442695, %v2861_v25  ;;  %v10199_v57 = vsub.f32 %v8380_v18, %v8512_v28 }
 0x4a9   : >> { %6149 = vpow2.f32 %v2920_v50  ;;  %v2932_v2 = vmul.f32 1.442695, %v2862_v61  ;;  %v2934_v58 = vmul.f32 1.442695, %v2863_v3  ;;  %v2936_v60 = vmul.f32 1.442695, %v2864_v17 }
 0x4aa   : >> { %6151 = vpow2.f32 %v2922_v7  ;;  %v10170_v50 = vld [vmem:[#allocation108_spill] sm:$0xff]  ;;  %v10172_v17 = vld [vmem:[#allocation107_spill] sm:$0xff]  ;;  %v2938_v4 = vmul.f32 1.442695, %v2865_v52  ;;  %v10173_v61 = vld [vmem:[#allocation110_spill] sm:$0xff] }
 0x4ab   : >> { %6153 = vpow2.f32 %v2924_v26  ;;  %v10174_v3 = vld [vmem:[#allocation112_spill] sm:$0xff]  ;;  %v10176_v7 = vld [vmem:[#allocation109_spill] sm:$0xff]  ;;  %v10178_v52 = vld [vmem:[#allocation114_spill] sm:$0xff]  ;;  %v2940_v63 = vmul.f32 1.442695, %v2866_v9 }
 0x4ac   : >> { %6155 = vpow2.f32 %v2926_v56  ;;  %v10171_v56 = vld [vmem:[#allocation106_spill] sm:$0xff]  ;;  %v10179_v36 = vld [vmem:[#allocation116_spill] sm:$0xff]  ;;  %v10180_v55 = vld [vmem:[#allocation113_spill] sm:$0xff] }
 0x4ad   : >> { %6157 = vpow2.f32 %v2928_v41  ;;  %v10177_v41 = vld [vmem:[#allocation111_spill] sm:$0xff]  ;;  %v10189_v9 = vld [vmem:[#allocation124_spill] sm:$0xff] }
 0x4ae   : >> { %6159 = vpow2.f32 %v2930_v1 }
 0x4af   : >> { %6161 = vpow2.f32 %v2932_v2 }
 0x4b0   : >> { %6163 = vpow2.f32 %v2934_v58  ;;  %v10182_v58 = vld [vmem:[#allocation115_spill] sm:$0xff] }
 0x4b1   : >> { %6165 = vpow2.f32 %v2936_v60  ;;  %v10195_v60 = vsub.f32 %v8340_v24, %v8512_v28  ;;  %v10198_v24 = vsub.f32 %v8362_v40, %v8512_v28  ;;  %v10201_v40 = vsub.f32 %v8226_v10, %v8514_v27 }
 0x4b2   : >> { %6167 = vpow2.f32 %v2938_v4  ;;  %v10193_v4 = vld [vmem:[#allocation126_spill] sm:$0xff] }
 0x4b3   : >> { %v8592_v26 = vpop.eup %6149  ;;  %6169 = vpow2.f32 %v2940_v63 }
 0x4b4   : >> { %10168 = vst [vmem:[#allocation128_spill] sm:$0xff] %v8592_v26  ;;  %v8600_v1 = vpop.eup %6151 }
 0x4b5   : >> { %10169 = vst [vmem:[#allocation129_spill] sm:$0xff] %v8600_v1  ;;  %v3048_v25 = vadd.f32 %v8600_v1, %v8592_v26  ;;  %v8614_v2 = vpop.eup %6153  ;;  %v2946_v26 = vmul.f32 1.442695, %v10195_v60  ;;  %v2948_v1 = vmul.f32 1.442695, %v10196_v35 }
 0x4b6   : >> { %10175 = vst [vmem:[#allocation108_spill] sm:$0xff] %v8614_v2  ;;  %v8627_v62 = vpop.eup %6155  ;;  %v2952_v60 = vmul.f32 1.442695, %v10198_v24  ;;  %v2954_v35 = vmul.f32 1.442695, %v10199_v57 }
 0x4b7   : >> { %v3049_v32 = vadd.f32 %v8614_v2, %v3048_v25  ;;  %10181 = vst [vmem:[#allocation106_spill] sm:$0xff] %v8627_v62  ;;  %v2942_v25 = vmul.f32 1.442695, %v2867_v8  ;;  %v8643_v2 = vpop.eup %6157  ;;  %v10194_v8 = vld [vmem:[#allocation125_spill] sm:$0xff] }
 0x4b8   : >> { %10187 = vst [vmem:[#allocation107_spill] sm:$0xff] %v8643_v2  ;;  %v8659_v51 = vpop.eup %6159 }
 0x4b9   : >> { %v3050_v14 = vadd.f32 %v8627_v62, %v3049_v32  ;;  %v10191_v32 = vsub.f32 %v8322_v59, %v8512_v28  ;;  %6171 = vpow2.f32 %v2942_v25 }
 0x4bb   : >> { %v2944_v62 = vmul.f32 1.442695, %v10191_v32  ;;  %v3051_v53 = vadd.f32 %v8643_v2, %v3050_v14  ;;  %v8668_v32 = vpop.eup %6161 }
 0x4bc   : >> { %v8674_v2 = vpop.eup %6163 }
 0x4bd   : >> { %v3052_v14 = vadd.f32 %v8659_v51, %v3051_v53  ;;  %6173 = vpow2.f32 %v2944_v62  ;;  %v8680_v21 = vpop.eup %6165  ;;  %v10197_v53 = vsub.f32 %v8332_v42, %v8512_v28 }
 0x4be   : >> { %6175 = vpow2.f32 %v2946_v26  ;;  %v8689_v62 = vpop.eup %6167  ;;  %v10200_v26 = vsub.f32 %v8206_v22, %v8514_v27  ;;  %v10203_v22 = vsub.f32 %v8198_v39, %v8514_v27 }
 0x4bf   : >> { %v3053_v63 = vadd.f32 %v8668_v32, %v3052_v14  ;;  %v2950_v25 = vmul.f32 1.442695, %v10197_v53  ;;  %6177 = vpow2.f32 %v2948_v1  ;;  %v8698_v53 = vpop.eup %6169  ;;  %v10202_v1 = vsub.f32 %v8354_v38, %v8512_v28 }
 0x4c0   : >> { %v2984_v42 = vmul.f32 1.442695, %v10200_v26  ;;  %v2988_v57 = vmul.f32 1.442695, %v10203_v22  ;;  %v10205_v38 = vsub.f32 %v8218_v47, %v8514_v27  ;;  %v1899_v47 = vld [vmem:[%s8732_s15] sm:$0xff] }
 0x4c1   : >> { %v3054_v59 = vadd.f32 %v8674_v2, %v3053_v63  ;;  %6179 = vpow2.f32 %v2950_v25  ;;  %v2956_v24 = vmul.f32 1.442695, %v10202_v1  ;;  %v10204_v25 = vsub.f32 %v8372_v11, %v8512_v28  ;;  %3252 = vmatprep.mubr.bf16.mxu0 %v1899_v47 }
 0x4c2   : >> { %6181 = vpow2.f32 %v2952_v60  ;;  %v10207_v11 = vsub.f32 %v8246_v31, %v8514_v27  ;;  %v10209_v31 = vsub.f32 %v8264_v19, %v8514_v27  ;;  %v10212_v19 = vsub.f32 %v8412_v34, %v8512_v28 }
 0x4c3   : >> { %v3055_v14 = vadd.f32 %v8680_v21, %v3054_v59  ;;  %v2986_v59 = vmul.f32 1.442695, %v10201_v40  ;;  %6183 = vpow2.f32 %v2954_v35  ;;  %v2958_v10 = vmul.f32 1.442695, %v10204_v25 }
 0x4c4   : >> { %6185 = vpow2.f32 %v2984_v42  ;;  %v10206_v35 = vsub.f32 %v8402_v15, %v8512_v28  ;;  %v2992_v42 = vmul.f32 1.442695, %v10207_v11  ;;  %v10208_v15 = vsub.f32 %v8420_v33, %v8512_v28 }
 0x4c5   : >> { %v3056_v63 = vadd.f32 %v8689_v62, %v3055_v14  ;;  %v8707_v14 = vpop.eup %6171  ;;  %6187 = vpow2.f32 %v2986_v59  ;;  %v1903_v59 = vld [vmem:[%s8732_s15 + $0x20] sm:$0xff]  ;;  %v10210_v25 = vsub.f32 %v8394_v16, %v8512_v28  ;;  %v10213_v11 = vsub.f32 %v8256_v5, %v8514_v27 }
 0x4c6   : >> { %6189 = vpow2.f32 %v2956_v24  ;;  %v2960_v39 = vmul.f32 1.442695, %v10206_v35  ;;  %v2962_v24 = vmul.f32 1.442695, %v10208_v15  ;;  %3317 = vmatprep.mubr.bf16.mxu1 %v1903_v59  ;;  %v10216_v5 = vsub.f32 %v8460_v37, %v8512_v28 }
 0x4c7   : >> { %v3057_v18 = vadd.f32 %v8698_v53, %v3056_v63  ;;  %v8716_v26 = vpop.eup %6173  ;;  %v2990_v63 = vmul.f32 1.442695, %v10205_v38  ;;  %6191 = vpow2.f32 %v2988_v57  ;;  %v2994_v57 = vmul.f32 1.442695, %v10209_v31 }
 0x4c8   : >> { %v8725_v1 = vpop.eup %6175  ;;  %6193 = vpow2.f32 %v2958_v10  ;;  %v2964_v10 = vmul.f32 1.442695, %v10210_v25  ;;  %v10211_v38 = vsub.f32 %v8238_v6, %v8514_v27  ;;  %v10214_v6 = vsub.f32 %v8442_v49, %v8512_v28 }
 0x4c9   : >> { %v3058_v60 = vadd.f32 %v8707_v14, %v3057_v18  ;;  %v8740_v22 = vpop.eup %6177  ;;  %6195 = vpow2.f32 %v2990_v63  ;;  %v2966_v63 = vmul.f32 1.442695, %v10212_v19 }
 0x4ca   : >> { %6197 = vpow2.f32 %v2960_v39  ;;  %v2996_v35 = vmul.f32 1.442695, %v10211_v38  ;;  %v2968_v59 = vmul.f32 1.442695, %v10214_v6  ;;  %v10220_v6 = vsub.f32 %v8452_v0, %v8512_v28 }
 0x4cb   : >> { %v3059_v40 = vadd.f32 %v8716_v26, %v3058_v60  ;;  %v8749_v33 = vpop.eup %6179  ;;  %6199 = vpow2.f32 %v2992_v42  ;;  %v2998_v42 = vmul.f32 1.442695, %v10213_v11  ;;  %v10219_v11 = vsub.f32 %v10171_v56, %v8514_v27 }
 0x4cc   : >> { %6201 = vpow2.f32 %v2962_v24  ;;  %v10215_v24 = vsub.f32 %v8286_v44, %v8514_v27 }
 0x4cd   : >> { %v3060_v18 = vadd.f32 %v8725_v1, %v3059_v40  ;;  %v8754_v40 = vpop.eup %6181  ;;  %6203 = vpow2.f32 %v2994_v57  ;;  %v2970_v57 = vmul.f32 1.442695, %v10216_v5 }
 0x4ce   : >> { %v8760_v16 = vpop.eup %6183  ;;  %6205 = vpow2.f32 %v2964_v10 }
 0x4cf   : >> { %v3061_v60 = vadd.f32 %v8740_v22, %v3060_v18  ;;  %v8765_v47 = vpop.eup %6185  ;;  %6207 = vpow2.f32 %v2996_v35  ;;  %v3000_v18 = vmul.f32 1.442695, %v10215_v24  ;;  %v10218_v35 = vsub.f32 %v8434_v30, %v8512_v28 }
 0x4d0   : >> { %v8771_v34 = vpop.eup %6187  ;;  %6209 = vpow2.f32 %v2966_v63 }
 0x4d1   : >> { %v3062_v39 = vadd.f32 %v8749_v33, %v3061_v60  ;;  %v8776_v31 = vpop.eup %6189  ;;  %v3085_v49 = vadd.f32 %v8771_v34, %v8765_v47  ;;  %6211 = vpow2.f32 %v2998_v42  ;;  %v10217_v60 = vsub.f32 %v10170_v50, %v8514_v27 }
 0x4d2   : >> { %v8784_v10 = vpop.eup %6191  ;;  %6213 = vpow2.f32 %v2968_v59  ;;  %v2972_v37 = vmul.f32 1.442695, %v10218_v35  ;;  %v3004_v42 = vmul.f32 1.442695, %v10219_v11  ;;  %v2974_v59 = vmul.f32 1.442695, %v10220_v6 }
 0x4d3   : >> { %v3063_v15 = vadd.f32 %v8754_v40, %v3062_v39  ;;  %v3002_v44 = vmul.f32 1.442695, %v10217_v60  ;;  %v8789_v38 = vpop.eup %6193  ;;  %v3086_v63 = vadd.f32 %v8784_v10, %v3085_v49  ;;  %6215 = vpow2.f32 %v3000_v18 }
 0x4d4   : >> { %v8796_v39 = vpop.eup %6195  ;;  %6217 = vpow2.f32 %v2970_v57  ;;  %v10221_v18 = vsub.f32 %v10172_v17, %v8514_v27  ;;  %v10222_v57 = vsub.f32 %v8482_v45, %v8512_v28 }
 0x4d5   : >> { %v3064_v25 = vadd.f32 %v8760_v16, %v3063_v15  ;;  %v8801_v50 = vpop.eup %6197  ;;  %v3087_v15 = vadd.f32 %v8796_v39, %v3086_v63  ;;  %6219 = vpow2.f32 %v3002_v44  ;;  %v10223_v44 = vsub.f32 %v10173_v61, %v8514_v27 }
 0x4d6   : >> { %v8808_v24 = vpop.eup %6199  ;;  %v3006_v5 = vmul.f32 1.442695, %v10221_v18  ;;  %6221 = vpow2.f32 %v2972_v37  ;;  %v10224_v37 = vsub.f32 %v8500_v29, %v8512_v28 }
 0x4d7   : >> { %v3065_v19 = vadd.f32 %v8776_v31, %v3064_v25  ;;  %v8813_v56 = vpop.eup %6201  ;;  %v2976_v25 = vmul.f32 1.442695, %v10222_v57  ;;  %v3088_v49 = vadd.f32 %v8808_v24, %v3087_v15  ;;  %6223 = vpow2.f32 %v3004_v42 }
 0x4d8   : >> { %v8820_v60 = vpop.eup %6203  ;;  %v3008_v35 = vmul.f32 1.442695, %v10223_v44  ;;  %6225 = vpow2.f32 %v2974_v59  ;;  %v10225_v42 = vsub.f32 %v10174_v3, %v8514_v27  ;;  %v10226_v59 = vsub.f32 %v8474_v48, %v8512_v28 }
 0x4d9   : >> { %v3066_v30 = vadd.f32 %v8789_v38, %v3065_v19  ;;  %v8825_v17 = vpop.eup %6205  ;;  %v2978_v19 = vmul.f32 1.442695, %v10224_v37  ;;  %v3089_v63 = vadd.f32 %v8820_v60, %v3088_v49  ;;  %6227 = vpow2.f32 %v3006_v5 }
 0x4da   : >> { %v8832_v11 = vpop.eup %6207  ;;  %v3010_v6 = vmul.f32 1.442695, %v10225_v42  ;;  %6229 = vpow2.f32 %v2976_v25  ;;  %v10227_v5 = vsub.f32 %v10176_v7, %v8514_v27  ;;  %v10228_v25 = vsub.f32 %v8492_v46, %v8512_v28 }
 0x4db   : >> { %v3067_v0 = vadd.f32 %v8801_v50, %v3066_v30  ;;  %v8837_v61 = vpop.eup %6209  ;;  %v2980_v30 = vmul.f32 1.442695, %v10226_v59  ;;  %v3090_v15 = vadd.f32 %v8832_v11, %v3089_v63  ;;  %6231 = vpow2.f32 %v3008_v35 }
 0x4dc   : >> { %v8844_v18 = vpop.eup %6211  ;;  %v3012_v57 = vmul.f32 1.442695, %v10227_v5  ;;  %6233 = vpow2.f32 %v2978_v19  ;;  %v10230_v35 = vsub.f32 %v10177_v41, %v8514_v27  ;;  %v10232_v46 = vsub.f32 %v10178_v52, %v8514_v27 }
 0x4dd   : >> { %v3068_v45 = vadd.f32 %v8813_v56, %v3067_v0  ;;  %v8849_v3 = vpop.eup %6213  ;;  %v2982_v0 = vmul.f32 1.442695, %v10228_v25  ;;  %v3091_v49 = vadd.f32 %v8844_v18, %v3090_v15  ;;  %6235 = vpow2.f32 %v3010_v6 }
 0x4de   : >> { %v8856_v44 = vpop.eup %6215  ;;  %v3014_v37 = vmul.f32 1.442695, %v10230_v35  ;;  %6237 = vpow2.f32 %v2980_v30  ;;  %v3016_v63 = vmul.f32 1.442695, %v10232_v46  ;;  %v10234_v30 = vsub.f32 %v10179_v36, %v8514_v27 }
 0x4df   : >> { %v3069_v29 = vadd.f32 %v8825_v17, %v3068_v45  ;;  %10229 = vst [vmem:[#allocation110_spill] sm:$0xff] %v8856_v44  ;;  %v8861_v7 = vpop.eup %6217  ;;  %v3092_v45 = vadd.f32 %v8856_v44, %v3091_v49  ;;  %6239 = vpow2.f32 %v3012_v57  ;;  %v10236_v25 = vsub.f32 %v10180_v55, %v8514_v27 }
 0x4e0   : >> { %v8865_v28 = vpop.eup %6219  ;;  %6241 = vpow2.f32 %v2982_v0 }
 0x4e1   : >> { %v3070_v48 = vadd.f32 %v8837_v61, %v3069_v29  ;;  %10231 = vst [vmem:[#allocation112_spill] sm:$0xff] %v8865_v28  ;;  %v8870_v42 = vpop.eup %6221  ;;  %v3093_v6 = vadd.f32 %v8865_v28, %v3092_v45  ;;  %6243 = vpow2.f32 %v3014_v37  ;;  %v3018_v29 = vmul.f32 1.442695, %v10234_v30 }
 0x4e2   : >> { %v8874_v59 = vpop.eup %6223  ;;  %6245 = vpow2.f32 %v3016_v63  ;;  %v3020_v0 = vmul.f32 1.442695, %v10236_v25  ;;  %v10238_v37 = vsub.f32 %v10182_v58, %v8514_v27 }
 0x4e3   : >> { %v3071_v19 = vadd.f32 %v8849_v3, %v3070_v48  ;;  %10233 = vst [vmem:[#allocation109_spill] sm:$0xff] %v8874_v59  ;;  %v8879_v15 = vpop.eup %6225  ;;  %v3094_v52 = vadd.f32 %v8874_v59, %v3093_v6  ;;  %6247 = vpow2.f32 %v3018_v29  ;;  %v10259_v59 = vld [vmem:[#allocation108_spill] sm:$0xff] }
 0x4e4   : >> { %v8883_v57 = vpop.eup %6227  ;;  %6249 = vpow2.f32 %v3020_v0 }
 0x4e5   : >> { %v3072_v41 = vadd.f32 %v8861_v7, %v3071_v19  ;;  %10235 = vst [vmem:[#allocation111_spill] sm:$0xff] %v8883_v57  ;;  %v8888_v48 = vpop.eup %6229  ;;  %v3095_v36 = vadd.f32 %v8883_v57, %v3094_v52  ;;  %v3022_v19 = vmul.f32 1.442695, %v10238_v37  ;;  %v10242_v52 = vsub.f32 %v10184_v43, %v8514_v27  ;;  %v10244_v37 = vld [vmem:[#allocation117_spill] sm:$0xff]  ;;  %v10246_v43 = vld [vmem:[#allocation119_spill] sm:$0xff] }
 0x4e6   : >> { %v8892_v35 = vpop.eup %6231 }
 0x4e7   : >> { %v3073_v5 = vadd.f32 %v8870_v42, %v3072_v41  ;;  %10237 = vst [vmem:[#allocation114_spill] sm:$0xff] %v8892_v35  ;;  %v8897_v45 = vpop.eup %6233  ;;  %v3096_v55 = vadd.f32 %v8892_v35, %v3095_v36  ;;  %v10240_v41 = vsub.f32 %v10183_v20, %v8514_v27  ;;  %6251 = vpow2.f32 %v3022_v19 }
 0x4e8   : >> { %v8901_v63 = vpop.eup %6235  ;;  %v3026_v25 = vmul.f32 1.442695, %v10242_v52  ;;  %v10247_v52 = vsub.f32 %v10246_v43, %v8514_v27 }
 0x4e9   : >> { %v3074_v49 = vadd.f32 %v8879_v15, %v3073_v5  ;;  %10239 = vst [vmem:[#allocation116_spill] sm:$0xff] %v8901_v63  ;;  %v3024_v6 = vmul.f32 1.442695, %v10240_v41  ;;  %v8906_v30 = vpop.eup %6237  ;;  %v3097_v58 = vadd.f32 %v8901_v63, %v3096_v55 }
 0x4ea   : >> { %v8910_v5 = vpop.eup %6239 }
 0x4eb   : >> { %v3075_v46 = vadd.f32 %v8888_v48, %v3074_v49  ;;  %10241 = vst [vmem:[#allocation113_spill] sm:$0xff] %v8910_v5  ;;  %v8915_v49 = vpop.eup %6241  ;;  %v3098_v20 = vadd.f32 %v8910_v5, %v3097_v58  ;;  %6253 = vpow2.f32 %v3024_v6  ;;  %v10248_v6 = vsub.f32 %v10188_v13, %v8514_v27 }
 0x4ec   : >> { %v8919_v36 = vpop.eup %6243  ;;  %6255 = vpow2.f32 %v3026_v25  ;;  %v10249_v25 = vsub.f32 %v10189_v9, %v8514_v27  ;;  %v10250_v13 = vsub.f32 %v10190_v12, %v8514_v27  ;;  %v10251_v9 = vsub.f32 %v10192_v54, %v8514_v27 }
 0x4ed   : >> { %v3076_v29 = vadd.f32 %v8897_v45, %v3075_v46  ;;  %10243 = vst [vmem:[#allocation115_spill] sm:$0xff] %v8919_v36  ;;  %v10245_v46 = vsub.f32 %v10244_v37, %v8514_v27  ;;  %v3099_v19 = vadd.f32 %v8919_v36, %v3098_v20  ;;  %v8926_v63 = vpop.eup %6245  ;;  %v3032_v37 = vmul.f32 1.442695, %v10248_v6 }
 0x4ee   : >> { %v8932_v5 = vpop.eup %6247  ;;  %v3034_v43 = vmul.f32 1.442695, %v10249_v25  ;;  %v10252_v12 = vsub.f32 %v10193_v4, %v8514_v27  ;;  %v10253_v54 = vsub.f32 %v8504_v23, %v8514_v27  ;;  %v10254_v4 = vsub.f32 %v10194_v8, %v8514_v27 }
 0x4ef   : >> { %v3077_v0 = vadd.f32 %v8906_v30, %v3076_v29  ;;  %v3028_v55 = vmul.f32 1.442695, %v10245_v46  ;;  %v3030_v29 = vmul.f32 1.442695, %v10247_v52  ;;  %v3100_v58 = vadd.f32 %v8926_v63, %v3099_v19  ;;  %v8938_v46 = vpop.eup %6249 }
 0x4f1   : >> { %v3078_v41 = vadd.f32 %v8915_v49, %v3077_v0  ;;  %6257 = vpow2.f32 %v3028_v55  ;;  %v3101_v20 = vadd.f32 %v8932_v5, %v3100_v58  ;;  %v8944_v36 = vpop.eup %6251  ;;  %v3036_v55 = vmul.f32 1.442695, %v10250_v13 }
 0x4f2   : >> { %6259 = vpow2.f32 %v3030_v29  ;;  %v3038_v29 = vmul.f32 1.442695, %v10251_v9 }
 0x4f3   : >> { %v3079_v35 = vrot.slane %v3078_v41, 4  ;;  %v3102_v19 = vadd.f32 %v8938_v46, %v3101_v20  ;;  %6261 = vpow2.f32 %v3032_v37  ;;  %v3040_v37 = vmul.f32 1.442695, %v10252_v12 }
 0x4f4   : >> { %6263 = vpow2.f32 %v3034_v43  ;;  %v3042_v43 = vmul.f32 1.442695, %v10253_v54 }
 0x4f5   : >> { %v3080_v0 = vadd.f32 %v3079_v35, %v3078_v41  ;;  %v3103_v41 = vadd.f32 %v8944_v36, %v3102_v19  ;;  %v8950_v58 = vpop.eup %6253  ;;  %6265 = vpow2.f32 %v3036_v55  ;;  %v3044_v55 = vmul.f32 1.442695, %v10254_v4 }
 0x4f6   : >> { %v8956_v25 = vpop.eup %6255  ;;  %6267 = vpow2.f32 %v3038_v29  ;;  %v10255_v29 = vld [vmem:[#allocation127_spill] sm:$0xff] }
 0x4f7   : >> { %v3081_v52 = vrot.slane %v3080_v0, 2  ;;  %v3104_v20 = vadd.f32 %v8950_v58, %v3103_v41 }
 0x4f9   : >> { %v3082_v35 = vadd.f32 %v3081_v52, %v3080_v0  ;;  %v3105_v52 = vadd.f32 %v8956_v25, %v3104_v20 }
 0x4fb   : >> { %v3083_v6 = vrot.slane %v3082_v35, 1  ;;  %v8962_v19 = vpop.eup %6257 }
 0x4fc   : >> { %v3106_v13 = vadd.f32 %v8962_v19, %v3105_v52  ;;  %v8968_v41 = vpop.eup %6259 }
 0x4fd   : >> { %v3084_v0 = vadd.f32 %v3083_v6, %v3082_v35  ;;  %v8974_v9 = vpop.eup %6261  ;;  %v10256_v6 = vsub.f32 %v10255_v29, %v8514_v27  ;;  %v10258_v29 = vld [vmem:[#allocation129_spill] sm:$0xff] }
 0x4fe   : >> { %v3107_v35 = vadd.f32 %v8968_v41, %v3106_v13  ;;  %v8980_v12 = vpop.eup %6263 }
 0x4ff   : >> { %6269 = vrcp.f32 %v3084_v0  ;;  %v3046_v23 = vmul.f32 1.442695, %v10256_v6  ;;  %v8983_v0 = vpop.eup %6265 }
 0x500   : >> { %6271 = vpow2.f32 %v3040_v37  ;;  %v3108_v20 = vadd.f32 %v8974_v9, %v3107_v35  ;;  %v8986_v52 = vpop.eup %6267 }
 0x501   : >> { %6273 = vpow2.f32 %v3042_v43 }
 0x502   : >> { %6275 = vpow2.f32 %v3044_v55  ;;  %v3109_v37 = vadd.f32 %v8980_v12, %v3108_v20  ;;  %v10257_v55 = vld [vmem:[#allocation128_spill] sm:$0xff] }
 0x503   : >> { %6277 = vpow2.f32 %v3046_v23 }
 0x504   : >> { %v3110_v8 = vadd.f32 %v8983_v0, %v3109_v37 }
 0x506   : >> { %v3111_v43 = vadd.f32 %v8986_v52, %v3110_v8 }
 0x509   : >> { %v8988_v54 = vpop.eup %6269 }
 0x50a   : >> { %v8991_v27 = vpop.eup %6271  ;;  %v3140_v13 = vmul.f32 %v8988_v54, %v8754_v40  ;;  %v3141_v4 = vmul.f32 %v8988_v54, %v8760_v16  ;;  %v3124_v35 = vmul.f32 %v8988_v54, %v10257_v55  ;;  %v3125_v6 = vmul.f32 %v8988_v54, %v10258_v29 }
 0x50b   : >> { %v3112_v23 = vadd.f32 %v8991_v27, %v3111_v43  ;;  %v3142_v20 = vmul.f32 %v8988_v54, %v8776_v31  ;;  %v3143_v37 = vmul.f32 %v8988_v54, %v8789_v38  ;;  %v9006_v8 = vpop.eup %6273  ;;  %v3126_v16 = vmul.f32 %v8988_v54, %v10259_v59  ;;  %v10260_v43 = vld [vmem:[#allocation106_spill] sm:$0xff] }
 0x50c   : >> { %v3196_v40 = vpack.c.bf16 %v3141_v4, %v3140_v13  ;;  %v3188_v57 = vpack.c.bf16 %v3125_v6, %v3124_v35  ;;  %v3144_v55 = vmul.f32 %v8988_v54, %v8801_v50  ;;  %v3127_v44 = vmul.f32 %v8988_v54, %v10260_v43  ;;  %v9017_v38 = vpop.eup %6275 }
 0x50d   : >> { %v3113_v29 = vadd.f32 %v9006_v8, %v3112_v23  ;;  %v3197_v28 = vpack.c.bf16 %v3143_v37, %v3142_v20  ;;  %v3145_v31 = vmul.f32 %v8988_v54, %v8813_v56  ;;  %v3146_v13 = vmul.f32 %v8988_v54, %v8825_v17  ;;  %v9024_v35 = vpop.eup %6277  ;;  %v10261_v37 = vld [vmem:[#allocation107_spill] sm:$0xff] }
 0x50e   : >> { %5750 = vmatprep.subr.bf16.mxu0 %v3196_v40  ;;  %v3147_v59 = vmul.f32 %v8988_v54, %v8837_v61  ;;  %v3148_v56 = vmul.f32 %v8988_v54, %v8849_v3  ;;  %v3149_v23 = vmul.f32 %v8988_v54, %v8861_v7  ;;  %v3189_v17 = vpack.c.bf16 %v3127_v44, %v3126_v16 }
 0x50f   : >> { %v3114_v50 = vadd.f32 %v9017_v38, %v3113_v29  ;;  %5751 = vmatpush3.bf16.msra.mxu0 %v3188_v57  ;;  %v3198_v4 = vpack.c.bf16 %v3145_v31, %v3144_v55  ;;  %v3128_v61 = vmul.f32 %v8988_v54, %v10261_v37  ;;  %v3129_v57 = vmul.f32 %v8988_v54, %v8659_v51 }
 0x510   : >> { %5752 = vmatprep.subr.bf16.mxu0 %v3197_v28  ;;  %v3199_v6 = vpack.c.bf16 %v3147_v59, %v3146_v13  ;;  %v3200_v40 = vpack.c.bf16 %v3149_v23, %v3148_v56  ;;  %v3150_v28 = vmul.f32 %v8988_v54, %v8870_v42  ;;  %v3151_v55 = vmul.f32 %v8988_v54, %v8879_v15 }
 0x511   : >> { %v3115_v20 = vadd.f32 %v9024_v35, %v3114_v50  ;;  %v3152_v7 = vmul.f32 %v8988_v54, %v8888_v48  ;;  %v3130_v44 = vmul.f32 %v8988_v54, %v8668_v32  ;;  %v3131_v16 = vmul.f32 %v8988_v54, %v8674_v2 }
 0x512   : >> { %v3201_v51 = vpack.c.bf16 %v3151_v55, %v3150_v28  ;;  %v3153_v29 = vmul.f32 %v8988_v54, %v8897_v45  ;;  %v3190_v43 = vpack.c.bf16 %v3129_v57, %v3128_v61  ;;  %v3154_v15 = vmul.f32 %v8988_v54, %v8906_v30  ;;  %v1900_v55 = vld [vmem:[%s8732_s15 + $0x8] sm:$0xff] }
 0x513   : >> { %v3116_v3 = vrot.slane %v3115_v20, 4  ;;  %5753 = vmatpush3.bf16.msra.mxu0 %v3189_v17  ;;  %v3155_v31 = vmul.f32 %v8988_v54, %v8915_v49  ;;  %v3191_v50 = vpack.c.bf16 %v3131_v16, %v3130_v44  ;;  %v3132_v2 = vmul.f32 %v8988_v54, %v8680_v21 }
 0x514   : >> { %5754 = vmatprep.subr.bf16.mxu0 %v3198_v4  ;;  %v3202_v48 = vpack.c.bf16 %v3153_v29, %v3152_v7  ;;  %v3133_v45 = vmul.f32 %v8988_v54, %v8689_v62  ;;  %v3134_v49 = vmul.f32 %v8988_v54, %v8698_v53  ;;  %v3135_v23 = vmul.f32 %v8988_v54, %v8707_v14 }
 0x515   : >> { %v3117_v42 = vadd.f32 %v3116_v3, %v3115_v20  ;;  %v3203_v59 = vpack.c.bf16 %v3155_v31, %v3154_v15  ;;  %v3136_v21 = vmul.f32 %v8988_v54, %v8716_v26  ;;  %v3137_v62 = vmul.f32 %v8988_v54, %v8725_v1  ;;  %v1901_v15 = vld [vmem:[%s8732_s15 + $0x10] sm:$0xff]  ;;  %v10262_v31 = vld [vmem:[#allocation110_spill] sm:$0xff] }
 0x516   : >> { %v3192_v56 = vpack.c.bf16 %v3133_v45, %v3132_v2  ;;  %v3138_v17 = vmul.f32 %v8988_v54, %v8740_v22  ;;  %v3139_v53 = vmul.f32 %v8988_v54, %v8749_v33  ;;  %v1891_v2 = vld [vmem:[%s9095_s2 + $0x10] sm:$0xff]  ;;  %v1902_v45 = vld [vmem:[%s8732_s15 + $0x18] sm:$0xff] }
 0x517   : >> { %v3118_v13 = vrot.slane %v3117_v42, 2  ;;  %5755 = vmatpush3.bf16.msra.mxu0 %v3190_v43  ;;  %v3194_v20 = vpack.c.bf16 %v3137_v62, %v3136_v21  ;;  %v1890_v43 = vld [vmem:[%s9095_s2 + $0x8] sm:$0xff]  ;;  %v10268_v21 = vld [vmem:[#allocation113_spill] sm:$0xff] }
 0x518   : >> { %5756 = vmatprep.subr.bf16.mxu0 %v3199_v6  ;;  %v3193_v6 = vpack.c.bf16 %v3135_v23, %v3134_v49  ;;  %v3195_v37 = vpack.c.bf16 %v3139_v53, %v3138_v17  ;;  %v10267_v49 = vld [vmem:[#allocation116_spill] sm:$0xff]  ;;  %v1892_v53 = vld [vmem:[%s9095_s2 + $0x18] sm:$0xff] }
 0x519   : >> { %v3119_v32 = vadd.f32 %v3118_v13, %v3117_v42  ;;  %v10263_v13 = vld [vmem:[#allocation112_spill] sm:$0xff] }
 0x51b   : >> { %v3120_v4 = vrot.slane %v3119_v32, 1  ;;  %5757 = vmatpush3.bf16.msra.mxu0 %v3191_v50 }
 0x51c   : >> { %5758 = vmatprep.subr.bf16.mxu0 %v3200_v40 }
 0x51d   : >> { %v3121_v30 = vadd.f32 %v3120_v4, %v3119_v32  ;;  %v10265_v32 = vld [vmem:[#allocation111_spill] sm:$0xff] }
 0x51f   : >> { %6279 = vrcp.f32 %v3121_v30  ;;  %5759 = vmatpush3.bf16.msra.mxu0 %v3192_v56  ;;  %v10266_v30 = vld [vmem:[#allocation114_spill] sm:$0xff] }
 0x520   : >> { %5760 = vmatprep.subr.bf16.mxu0 %v3201_v51 }
 0x523   : >> { %5761 = vmatpush3.bf16.msra.mxu0 %v3193_v6 }
 0x524   : >> { %5762 = vmatprep.subr.bf16.mxu0 %v3202_v48 }
 0x527   : >> { %5763 = vmatpush3.bf16.msra.mxu0 %v3194_v20  ;;  %v10269_v20 = vld [vmem:[#allocation115_spill] sm:$0xff] }
 0x528   : >> { %5764 = vmatprep.subr.bf16.mxu0 %v3203_v59 }
 0x529   : >> { %v9067_v14 = vpop.eup %6279 }
 0x52a   : >> { %v3172_v26 = vmul.f32 %v9067_v14, %v8926_v63  ;;  %v3173_v1 = vmul.f32 %v9067_v14, %v8932_v5  ;;  %v3156_v61 = vmul.f32 %v9067_v14, %v8765_v47  ;;  %v3157_v22 = vmul.f32 %v9067_v14, %v8771_v34 }
 0x52b   : >> { %v3174_v33 = vmul.f32 %v9067_v14, %v8938_v46  ;;  %v3175_v54 = vmul.f32 %v9067_v14, %v8944_v36  ;;  %v3158_v57 = vmul.f32 %v9067_v14, %v8784_v10  ;;  %v3159_v63 = vmul.f32 %v9067_v14, %v8796_v39  ;;  %5765 = vmatpush3.bf16.msra.mxu0 %v3195_v37  ;;  %v1889_v39 = vld [vmem:[%s9095_s2] sm:$0xff] }
 0x52c   : >> { %v3212_v5 = vpack.c.bf16 %v3173_v1, %v3172_v26  ;;  %v3204_v47 = vpack.c.bf16 %v3157_v22, %v3156_v61  ;;  %v3176_v40 = vmul.f32 %v9067_v14, %v8950_v58  ;;  %v3177_v34 = vmul.f32 %v9067_v14, %v8956_v25  ;;  %v1893_v26 = vld [vmem:[%s9095_s2 + $0x20] sm:$0xff]  ;;  %v1904_v1 = vld [vmem:[%s8732_s15 + $0x28] sm:$0xff]  ;;  %v1905_v22 = vld [vmem:[%s8732_s15 + $0x30] sm:$0xff] }
 0x52d   : >> { %v3213_v46 = vpack.c.bf16 %v3175_v54, %v3174_v33  ;;  %v3178_v36 = vmul.f32 %v9067_v14, %v8962_v19  ;;  %v3179_v10 = vmul.f32 %v9067_v14, %v8968_v41  ;;  %v3180_v58 = vmul.f32 %v9067_v14, %v8974_v9  ;;  %v1894_v61 = vld [vmem:[%s9095_s2 + $0x28] sm:$0xff]  ;;  %v1895_v33 = vld [vmem:[%s9095_s2 + $0x30] sm:$0xff]  ;;  %v1906_v54 = vld [vmem:[%s8732_s15 + $0x38] sm:$0xff] }
 0x52e   : >> { %5790 = vmatprep.subr.bf16.mxu1 %v3212_v5  ;;  %v3214_v28 = vpack.c.bf16 %v3177_v34, %v3176_v40  ;;  %v3181_v25 = vmul.f32 %v9067_v14, %v8980_v12  ;;  %v3205_v3 = vpack.c.bf16 %v3159_v63, %v3158_v57  ;;  %v3182_v19 = vmul.f32 %v9067_v14, %v8983_v0 }
 0x52f   : >> { %5791 = vmatpush3.bf16.msra.mxu1 %v3204_v47  ;;  %v3215_v7 = vpack.c.bf16 %v3179_v10, %v3178_v36  ;;  %v3160_v41 = vmul.f32 %v9067_v14, %v8808_v24  ;;  %v3161_v44 = vmul.f32 %v9067_v14, %v8820_v60  ;;  %v3183_v9 = vmul.f32 %v9067_v14, %v8986_v52 }
 0x530   : >> { %5792 = vmatprep.subr.bf16.mxu1 %v3213_v46  ;;  %v3216_v16 = vpack.c.bf16 %v3181_v25, %v3180_v58  ;;  %3253 = vmatmul.mubr.bf16.vlgmr.msra.gmra.mrb[32].mxu0 %v1889_v39  ;;  %v3184_v12 = vmul.f32 %v9067_v14, %v8991_v27  ;;  %v3185_v51 = vmul.f32 %v9067_v14, %v9006_v8 }
 0x531   : >> { %3260 = vmatprep.mubr.bf16.mxu0 %v1900_v55  ;;  %v3217_v0 = vpack.c.bf16 %v3183_v9, %v3182_v19  ;;  %v3186_v24 = vmul.f32 %v9067_v14, %v9017_v38  ;;  %v3187_v29 = vmul.f32 %v9067_v14, %v9024_v35  ;;  %v3206_v52 = vpack.c.bf16 %v3161_v44, %v3160_v41 }
 0x532   : >> { %v3218_v60 = vpack.c.bf16 %v3185_v51, %v3184_v12  ;;  %v3162_v42 = vmul.f32 %v9067_v14, %v8832_v11  ;;  %v3163_v27 = vmul.f32 %v9067_v14, %v8844_v18  ;;  %v3164_v48 = vmul.f32 %v9067_v14, %v10262_v31  ;;  %v10264_v18 = vld [vmem:[#allocation109_spill] sm:$0xff] }
 0x533   : >> { %5793 = vmatpush3.bf16.msra.mxu1 %v3205_v3  ;;  %v3219_v8 = vpack.c.bf16 %v3187_v29, %v3186_v24  ;;  %v3165_v35 = vmul.f32 %v9067_v14, %v10263_v13  ;;  %v3166_v59 = vmul.f32 %v9067_v14, %v10264_v18  ;;  %v3167_v50 = vmul.f32 %v9067_v14, %v10265_v32 }
 0x534   : >> { %5794 = vmatprep.subr.bf16.mxu1 %v3214_v28  ;;  %v3207_v38 = vpack.c.bf16 %v3163_v27, %v3162_v42  ;;  %v3168_v56 = vmul.f32 %v9067_v14, %v10266_v30  ;;  %v3169_v23 = vmul.f32 %v9067_v14, %v10267_v49  ;;  %v3170_v62 = vmul.f32 %v9067_v14, %v10268_v21 }
 0x535   : >> { %v3208_v11 = vpack.c.bf16 %v3165_v35, %v3164_v48  ;;  %v3209_v4 = vpack.c.bf16 %v3167_v50, %v3166_v59  ;;  %v3171_v17 = vmul.f32 %v9067_v14, %v10269_v20  ;;  %v1896_v14 = vld [vmem:[%s9095_s2 + $0x38] sm:$0xff] }
 0x536   : >> { %v3210_v6 = vpack.c.bf16 %v3169_v23, %v3168_v56 }
 0x537   : >> { %5795 = vmatpush3.bf16.msra.mxu1 %v3206_v52  ;;  %v3211_v37 = vpack.c.bf16 %v3171_v17, %v3170_v62 }
 0x538   : >> { %5796 = vmatprep.subr.bf16.mxu1 %v3215_v7  ;;  %3261 = vmatmul.mubr.bf16.gmra.mrb[36].mxu0 %v1890_v43 }
 0x539   : >> { %3268 = vmatprep.mubr.bf16.mxu0 %v1901_v15 }
 0x53b   : >> { %5797 = vmatpush3.bf16.msra.mxu1 %v3207_v38 }
 0x53c   : >> { %5798 = vmatprep.subr.bf16.mxu1 %v3216_v16 }
 0x53f   : >> { %5799 = vmatpush3.bf16.msra.mxu1 %v3208_v11 }
 0x540   : >> { %5800 = vmatprep.subr.bf16.mxu1 %v3217_v0  ;;  %3269 = vmatmul.mubr.bf16.gmra.mrb[40].mxu0 %v1891_v2 }
 0x541   : >> { %3276 = vmatprep.mubr.bf16.mxu0 %v1902_v45 }
 0x543   : >> { %5801 = vmatpush3.bf16.msra.mxu1 %v3209_v4 }
 0x544   : >> { %5802 = vmatprep.subr.bf16.mxu1 %v3218_v60 }
 0x547   : >> { %5803 = vmatpush3.bf16.msra.mxu1 %v3210_v6 }
 0x548   : >> { %5804 = vmatprep.subr.bf16.mxu1 %v3219_v8  ;;  %3277 = vmatmul.mubr.bf16.gmra.mrb[44].mxu0 %v1892_v53 }
 0x54b   : >> { %5805 = vmatpush3.bf16.msra.mxu1 %v3211_v37 }
 0x54e   : >> { %3318 = vmatmul.mubr.bf16.vlgmr.msra.gmra.mrb[32].mxu1 %v1893_v26 }
 0x54f   : >> { %3325 = vmatprep.mubr.bf16.mxu1 %v1904_v1 }
 0x556   : >> { %3326 = vmatmul.mubr.bf16.gmra.mrb[36].mxu1 %v1894_v61  ;;  %v10270_v61 = vmov (%p1845_p4), 0  }
 0x557   : >> { %3333 = vmatprep.mubr.bf16.mxu1 %v1905_v22  ;;  %3481 = vmatprep.mubr.bf16.mxu0 (%p1845_p4), %v10270_v61 }
 0x55e   : >> { %3334 = vmatmul.mubr.bf16.gmra.mrb[40].mxu1 %v1895_v33 }
 0x55f   : >> { %3341 = vmatprep.mubr.bf16.mxu1 %v1906_v54 }
 0x566   : >> { %3342 = vmatmul.mubr.bf16.gmra.mrb[44].mxu1 %v1896_v14 }
 0x567   : > { %4043 = vmatprep.mubr.bf16.mxu1 (%p1845_p4), %v10270_v61 }
 0x603   : >> { %v5766_v57 = vpop.f32.mrb[32].mxu0 }
 0x604   : >> { %v5767_v63 = vpop.f32.mrb[33].mxu0 }
 0x605   : >> { %v5768_v5 = vadd.f32 %v5767_v63, %v5766_v57  ;;  %v5769_v47 = vpop.f32.mrb[34].mxu0 }
 0x606   : >> { %v5770_v40 = vpop.f32.mrb[35].mxu0 }
 0x607   : >> { %v5771_v34 = vadd.f32 %v5770_v40, %v5769_v47 }
 0x609   : >> { %v3350_v46 = vpack.c.bf16 %v5771_v34, %v5768_v5 }
 0x60b   : >> { %3360 = vst [vmem:[%s9153_s11] sm:$0xff] %v3350_v46  ;;  %v5772_v28 = vpop.f32.mrb[36].mxu0 }
 0x60c   : >> { %v5773_v36 = vpop.f32.mrb[37].mxu0 }
 0x60d   : >> { %v5774_v10 = vadd.f32 %v5773_v36, %v5772_v28  ;;  %v5775_v39 = vpop.f32.mrb[38].mxu0 }
 0x60e   : >> { %v5776_v58 = vpop.f32.mrb[39].mxu0 }
 0x60f   : >> { %v5777_v25 = vadd.f32 %v5776_v58, %v5775_v39  ;;  %v6282_v39 = vld [vmem:[%s7057_s29 + $0x8] sm:$0xff] (%p1845_p4)   ;;  %v6283_v58 = vld [vmem:[%s7057_s29 + $0x10] sm:$0xff] (%p1845_p4)  }
 0x611   : >> { %v3351_v55 = vpack.c.bf16 %v5777_v25, %v5774_v10  ;;  %v6281_v10 = vld [vmem:[%s7057_s29] sm:$0xff] (%p1845_p4)   ;;  %v6284_v25 = vld [vmem:[%s7057_s29 + $0x18] sm:$0xff] (%p1845_p4)  }
 0x613   : >> { %3361 = vst [vmem:[%s9153_s11 + $0x8] sm:$0xff] %v3351_v55  ;;  %v5778_v3 = vpop.f32.mrb[40].mxu0  ;;  %v6285_v55 = vld [vmem:[%s7057_s29 + $0x20] sm:$0xff] (%p1845_p4)  }
 0x614   : >> { %v5779_v7 = vpop.f32.mrb[41].mxu0 }
 0x615   : >> { %v5780_v19 = vadd.f32 %v5779_v7, %v5778_v3  ;;  %v5781_v41 = vpop.f32.mrb[42].mxu0  ;;  %v6286_v3 = vld [vmem:[%s7057_s29 + $0x28] sm:$0xff] (%p1845_p4)   ;;  %v6287_v7 = vld [vmem:[%s7057_s29 + $0x30] sm:$0xff] (%p1845_p4)  }
 0x616   : >> { %v5782_v44 = vpop.f32.mrb[43].mxu0 }
 0x617   : >> { %v5783_v16 = vadd.f32 %v5782_v44, %v5781_v41 }
 0x619   : >> { %v3352_v9 = vpack.c.bf16 %v5783_v16, %v5780_v19  ;;  %v6288_v19 = vld [vmem:[%s7057_s29 + $0x38] sm:$0xff] (%p1845_p4)  }
 0x61b   : >> { %3362 = vst [vmem:[%s9153_s11 + $0x10] sm:$0xff] %v3352_v9  ;;  %v5784_v12 = vpop.f32.mrb[44].mxu0 }
 0x61c   : >> { %v5785_v51 = vpop.f32.mrb[45].mxu0 }
 0x61d   : >> { %v5786_v0 = vadd.f32 %v5785_v51, %v5784_v12  ;;  %v5787_v24 = vpop.f32.mrb[46].mxu0 }
 0x61e   : >> { %v5788_v60 = vpop.f32.mrb[47].mxu0 }
 0x61f   : >> { %v5789_v29 = vadd.f32 %v5788_v60, %v5787_v24  ;;  %v9184_v60 = vstv (%p1845_p4), %s7074_s9 }
 0x621   : >> { %v5806_v52 = vpop.f32.mrb[32].mxu1  ;;  %v3353_v27 = vpack.c.bf16 %v5789_v29, %v5786_v0 }
 0x622   : >> { %v5807_v42 = vpop.f32.mrb[33].mxu1 }
 0x623   : >> { %v5808_v8 = vadd.f32 %v5807_v42, %v5806_v52  ;;  %v5809_v43 = vpop.f32.mrb[34].mxu1  ;;  %3363 = vst [vmem:[%s9153_s11 + $0x18] sm:$0xff] %v3353_v27 }
 0x624   : >> { %v5810_v15 = vpop.f32.mrb[35].mxu1 }
 0x625   : >> { %v5811_v38 = vadd.f32 %v5810_v15, %v5809_v43 }
 0x627   : >> { %v3354_v31 = vpack.c.bf16 %v5811_v38, %v5808_v8  ;;  %v10271_v38 = vld [vmem:[#allocation41_spill] sm:$0xff] (%p1845_p4) }
 0x629   : >> { %3364 = vst [vmem:[%s9153_s11 + $0x20] sm:$0xff] %v3354_v31  ;;  %v5812_v48 = vpop.f32.mrb[36].mxu1 }
 0x62a   : >> { %v5813_v13 = vpop.f32.mrb[37].mxu1 }
 0x62b   : >> { %v5814_v35 = vadd.f32 %v5813_v13, %v5812_v48  ;;  %v5815_v11 = vpop.f32.mrb[38].mxu1  ;;  %v10272_v13 = vld [vmem:[#allocation35_spill] sm:$0xff] (%p1845_p4) }
 0x62c   : >> { %v5816_v18 = vpop.f32.mrb[39].mxu1 }
 0x62d   : >> { %v5817_v59 = vadd.f32 %v5816_v18, %v5815_v11  ;;  %v10273_v18 = vld [vmem:[#allocation40_spill] sm:$0xff] (%p1845_p4) }
 0x62f   : >> { %v3355_v32 = vpack.c.bf16 %v5817_v59, %v5814_v35 }
 0x631   : >> { %3365 = vst [vmem:[%s9153_s11 + $0x28] sm:$0xff] %v3355_v32  ;;  %v5818_v50 = vpop.f32.mrb[40].mxu1  ;;  %v10274_v32 = vld [vmem:[#allocation43_spill] sm:$0xff] (%p1845_p4) }
 0x632   : >> { %v5819_v2 = vpop.f32.mrb[41].mxu1 }
 0x633   : >> { %v5820_v45 = vadd.f32 %v5819_v2, %v5818_v50  ;;  %v5821_v4 = vpop.f32.mrb[42].mxu1 }
 0x634   : >> { %v5822_v30 = vpop.f32.mrb[43].mxu1 }
 0x635   : >> { %v5823_v56 = vadd.f32 %v5822_v30, %v5821_v4  ;;  %v10275_v4 = vld [vmem:[#allocation34_spill] sm:$0xff] (%p1845_p4) }
 0x637   : >> { %v3356_v49 = vpack.c.bf16 %v5823_v56, %v5820_v45  ;;  %v10276_v56 = vld [vmem:[#allocation36_spill] sm:$0xff] (%p1845_p4) }
 0x639   : >> { %3366 = vst [vmem:[%s9153_s11 + $0x30] sm:$0xff] %v3356_v49  ;;  %v5824_v23 = vpop.f32.mrb[44].mxu1 }
 0x63a   : >> { %v5825_v6 = vpop.f32.mrb[45].mxu1 }
 0x63b   : >> { %v5826_v21 = vadd.f32 %v5825_v6, %v5824_v23  ;;  %v5827_v62 = vpop.f32.mrb[46].mxu1  ;;  %1847 = sbr.rel (!%p1845_p4) target bundleno = 782 (0x30e), region = 167 }
 0x63c   : >> { %v5828_v20 = vpop.f32.mrb[47].mxu1 }
 0x63d   : >> { %v5829_v17 = vadd.f32 %v5828_v20, %v5827_v62 }
 0x63f   : >> { %v3357_v53 = vpack.c.bf16 %v5829_v17, %v5826_v21 }
 0x641   : >> { %3367 = vst [vmem:[%s9153_s11 + $0x38] sm:$0xff] %v3357_v53 }
 0x648   : > { %v3377_v37 = vld [vmem:[#allocation6 + $0x40] sm:$0xff]  ;;  %v3378_v1 = vld [vmem:[#allocation6 + $0x48] sm:$0xff]  ;;  %v3379_v33 = vld [vmem:[#allocation6 + $0x50] sm:$0xff] }
 0x649   : > { %v3368_v26 = vld [vmem:[#allocation6] sm:$0xff]  ;;  %3449 = vmatprep.subr.bf16.mxu0 %v3377_v37  ;;  %v3369_v22 = vld [vmem:[#allocation6 + $0x8] sm:$0xff]  ;;  %v3370_v54 = vld [vmem:[#allocation6 + $0x10] sm:$0xff] }
 0x64a   : > { %3450 = vmatpush1.bf16.msra.mxu0 %v3368_v26  ;;  %v3380_v14 = vld [vmem:[#allocation6 + $0x58] sm:$0xff]  ;;  %v3381_v63 = vld [vmem:[#allocation6 + $0x60] sm:$0xff]  ;;  %v3382_v47 = vld [vmem:[#allocation6 + $0x68] sm:$0xff] }
 0x64b   : > { %3451 = vmatprep.subr.bf16.mxu0 %v3378_v1  ;;  %v3371_v57 = vld [vmem:[#allocation6 + $0x18] sm:$0xff]  ;;  %v3372_v5 = vld [vmem:[#allocation6 + $0x20] sm:$0xff]  ;;  %v3373_v40 = vld [vmem:[#allocation6 + $0x28] sm:$0xff] }
 0x64c   : > { %v3383_v34 = vld [vmem:[#allocation6 + $0x70] sm:$0xff]  ;;  %v3384_v28 = vld [vmem:[#allocation6 + $0x78] sm:$0xff] }
 0x64d   : > { %v3374_v46 = vld [vmem:[#allocation6 + $0x30] sm:$0xff]  ;;  %v3375_v36 = vld [vmem:[#allocation6 + $0x38] sm:$0xff] }
 0x64e   : > { %3452 = vmatpush1.bf16.msra.mxu0 %v3369_v22  ;;  %v10277_v37 = vld [vmem:[#allocation45_spill] sm:$0xff] }
 0x64f   : > { %3453 = vmatprep.subr.bf16.mxu0 %v3379_v33  ;;  %v10278_v33 = vld [vmem:[#allocation37_spill] sm:$0xff] }
 0x652   : > { %3454 = vmatpush1.bf16.msra.mxu0 %v3370_v54 }
 0x653   : > { %3455 = vmatprep.subr.bf16.mxu0 %v3380_v14 }
 0x656   : > { %3456 = vmatpush1.bf16.msra.mxu0 %v3371_v57 }
 0x657   : > { %3457 = vmatprep.subr.bf16.mxu0 %v3381_v63  ;;  %v10279_v63 = vld [vmem:[#allocation47_spill] sm:$0xff] }
 0x65a   : > { %3458 = vmatpush1.bf16.msra.mxu0 %v3372_v5 }
 0x65b   : > { %3459 = vmatprep.subr.bf16.mxu0 %v3382_v47 }
 0x65e   : > { %3460 = vmatpush1.bf16.msra.mxu0 %v3373_v40 }
 0x65f   : > { %3461 = vmatprep.subr.bf16.mxu0 %v3383_v34 }
 0x662   : > { %3462 = vmatpush1.bf16.msra.mxu0 %v3374_v46  ;;  %v10280_v46 = vld [vmem:[#allocation38_spill] sm:$0xff] }
 0x663   : > { %3463 = vmatprep.subr.bf16.mxu0 %v3384_v28 }
 0x666   : > { %3464 = vmatpush1.bf16.msra.mxu0 %v3375_v36 }
 0x669   : > { %3482 = vmatmul.mubr.bf16.vlgmr.msra.gmra.mrb[0].mxu0 %v6281_v10 }
 0x66a   : > { %3491 = vmatprep.mubr.bf16.mxu0 %v10270_v61 }
 0x671   : > { %3492 = vmatmul.mubr.bf16.gmra.mrb[4].mxu0 %v6282_v39 }
 0x672   : > { %3501 = vmatprep.mubr.bf16.mxu0 %v10270_v61 }
 0x679   : > { %3502 = vmatmul.mubr.bf16.gmra.mrb[8].mxu0 %v6283_v58 }
 0x67a   : > { %3511 = vmatprep.mubr.bf16.mxu0 %v10270_v61 }
 0x681   : > { %3512 = vmatmul.mubr.bf16.gmra.mrb[12].mxu0 %v6284_v25 }
 0x682   : > { %3521 = vmatprep.mubr.bf16.mxu0 %v10270_v61 }
 0x689   : > { %3522 = vmatmul.mubr.bf16.gmra.mrb[16].mxu0 %v6285_v55 }
 0x68a   : > { %3531 = vmatprep.mubr.bf16.mxu0 %v10270_v61 }
 0x691   : > { %3532 = vmatmul.mubr.bf16.gmra.mrb[20].mxu0 %v6286_v3 }
 0x692   : > { %3541 = vmatprep.mubr.bf16.mxu0 %v10270_v61 }
 0x699   : > { %3542 = vmatmul.mubr.bf16.gmra.mrb[24].mxu0 %v6287_v7 }
 0x69a   : > { %3551 = vmatprep.mubr.bf16.mxu0 %v10270_v61 }
 0x6a1   : > { %3552 = vmatmul.mubr.bf16.gmra.mrb[28].mxu0 %v6288_v19 }
 0x73c   : > { %v3483_v41 = vpop.f32.mrb[0].mxu0 }
 0x73d   : > { %v3485_v44 = vpop.f32.mrb[1].mxu0  ;;  %v3563_v42 = vmul.f32 %v9184_v60, %v3483_v41 }
 0x73e   : > { %v3487_v16 = vpop.f32.mrb[2].mxu0  ;;  %v3564_v8 = vmul.f32 %v9184_v60, %v3485_v44  ;;  %v10281_v44 = vld [vmem:[#allocation49_spill] sm:$0xff] }
 0x73f   : > { %v3489_v9 = vpop.f32.mrb[3].mxu0  ;;  %v3565_v29 = vmul.f32 %v9184_v60, %v3487_v16  ;;  %v9199_v59 = vadd.f32 %v3563_v42, %v10273_v18 }
 0x740   : > { %v3566_v52 = vmul.f32 %v9184_v60, %v3489_v9  ;;  %v9206_v30 = vadd.f32 %v3564_v8, %v10275_v4 }
 0x741   : > { %v9193_v31 = vadd.f32 %v3565_v29, %v10271_v38  ;;  %v3627_v17 = vmul.f32 %v9199_v59, %v9199_v59 }
 0x742   : > { %v9196_v35 = vadd.f32 %v3566_v52, %v10272_v13  ;;  %v3628_v1 = vmul.f32 %v9206_v30, %v9206_v30 }
 0x743   : > { %v3629_v6 = vmul.f32 %v9193_v31, %v9193_v31 }
 0x744   : > { %v3493_v12 = vpop.f32.mrb[4].mxu0  ;;  %v3630_v62 = vmul.f32 %v9196_v35, %v9196_v35 }
 0x745   : > { %v3495_v51 = vpop.f32.mrb[5].mxu0  ;;  %v3567_v27 = vmul.f32 %v9184_v60, %v3493_v12  ;;  %v3659_v57 = vadd.f32 %v3629_v6, %v3627_v17  ;;  %v10282_v12 = vld [vmem:[#allocation39_spill] sm:$0xff] }
 0x746   : > { %v3497_v0 = vpop.f32.mrb[6].mxu0  ;;  %v3568_v43 = vmul.f32 %v9184_v60, %v3495_v51  ;;  %v3680_v34 = vadd.f32 %v3630_v62, %v3628_v1  ;;  %v10286_v62 = vld [vmem:[#allocation44_spill] sm:$0xff] }
 0x747   : > { %v3499_v24 = vpop.f32.mrb[7].mxu0  ;;  %v9202_v50 = vadd.f32 %v3567_v27, %v10274_v32  ;;  %v3569_v2 = vmul.f32 %v9184_v60, %v3497_v0  ;;  %v10284_v27 = vld [vmem:[#allocation42_spill] sm:$0xff] }
 0x748   : > { %v9209_v49 = vadd.f32 %v3568_v43, %v10276_v56  ;;  %v3570_v23 = vmul.f32 %v9184_v60, %v3499_v24  ;;  %v10283_v24 = vld [vmem:[#allocation51_spill] sm:$0xff]  ;;  %v10285_v56 = vld [vmem:[#allocation53_spill] sm:$0xff] }
 0x749   : > { %v3631_v53 = vmul.f32 %v9202_v50, %v9202_v50  ;;  %v9223_v26 = vadd.f32 %v3569_v2, %v10277_v37 }
 0x74a   : > { %v3632_v22 = vmul.f32 %v9209_v49, %v9209_v49  ;;  %v9230_v54 = vadd.f32 %v3570_v23, %v10278_v33  ;;  %v10288_v33 = vld [vmem:[#allocation46_spill] sm:$0xff] }
 0x74b   : > { %v3660_v39 = vadd.f32 %v3659_v57, %v3631_v53  ;;  %v3633_v58 = vmul.f32 %v9223_v26, %v9223_v26  ;;  %v10287_v53 = vld [vmem:[#allocation55_spill] sm:$0xff] }
 0x74c   : > { %v3503_v15 = vpop.f32.mrb[8].mxu0  ;;  %v3681_v3 = vadd.f32 %v3680_v34, %v3632_v22  ;;  %v3634_v7 = vmul.f32 %v9230_v54, %v9230_v54 }
 0x74d   : > { %v3505_v48 = vpop.f32.mrb[9].mxu0  ;;  %v3571_v21 = vmul.f32 %v9184_v60, %v3503_v15  ;;  %v3661_v0 = vadd.f32 %v3660_v39, %v3633_v58 }
 0x74e   : > { %v3507_v11 = vpop.f32.mrb[10].mxu0  ;;  %v3572_v20 = vmul.f32 %v9184_v60, %v3505_v48  ;;  %v3682_v42 = vadd.f32 %v3681_v3, %v3634_v7  ;;  %v10290_v3 = vld [vmem:[#allocation48_spill] sm:$0xff] }
 0x74f   : > { %v3509_v45 = vpop.f32.mrb[11].mxu0  ;;  %v9233_v5 = vadd.f32 %v3571_v21, %v10279_v63  ;;  %v3573_v47 = vmul.f32 %v9184_v60, %v3507_v11 }
 0x750   : > { %v9237_v28 = vadd.f32 %v3572_v20, %v10280_v46  ;;  %v3574_v36 = vmul.f32 %v9184_v60, %v3509_v45 }
 0x751   : > { %v3635_v41 = vmul.f32 %v9233_v5, %v9233_v5  ;;  %v9249_v16 = vadd.f32 %v3573_v47, %v10281_v44 }
 0x752   : > { %v3636_v9 = vmul.f32 %v9237_v28, %v9237_v28  ;;  %v9254_v51 = vadd.f32 %v3574_v36, %v10282_v12 }
 0x753   : > { %v3662_v38 = vadd.f32 %v3661_v0, %v3635_v41  ;;  %v3637_v48 = vmul.f32 %v9249_v16, %v9249_v16 }
 0x754   : > { %v3513_v14 = vpop.f32.mrb[12].mxu0  ;;  %v3683_v18 = vadd.f32 %v3682_v42, %v3636_v9  ;;  %v3638_v32 = vmul.f32 %v9254_v51, %v9254_v51  ;;  %v10291_v9 = vld [vmem:[#allocation59_spill] sm:$0xff]  ;;  %v10292_v42 = vld [vmem:[#allocation50_spill] sm:$0xff] }
 0x755   : > { %v3515_v40 = vpop.f32.mrb[13].mxu0  ;;  %v3575_v25 = vmul.f32 %v9184_v60, %v3513_v14  ;;  %v3663_v17 = vadd.f32 %v3662_v38, %v3637_v48 }
 0x756   : > { %v3517_v10 = vpop.f32.mrb[14].mxu0  ;;  %v3576_v19 = vmul.f32 %v9184_v60, %v3515_v40  ;;  %v3684_v22 = vadd.f32 %v3683_v18, %v3638_v32  ;;  %v10293_v18 = vld [vmem:[#allocation61_spill] sm:$0xff] }
 0x757   : > { %v3519_v55 = vpop.f32.mrb[15].mxu0  ;;  %v9257_v29 = vadd.f32 %v3575_v25, %v10283_v24  ;;  %v3577_v52 = vmul.f32 %v9184_v60, %v3517_v10  ;;  %v10289_v10 = vld [vmem:[#allocation57_spill] sm:$0xff] }
 0x758   : > { %v9261_v8 = vadd.f32 %v3576_v19, %v10284_v27  ;;  %v3578_v43 = vmul.f32 %v9184_v60, %v3519_v55 }
 0x759   : > { %v3639_v4 = vmul.f32 %v9257_v29, %v9257_v29  ;;  %v9273_v23 = vadd.f32 %v3577_v52, %v10285_v56 }
 0x75a   : > { %v3640_v21 = vmul.f32 %v9261_v8, %v9261_v8  ;;  %v9278_v20 = vadd.f32 %v3578_v43, %v10286_v62 }
 0x75b   : > { %v3664_v63 = vadd.f32 %v3663_v17, %v3639_v4  ;;  %v3641_v47 = vmul.f32 %v9273_v23, %v9273_v23 }
 0x75c   : > { %v3523_v15 = vpop.f32.mrb[16].mxu0  ;;  %v3685_v40 = vadd.f32 %v3684_v22, %v3640_v21  ;;  %v3642_v34 = vmul.f32 %v9278_v20, %v9278_v20 }
 0x75d   : > { %v3579_v13 = vmul.f32 %v9184_v60, %v3523_v15  ;;  %v3525_v11 = vpop.f32.mrb[17].mxu0  ;;  %v3665_v44 = vadd.f32 %v3664_v63, %v3641_v47 }
 0x75e   : > { %v3580_v2 = vmul.f32 %v9184_v60, %v3525_v11  ;;  %v3527_v45 = vpop.f32.mrb[18].mxu0  ;;  %v3686_v52 = vadd.f32 %v3685_v40, %v3642_v34 }
 0x75f   : > { %v3529_v6 = vpop.f32.mrb[19].mxu0  ;;  %v9281_v37 = vadd.f32 %v3579_v13, %v10287_v53  ;;  %v3581_v1 = vmul.f32 %v9184_v60, %v3527_v45  ;;  %v10294_v45 = vld [vmem:[#allocation52_spill] sm:$0xff] }
 0x760   : > { %v9285_v14 = vadd.f32 %v3580_v2, %v10288_v33  ;;  %v3582_v57 = vmul.f32 %v9184_v60, %v3529_v6 }
 0x761   : > { %v3643_v36 = vmul.f32 %v9281_v37, %v9281_v37  ;;  %v9295_v39 = vadd.f32 %v3581_v1, %v10289_v10 }
 0x762   : > { %v3644_v55 = vmul.f32 %v9285_v14, %v9285_v14  ;;  %v9301_v7 = vadd.f32 %v3582_v57, %v10290_v3  ;;  %v10295_v57 = vld [vmem:[#allocation62_spill] sm:$0xff] }
 0x763   : > { %v3666_v15 = vadd.f32 %v3665_v44, %v3643_v36  ;;  %v3645_v38 = vmul.f32 %v9295_v39, %v9295_v39  ;;  %v10296_v36 = vld [vmem:[#allocation54_spill] sm:$0xff] }
 0x764   : > { %v3533_v46 = vpop.f32.mrb[20].mxu0  ;;  %v3687_v48 = vadd.f32 %v3686_v52, %v3644_v55  ;;  %v3646_v13 = vmul.f32 %v9301_v7, %v9301_v7  ;;  %v10297_v55 = vld [vmem:[#allocation63_spill] sm:$0xff] }
 0x765   : > { %v3583_v58 = vmul.f32 %v9184_v60, %v3533_v46  ;;  %v3535_v25 = vpop.f32.mrb[21].mxu0  ;;  %v3667_v6 = vadd.f32 %v3666_v15, %v3645_v38 }
 0x766   : > { %v3584_v19 = vmul.f32 %v9184_v60, %v3535_v25  ;;  %v3537_v41 = vpop.f32.mrb[22].mxu0  ;;  %v3688_v17 = vadd.f32 %v3687_v48, %v3646_v13 }
 0x767   : > { %v9305_v12 = vadd.f32 %v3583_v58, %v10291_v9  ;;  %v3585_v0 = vmul.f32 %v9184_v60, %v3537_v41  ;;  %v3539_v24 = vpop.f32.mrb[23].mxu0  ;;  %v10298_v41 = vld [vmem:[#allocation56_spill] sm:$0xff] }
 0x768   : > { %v9309_v27 = vadd.f32 %v3584_v19, %v10292_v42  ;;  %v3586_v43 = vmul.f32 %v9184_v60, %v3539_v24 }
 0x769   : > { %v3647_v11 = vmul.f32 %v9305_v12, %v9305_v12  ;;  %v9319_v32 = vadd.f32 %v3585_v0, %v10293_v18  ;;  %v10299_v18 = vld [vmem:[#allocation64_spill] sm:$0xff] }
 0x76a   : > { %v3648_v2 = vmul.f32 %v9309_v27, %v9309_v27  ;;  %v9324_v4 = vadd.f32 %v3586_v43, %v10294_v45 }
 0x76b   : > { %v3668_v22 = vadd.f32 %v3667_v6, %v3647_v11  ;;  %v3649_v33 = vmul.f32 %v9319_v32, %v9319_v32  ;;  %v10300_v6 = vld [vmem:[#allocation58_spill] sm:$0xff] }
 0x76c   : > { %v3543_v56 = vpop.f32.mrb[24].mxu0  ;;  %v3689_v34 = vadd.f32 %v3688_v17, %v3648_v2  ;;  %v3650_v46 = vmul.f32 %v9324_v4, %v9324_v4 }
 0x76d   : > { %v3587_v21 = vmul.f32 %v9184_v60, %v3543_v56  ;;  %v3545_v62 = vpop.f32.mrb[25].mxu0  ;;  %v3669_v9 = vadd.f32 %v3668_v22, %v3649_v33 }
 0x76e   : > { %v3588_v53 = vmul.f32 %v9184_v60, %v3545_v62  ;;  %v3547_v1 = vpop.f32.mrb[26].mxu0  ;;  %v3690_v0 = vadd.f32 %v3689_v34, %v3650_v46 }
 0x76f   : > { %v9331_v63 = vadd.f32 %v3587_v21, %v10295_v57  ;;  %v3589_v47 = vmul.f32 %v9184_v60, %v3547_v1  ;;  %v3549_v40 = vpop.f32.mrb[27].mxu0  ;;  %v10301_v1 = vld [vmem:[#allocation65_spill] sm:$0xff] }
 0x770   : > { %v9337_v10 = vadd.f32 %v3588_v53, %v10296_v36  ;;  %v3590_v58 = vmul.f32 %v9184_v60, %v3549_v40 }
 0x771   : > { %v3651_v25 = vmul.f32 %v9331_v63, %v9331_v63  ;;  %v9343_v3 = vadd.f32 %v3589_v47, %v10297_v55  ;;  %v10302_v47 = vld [vmem:[#allocation60_spill] sm:$0xff] }
 0x772   : > { %v3652_v19 = vmul.f32 %v9337_v10, %v9337_v10  ;;  %v9348_v44 = vadd.f32 %v3590_v58, %v10298_v41 }
 0x773   : > { %v3670_v52 = vadd.f32 %v3669_v9, %v3651_v25  ;;  %v3653_v42 = vmul.f32 %v9343_v3, %v9343_v3 }
 0x774   : > { %v3553_v24 = vpop.f32.mrb[28].mxu0  ;;  %v3691_v38 = vadd.f32 %v3690_v0, %v3652_v19  ;;  %v3654_v48 = vmul.f32 %v9348_v44, %v9348_v44 }
 0x775   : > { %v3591_v43 = vmul.f32 %v9184_v60, %v3553_v24  ;;  %v3555_v15 = vpop.f32.mrb[29].mxu0  ;;  %v3671_v17 = vadd.f32 %v3670_v52, %v3653_v42 }
 0x776   : > { %v3592_v13 = vmul.f32 %v9184_v60, %v3555_v15  ;;  %v3557_v11 = vpop.f32.mrb[30].mxu0  ;;  %v3692_v33 = vadd.f32 %v3691_v38, %v3654_v48 }
 0x777   : > { %v9357_v2 = vadd.f32 %v3591_v43, %v10299_v18  ;;  %v3593_v45 = vmul.f32 %v9184_v60, %v3557_v11  ;;  %v3559_v56 = vpop.f32.mrb[31].mxu0 }
 0x778   : > { %v9361_v21 = vadd.f32 %v3592_v13, %v10300_v6  ;;  %v3594_v62 = vmul.f32 %v9184_v60, %v3559_v56 }
 0x779   : > { %v3655_v53 = vmul.f32 %v9357_v2, %v9357_v2  ;;  %v9367_v22 = vadd.f32 %v3593_v45, %v10301_v1 }
 0x77a   : > { %v3656_v57 = vmul.f32 %v9361_v21, %v9361_v21  ;;  %v9372_v40 = vadd.f32 %v3594_v62, %v10302_v47 }
 0x77b   : > { %v3672_v34 = vadd.f32 %v3671_v17, %v3655_v53  ;;  %v3657_v46 = vmul.f32 %v9367_v22, %v9367_v22 }
 0x77c   : > { %v3693_v36 = vadd.f32 %v3692_v33, %v3656_v57  ;;  %v3658_v60 = vmul.f32 %v9372_v40, %v9372_v40 }
 0x77d   : > { %v3673_v58 = vadd.f32 %v3672_v34, %v3657_v46 }
 0x77e   : > { %v3694_v25 = vadd.f32 %v3693_v36, %v3658_v60 }
 0x77f   : > { %v3674_v55 = vrot.slane %v3673_v58, 4 }
 0x780   : > { %v3695_v19 = vrot.slane %v3694_v25, 4 }
 0x781   : > { %v3675_v41 = vadd.f32 %v3674_v55, %v3673_v58 }
 0x782   : > { %v3696_v9 = vadd.f32 %v3695_v19, %v3694_v25 }
 0x783   : > { %v3676_v0 = vrot.slane %v3675_v41, 2 }
 0x784   : > { %v3697_v24 = vrot.slane %v3696_v9, 2 }
 0x785   : > { %v3677_v52 = vadd.f32 %v3676_v0, %v3675_v41 }
 0x786   : > { %v3698_v42 = vadd.f32 %v3697_v24, %v3696_v9 }
 0x787   : > { %v3678_v43 = vrot.slane %v3677_v52, 1 }
 0x788   : > { %v3699_v15 = vrot.slane %v3698_v42, 1 }
 0x789   : > { %v3679_v38 = vadd.f32 %v3678_v43, %v3677_v52 }
 0x78a   : > { %v3700_v48 = vadd.f32 %v3699_v15, %v3698_v42 }
 0x78b   : > { %v3701_v13 = vmul.f32 0.0078125, %v3679_v38 }
 0x78c   : > { %v3702_v11 = vmul.f32 0.0078125, %v3700_v48 }
 0x78d   : > { %v3703_v18 = vadd.f32 1e-06, %v3701_v13 }
 0x78e   : > { %v3704_v45 = vadd.f32 1e-06, %v3702_v11 }
 0x78f   : > { %6369 = vrsqrt.f32 %v3703_v18 }
 0x790   : > { %6371 = vrsqrt.f32 %v3704_v45 }
 0x799   : > { %v6370_v56 = vpop.eup %6369 }
 0x79a   : > { %v6372_v6 = vpop.eup %6371  ;;  %v3707_v62 = vmul.f32 %v6370_v56, %v9199_v59  ;;  %v3709_v17 = vmul.f32 %v6370_v56, %v9193_v31  ;;  %v3711_v46 = vmul.f32 %v6370_v56, %v9202_v50  ;;  %v3713_v36 = vmul.f32 %v6370_v56, %v9223_v26 }
 0x79b   : > { %v3708_v53 = vmul.f32 %v6372_v6, %v9206_v30  ;;  %v3710_v1 = vmul.f32 %v6372_v6, %v9196_v35  ;;  %v3712_v33 = vmul.f32 %v6372_v6, %v9209_v49  ;;  %v3714_v57 = vmul.f32 %v6372_v6, %v9230_v54 }
 0x79c   : > { %v3739_v34 = vpack.c.bf16 %v3709_v17, %v3707_v62  ;;  %v3716_v58 = vmul.f32 %v6372_v6, %v9237_v28  ;;  %v3718_v25 = vmul.f32 %v6372_v6, %v9254_v51  ;;  %v3741_v55 = vpack.c.bf16 %v3713_v36, %v3711_v46 }
 0x79d   : > { %v3740_v47 = vpack.c.bf16 %v3710_v1, %v3708_v53  ;;  %v3742_v60 = vpack.c.bf16 %v3714_v57, %v3712_v33  ;;  %v3715_v19 = vmul.f32 %v6370_v56, %v9233_v5  ;;  %v3717_v41 = vmul.f32 %v6370_v56, %v9249_v16 }
 0x79e   : > { %v3744_v9 = vpack.c.bf16 %v3718_v25, %v3716_v58  ;;  %v3720_v0 = vmul.f32 %v6372_v6, %v9261_v8  ;;  %v3722_v24 = vmul.f32 %v6372_v6, %v9278_v20  ;;  %v3719_v42 = vmul.f32 %v6370_v56, %v9257_v29 }
 0x79f   : > { %4011 = vmatprep.subr.bf16.mxu1 %v3740_v47  ;;  %v3743_v52 = vpack.c.bf16 %v3717_v41, %v3715_v19  ;;  %v3721_v43 = vmul.f32 %v6370_v56, %v9273_v23  ;;  %v3724_v38 = vmul.f32 %v6372_v6, %v9285_v14  ;;  %v3726_v48 = vmul.f32 %v6372_v6, %v9301_v7 }
 0x7a0   : > { %4012 = vmatpush1.bf16.msra.mxu1 %v3739_v34  ;;  %v3746_v15 = vpack.c.bf16 %v3722_v24, %v3720_v0  ;;  %v3723_v11 = vmul.f32 %v6370_v56, %v9281_v37  ;;  %v3725_v18 = vmul.f32 %v6370_v56, %v9295_v39  ;;  %v3728_v62 = vmul.f32 %v6372_v6, %v9309_v27 }
 0x7a1   : > { %4013 = vmatprep.subr.bf16.mxu1 %v3742_v60  ;;  %v3745_v13 = vpack.c.bf16 %v3721_v43, %v3719_v42  ;;  %v3748_v45 = vpack.c.bf16 %v3726_v48, %v3724_v38  ;;  %v3730_v17 = vmul.f32 %v6372_v6, %v9324_v4  ;;  %v3727_v1 = vmul.f32 %v6370_v56, %v9305_v12  ;;  %v6291_v42 = vld [vmem:[%s7059_s12 + $0x10] sm:$0xff]   ;;  %v6293_v43 = vld [vmem:[%s7059_s12 + $0x20] sm:$0xff]   ;;  %v6296_v48 = vld [vmem:[%s7059_s12 + $0x38] sm:$0xff]  }
 0x7a2   : > { %v3747_v53 = vpack.c.bf16 %v3725_v18, %v3723_v11  ;;  %v3729_v33 = vmul.f32 %v6370_v56, %v9319_v32  ;;  %v3732_v47 = vmul.f32 %v6372_v6, %v9337_v10  ;;  %v3734_v34 = vmul.f32 %v6372_v6, %v9348_v44  ;;  %v6295_v38 = vld [vmem:[%s7059_s12 + $0x30] sm:$0xff]   ;;  %v6298_v11 = vld [vmem:[%s7059_s12 + $0x48] sm:$0xff]  }
 0x7a3   : > { %v3750_v57 = vpack.c.bf16 %v3730_v17, %v3728_v62  ;;  %v3731_v36 = vmul.f32 %v6370_v56, %v9331_v63  ;;  %v3733_v60 = vmul.f32 %v6370_v56, %v9343_v3  ;;  %v3738_v58 = vmul.f32 %v6372_v6, %v9372_v40  ;;  %v6299_v18 = vld [vmem:[%s7059_s12 + $0x50] sm:$0xff]   ;;  %v6301_v62 = vld [vmem:[%s7059_s12 + $0x60] sm:$0xff]   ;;  %v6302_v17 = vld [vmem:[%s7059_s12 + $0x68] sm:$0xff]  }
 0x7a4   : > { %4014 = vmatpush1.bf16.msra.mxu1 %v3741_v55  ;;  %v3749_v46 = vpack.c.bf16 %v3729_v33, %v3727_v1  ;;  %v3752_v25 = vpack.c.bf16 %v3734_v34, %v3732_v47  ;;  %v3736_v55 = vmul.f32 %v6372_v6, %v9361_v21  ;;  %v3737_v19 = vmul.f32 %v6370_v56, %v9367_v22  ;;  %v6290_v6 = vld [vmem:[%s7059_s12 + $0x8] sm:$0xff]   ;;  %v6304_v1 = vld [vmem:[%s7059_s12 + $0x78] sm:$0xff]   ;;  %v6305_v33 = vld [vmem:[%s7059_s12 + $0x80] sm:$0xff]  }
 0x7a5   : > { %4015 = vmatprep.subr.bf16.mxu1 %v3744_v9  ;;  %v3751_v41 = vpack.c.bf16 %v3733_v60, %v3731_v36  ;;  %v3735_v9 = vmul.f32 %v6370_v56, %v9357_v2  ;;  %v6292_v56 = vld [vmem:[%s7059_s12 + $0x18] sm:$0xff]   ;;  %v6307_v47 = vld [vmem:[%s7059_s12 + $0x90] sm:$0xff]   ;;  %v6310_v36 = vld [vmem:[%s7059_s12 + $0xa8] sm:$0xff]  }
 0x7a6   : > { %v3754_v0 = vpack.c.bf16 %v3738_v58, %v3736_v55  ;;  %v6308_v34 = vld [vmem:[%s7059_s12 + $0x98] sm:$0xff]   ;;  %v6311_v60 = vld [vmem:[%s7059_s12 + $0xb0] sm:$0xff]   ;;  %v6314_v55 = vld [vmem:[%s7059_s12 + $0xc8] sm:$0xff]  }
 0x7a7   : > { %v3753_v24 = vpack.c.bf16 %v3737_v19, %v3735_v9  ;;  %v6312_v58 = vld [vmem:[%s7059_s12 + $0xb8] sm:$0xff]   ;;  %v6315_v19 = vld [vmem:[%s7059_s12 + $0xd0] sm:$0xff]  }
 0x7a8   : > { %4016 = vmatpush1.bf16.msra.mxu1 %v3743_v52  ;;  %v6289_v52 = vld [vmem:[%s7059_s12] sm:$0xff]  }
 0x7a9   : > { %4017 = vmatprep.subr.bf16.mxu1 %v3746_v15  ;;  %v6294_v15 = vld [vmem:[%s7059_s12 + $0x28] sm:$0xff]  }
 0x7ac   : > { %4018 = vmatpush1.bf16.msra.mxu1 %v3745_v13  ;;  %v6297_v13 = vld [vmem:[%s7059_s12 + $0x40] sm:$0xff]  }
 0x7ad   : > { %4019 = vmatprep.subr.bf16.mxu1 %v3748_v45  ;;  %v6300_v45 = vld [vmem:[%s7059_s12 + $0x58] sm:$0xff]  }
 0x7b0   : > { %4020 = vmatpush1.bf16.msra.mxu1 %v3747_v53  ;;  %v6303_v53 = vld [vmem:[%s7059_s12 + $0x70] sm:$0xff]  }
 0x7b1   : > { %4021 = vmatprep.subr.bf16.mxu1 %v3750_v57  ;;  %v6306_v57 = vld [vmem:[%s7059_s12 + $0x88] sm:$0xff]  }
 0x7b4   : > { %4022 = vmatpush1.bf16.msra.mxu1 %v3749_v46  ;;  %v6309_v46 = vld [vmem:[%s7059_s12 + $0xa0] sm:$0xff]  }
 0x7b5   : > { %4023 = vmatprep.subr.bf16.mxu1 %v3752_v25  ;;  %v6313_v25 = vld [vmem:[%s7059_s12 + $0xc0] sm:$0xff]  }
 0x7b8   : > { %4024 = vmatpush1.bf16.msra.mxu1 %v3751_v41 }
 0x7b9   : > { %4025 = vmatprep.subr.bf16.mxu1 %v3754_v0 }
 0x7bc   : > { %4026 = vmatpush1.bf16.msra.mxu1 %v3753_v24  ;;  %v6316_v24 = vld [vmem:[%s7059_s12 + $0xd8] sm:$0xff]  }
 0x7bf   : > { %4044 = vmatmul.mubr.bf16.vlgmr.msra.gmra.mrb[0].mxu1 %v6289_v52 }
 0x7c0   : > { %4053 = vmatprep.mubr.bf16.mxu1 %v10270_v61 }
 0x7c7   : > { %4054 = vmatmul.mubr.bf16.gmra.mrb[4].mxu1 %v6290_v6 }
 0x7c8   : > { %4063 = vmatprep.mubr.bf16.mxu1 %v10270_v61 }
 0x7cf   : > { %4064 = vmatmul.mubr.bf16.gmra.mrb[8].mxu1 %v6291_v42 }
 0x7d0   : > { %4073 = vmatprep.mubr.bf16.mxu1 %v10270_v61 }
 0x7d7   : > { %4074 = vmatmul.mubr.bf16.gmra.mrb[12].mxu1 %v6292_v56 }
 0x7d8   : > { %4083 = vmatprep.mubr.bf16.mxu1 %v10270_v61 }
 0x7df   : > { %4084 = vmatmul.mubr.bf16.gmra.mrb[16].mxu1 %v6293_v43 }
 0x7e0   : > { %4093 = vmatprep.mubr.bf16.mxu1 %v10270_v61 }
 0x7e7   : > { %4094 = vmatmul.mubr.bf16.gmra.mrb[20].mxu1 %v6294_v15 }
 0x7e8   : > { %4103 = vmatprep.mubr.bf16.mxu1 %v10270_v61 }
 0x7ef   : > { %4104 = vmatmul.mubr.bf16.gmra.mrb[24].mxu1 %v6295_v38 }
 0x7f0   : > { %4113 = vmatprep.mubr.bf16.mxu1 %v10270_v61 }
 0x7f7   : > { %4114 = vmatmul.mubr.bf16.gmra.mrb[28].mxu1 %v6296_v48 }
 0x7f8   : > { %4123 = vmatprep.mubr.bf16.mxu1 %v10270_v61 }
 0x7ff   : > { %4124 = vmatmul.mubr.bf16.gmra.mrb[32].mxu1 %v6297_v13 }
 0x800   : > { %4133 = vmatprep.mubr.bf16.mxu1 %v10270_v61 }
 0x807   : > { %4134 = vmatmul.mubr.bf16.gmra.mrb[36].mxu1 %v6298_v11 }
 0x808   : > { %4143 = vmatprep.mubr.bf16.mxu1 %v10270_v61 }
 0x80f   : > { %4144 = vmatmul.mubr.bf16.gmra.mrb[40].mxu1 %v6299_v18 }
 0x810   : > { %4153 = vmatprep.mubr.bf16.mxu1 %v10270_v61 }
 0x817   : > { %4154 = vmatmul.mubr.bf16.gmra.mrb[44].mxu1 %v6300_v45 }
 0x818   : > { %4163 = vmatprep.mubr.bf16.mxu1 %v10270_v61 }
 0x81f   : > { %4164 = vmatmul.mubr.bf16.gmra.mrb[48].mxu1 %v6301_v62 }
 0x820   : > { %4173 = vmatprep.mubr.bf16.mxu1 %v10270_v61 }
 0x827   : > { %4174 = vmatmul.mubr.bf16.gmra.mrb[52].mxu1 %v6302_v17 }
 0x828   : > { %4183 = vmatprep.mubr.bf16.mxu1 %v10270_v61 }
 0x82f   : > { %4184 = vmatmul.mubr.bf16.gmra.mrb[56].mxu1 %v6303_v53  ;;  %v6317_v53 = vld [vmem:[%s7059_s12 + $0xe0] sm:$0xff]  }
 0x830   : > { %4193 = vmatprep.mubr.bf16.mxu1 %v10270_v61 }
 0x837   : > { %4194 = vmatmul.mubr.bf16.gmra.mrb[60].mxu1 %v6304_v1 }
 0x838   : > { %4203 = vmatprep.mubr.bf16.mxu1 %v10270_v61 }
 0x83f   : > { %4204 = vmatmul.mubr.bf16.gmra.mrb[64].mxu1 %v6305_v33 }
 0x840   : > { %4213 = vmatprep.mubr.bf16.mxu1 %v10270_v61 }
 0x847   : > { %4214 = vmatmul.mubr.bf16.gmra.mrb[68].mxu1 %v6306_v57 }
 0x848   : > { %4223 = vmatprep.mubr.bf16.mxu1 %v10270_v61 }
 0x84f   : > { %4224 = vmatmul.mubr.bf16.gmra.mrb[72].mxu1 %v6307_v47 }
 0x850   : > { %4233 = vmatprep.mubr.bf16.mxu1 %v10270_v61 }
 0x857   : > { %4234 = vmatmul.mubr.bf16.gmra.mrb[76].mxu1 %v6308_v34 }
 0x858   : > { %4243 = vmatprep.mubr.bf16.mxu1 %v10270_v61 }
 0x85f   : > { %4244 = vmatmul.mubr.bf16.gmra.mrb[80].mxu1 %v6309_v46 }
 0x860   : > { %4253 = vmatprep.mubr.bf16.mxu1 %v10270_v61 }
 0x867   : > { %4254 = vmatmul.mubr.bf16.gmra.mrb[84].mxu1 %v6310_v36 }
 0x868   : > { %4263 = vmatprep.mubr.bf16.mxu1 %v10270_v61 }
 0x86f   : > { %4264 = vmatmul.mubr.bf16.gmra.mrb[88].mxu1 %v6311_v60 }
 0x870   : > { %4273 = vmatprep.mubr.bf16.mxu1 %v10270_v61 }
 0x877   : > { %4274 = vmatmul.mubr.bf16.gmra.mrb[92].mxu1 %v6312_v58 }
 0x878   : > { %4283 = vmatprep.mubr.bf16.mxu1 %v10270_v61 }
 0x87f   : > { %4284 = vmatmul.mubr.bf16.gmra.mrb[96].mxu1 %v6313_v25 }
 0x880   : > { %4293 = vmatprep.mubr.bf16.mxu1 %v10270_v61 }
 0x887   : > { %4294 = vmatmul.mubr.bf16.gmra.mrb[100].mxu1 %v6314_v55  ;;  %v6323_v55 = vld [vmem:[%s7065_s8 + $0x4] ss:$16 sps:$4 sm:$0xff]  }
 0x888   : > { %4303 = vmatprep.mubr.bf16.mxu1 %v10270_v61  ;;  %4908 = vmatprep.mubr.bf16.mxu0 %v6323_v55 }
 0x88f   : > { %4304 = vmatmul.mubr.bf16.gmra.mrb[104].mxu1 %v6315_v19 }
 0x890   : > { %4313 = vmatprep.mubr.bf16.mxu1 %v10270_v61 }
 0x892   : > { %v4045_v41 = vpop.f32.mrb[0].mxu1 }
 0x893   : > { %v4364_v9 = vmax.f32 %v4045_v41, 0.0  ;;  %v4047_v0 = vpop.f32.mrb[1].mxu1 }
 0x894   : > { %v4365_v52 = vmax.f32 %v4047_v0, 0.0  ;;  %v4049_v6 = vpop.f32.mrb[2].mxu1 }
 0x895   : > { %v4366_v42 = vmax.f32 %v4049_v6, 0.0  ;;  %v4051_v56 = vpop.f32.mrb[3].mxu1  ;;  %v4492_v15 = vmul.f32 %v4364_v9, %v4364_v9 }
 0x896   : > { %v4367_v43 = vmax.f32 %v4051_v56, 0.0  ;;  %v4493_v48 = vmul.f32 %v4365_v52, %v4365_v52 }
 0x897   : > { %v4494_v38 = vmul.f32 %v4366_v42, %v4366_v42  ;;  %4314 = vmatmul.mubr.bf16.gmra.mrb[108].mxu1 %v6316_v24  ;;  %v6318_v24 = vld [vmem:[%s7059_s12 + $0xe8] sm:$0xff]  }
 0x898   : > { %v4495_v13 = vmul.f32 %v4367_v43, %v4367_v43  ;;  %4323 = vmatprep.mubr.bf16.mxu1 %v10270_v61 }
 0x899   : > { %v4620_v11 = vpack.c.bf16 %v4494_v38, %v4492_v15 }
 0x89a   : > { %v4621_v18 = vpack.c.bf16 %v4495_v13, %v4493_v48  ;;  %v4055_v45 = vpop.f32.mrb[4].mxu1 }
 0x89b   : > { %v4368_v62 = vmax.f32 %v4055_v45, 0.0  ;;  %v4057_v17 = vpop.f32.mrb[5].mxu1 }
 0x89c   : > { %v4369_v1 = vmax.f32 %v4057_v17, 0.0  ;;  %v4059_v33 = vpop.f32.mrb[6].mxu1  ;;  %4876 = vmatprep.subr.bf16.mxu0 %v4621_v18 }
 0x89d   : > { %v4370_v57 = vmax.f32 %v4059_v33, 0.0  ;;  %v4061_v47 = vpop.f32.mrb[7].mxu1  ;;  %4877 = vmatpush1.bf16.msra.mxu0 %v4620_v11  ;;  %v4496_v46 = vmul.f32 %v4368_v62, %v4368_v62 }
 0x89e   : > { %v4371_v34 = vmax.f32 %v4061_v47, 0.0  ;;  %v4497_v60 = vmul.f32 %v4369_v1, %v4369_v1 }
 0x89f   : > { %v4498_v36 = vmul.f32 %v4370_v57, %v4370_v57  ;;  %4324 = vmatmul.mubr.bf16.gmra.mrb[112].mxu1 %v6317_v53  ;;  %v6319_v53 = vld [vmem:[%s7059_s12 + $0xf0] sm:$0xff]  }
 0x8a0   : > { %v4499_v58 = vmul.f32 %v4371_v34, %v4371_v34  ;;  %4333 = vmatprep.mubr.bf16.mxu1 %v10270_v61 }
 0x8a1   : > { %v4622_v25 = vpack.c.bf16 %v4498_v36, %v4496_v46 }
 0x8a2   : > { %v4623_v19 = vpack.c.bf16 %v4499_v58, %v4497_v60  ;;  %v4065_v41 = vpop.f32.mrb[8].mxu1 }
 0x8a3   : > { %v4372_v9 = vmax.f32 %v4065_v41, 0.0  ;;  %v4067_v0 = vpop.f32.mrb[9].mxu1 }
 0x8a4   : > { %v4373_v52 = vmax.f32 %v4067_v0, 0.0  ;;  %v4069_v6 = vpop.f32.mrb[10].mxu1  ;;  %4878 = vmatprep.subr.bf16.mxu0 %v4623_v19  ;;  %v6320_v0 = vld [vmem:[%s7059_s12 + $0xf8] sm:$0xff]  }
 0x8a5   : > { %v4374_v42 = vmax.f32 %v4069_v6, 0.0  ;;  %v4071_v56 = vpop.f32.mrb[11].mxu1  ;;  %4879 = vmatpush1.bf16.msra.mxu0 %v4622_v25  ;;  %v4500_v15 = vmul.f32 %v4372_v9, %v4372_v9 }
 0x8a6   : > { %v4375_v43 = vmax.f32 %v4071_v56, 0.0  ;;  %v4501_v48 = vmul.f32 %v4373_v52, %v4373_v52 }
 0x8a7   : > { %v4502_v38 = vmul.f32 %v4374_v42, %v4374_v42  ;;  %4334 = vmatmul.mubr.bf16.gmra.mrb[116].mxu1 %v6318_v24 }
 0x8a8   : > { %v4503_v13 = vmul.f32 %v4375_v43, %v4375_v43  ;;  %4343 = vmatprep.mubr.bf16.mxu1 %v10270_v61 }
 0x8a9   : > { %v4624_v11 = vpack.c.bf16 %v4502_v38, %v4500_v15 }
 0x8aa   : > { %v4625_v18 = vpack.c.bf16 %v4503_v13, %v4501_v48  ;;  %v4075_v45 = vpop.f32.mrb[12].mxu1 }
 0x8ab   : > { %v4376_v62 = vmax.f32 %v4075_v45, 0.0  ;;  %v4077_v17 = vpop.f32.mrb[13].mxu1 }
 0x8ac   : > { %v4377_v1 = vmax.f32 %v4077_v17, 0.0  ;;  %v4079_v33 = vpop.f32.mrb[14].mxu1  ;;  %4880 = vmatprep.subr.bf16.mxu0 %v4625_v18 }
 0x8ad   : > { %v4378_v57 = vmax.f32 %v4079_v33, 0.0  ;;  %v4081_v47 = vpop.f32.mrb[15].mxu1  ;;  %4881 = vmatpush1.bf16.msra.mxu0 %v4624_v11  ;;  %v4504_v46 = vmul.f32 %v4376_v62, %v4376_v62 }
 0x8ae   : > { %v4379_v34 = vmax.f32 %v4081_v47, 0.0  ;;  %v4505_v60 = vmul.f32 %v4377_v1, %v4377_v1 }
 0x8af   : > { %v4506_v36 = vmul.f32 %v4378_v57, %v4378_v57  ;;  %4344 = vmatmul.mubr.bf16.gmra.mrb[120].mxu1 %v6319_v53 }
 0x8b0   : > { %v4507_v58 = vmul.f32 %v4379_v34, %v4379_v34  ;;  %4353 = vmatprep.mubr.bf16.mxu1 %v10270_v61 }
 0x8b1   : > { %v4626_v25 = vpack.c.bf16 %v4506_v36, %v4504_v46 }
 0x8b2   : > { %v4627_v55 = vpack.c.bf16 %v4507_v58, %v4505_v60  ;;  %v4085_v19 = vpop.f32.mrb[16].mxu1 }
 0x8b3   : > { %v4380_v41 = vmax.f32 %v4085_v19, 0.0  ;;  %v4087_v9 = vpop.f32.mrb[17].mxu1 }
 0x8b4   : > { %v4381_v24 = vmax.f32 %v4087_v9, 0.0  ;;  %v4089_v52 = vpop.f32.mrb[18].mxu1  ;;  %4882 = vmatprep.subr.bf16.mxu0 %v4627_v55 }
 0x8b5   : > { %v4382_v6 = vmax.f32 %v4089_v52, 0.0  ;;  %v4091_v42 = vpop.f32.mrb[19].mxu1  ;;  %4883 = vmatpush1.bf16.msra.mxu0 %v4626_v25  ;;  %v4508_v43 = vmul.f32 %v4380_v41, %v4380_v41 }
 0x8b6   : > { %v4383_v56 = vmax.f32 %v4091_v42, 0.0  ;;  %v4509_v38 = vmul.f32 %v4381_v24, %v4381_v24 }
 0x8b7   : > { %v4510_v15 = vmul.f32 %v4382_v6, %v4382_v6  ;;  %4354 = vmatmul.mubr.bf16.gmra.mrb[124].mxu1 %v6320_v0 }
 0x8b8   : > { %v4511_v48 = vmul.f32 %v4383_v56, %v4383_v56 }
 0x8b9   : > { %v4628_v13 = vpack.c.bf16 %v4510_v15, %v4508_v43 }
 0x8ba   : > { %v4629_v61 = vpack.c.bf16 %v4511_v48, %v4509_v38  ;;  %v4095_v11 = vpop.f32.mrb[20].mxu1 }
 0x8bb   : > { %v4384_v18 = vmax.f32 %v4095_v11, 0.0  ;;  %v4097_v45 = vpop.f32.mrb[21].mxu1 }
 0x8bc   : > { %v4385_v62 = vmax.f32 %v4097_v45, 0.0  ;;  %v4099_v17 = vpop.f32.mrb[22].mxu1  ;;  %4884 = vmatprep.subr.bf16.mxu0 %v4629_v61 }
 0x8bd   : > { %v4386_v53 = vmax.f32 %v4099_v17, 0.0  ;;  %v4101_v1 = vpop.f32.mrb[23].mxu1  ;;  %4885 = vmatpush1.bf16.msra.mxu0 %v4628_v13  ;;  %v4512_v57 = vmul.f32 %v4384_v18, %v4384_v18 }
 0x8be   : > { %v4387_v33 = vmax.f32 %v4101_v1, 0.0  ;;  %v4513_v34 = vmul.f32 %v4385_v62, %v4385_v62 }
 0x8bf   : > { %v4514_v47 = vmul.f32 %v4386_v53, %v4386_v53 }
 0x8c0   : > { %v4515_v46 = vmul.f32 %v4387_v33, %v4387_v33 }
 0x8c1   : > { %v4630_v36 = vpack.c.bf16 %v4514_v47, %v4512_v57 }
 0x8c2   : > { %v4631_v60 = vpack.c.bf16 %v4515_v46, %v4513_v34  ;;  %v4105_v58 = vpop.f32.mrb[24].mxu1 }
 0x8c3   : > { %v4388_v25 = vmax.f32 %v4105_v58, 0.0  ;;  %v4107_v55 = vpop.f32.mrb[25].mxu1 }
 0x8c4   : > { %v4389_v19 = vmax.f32 %v4107_v55, 0.0  ;;  %v4109_v41 = vpop.f32.mrb[26].mxu1  ;;  %4886 = vmatprep.subr.bf16.mxu0 %v4631_v60 }
 0x8c5   : > { %v4390_v9 = vmax.f32 %v4109_v41, 0.0  ;;  %v4111_v0 = vpop.f32.mrb[27].mxu1  ;;  %4887 = vmatpush1.bf16.msra.mxu0 %v4630_v36  ;;  %v4516_v52 = vmul.f32 %v4388_v25, %v4388_v25 }
 0x8c6   : > { %v4391_v24 = vmax.f32 %v4111_v0, 0.0  ;;  %v4517_v42 = vmul.f32 %v4389_v19, %v4389_v19 }
 0x8c7   : > { %v4518_v6 = vmul.f32 %v4390_v9, %v4390_v9 }
 0x8c8   : > { %v4519_v56 = vmul.f32 %v4391_v24, %v4391_v24 }
 0x8c9   : > { %v4632_v43 = vpack.c.bf16 %v4518_v6, %v4516_v52 }
 0x8ca   : > { %v4633_v15 = vpack.c.bf16 %v4519_v56, %v4517_v42  ;;  %v4115_v38 = vpop.f32.mrb[28].mxu1 }
 0x8cb   : > { %v4392_v48 = vmax.f32 %v4115_v38, 0.0  ;;  %v4117_v13 = vpop.f32.mrb[29].mxu1 }
 0x8cc   : > { %v4393_v61 = vmax.f32 %v4117_v13, 0.0  ;;  %v4119_v11 = vpop.f32.mrb[30].mxu1  ;;  %4888 = vmatprep.subr.bf16.mxu0 %v4633_v15 }
 0x8cd   : > { %v4394_v18 = vmax.f32 %v4119_v11, 0.0  ;;  %v4121_v45 = vpop.f32.mrb[31].mxu1  ;;  %4889 = vmatpush1.bf16.msra.mxu0 %v4632_v43  ;;  %v4520_v17 = vmul.f32 %v4392_v48, %v4392_v48 }
 0x8ce   : > { %v4395_v62 = vmax.f32 %v4121_v45, 0.0  ;;  %v4521_v1 = vmul.f32 %v4393_v61, %v4393_v61 }
 0x8cf   : > { %v4522_v53 = vmul.f32 %v4394_v18, %v4394_v18 }
 0x8d0   : > { %v4523_v33 = vmul.f32 %v4395_v62, %v4395_v62 }
 0x8d1   : > { %v4634_v57 = vpack.c.bf16 %v4522_v53, %v4520_v17 }
 0x8d2   : > { %v4635_v47 = vpack.c.bf16 %v4523_v33, %v4521_v1  ;;  %v4125_v34 = vpop.f32.mrb[32].mxu1 }
 0x8d3   : > { %v4396_v46 = vmax.f32 %v4125_v34, 0.0  ;;  %v4127_v36 = vpop.f32.mrb[33].mxu1 }
 0x8d4   : > { %v4397_v60 = vmax.f32 %v4127_v36, 0.0  ;;  %v4129_v58 = vpop.f32.mrb[34].mxu1  ;;  %4890 = vmatprep.subr.bf16.mxu0 %v4635_v47 }
 0x8d5   : > { %v4398_v25 = vmax.f32 %v4129_v58, 0.0  ;;  %v4131_v55 = vpop.f32.mrb[35].mxu1  ;;  %4891 = vmatpush1.bf16.msra.mxu0 %v4634_v57  ;;  %v4524_v41 = vmul.f32 %v4396_v46, %v4396_v46 }
 0x8d6   : > { %v4399_v19 = vmax.f32 %v4131_v55, 0.0  ;;  %v4525_v0 = vmul.f32 %v4397_v60, %v4397_v60 }
 0x8d7   : > { %v4526_v9 = vmul.f32 %v4398_v25, %v4398_v25 }
 0x8d8   : > { %v4527_v24 = vmul.f32 %v4399_v19, %v4399_v19 }
 0x8d9   : > { %v4636_v52 = vpack.c.bf16 %v4526_v9, %v4524_v41 }
 0x8da   : > { %v4637_v6 = vpack.c.bf16 %v4527_v24, %v4525_v0  ;;  %v4135_v42 = vpop.f32.mrb[36].mxu1 }
 0x8db   : > { %v4400_v56 = vmax.f32 %v4135_v42, 0.0  ;;  %v4137_v43 = vpop.f32.mrb[37].mxu1 }
 0x8dc   : > { %v4401_v15 = vmax.f32 %v4137_v43, 0.0  ;;  %v4139_v38 = vpop.f32.mrb[38].mxu1  ;;  %4892 = vmatprep.subr.bf16.mxu0 %v4637_v6 }
 0x8dd   : > { %v4402_v48 = vmax.f32 %v4139_v38, 0.0  ;;  %v4141_v13 = vpop.f32.mrb[39].mxu1  ;;  %4893 = vmatpush1.bf16.msra.mxu0 %v4636_v52  ;;  %v4528_v11 = vmul.f32 %v4400_v56, %v4400_v56 }
 0x8de   : > { %v4403_v61 = vmax.f32 %v4141_v13, 0.0  ;;  %v4529_v45 = vmul.f32 %v4401_v15, %v4401_v15 }
 0x8df   : > { %v4530_v18 = vmul.f32 %v4402_v48, %v4402_v48 }
 0x8e0   : > { %v4531_v62 = vmul.f32 %v4403_v61, %v4403_v61 }
 0x8e1   : > { %v4638_v17 = vpack.c.bf16 %v4530_v18, %v4528_v11 }
 0x8e2   : > { %v4639_v53 = vpack.c.bf16 %v4531_v62, %v4529_v45  ;;  %v4145_v1 = vpop.f32.mrb[40].mxu1 }
 0x8e3   : > { %v4404_v33 = vmax.f32 %v4145_v1, 0.0  ;;  %v4147_v57 = vpop.f32.mrb[41].mxu1 }
 0x8e4   : > { %v4405_v47 = vmax.f32 %v4147_v57, 0.0  ;;  %v4149_v34 = vpop.f32.mrb[42].mxu1  ;;  %4894 = vmatprep.subr.bf16.mxu0 %v4639_v53 }
 0x8e5   : > { %v4406_v46 = vmax.f32 %v4149_v34, 0.0  ;;  %v4151_v36 = vpop.f32.mrb[43].mxu1  ;;  %4895 = vmatpush1.bf16.msra.mxu0 %v4638_v17  ;;  %v4532_v58 = vmul.f32 %v4404_v33, %v4404_v33 }
 0x8e6   : > { %v4407_v60 = vmax.f32 %v4151_v36, 0.0  ;;  %v4533_v55 = vmul.f32 %v4405_v47, %v4405_v47 }
 0x8e7   : > { %v4534_v25 = vmul.f32 %v4406_v46, %v4406_v46 }
 0x8e8   : > { %v4535_v19 = vmul.f32 %v4407_v60, %v4407_v60 }
 0x8e9   : > { %v4640_v41 = vpack.c.bf16 %v4534_v25, %v4532_v58 }
 0x8ea   : > { %v4641_v9 = vpack.c.bf16 %v4535_v19, %v4533_v55  ;;  %v4155_v0 = vpop.f32.mrb[44].mxu1 }
 0x8eb   : > { %v4408_v24 = vmax.f32 %v4155_v0, 0.0  ;;  %v4157_v52 = vpop.f32.mrb[45].mxu1 }
 0x8ec   : > { %v4409_v6 = vmax.f32 %v4157_v52, 0.0  ;;  %v4159_v42 = vpop.f32.mrb[46].mxu1  ;;  %4896 = vmatprep.subr.bf16.mxu0 %v4641_v9 }
 0x8ed   : > { %v4410_v56 = vmax.f32 %v4159_v42, 0.0  ;;  %v4161_v43 = vpop.f32.mrb[47].mxu1  ;;  %4897 = vmatpush1.bf16.msra.mxu0 %v4640_v41  ;;  %v4536_v38 = vmul.f32 %v4408_v24, %v4408_v24 }
 0x8ee   : > { %v4411_v15 = vmax.f32 %v4161_v43, 0.0  ;;  %v4537_v13 = vmul.f32 %v4409_v6, %v4409_v6 }
 0x8ef   : > { %v4538_v48 = vmul.f32 %v4410_v56, %v4410_v56 }
 0x8f0   : > { %v4539_v61 = vmul.f32 %v4411_v15, %v4411_v15 }
 0x8f1   : > { %v4642_v11 = vpack.c.bf16 %v4538_v48, %v4536_v38 }
 0x8f2   : > { %v4643_v18 = vpack.c.bf16 %v4539_v61, %v4537_v13  ;;  %v4165_v45 = vpop.f32.mrb[48].mxu1 }
 0x8f3   : > { %v4412_v62 = vmax.f32 %v4165_v45, 0.0  ;;  %v4167_v17 = vpop.f32.mrb[49].mxu1 }
 0x8f4   : > { %v4413_v53 = vmax.f32 %v4167_v17, 0.0  ;;  %v4169_v1 = vpop.f32.mrb[50].mxu1  ;;  %4898 = vmatprep.subr.bf16.mxu0 %v4643_v18 }
 0x8f5   : > { %v4414_v33 = vmax.f32 %v4169_v1, 0.0  ;;  %v4171_v57 = vpop.f32.mrb[51].mxu1  ;;  %4899 = vmatpush1.bf16.msra.mxu0 %v4642_v11  ;;  %v4540_v34 = vmul.f32 %v4412_v62, %v4412_v62 }
 0x8f6   : > { %v4415_v47 = vmax.f32 %v4171_v57, 0.0  ;;  %v4541_v36 = vmul.f32 %v4413_v53, %v4413_v53 }
 0x8f7   : > { %v4542_v46 = vmul.f32 %v4414_v33, %v4414_v33 }
 0x8f8   : > { %v4543_v60 = vmul.f32 %v4415_v47, %v4415_v47 }
 0x8f9   : > { %v4644_v58 = vpack.c.bf16 %v4542_v46, %v4540_v34 }
 0x8fa   : > { %v4645_v25 = vpack.c.bf16 %v4543_v60, %v4541_v36  ;;  %v4175_v55 = vpop.f32.mrb[52].mxu1 }
 0x8fb   : > { %v4416_v19 = vmax.f32 %v4175_v55, 0.0  ;;  %v4177_v41 = vpop.f32.mrb[53].mxu1 }
 0x8fc   : > { %v4417_v9 = vmax.f32 %v4177_v41, 0.0  ;;  %v4179_v0 = vpop.f32.mrb[54].mxu1  ;;  %4900 = vmatprep.subr.bf16.mxu0 %v4645_v25 }
 0x8fd   : > { %v4418_v24 = vmax.f32 %v4179_v0, 0.0  ;;  %v4181_v52 = vpop.f32.mrb[55].mxu1  ;;  %4901 = vmatpush1.bf16.msra.mxu0 %v4644_v58  ;;  %v4544_v42 = vmul.f32 %v4416_v19, %v4416_v19 }
 0x8fe   : > { %v4419_v6 = vmax.f32 %v4181_v52, 0.0  ;;  %v4545_v43 = vmul.f32 %v4417_v9, %v4417_v9 }
 0x8ff   : > { %v4546_v56 = vmul.f32 %v4418_v24, %v4418_v24 }
 0x900   : > { %v4547_v15 = vmul.f32 %v4419_v6, %v4419_v6 }
 0x901   : > { %v4646_v38 = vpack.c.bf16 %v4546_v56, %v4544_v42 }
 0x902   : > { %v4647_v48 = vpack.c.bf16 %v4547_v15, %v4545_v43  ;;  %v4185_v13 = vpop.f32.mrb[56].mxu1 }
 0x903   : > { %v4420_v61 = vmax.f32 %v4185_v13, 0.0  ;;  %v4187_v11 = vpop.f32.mrb[57].mxu1 }
 0x904   : > { %v4421_v18 = vmax.f32 %v4187_v11, 0.0  ;;  %v4189_v45 = vpop.f32.mrb[58].mxu1  ;;  %4902 = vmatprep.subr.bf16.mxu0 %v4647_v48 }
 0x905   : > { %v4422_v62 = vmax.f32 %v4189_v45, 0.0  ;;  %v4191_v17 = vpop.f32.mrb[59].mxu1  ;;  %4903 = vmatpush1.bf16.msra.mxu0 %v4646_v38  ;;  %v4548_v1 = vmul.f32 %v4420_v61, %v4420_v61  ;;  %v6321_v61 = vld [vmem:[%s7065_s8] ss:$16 sps:$4 sm:$0xff]   ;;  %v6324_v45 = vld [vmem:[%s7065_s8 + $0x24] ss:$16 sps:$4 sm:$0xff]  }
 0x906   : > { %v4423_v53 = vmax.f32 %v4191_v17, 0.0  ;;  %v4549_v57 = vmul.f32 %v4421_v18, %v4421_v18 }
 0x907   : > { %v4550_v33 = vmul.f32 %v4422_v62, %v4422_v62 }
 0x908   : > { %v4551_v47 = vmul.f32 %v4423_v53, %v4423_v53 }
 0x909   : > { %v4648_v34 = vpack.c.bf16 %v4550_v33, %v4548_v1 }
 0x90a   : > { %v4649_v46 = vpack.c.bf16 %v4551_v47, %v4549_v57  ;;  %v4195_v36 = vpop.f32.mrb[60].mxu1 }
 0x90b   : > { %v4424_v60 = vmax.f32 %v4195_v36, 0.0  ;;  %v4197_v58 = vpop.f32.mrb[61].mxu1 }
 0x90c   : > { %v4425_v25 = vmax.f32 %v4197_v58, 0.0  ;;  %v4199_v55 = vpop.f32.mrb[62].mxu1  ;;  %4904 = vmatprep.subr.bf16.mxu0 %v4649_v46 }
 0x90d   : > { %v4426_v19 = vmax.f32 %v4199_v55, 0.0  ;;  %v4201_v41 = vpop.f32.mrb[63].mxu1  ;;  %4905 = vmatpush1.bf16.msra.mxu0 %v4648_v34  ;;  %v4552_v0 = vmul.f32 %v4424_v60, %v4424_v60 }
 0x90e   : > { %v4427_v9 = vmax.f32 %v4201_v41, 0.0  ;;  %v4553_v52 = vmul.f32 %v4425_v25, %v4425_v25  ;;  %v6326_v25 = vld [vmem:[%s7065_s8 + $0x20] ss:$16 sps:$4 sm:$0xff]   ;;  %v6327_v41 = vld [vmem:[%s7065_s8 + $0x44] ss:$16 sps:$4 sm:$0xff]  }
 0x90f   : > { %v4554_v24 = vmul.f32 %v4426_v19, %v4426_v19 }
 0x910   : > { %v4555_v6 = vmul.f32 %v4427_v9, %v4427_v9 }
 0x911   : > { %v4650_v42 = vpack.c.bf16 %v4554_v24, %v4552_v0 }
 0x912   : > { %v4651_v56 = vpack.c.bf16 %v4555_v6, %v4553_v52  ;;  %v4205_v43 = vpop.f32.mrb[64].mxu1 }
 0x913   : > { %v4428_v15 = vmax.f32 %v4205_v43, 0.0  ;;  %v4207_v38 = vpop.f32.mrb[65].mxu1 }
 0x914   : > { %v4429_v48 = vmax.f32 %v4207_v38, 0.0  ;;  %v4209_v13 = vpop.f32.mrb[66].mxu1  ;;  %4906 = vmatprep.subr.bf16.mxu0 %v4651_v56 }
 0x915   : > { %v4430_v11 = vmax.f32 %v4209_v13, 0.0  ;;  %v4211_v18 = vpop.f32.mrb[67].mxu1  ;;  %4907 = vmatpush1.bf16.msra.mxu0 %v4650_v42  ;;  %v4556_v17 = vmul.f32 %v4428_v15, %v4428_v15 }
 0x916   : > { %v4431_v62 = vmax.f32 %v4211_v18, 0.0  ;;  %v4557_v1 = vmul.f32 %v4429_v48, %v4429_v48 }
 0x917   : > { %v4558_v53 = vmul.f32 %v4430_v11, %v4430_v11 }
 0x918   : > { %v4559_v33 = vmul.f32 %v4431_v62, %v4431_v62  ;;  %4909 = vmatmul.mubr.bf16.vlgmr.msra.gmra.mrb[32].mxu0 %v6321_v61  ;;  %v6329_v61 = vld [vmem:[%s7065_s8 + $0x40] ss:$16 sps:$4 sm:$0xff]  }
 0x919   : > { %v4652_v57 = vpack.c.bf16 %v4558_v53, %v4556_v17  ;;  %4918 = vmatprep.mubr.bf16.mxu0 %v6324_v45  ;;  %v6330_v45 = vld [vmem:[%s7065_s8 + $0x64] ss:$16 sps:$4 sm:$0xff]  }
 0x91a   : > { %v4653_v47 = vpack.c.bf16 %v4559_v33, %v4557_v1  ;;  %v4215_v34 = vpop.f32.mrb[68].mxu1 }
 0x91b   : > { %v4432_v46 = vmax.f32 %v4215_v34, 0.0  ;;  %v4217_v36 = vpop.f32.mrb[69].mxu1 }
 0x91c   : > { %v4433_v60 = vmax.f32 %v4217_v36, 0.0  ;;  %v4219_v58 = vpop.f32.mrb[70].mxu1  ;;  %4989 = vmatprep.subr.bf16.mxu0 %v4653_v47 }
 0x91d   : > { %v4434_v55 = vmax.f32 %v4219_v58, 0.0  ;;  %v4221_v19 = vpop.f32.mrb[71].mxu1  ;;  %4990 = vmatpush1.bf16.msra.mxu0 %v4652_v57  ;;  %v4560_v0 = vmul.f32 %v4432_v46, %v4432_v46 }
 0x91e   : > { %v4435_v9 = vmax.f32 %v4221_v19, 0.0  ;;  %v4561_v52 = vmul.f32 %v4433_v60, %v4433_v60 }
 0x91f   : > { %v4562_v24 = vmul.f32 %v4434_v55, %v4434_v55 }
 0x920   : > { %v4563_v6 = vmul.f32 %v4435_v9, %v4435_v9  ;;  %4919 = vmatmul.mubr.bf16.gmra.mrb[36].mxu0 %v6326_v25  ;;  %v6332_v25 = vld [vmem:[%s7065_s8 + $0x60] ss:$16 sps:$4 sm:$0xff]  }
 0x921   : > { %v4654_v42 = vpack.c.bf16 %v4562_v24, %v4560_v0  ;;  %4928 = vmatprep.mubr.bf16.mxu0 %v6327_v41  ;;  %v6333_v41 = vld [vmem:[%s7065_s8 + $0x84] ss:$16 sps:$4 sm:$0xff]  }
 0x922   : > { %v4655_v56 = vpack.c.bf16 %v4563_v6, %v4561_v52  ;;  %v4225_v43 = vpop.f32.mrb[72].mxu1 }
 0x923   : > { %v4436_v15 = vmax.f32 %v4225_v43, 0.0  ;;  %v4227_v38 = vpop.f32.mrb[73].mxu1 }
 0x924   : > { %v4437_v48 = vmax.f32 %v4227_v38, 0.0  ;;  %v4229_v13 = vpop.f32.mrb[74].mxu1  ;;  %4991 = vmatprep.subr.bf16.mxu0 %v4655_v56 }
 0x925   : > { %v4438_v11 = vmax.f32 %v4229_v13, 0.0  ;;  %v4231_v18 = vpop.f32.mrb[75].mxu1  ;;  %4992 = vmatpush1.bf16.msra.mxu0 %v4654_v42  ;;  %v4564_v17 = vmul.f32 %v4436_v15, %v4436_v15 }
 0x926   : > { %v4439_v62 = vmax.f32 %v4231_v18, 0.0  ;;  %v4565_v1 = vmul.f32 %v4437_v48, %v4437_v48 }
 0x927   : > { %v4566_v53 = vmul.f32 %v4438_v11, %v4438_v11 }
 0x928   : > { %v4567_v33 = vmul.f32 %v4439_v62, %v4439_v62  ;;  %4929 = vmatmul.mubr.bf16.gmra.mrb[40].mxu0 %v6329_v61  ;;  %v6335_v61 = vld [vmem:[%s7065_s8 + $0x80] ss:$16 sps:$4 sm:$0xff]  }
 0x929   : > { %v4656_v57 = vpack.c.bf16 %v4566_v53, %v4564_v17  ;;  %4938 = vmatprep.mubr.bf16.mxu0 %v6330_v45  ;;  %v6336_v45 = vld [vmem:[%s7065_s8 + $0xa4] ss:$16 sps:$4 sm:$0xff]  }
 0x92a   : > { %v4657_v47 = vpack.c.bf16 %v4567_v33, %v4565_v1  ;;  %v4235_v34 = vpop.f32.mrb[76].mxu1 }
 0x92b   : > { %v4440_v46 = vmax.f32 %v4235_v34, 0.0  ;;  %v4237_v36 = vpop.f32.mrb[77].mxu1 }
 0x92c   : > { %v4441_v60 = vmax.f32 %v4237_v36, 0.0  ;;  %v4239_v58 = vpop.f32.mrb[78].mxu1  ;;  %4993 = vmatprep.subr.bf16.mxu0 %v4657_v47 }
 0x92d   : > { %v4442_v55 = vmax.f32 %v4239_v58, 0.0  ;;  %v4241_v19 = vpop.f32.mrb[79].mxu1  ;;  %4994 = vmatpush1.bf16.msra.mxu0 %v4656_v57  ;;  %v4568_v0 = vmul.f32 %v4440_v46, %v4440_v46 }
 0x92e   : > { %v4443_v9 = vmax.f32 %v4241_v19, 0.0  ;;  %v4569_v52 = vmul.f32 %v4441_v60, %v4441_v60 }
 0x92f   : > { %v4570_v24 = vmul.f32 %v4442_v55, %v4442_v55 }
 0x930   : > { %v4571_v6 = vmul.f32 %v4443_v9, %v4443_v9  ;;  %4939 = vmatmul.mubr.bf16.gmra.mrb[44].mxu0 %v6332_v25  ;;  %v6338_v25 = vld [vmem:[%s7065_s8 + $0xa0] ss:$16 sps:$4 sm:$0xff]  }
 0x931   : > { %v4658_v42 = vpack.c.bf16 %v4570_v24, %v4568_v0  ;;  %4948 = vmatprep.mubr.bf16.mxu0 %v6333_v41  ;;  %v6339_v41 = vld [vmem:[%s7065_s8 + $0xc4] ss:$16 sps:$4 sm:$0xff]  }
 0x932   : > { %v4659_v56 = vpack.c.bf16 %v4571_v6, %v4569_v52  ;;  %v4245_v43 = vpop.f32.mrb[80].mxu1 }
 0x933   : > { %v4444_v15 = vmax.f32 %v4245_v43, 0.0  ;;  %v4247_v38 = vpop.f32.mrb[81].mxu1 }
 0x934   : > { %v4445_v48 = vmax.f32 %v4247_v38, 0.0  ;;  %v4249_v13 = vpop.f32.mrb[82].mxu1  ;;  %4995 = vmatprep.subr.bf16.mxu0 %v4659_v56 }
 0x935   : > { %v4446_v11 = vmax.f32 %v4249_v13, 0.0  ;;  %v4251_v18 = vpop.f32.mrb[83].mxu1  ;;  %4996 = vmatpush1.bf16.msra.mxu0 %v4658_v42  ;;  %v4572_v17 = vmul.f32 %v4444_v15, %v4444_v15 }
 0x936   : > { %v4447_v62 = vmax.f32 %v4251_v18, 0.0  ;;  %v4573_v1 = vmul.f32 %v4445_v48, %v4445_v48 }
 0x937   : > { %v4574_v53 = vmul.f32 %v4446_v11, %v4446_v11 }
 0x938   : > { %v4575_v33 = vmul.f32 %v4447_v62, %v4447_v62  ;;  %4949 = vmatmul.mubr.bf16.gmra.mrb[48].mxu0 %v6335_v61  ;;  %v6341_v61 = vld [vmem:[%s7065_s8 + $0xc0] ss:$16 sps:$4 sm:$0xff]  }
 0x939   : > { %v4660_v57 = vpack.c.bf16 %v4574_v53, %v4572_v17  ;;  %4958 = vmatprep.mubr.bf16.mxu0 %v6336_v45  ;;  %v6342_v45 = vld [vmem:[%s7065_s8 + $0xe4] ss:$16 sps:$4 sm:$0xff]  }
 0x93a   : > { %v4661_v47 = vpack.c.bf16 %v4575_v33, %v4573_v1  ;;  %v4255_v34 = vpop.f32.mrb[84].mxu1 }
 0x93b   : > { %v4448_v46 = vmax.f32 %v4255_v34, 0.0  ;;  %v4257_v36 = vpop.f32.mrb[85].mxu1 }
 0x93c   : > { %v4449_v60 = vmax.f32 %v4257_v36, 0.0  ;;  %v4259_v58 = vpop.f32.mrb[86].mxu1  ;;  %4997 = vmatprep.subr.bf16.mxu0 %v4661_v47 }
 0x93d   : > { %v4450_v55 = vmax.f32 %v4259_v58, 0.0  ;;  %v4261_v19 = vpop.f32.mrb[87].mxu1  ;;  %4998 = vmatpush1.bf16.msra.mxu0 %v4660_v57  ;;  %v4576_v0 = vmul.f32 %v4448_v46, %v4448_v46 }
 0x93e   : > { %v4451_v9 = vmax.f32 %v4261_v19, 0.0  ;;  %v4577_v52 = vmul.f32 %v4449_v60, %v4449_v60 }
 0x93f   : > { %v4578_v24 = vmul.f32 %v4450_v55, %v4450_v55 }
 0x940   : > { %v4579_v6 = vmul.f32 %v4451_v9, %v4451_v9  ;;  %4959 = vmatmul.mubr.bf16.gmra.mrb[52].mxu0 %v6338_v25  ;;  %v6344_v25 = vld [vmem:[%s7065_s8 + $0xe0] ss:$16 sps:$4 sm:$0xff]  }
 0x941   : > { %v4662_v42 = vpack.c.bf16 %v4578_v24, %v4576_v0  ;;  %4968 = vmatprep.mubr.bf16.mxu0 %v6339_v41  ;;  %v6347_v41 = vld [vmem:[%s7065_s8 + $0xc] ss:$16 sps:$4 sm:$0xff]  }
 0x942   : > { %v4663_v56 = vpack.c.bf16 %v4579_v6, %v4577_v52  ;;  %v4265_v43 = vpop.f32.mrb[88].mxu1 }
 0x943   : > { %v4452_v15 = vmax.f32 %v4265_v43, 0.0  ;;  %v4267_v38 = vpop.f32.mrb[89].mxu1 }
 0x944   : > { %v4453_v48 = vmax.f32 %v4267_v38, 0.0  ;;  %v4269_v13 = vpop.f32.mrb[90].mxu1  ;;  %4999 = vmatprep.subr.bf16.mxu0 %v4663_v56 }
 0x945   : > { %v4454_v11 = vmax.f32 %v4269_v13, 0.0  ;;  %v4271_v18 = vpop.f32.mrb[91].mxu1  ;;  %5000 = vmatpush1.bf16.msra.mxu0 %v4662_v42  ;;  %v4580_v17 = vmul.f32 %v4452_v15, %v4452_v15 }
 0x946   : > { %v4455_v62 = vmax.f32 %v4271_v18, 0.0  ;;  %v4581_v1 = vmul.f32 %v4453_v48, %v4453_v48 }
 0x947   : > { %v4582_v53 = vmul.f32 %v4454_v11, %v4454_v11 }
 0x948   : > { %v4583_v33 = vmul.f32 %v4455_v62, %v4455_v62  ;;  %4969 = vmatmul.mubr.bf16.gmra.mrb[56].mxu0 %v6341_v61 }
 0x949   : > { %v4664_v57 = vpack.c.bf16 %v4582_v53, %v4580_v17  ;;  %4978 = vmatprep.mubr.bf16.mxu0 %v6342_v45 }
 0x94a   : > { %v4665_v47 = vpack.c.bf16 %v4583_v33, %v4581_v1  ;;  %v4275_v34 = vpop.f32.mrb[92].mxu1 }
 0x94b   : > { %v4456_v46 = vmax.f32 %v4275_v34, 0.0  ;;  %v4277_v36 = vpop.f32.mrb[93].mxu1 }
 0x94c   : > { %v4457_v60 = vmax.f32 %v4277_v36, 0.0  ;;  %v4279_v58 = vpop.f32.mrb[94].mxu1  ;;  %5001 = vmatprep.subr.bf16.mxu0 %v4665_v47 }
 0x94d   : > { %v4458_v55 = vmax.f32 %v4279_v58, 0.0  ;;  %v4281_v19 = vpop.f32.mrb[95].mxu1  ;;  %5002 = vmatpush1.bf16.msra.mxu0 %v4664_v57  ;;  %v4584_v0 = vmul.f32 %v4456_v46, %v4456_v46 }
 0x94e   : > { %v4459_v9 = vmax.f32 %v4281_v19, 0.0  ;;  %v4585_v52 = vmul.f32 %v4457_v60, %v4457_v60 }
 0x94f   : > { %v4586_v24 = vmul.f32 %v4458_v55, %v4458_v55 }
 0x950   : > { %v4587_v6 = vmul.f32 %v4459_v9, %v4459_v9  ;;  %4979 = vmatmul.mubr.bf16.gmra.mrb[60].mxu0 %v6344_v25 }
 0x951   : > { %v4666_v42 = vpack.c.bf16 %v4586_v24, %v4584_v0  ;;  %5021 = vmatprep.mubr.bf16.mxu0 %v6347_v41 }
 0x952   : > { %v4667_v56 = vpack.c.bf16 %v4587_v6, %v4585_v52  ;;  %v4285_v43 = vpop.f32.mrb[96].mxu1 }
 0x953   : > { %v4460_v15 = vmax.f32 %v4285_v43, 0.0  ;;  %v4287_v38 = vpop.f32.mrb[97].mxu1 }
 0x954   : > { %v4461_v48 = vmax.f32 %v4287_v38, 0.0  ;;  %v4289_v13 = vpop.f32.mrb[98].mxu1  ;;  %5003 = vmatprep.subr.bf16.mxu0 %v4667_v56 }
 0x955   : > { %v4462_v61 = vmax.f32 %v4289_v13, 0.0  ;;  %v4291_v11 = vpop.f32.mrb[99].mxu1  ;;  %5004 = vmatpush1.bf16.msra.mxu0 %v4666_v42  ;;  %v4588_v45 = vmul.f32 %v4460_v15, %v4460_v15 }
 0x956   : > { %v4463_v18 = vmax.f32 %v4291_v11, 0.0  ;;  %v4589_v17 = vmul.f32 %v4461_v48, %v4461_v48 }
 0x957   : > { %v4590_v62 = vmul.f32 %v4462_v61, %v4462_v61 }
 0x958   : > { %v4591_v53 = vmul.f32 %v4463_v18, %v4463_v18 }
 0x959   : > { %v4668_v1 = vpack.c.bf16 %v4590_v62, %v4588_v45 }
 0x95a   : > { %v4669_v33 = vpack.c.bf16 %v4591_v53, %v4589_v17  ;;  %v4295_v57 = vpop.f32.mrb[100].mxu1 }
 0x95b   : > { %v4464_v47 = vmax.f32 %v4295_v57, 0.0  ;;  %v4297_v34 = vpop.f32.mrb[101].mxu1 }
 0x95c   : > { %v4465_v46 = vmax.f32 %v4297_v34, 0.0  ;;  %v4299_v36 = vpop.f32.mrb[102].mxu1  ;;  %5005 = vmatprep.subr.bf16.mxu0 %v4669_v33 }
 0x95d   : > { %v4466_v60 = vmax.f32 %v4299_v36, 0.0  ;;  %v4301_v58 = vpop.f32.mrb[103].mxu1  ;;  %5006 = vmatpush1.bf16.msra.mxu0 %v4668_v1  ;;  %v4592_v55 = vmul.f32 %v4464_v47, %v4464_v47 }
 0x95e   : > { %v4467_v25 = vmax.f32 %v4301_v58, 0.0  ;;  %v4593_v41 = vmul.f32 %v4465_v46, %v4465_v46 }
 0x95f   : > { %v4594_v19 = vmul.f32 %v4466_v60, %v4466_v60 }
 0x960   : > { %v4595_v9 = vmul.f32 %v4467_v25, %v4467_v25 }
 0x961   : > { %v4670_v0 = vpack.c.bf16 %v4594_v19, %v4592_v55 }
 0x962   : > { %v4671_v24 = vpack.c.bf16 %v4595_v9, %v4593_v41  ;;  %v4305_v52 = vpop.f32.mrb[104].mxu1 }
 0x963   : > { %v4468_v6 = vmax.f32 %v4305_v52, 0.0  ;;  %v4307_v42 = vpop.f32.mrb[105].mxu1 }
 0x964   : > { %v4469_v56 = vmax.f32 %v4307_v42, 0.0  ;;  %v4309_v43 = vpop.f32.mrb[106].mxu1  ;;  %5007 = vmatprep.subr.bf16.mxu0 %v4671_v24 }
 0x965   : > { %v4470_v15 = vmax.f32 %v4309_v43, 0.0  ;;  %v4311_v38 = vpop.f32.mrb[107].mxu1  ;;  %5008 = vmatpush1.bf16.msra.mxu0 %v4670_v0  ;;  %v4596_v13 = vmul.f32 %v4468_v6, %v4468_v6 }
 0x966   : > { %v4471_v48 = vmax.f32 %v4311_v38, 0.0  ;;  %v4597_v11 = vmul.f32 %v4469_v56, %v4469_v56 }
 0x967   : > { %v4598_v61 = vmul.f32 %v4470_v15, %v4470_v15 }
 0x968   : > { %v4599_v18 = vmul.f32 %v4471_v48, %v4471_v48 }
 0x969   : > { %v4672_v45 = vpack.c.bf16 %v4598_v61, %v4596_v13 }
 0x96a   : > { %v4673_v62 = vpack.c.bf16 %v4599_v18, %v4597_v11  ;;  %v4315_v17 = vpop.f32.mrb[108].mxu1 }
 0x96b   : > { %v4472_v53 = vmax.f32 %v4315_v17, 0.0  ;;  %v4317_v1 = vpop.f32.mrb[109].mxu1 }
 0x96c   : > { %v4473_v33 = vmax.f32 %v4317_v1, 0.0  ;;  %v4319_v57 = vpop.f32.mrb[110].mxu1  ;;  %5009 = vmatprep.subr.bf16.mxu0 %v4673_v62 }
 0x96d   : > { %v4474_v47 = vmax.f32 %v4319_v57, 0.0  ;;  %v4321_v34 = vpop.f32.mrb[111].mxu1  ;;  %5010 = vmatpush1.bf16.msra.mxu0 %v4672_v45  ;;  %v4600_v36 = vmul.f32 %v4472_v53, %v4472_v53 }
 0x96e   : > { %v4475_v46 = vmax.f32 %v4321_v34, 0.0  ;;  %v4601_v58 = vmul.f32 %v4473_v33, %v4473_v33 }
 0x96f   : > { %v4602_v60 = vmul.f32 %v4474_v47, %v4474_v47 }
 0x970   : > { %v4603_v25 = vmul.f32 %v4475_v46, %v4475_v46 }
 0x971   : > { %v4674_v55 = vpack.c.bf16 %v4602_v60, %v4600_v36 }
 0x972   : > { %v4675_v19 = vpack.c.bf16 %v4603_v25, %v4601_v58  ;;  %v4325_v41 = vpop.f32.mrb[112].mxu1 }
 0x973   : > { %v4476_v9 = vmax.f32 %v4325_v41, 0.0  ;;  %v4327_v0 = vpop.f32.mrb[113].mxu1 }
 0x974   : > { %v4477_v24 = vmax.f32 %v4327_v0, 0.0  ;;  %v4329_v52 = vpop.f32.mrb[114].mxu1  ;;  %5011 = vmatprep.subr.bf16.mxu0 %v4675_v19 }
 0x975   : > { %v4478_v6 = vmax.f32 %v4329_v52, 0.0  ;;  %v4331_v42 = vpop.f32.mrb[115].mxu1  ;;  %5012 = vmatpush1.bf16.msra.mxu0 %v4674_v55  ;;  %v4604_v43 = vmul.f32 %v4476_v9, %v4476_v9 }
 0x976   : > { %v4479_v56 = vmax.f32 %v4331_v42, 0.0  ;;  %v4605_v38 = vmul.f32 %v4477_v24, %v4477_v24 }
 0x977   : > { %v4606_v15 = vmul.f32 %v4478_v6, %v4478_v6 }
 0x978   : > { %v4607_v48 = vmul.f32 %v4479_v56, %v4479_v56 }
 0x979   : > { %v4676_v13 = vpack.c.bf16 %v4606_v15, %v4604_v43 }
 0x97a   : > { %v4677_v61 = vpack.c.bf16 %v4607_v48, %v4605_v38  ;;  %v4335_v11 = vpop.f32.mrb[116].mxu1 }
 0x97b   : > { %v4480_v18 = vmax.f32 %v4335_v11, 0.0  ;;  %v4337_v45 = vpop.f32.mrb[117].mxu1 }
 0x97c   : > { %v4481_v62 = vmax.f32 %v4337_v45, 0.0  ;;  %v4339_v17 = vpop.f32.mrb[118].mxu1  ;;  %5013 = vmatprep.subr.bf16.mxu0 %v4677_v61 }
 0x97d   : > { %v4482_v53 = vmax.f32 %v4339_v17, 0.0  ;;  %v4341_v1 = vpop.f32.mrb[119].mxu1  ;;  %5014 = vmatpush1.bf16.msra.mxu0 %v4676_v13  ;;  %v4608_v57 = vmul.f32 %v4480_v18, %v4480_v18 }
 0x97e   : > { %v4483_v33 = vmax.f32 %v4341_v1, 0.0  ;;  %v4609_v34 = vmul.f32 %v4481_v62, %v4481_v62 }
 0x97f   : > { %v4610_v47 = vmul.f32 %v4482_v53, %v4482_v53 }
 0x980   : > { %v4611_v46 = vmul.f32 %v4483_v33, %v4483_v33 }
 0x981   : > { %v4678_v36 = vpack.c.bf16 %v4610_v47, %v4608_v57 }
 0x982   : > { %v4679_v60 = vpack.c.bf16 %v4611_v46, %v4609_v34  ;;  %v4345_v58 = vpop.f32.mrb[120].mxu1  ;;  %v6345_v34 = vld [vmem:[%s7065_s8 + $0x8] ss:$16 sps:$4 sm:$0xff]   ;;  %v6348_v46 = vld [vmem:[%s7065_s8 + $0x2c] ss:$16 sps:$4 sm:$0xff]  }
 0x983   : > { %v4484_v25 = vmax.f32 %v4345_v58, 0.0  ;;  %v4347_v55 = vpop.f32.mrb[121].mxu1  ;;  %v6353_v58 = vld [vmem:[%s7065_s8 + $0x48] ss:$16 sps:$4 sm:$0xff]  }
 0x984   : > { %v4485_v19 = vmax.f32 %v4347_v55, 0.0  ;;  %v4349_v41 = vpop.f32.mrb[122].mxu1  ;;  %5015 = vmatprep.subr.bf16.mxu0 %v4679_v60  ;;  %v6351_v60 = vld [vmem:[%s7065_s8 + $0x4c] ss:$16 sps:$4 sm:$0xff]   ;;  %v6356_v55 = vld [vmem:[%s7065_s8 + $0x68] ss:$16 sps:$4 sm:$0xff]  }
 0x985   : > { %v4486_v9 = vmax.f32 %v4349_v41, 0.0  ;;  %v4351_v0 = vpop.f32.mrb[123].mxu1  ;;  %5016 = vmatpush1.bf16.msra.mxu0 %v4678_v36  ;;  %v4612_v52 = vmul.f32 %v4484_v25, %v4484_v25  ;;  %v6350_v36 = vld [vmem:[%s7065_s8 + $0x28] ss:$16 sps:$4 sm:$0xff]   ;;  %v6354_v25 = vld [vmem:[%s7065_s8 + $0x6c] ss:$16 sps:$4 sm:$0xff]  }
 0x986   : > { %v4487_v24 = vmax.f32 %v4351_v0, 0.0  ;;  %v4613_v42 = vmul.f32 %v4485_v19, %v4485_v19  ;;  %v6357_v19 = vld [vmem:[%s7065_s8 + $0x8c] ss:$16 sps:$4 sm:$0xff]   ;;  %v6359_v41 = vld [vmem:[%s7065_s8 + $0x88] ss:$16 sps:$4 sm:$0xff]  }
 0x987   : > { %v4614_v6 = vmul.f32 %v4486_v9, %v4486_v9  ;;  %v6360_v9 = vld [vmem:[%s7065_s8 + $0xac] ss:$16 sps:$4 sm:$0xff]   ;;  %v6362_v0 = vld [vmem:[%s7065_s8 + $0xa8] ss:$16 sps:$4 sm:$0xff]  }
 0x988   : > { %v4615_v56 = vmul.f32 %v4487_v24, %v4487_v24  ;;  %v6363_v24 = vld [vmem:[%s7065_s8 + $0xcc] ss:$16 sps:$4 sm:$0xff]  }
 0x989   : > { %v4680_v43 = vpack.c.bf16 %v4614_v6, %v4612_v52  ;;  %v6365_v52 = vld [vmem:[%s7065_s8 + $0xc8] ss:$16 sps:$4 sm:$0xff]   ;;  %v6366_v6 = vld [vmem:[%s7065_s8 + $0xec] ss:$16 sps:$4 sm:$0xff]  }
 0x98a   : > { %v4681_v15 = vpack.c.bf16 %v4615_v56, %v4613_v42  ;;  %v4355_v38 = vpop.f32.mrb[124].mxu1  ;;  %v6368_v42 = vld [vmem:[%s7065_s8 + $0xe8] ss:$16 sps:$4 sm:$0xff]   ;;  %v9506_v56 = vstv %s7082_s23 }
 0x98b   : > { %v4488_v48 = vmax.f32 %v4355_v38, 0.0  ;;  %v4357_v13 = vpop.f32.mrb[125].mxu1 }
 0x98c   : > { %v4489_v61 = vmax.f32 %v4357_v13, 0.0  ;;  %v4359_v11 = vpop.f32.mrb[126].mxu1  ;;  %5017 = vmatprep.subr.bf16.mxu0 %v4681_v15 }
 0x98d   : > { %v4490_v18 = vmax.f32 %v4359_v11, 0.0  ;;  %v4361_v45 = vpop.f32.mrb[127].mxu1  ;;  %5018 = vmatpush1.bf16.msra.mxu0 %v4680_v43  ;;  %v4616_v17 = vmul.f32 %v4488_v48, %v4488_v48 }
 0x98e   : > { %v4491_v62 = vmax.f32 %v4361_v45, 0.0  ;;  %v4617_v1 = vmul.f32 %v4489_v61, %v4489_v61 }
 0x98f   : > { %v4618_v53 = vmul.f32 %v4490_v18, %v4490_v18 }
 0x990   : > { %v4619_v33 = vmul.f32 %v4491_v62, %v4491_v62 }
 0x991   : > { %v4682_v57 = vpack.c.bf16 %v4618_v53, %v4616_v17 }
 0x992   : > { %v4683_v47 = vpack.c.bf16 %v4619_v33, %v4617_v1 }
 0x994   : > { %5019 = vmatprep.subr.bf16.mxu0 %v4683_v47 }
 0x995   : > { %5020 = vmatpush1.bf16.msra.mxu0 %v4682_v57 }
 0x998   : > { %5022 = vmatmul.mubr.bf16.vlgmr.msra.gmra.mrb[32].mxu0 %v6345_v34 }
 0x999   : > { %5031 = vmatprep.mubr.bf16.mxu0 %v6348_v46 }
 0x9a0   : > { %5032 = vmatmul.mubr.bf16.gmra.mrb[36].mxu0 %v6350_v36 }
 0x9a1   : > { %5041 = vmatprep.mubr.bf16.mxu0 %v6351_v60 }
 0x9a8   : > { %5042 = vmatmul.mubr.bf16.gmra.mrb[40].mxu0 %v6353_v58 }
 0x9a9   : > { %5051 = vmatprep.mubr.bf16.mxu0 %v6354_v25 }
 0x9b0   : > { %5052 = vmatmul.mubr.bf16.gmra.mrb[44].mxu0 %v6356_v55 }
 0x9b1   : > { %5061 = vmatprep.mubr.bf16.mxu0 %v6357_v19 }
 0x9b8   : > { %5062 = vmatmul.mubr.bf16.gmra.mrb[48].mxu0 %v6359_v41 }
 0x9b9   : > { %5071 = vmatprep.mubr.bf16.mxu0 %v6360_v9 }
 0x9c0   : > { %5072 = vmatmul.mubr.bf16.gmra.mrb[52].mxu0 %v6362_v0 }
 0x9c1   : > { %5081 = vmatprep.mubr.bf16.mxu0 %v6363_v24 }
 0x9c8   : > { %5082 = vmatmul.mubr.bf16.gmra.mrb[56].mxu0 %v6365_v52 }
 0x9c9   : > { %5091 = vmatprep.mubr.bf16.mxu0 %v6366_v6 }
 0x9d0   : > { %5092 = vmatmul.mubr.bf16.gmra.mrb[60].mxu0 %v6368_v42 }
 0xa6b   : > { %v5023_v43 = vpop.f32.mrb[32].mxu0 }
 0xa6c   : > { %v5103_v15 = vmul.f32 %v9506_v56, %v5023_v43  ;;  %v5025_v38 = vpop.f32.mrb[33].mxu0 }
 0xa6d   : > { %v5104_v48 = vmul.f32 %v9506_v56, %v5025_v38  ;;  %v5027_v13 = vpop.f32.mrb[34].mxu0 }
 0xa6e   : > { %v5105_v61 = vmul.f32 %v9506_v56, %v5027_v13  ;;  %v5029_v11 = vpop.f32.mrb[35].mxu0  ;;  %v9513_v45 = vadd.f32 %v5103_v15, %v9199_v59 }
 0xa6f   : > { %v5106_v18 = vmul.f32 %v9506_v56, %v5029_v11  ;;  %v9519_v17 = vadd.f32 %v5104_v48, %v9206_v30 }
 0xa70   : > { %v9516_v62 = vadd.f32 %v5105_v61, %v9193_v31 }
 0xa71   : > { %v9522_v53 = vadd.f32 %v5106_v18, %v9196_v35 }
 0xa72   : > { %v5167_v1 = vpack.c.bf16 %v9516_v62, %v9513_v45 }
 0xa73   : > { %v5168_v33 = vpack.c.bf16 %v9522_v53, %v9519_v17  ;;  %v5033_v57 = vpop.f32.mrb[36].mxu0 }
 0xa74   : > { %5183 = vst [vmem:[#allocation2] sm:$0xff] %v5167_v1  ;;  %v5107_v59 = vmul.f32 %v9506_v56, %v5033_v57  ;;  %v5035_v47 = vpop.f32.mrb[37].mxu0 }
 0xa75   : > { %5184 = vst [vmem:[#allocation2 + $0x8] sm:$0xff] %v5168_v33  ;;  %v5108_v31 = vmul.f32 %v9506_v56, %v5035_v47  ;;  %v5037_v34 = vpop.f32.mrb[38].mxu0 }
 0xa76   : > { %v5109_v30 = vmul.f32 %v9506_v56, %v5037_v34  ;;  %v5039_v46 = vpop.f32.mrb[39].mxu0  ;;  %v9533_v36 = vadd.f32 %v5107_v59, %v9202_v50 }
 0xa77   : > { %v5110_v35 = vmul.f32 %v9506_v56, %v5039_v46  ;;  %v9539_v58 = vadd.f32 %v5108_v31, %v9209_v49 }
 0xa78   : > { %v9536_v60 = vadd.f32 %v5109_v30, %v9223_v26 }
 0xa79   : > { %v9542_v25 = vadd.f32 %v5110_v35, %v9230_v54 }
 0xa7a   : > { %v5169_v55 = vpack.c.bf16 %v9536_v60, %v9533_v36 }
 0xa7b   : > { %v5170_v19 = vpack.c.bf16 %v9542_v25, %v9539_v58  ;;  %v5043_v41 = vpop.f32.mrb[40].mxu0 }
 0xa7c   : > { %5185 = vst [vmem:[#allocation2 + $0x10] sm:$0xff] %v5169_v55  ;;  %v5111_v50 = vmul.f32 %v9506_v56, %v5043_v41  ;;  %v5045_v9 = vpop.f32.mrb[41].mxu0 }
 0xa7d   : > { %5186 = vst [vmem:[#allocation2 + $0x18] sm:$0xff] %v5170_v19  ;;  %v5112_v26 = vmul.f32 %v9506_v56, %v5045_v9  ;;  %v5047_v0 = vpop.f32.mrb[42].mxu0 }
 0xa7e   : > { %v5113_v49 = vmul.f32 %v9506_v56, %v5047_v0  ;;  %v5049_v24 = vpop.f32.mrb[43].mxu0  ;;  %v9553_v52 = vadd.f32 %v5111_v50, %v9233_v5 }
 0xa7f   : > { %v5114_v54 = vmul.f32 %v9506_v56, %v5049_v24  ;;  %v9559_v42 = vadd.f32 %v5112_v26, %v9237_v28 }
 0xa80   : > { %v9556_v6 = vadd.f32 %v5113_v49, %v9249_v16 }
 0xa81   : > { %v9562_v43 = vadd.f32 %v5114_v54, %v9254_v51 }
 0xa82   : > { %v5171_v15 = vpack.c.bf16 %v9556_v6, %v9553_v52 }
 0xa83   : > { %v5172_v38 = vpack.c.bf16 %v9562_v43, %v9559_v42  ;;  %v5053_v48 = vpop.f32.mrb[44].mxu0 }
 0xa84   : > { %5187 = vst [vmem:[#allocation2 + $0x20] sm:$0xff] %v5171_v15  ;;  %v5115_v5 = vmul.f32 %v9506_v56, %v5053_v48  ;;  %v5055_v13 = vpop.f32.mrb[45].mxu0 }
 0xa85   : > { %5188 = vst [vmem:[#allocation2 + $0x28] sm:$0xff] %v5172_v38  ;;  %v5116_v16 = vmul.f32 %v9506_v56, %v5055_v13  ;;  %v5057_v61 = vpop.f32.mrb[46].mxu0 }
 0xa86   : > { %v5117_v28 = vmul.f32 %v9506_v56, %v5057_v61  ;;  %v5059_v11 = vpop.f32.mrb[47].mxu0  ;;  %v9573_v18 = vadd.f32 %v5115_v5, %v9257_v29 }
 0xa87   : > { %v5118_v51 = vmul.f32 %v9506_v56, %v5059_v11  ;;  %v9579_v33 = vadd.f32 %v5116_v16, %v9261_v8 }
 0xa88   : > { %v9576_v1 = vadd.f32 %v5117_v28, %v9273_v23 }
 0xa89   : > { %v9582_v57 = vadd.f32 %v5118_v51, %v9278_v20 }
 0xa8a   : > { %v5173_v59 = vpack.c.bf16 %v9576_v1, %v9573_v18 }
 0xa8b   : > { %v5174_v47 = vpack.c.bf16 %v9582_v57, %v9579_v33  ;;  %v5063_v31 = vpop.f32.mrb[48].mxu0 }
 0xa8c   : > { %5189 = vst [vmem:[#allocation2 + $0x30] sm:$0xff] %v5173_v59  ;;  %v5119_v29 = vmul.f32 %v9506_v56, %v5063_v31  ;;  %v5065_v34 = vpop.f32.mrb[49].mxu0 }
 0xa8d   : > { %5190 = vst [vmem:[#allocation2 + $0x38] sm:$0xff] %v5174_v47  ;;  %v5120_v23 = vmul.f32 %v9506_v56, %v5065_v34  ;;  %v5067_v30 = vpop.f32.mrb[50].mxu0 }
 0xa8e   : > { %v5121_v8 = vmul.f32 %v9506_v56, %v5067_v30  ;;  %v5069_v46 = vpop.f32.mrb[51].mxu0  ;;  %v9593_v35 = vadd.f32 %v5119_v29, %v9281_v37 }
 0xa8f   : > { %v5122_v20 = vmul.f32 %v9506_v56, %v5069_v46  ;;  %v9599_v19 = vadd.f32 %v5120_v23, %v9285_v14 }
 0xa90   : > { %v9596_v55 = vadd.f32 %v5121_v8, %v9295_v39 }
 0xa91   : > { %v9602_v41 = vadd.f32 %v5122_v20, %v9301_v7 }
 0xa92   : > { %v5175_v50 = vpack.c.bf16 %v9596_v55, %v9593_v35 }
 0xa93   : > { %v5176_v9 = vpack.c.bf16 %v9602_v41, %v9599_v19  ;;  %v5073_v26 = vpop.f32.mrb[52].mxu0 }
 0xa94   : > { %5191 = vst [vmem:[#allocation2 + $0x40] sm:$0xff] %v5175_v50  ;;  %v5123_v37 = vmul.f32 %v9506_v56, %v5073_v26  ;;  %v5075_v0 = vpop.f32.mrb[53].mxu0 }
 0xa95   : > { %5192 = vst [vmem:[#allocation2 + $0x48] sm:$0xff] %v5176_v9  ;;  %v5124_v39 = vmul.f32 %v9506_v56, %v5075_v0  ;;  %v5077_v49 = vpop.f32.mrb[54].mxu0 }
 0xa96   : > { %v5125_v14 = vmul.f32 %v9506_v56, %v5077_v49  ;;  %v5079_v24 = vpop.f32.mrb[55].mxu0  ;;  %v9613_v54 = vadd.f32 %v5123_v37, %v9305_v12  ;;  %v5700_v49 = vpack.c.bf16 (!%p5664_p6), %v9579_v33, %v9573_v18 }
 0xa97   : > { %v5126_v7 = vmul.f32 %v9506_v56, %v5079_v24  ;;  %v9619_v38 = vadd.f32 %v5124_v39, %v9309_v27  ;;  %v5694_v39 = vpack.c.bf16 (!%p5664_p6), %v9519_v17, %v9513_v45  ;;  %v5701_v45 = vpack.c.bf16 (!%p5664_p6), %v9582_v57, %v9576_v1 }
 0xa98   : > { %v9616_v15 = vadd.f32 %v5125_v14, %v9319_v32  ;;  %v5703_v17 = vpack.c.bf16 (!%p5664_p6), %v9602_v41, %v9596_v55  ;;  %5289 = vst [vmem:[#allocation21 + $0x30] sm:$0xff] (!%p5664_p6), %v5700_v49 }
 0xa99   : > { %v9622_v48 = vadd.f32 %v5126_v7, %v9324_v4  ;;  %5283 = vst [vmem:[#allocation21] sm:$0xff] (!%p5664_p6), %v5694_v39  ;;  %5290 = vst [vmem:[#allocation21 + $0x38] sm:$0xff] (!%p5664_p6), %v5701_v45 }
 0xa9a   : > { %v5177_v5 = vpack.c.bf16 %v9616_v15, %v9613_v54  ;;  %5292 = vst [vmem:[#allocation21 + $0x48] sm:$0xff] (!%p5664_p6), %v5703_v17 }
 0xa9b   : > { %v5178_v13 = vpack.c.bf16 %v9622_v48, %v9619_v38  ;;  %v5083_v16 = vpop.f32.mrb[56].mxu0 }
 0xa9c   : > { %5193 = vst [vmem:[#allocation2 + $0x50] sm:$0xff] %v5177_v5  ;;  %v5127_v12 = vmul.f32 %v9506_v56, %v5083_v16  ;;  %v5085_v61 = vpop.f32.mrb[57].mxu0 }
 0xa9d   : > { %5194 = vst [vmem:[#allocation2 + $0x58] sm:$0xff] %v5178_v13  ;;  %v5128_v32 = vmul.f32 %v9506_v56, %v5085_v61  ;;  %v5087_v28 = vpop.f32.mrb[58].mxu0 }
 0xa9e   : > { %v5129_v27 = vmul.f32 %v9506_v56, %v5087_v28  ;;  %v5089_v11 = vpop.f32.mrb[59].mxu0  ;;  %v5159_v51 = vadd.f32 %v5127_v12, %v9331_v63 }
 0xa9f   : > { %v5130_v4 = vmul.f32 %v9506_v56, %v5089_v11  ;;  %v5160_v47 = vadd.f32 %v5128_v32, %v9337_v10 }
 0xaa0   : > { %v5161_v59 = vadd.f32 %v5129_v27, %v9343_v3 }
 0xaa1   : > { %v5162_v31 = vadd.f32 %v5130_v4, %v9348_v44 }
 0xaa2   : > { %v5179_v29 = vpack.c.bf16 %v5161_v59, %v5159_v51 }
 0xaa3   : > { %v5180_v34 = vpack.c.bf16 %v5162_v31, %v5160_v47  ;;  %v5093_v23 = vpop.f32.mrb[60].mxu0 }
 0xaa4   : > { %5195 = vst [vmem:[#allocation2 + $0x60] sm:$0xff] %v5179_v29  ;;  %v5131_v30 = vmul.f32 %v9506_v56, %v5093_v23  ;;  %v5095_v8 = vpop.f32.mrb[61].mxu0 }
 0xaa5   : > { %5196 = vst [vmem:[#allocation2 + $0x68] sm:$0xff] %v5180_v34  ;;  %v5132_v46 = vmul.f32 %v9506_v56, %v5095_v8  ;;  %v5097_v20 = vpop.f32.mrb[62].mxu0 }
 0xaa6   : > { %v5133_v50 = vmul.f32 %v9506_v56, %v5097_v20  ;;  %v5099_v63 = vpop.f32.mrb[63].mxu0  ;;  %v5163_v10 = vadd.f32 %v5131_v30, %v9357_v2  ;;  %v5696_v2 = vpack.c.bf16 (!%p5664_p6), %v9539_v58, %v9533_v36  ;;  %v5705_v36 = vpack.c.bf16 (!%p5664_p6), %v9622_v48, %v9616_v15 }
 0xaa7   : > { %v5134_v3 = vmul.f32 %v9506_v56, %v5099_v63  ;;  %v5164_v9 = vadd.f32 %v5132_v46, %v9361_v21  ;;  %5202 = sbr.rel (%p5664_p6) target bundleno = 2736 (0xab0), region = 99  ;;  %v5695_v56 = vpack.c.bf16 (!%p5664_p6), %v9522_v53, %v9516_v62  ;;  %v5697_v21 = vpack.c.bf16 (!%p5664_p6), %v9542_v25, %v9536_v60 }
 0xaa8   : > { %v5165_v44 = vadd.f32 %v5133_v50, %v9367_v22  ;;  %v5698_v22 = vpack.c.bf16 (!%p5664_p6), %v9559_v42, %v9553_v52  ;;  %5285 = vst [vmem:[#allocation21 + $0x10] sm:$0xff] (!%p5664_p6), %v5696_v2  ;;  %v5702_v62 = vpack.c.bf16 (!%p5664_p6), %v9599_v19, %v9593_v35  ;;  %v5704_v53 = vpack.c.bf16 (!%p5664_p6), %v9619_v38, %v9613_v54 }
 0xaa9   : > { %v5166_v26 = vadd.f32 %v5134_v3, %v9372_v40  ;;  %v5699_v40 = vpack.c.bf16 (!%p5664_p6), %v9562_v43, %v9556_v6  ;;  %5284 = vst [vmem:[#allocation21 + $0x8] sm:$0xff] (!%p5664_p6), %v5695_v56  ;;  %5286 = vst [vmem:[#allocation21 + $0x18] sm:$0xff] (!%p5664_p6), %v5697_v21  ;;  %v5706_v60 = vpack.c.bf16 (!%p5664_p6), %v5160_v47, %v5159_v51 }
 0xaaa   : > { %v5181_v37 = vpack.c.bf16 %v5165_v44, %v5163_v10  ;;  %5287 = vst [vmem:[#allocation21 + $0x20] sm:$0xff] (!%p5664_p6), %v5698_v22  ;;  %v5707_v58 = vpack.c.bf16 (!%p5664_p6), %v5162_v31, %v5161_v59  ;;  %v5708_v25 = vpack.c.bf16 (!%p5664_p6), %v5164_v9, %v5163_v10  ;;  %5291 = vst [vmem:[#allocation21 + $0x40] sm:$0xff] (!%p5664_p6), %v5702_v62 }
 0xaab   : > { %v5182_v0 = vpack.c.bf16 %v5166_v26, %v5164_v9  ;;  %5288 = vst [vmem:[#allocation21 + $0x28] sm:$0xff] (!%p5664_p6), %v5699_v40  ;;  %v5709_v52 = vpack.c.bf16 (!%p5664_p6), %v5166_v26, %v5165_v44  ;;  %5293 = vst [vmem:[#allocation21 + $0x50] sm:$0xff] (!%p5664_p6), %v5704_v53 }
 0xaac   : > { %5197 = vst [vmem:[#allocation2 + $0x70] sm:$0xff] %v5181_v37  ;;  %5294 = vst [vmem:[#allocation21 + $0x58] sm:$0xff] (!%p5664_p6), %v5705_v36 }
 0xaad   : > { %5198 = vst [vmem:[#allocation2 + $0x78] sm:$0xff] %v5182_v0  ;;  %5295 = vst [vmem:[#allocation21 + $0x60] sm:$0xff] (!%p5664_p6), %v5706_v60 }
 0xaae   : > { %5296 = vst [vmem:[#allocation21 + $0x68] sm:$0xff] %v5707_v58  ;;  %5297 = vst [vmem:[#allocation21 + $0x70] sm:$0xff] %v5708_v25 }
 0xaaf   : > { %5298 = vst [vmem:[#allocation21 + $0x78] sm:$0xff] %v5709_v52 }
 0xab0 PF: > { %s10304_s0 = sld [smem:[#allocation30_spill]]  ;;  %s6697_s22 = smov [#allocation21]  }
 0xab1   : > { %s5305_s29 = sshll.u32 %s6697_s22, 4  ;;  %s5306_s29 = int_to_ptr.vmem [resolvable:$true] %s5305_s29 }
 0xab2   : > { %s6592_s10 = scalar_lea.vmem %s5306_s29, 2048  ;;  %p6599_p0 = scmp.lt.s32.totalorder %s5306_s29, %s5306_s29 }
 0xab3   : > { %p6593_p11 = scmp.ne.s32.totalorder %s5306_s29, %s6592_s10  ;;  %p6600_p3 = scmp.lt.s32.totalorder %s6592_s10, %s6592_s10 }
 0xab5   : > { %p6601_p10 = por %p6600_p3, %p6599_p0 }
 0xab6   : > { %p6024_p9 = scmp.eq.s32.totalorder %s10304_s0, 2 }
 0xab8   : > { %p6594_p2 = pnand %p6593_p11, %p6024_p9 }
 0xaba   : > { %p6595_p12 = pneg %p6594_p2 }
 0xabc   : > { %p6602_p7 = pnand %p6601_p10, %p6595_p12 }
 0xabe   : > { %6605 = shalt.err (!%p6602_p7)
}
 0xabf   : > { %s10305_s18 = sld [smem:[#allocation134_spill]] }
 0xac5   : > { %s6606_s28 = scalar_lea.hbm %s10305_s18, 2048 }
 0xac6   : > { %p6607_p5 = scmp.ne.s32.totalorder %s10305_s18, %s6606_s28  ;;  %p6612_p1 = scmp.lt.u32.totalorder %s6606_s28, %s10305_s18 }
 0xac8   : > { %p6608_p13 = pnand %p6607_p5, %p6024_p9 }
 0xaca   : > { %p6609_p8 = pneg %p6608_p13 }
 0xacc   : > { %p6614_p4 = pnand %p6612_p1, %p6609_p8 }
 0xace   : > { %6617 = shalt.err (!%p6614_p4)
}
 0xacf   : > { %s6698_s4 = smov 128   ;;  %s6699_s14 = smov 8  }
 0xad0   : > { %5986 = dma.vmem_to_hbm [thread:$0]  (%p6024_p9), %s5306_s29, 2048, %s10305_s18, [#allocation9], %s6698_s4, %s6698_s4, %s6699_s14  }
 0xad1   : > { %6659 = dma.done.wait (%p6024_p9), [#allocation9], 2048  }
 0xad2   : > { %6661 = vsyncadd (%p6024_p9), [#allocation9], 4294965248 }
 0xad3 PF: > { %s10306_s30 = sld [smem:[#allocation32_spill]]  ;;  %s10307_s27 = sld [smem:[#allocation28_spill]] }
 0xad4   : > { %s10308_s28 = sld [smem:[#allocation29_spill]]  ;;  %s10309_s29 = sld [smem:[#allocation33_spill]] }
 0xad9   : > { %p25_p6 = scmp.ge.s32.totalorder %s10306_s30, 5  }
 0xadb   :  { %27 = sbr.rel (!%p25_p6) target bundleno = 15 (0xf), region = 178 }
 0xae2   :  { %5321 = vsyncpa [#allocation8], 1 }
 0xae3   :  { %5323 = vsyncpa [#allocation8 + $0x1], 1 }
 0xae4   :  { %5324 = vsyncpa [#allocation13], 1 }
 0xae5   :  { %5326 = vsyncpa [#allocation13 + $0x1], 1 }
 0xae6   :  { %5327 = vsyncpa [#allocation16], 1 }
 0xae7   :  { %5329 = vsyncpa [#allocation16 + $0x1], 1 }
 0xae8   :  { %5330 = vsyncpa [#allocation19], 1 }
 0xae9   :  { %5331 = vsyncpa [#allocation9], 1 }
 0xaea   :  { %5333 = vsyncpa [#allocation9 + $0x1], 1 }
 0xaeb   :  { %5334 = vsyncpa [#allocation10], 1 }
 0xaec   :  { %5336 = vsyncpa [#allocation10 + $0x1], 1 }

</bundles_post_ra>
